<compile_context>
chip_gen: v6e
topology: v6e:2x2x1
jax: 0.10.0
libtpu: 0.0.40
codegen_flags: <defaults>
</compile_context>

<pallas_src>
import functools
import math

import jax
import jax.numpy as jnp
from jax.experimental import pallas as pl
from jax.experimental.pallas import tpu as pltpu


# ------------------------------------------------------------------ Pallas kernel
def _gemm_fused_kernel(a_ref, b_ref, scale_ref, shift_ref, o_ref, *, act):
    # bf16 x bf16 -> f32 on the MXU; epilogue (folded BN + activation) in f32 on VPU/EUP.
    acc = jnp.dot(a_ref[...], b_ref[...], preferred_element_type=jnp.float32)
    y = acc * scale_ref[...] + shift_ref[...]
    if act == "relu":
        y = jnp.maximum(y, 0.0)
    elif act == "tanh":
        y = jnp.tanh(y)
    o_ref[...] = y.astype(o_ref.dtype)


def _pick_tile(dim, candidates):
    # Largest candidate that divides `dim` exactly AND leaves >=2 tiles (so both v7x
    # TensorCores get work); otherwise take the whole dim (no padding, no trailing slice).
    for t in candidates:
        if dim % t == 0 and dim // t >= 2:
            return t
    return dim


def fused_gemm(a, b, scale, shift, *, act, out_dtype):
    """act((a @ b) * scale + shift) with a 2-D parallel (M-tiles, N-tiles) grid."""
    M, K = a.shape
    K2, N = b.shape
    assert K == K2
    tm = _pick_tile(M, (512, 256, 128, 64, 32, 16))
    tn = _pick_tile(N, (512, 256, 128))

    scale2 = scale.reshape(1, N).astype(jnp.float32)
    shift2 = shift.reshape(1, N).astype(jnp.float32)

    kernel = functools.partial(_gemm_fused_kernel, act=act)
    return pl.pallas_call(
        kernel,
        out_shape=jax.ShapeDtypeStruct((M, N), out_dtype),
        grid_spec=pltpu.PrefetchScalarGridSpec(
            num_scalar_prefetch=0,
            grid=(M // tm, N // tn),
            in_specs=[
                pl.BlockSpec((tm, K), lambda i, j: (i, 0)),
                pl.BlockSpec((K, tn), lambda i, j: (0, j)),
                pl.BlockSpec((1, tn), lambda i, j: (0, j)),
                pl.BlockSpec((1, tn), lambda i, j: (0, j)),
            ],
            out_specs=pl.BlockSpec((tm, tn), lambda i, j: (i, j)),
        ),
        compiler_params=pltpu.CompilerParams(
            dimension_semantics=("parallel", "parallel")),
    )(a.astype(jnp.bfloat16), b.astype(jnp.bfloat16), scale2, shift2)


# ------------------------------------------------------------------ transposed-conv lowering
def _phase_weight(w):
    """ConvTranspose2d weight (Cin, Cout, 4, 4), stride 2, pad 1 -> (9*Cin, 4*Cout).

    Sub-pixel decomposition: out[n, 2i+a, 2j+b, co] =
        sum_{u in {a,a+1}, v in {b,b+1}, ci} x_pad[n, i+u, j+v, ci] * W[ci, co, 3+a-2u, 3+b-2v]
    Rows of the returned matrix are ordered (u, v, ci), columns (a, b, co); taps outside the
    2x2 sub-window of a phase are zero (weights are tiny, built once at prepare time).
    """
    cin, cout = w.shape[0], w.shape[1]
    w9 = jnp.zeros((3, 3, cin, 2, 2, cout), w.dtype)
    for a in range(2):
        for b in range(2):
            for u in (a, a + 1):
                for v in (b, b + 1):
                    ky = 3 + a - 2 * u
                    kx = 3 + b - 2 * v
                    w9 = w9.at[u, v, :, a, b, :].set(w[:, :, ky, kx])
    return w9.reshape(9 * cin, 4 * cout)


def convtr_s2_fused(x, w9, scale4, shift4, *, act, out_dtype):
    """ConvTranspose2d(k=4, s=2, p=1, bias=False) [+ folded BN] + activation, NHWC."""
    n, h, w_, cin = x.shape
    cout = w9.shape[1] // 4
    xp = jnp.pad(x, ((0, 0), (1, 1), (1, 1), (0, 0)))
    # Shared 3x3-neighbourhood patches (bf16) — no zero-stuffed/dilated input is built.
    cols = [xp[:, u:u + h, v:v + w_, :] for u in range(3) for v in range(3)]
    patches = jnp.concatenate(cols, axis=-1).reshape(n * h * w_, 9 * cin)
    y = fused_gemm(patches, w9, scale4, shift4, act=act, out_dtype=out_dtype)
    # (N*H*W, 4*Cout) lane-dense slab -> interleave the 2x2 phases back into (N, 2H, 2W, C).
    y = y.reshape(n, h, w_, 2, 2, cout)
    y = jnp.transpose(y, (0, 1, 3, 2, 4, 5)).reshape(n, 2 * h, 2 * w_, cout)
    return y


# ------------------------------------------------------------------ parameters
def init_params(key, input_dim=16, output_col=1, num_node=16):
    keys = iter(jax.random.split(key, 32))

    def convtr_init(cin, cout, k):
        bound = 1.0 / math.sqrt(cin * k * k)
        return jax.random.uniform(next(keys), (cin, cout, k, k), jnp.float32, -bound, bound)

    def bn_init(c):
        gamma = jax.random.uniform(next(keys), (c,), jnp.float32, 0.8, 1.2)
        beta = 0.1 * jax.random.normal(next(keys), (c,), jnp.float32)
        mean = 0.1 * jax.random.normal(next(keys), (c,), jnp.float32)
        var = jax.random.uniform(next(keys), (c,), jnp.float32, 0.5, 1.5)
        return (gamma, beta, mean, var, 1e-5)

    n = num_node
    return {
        "convtr1": convtr_init(input_dim, n * 16, 4),
        "convtr2": convtr_init(n * 16, n * 8, 4),
        "convtr3": convtr_init(n * 8, n * 4, 4),
        "convtr4": convtr_init(n * 4, n * 4, 4),
        "convtr5": convtr_init(n * 4, output_col, 4),
        "bn1": bn_init(n * 16),
        "bn2": bn_init(n * 8),
        "bn3": bn_init(n * 4),
        "bn4": bn_init(n * 4),
    }


def prepare_params(params):
    """One-time host-side folding: bf16 GEMM weights + f32 per-column scale/shift."""
    def fold(bn):
        gamma, beta, mean, var, eps = bn
        scale = gamma * jax.lax.rsqrt(var + eps)
        shift = beta - mean * scale
        return scale, shift

    # convtr1: 1x1 latent -> 4x4, stride 1 / pad 0 -> plain GEMM (Cin, 16*Cout).
    w1 = params["convtr1"]
    cin, c1 = w1.shape[0], w1.shape[1]
    w1m = jnp.transpose(w1, (0, 2, 3, 1)).reshape(cin, 16 * c1).astype(jnp.bfloat16)
    s1, b1 = fold(params["bn1"])

    def s2_layer(w, bn):
        cout = w.shape[1]
        wm = _phase_weight(w).astype(jnp.bfloat16)
        if bn is None:
            scale = jnp.ones((cout,), jnp.float32)
            shift = jnp.zeros((cout,), jnp.float32)
        else:
            scale, shift = fold(bn)
        return wm, jnp.tile(scale, 4), jnp.tile(shift, 4)

    w2m, s2, b2 = s2_layer(params["convtr2"], params["bn2"])
    w3m, s3, b3 = s2_layer(params["convtr3"], params["bn3"])
    w4m, s4, b4 = s2_layer(params["convtr4"], params["bn4"])
    w5m, s5, b5 = s2_layer(params["convtr5"], None)

    return {
        "w1": w1m, "s1": jnp.tile(s1, 16), "b1": jnp.tile(b1, 16),
        "w2": w2m, "s2": s2, "b2": b2,
        "w3": w3m, "s3": s3, "b3": b3,
        "w4": w4m, "s4": s4, "b4": b4,
        "w5": w5m, "s5": s5, "b5": b5,
    }


# ------------------------------------------------------------------ forward passes
def forward(p, z):
    n = z.shape[0]
    assert z.shape[2] == 1 and z.shape[3] == 1, "Generator expects a 1x1 latent spatial input"
    x = z.reshape(n, z.shape[1]).astype(jnp.bfloat16)
    c1 = p["w1"].shape[1] // 16
    # convtr1 + bn1 + relu
    x = fused_gemm(x, p["w1"], p["s1"], p["b1"], act="relu", out_dtype=jnp.bfloat16)
    x = x.reshape(n, 4, 4, c1)                                             # NHWC, 4x4
    # convtr2..4 (+ bn2..4 + relu), convtr5 + tanh
    x = convtr_s2_fused(x, p["w2"], p["s2"], p["b2"], act="relu", out_dtype=jnp.bfloat16)
    x = convtr_s2_fused(x, p["w3"], p["s3"], p["b3"], act="relu", out_dtype=jnp.bfloat16)
    x = convtr_s2_fused(x, p["w4"], p["s4"], p["b4"], act="relu", out_dtype=jnp.bfloat16)
    x = convtr_s2_fused(x, p["w5"], p["s5"], p["b5"], act="tanh", out_dtype=jnp.float32)
    return jnp.transpose(x, (0, 3, 1, 2))                                  # back to NCHW


def reference_forward(params, z):
    def convtr(x_nhwc, w, stride, pad):
        kh, kw = w.shape[2], w.shape[3]
        w_hwio = jnp.transpose(w[:, :, ::-1, ::-1], (2, 3, 0, 1))
        return jax.lax.conv_general_dilated(
            x_nhwc, w_hwio, window_strides=(1, 1),
            padding=[(kh - 1 - pad, kh - 1 - pad), (kw - 1 - pad, kw - 1 - pad)],
            lhs_dilation=(stride, stride),
            dimension_numbers=("NHWC", "HWIO", "NHWC"))

    def bn(x, p):
        gamma, beta, mean, var, eps = p
        return (x - mean) / jnp.sqrt(var + eps) * gamma + beta

    x = jnp.transpose(z, (0, 2, 3, 1))
    x = jax.nn.relu(bn(convtr(x, params["convtr1"], 1, 0), params["bn1"]))
    x = jax.nn.relu(bn(convtr(x, params["convtr2"], 2, 1), params["bn2"]))
    x = jax.nn.relu(bn(convtr(x, params["convtr3"], 2, 1), params["bn3"]))
    x = jax.nn.relu(bn(convtr(x, params["convtr4"], 2, 1), params["bn4"]))
    x = jnp.tanh(convtr(x, params["convtr5"], 2, 1))
    return jnp.transpose(x, (0, 3, 1, 2))


# ------------------------------------------------------------------ test
if __name__ == "__main__":
    BATCH, IN_DIM, OUT_C, NUM_NODE = 2, 16, 1, 16
    key = jax.random.PRNGKey(0)
    pkey, zkey = jax.random.split(key)
    params = init_params(pkey, input_dim=IN_DIM, output_col=OUT_C, num_node=NUM_NODE)
    prepped = prepare_params(params)
    z = jax.random.normal(zkey, (BATCH, IN_DIM, 1, 1), jnp.float32)

    out = jax.block_until_ready(jax.jit(forward)(prepped, z))
    ref = jax.block_until_ready(jax.jit(reference_forward)(params, z))

    assert out.shape == (BATCH, OUT_C, 64, 64), out.shape
    assert bool(jnp.all(jnp.isfinite(out)))
    max_err = float(jnp.max(jnp.abs(out - ref)))
    assert bool(jnp.allclose(out, ref, rtol=5e-2, atol=5e-2)), max_err
    print("KERNEL_OK")
</pallas_src>

<mosaic_0001>
module attributes {stable_mosaic.version = 11 : i64} {
  func.func @_gemm_fused_kernel(%arg0: i32, %arg1: i32, %arg2: memref<2x16xbf16, #tpu.memory_space<vmem>>, %arg3: memref<16x512xbf16, #tpu.memory_space<vmem>>, %arg4: memref<1x512xf32, #tpu.memory_space<vmem>>, %arg5: memref<1x512xf32, #tpu.memory_space<vmem>>, %arg6: memref<2x512xbf16, #tpu.memory_space<vmem>>) attributes {dimension_semantics = [#tpu.dimension_semantics<parallel>, #tpu.dimension_semantics<parallel>], iteration_bounds = array<i64: 1, 8>, scalar_prefetch = 0 : i64, scratch_operands = 0 : i64, tpu.core_type = #tpu.core_type<tc>, window_params = [{transform_indices = @transform_0, window_bounds = array<i64: 2, 16>}, {transform_indices = @transform_1, window_bounds = array<i64: 16, 512>}, {transform_indices = @transform_2, window_bounds = array<i64: 1, 512>}, {transform_indices = @transform_3, window_bounds = array<i64: 1, 512>}, {transform_indices = @transform_4, window_bounds = array<i64: 2, 512>}]} {
    %c0 = arith.constant 0 : index
    %c0_0 = arith.constant 0 : index
    %0 = vector.load %arg2[%c0, %c0_0] : memref<2x16xbf16, #tpu.memory_space<vmem>>, vector<2x16xbf16>
    %c0_1 = arith.constant 0 : index
    %c0_2 = arith.constant 0 : index
    %1 = vector.load %arg3[%c0_1, %c0_2] : memref<16x512xbf16, #tpu.memory_space<vmem>>, vector<16x512xbf16>
    %cst = arith.constant dense<0.000000e+00> : vector<2x512xf32>
    %2 = tpu.matmul %0, %1, %cst {dimension_numbers = #tpu.dot_dimension_numbers<[1], [0], [0], [1], [0, 0, 1, 1], [], []>} : vector<2x16xbf16>, vector<16x512xbf16>, vector<2x512xf32> -> vector<2x512xf32>
    %c0_3 = arith.constant 0 : index
    %c0_4 = arith.constant 0 : index
    %3 = vector.load %arg4[%c0_3, %c0_4] : memref<1x512xf32, #tpu.memory_space<vmem>>, vector<1x512xf32>
    %4 = vector.broadcast %3 : vector<1x512xf32> to vector<2x512xf32>
    %5 = arith.mulf %2, %4 : vector<2x512xf32>
    %c0_5 = arith.constant 0 : index
    %c0_6 = arith.constant 0 : index
    %6 = vector.load %arg5[%c0_5, %c0_6] : memref<1x512xf32, #tpu.memory_space<vmem>>, vector<1x512xf32>
    %7 = vector.broadcast %6 : vector<1x512xf32> to vector<2x512xf32>
    %8 = arith.addf %5, %7 : vector<2x512xf32>
    %cst_7 = arith.constant 0.000000e+00 : f32
    %9 = vector.broadcast %cst_7 : f32 to vector<2x512xf32>
    %10 = arith.maximumf %8, %9 : vector<2x512xf32>
    %11 = arith.truncf %10 : vector<2x512xf32> to vector<2x512xbf16>
    %c0_8 = arith.constant 0 : index
    %c0_9 = arith.constant 0 : index
    %12 = vector.load %arg6[%c0_8, %c0_9] : memref<2x512xbf16, #tpu.memory_space<vmem>>, vector<2x512xbf16>
    tpu.vector_store %arg6[%c0_8, %c0_9], %11 {strides = array<i32>} : memref<2x512xbf16, #tpu.memory_space<vmem>>, vector<2x512xbf16>,
    return
  }
  func.func @transform_0(%arg0: i32, %arg1: i32) -> (i32, i32) {
    %c0_i32 = arith.constant 0 : i32
    %c0_i32_0 = arith.constant 0 : i32
    return %arg0, %c0_i32 : i32, i32
  }
  func.func @transform_1(%arg0: i32, %arg1: i32) -> (i32, i32) {
    %c0_i32 = arith.constant 0 : i32
    %c0_i32_0 = arith.constant 0 : i32
    return %c0_i32, %arg1 : i32, i32
  }
  func.func @transform_2(%arg0: i32, %arg1: i32) -> (i32, i32) {
    %c0_i32 = arith.constant 0 : i32
    %c0_i32_0 = arith.constant 0 : i32
    return %c0_i32, %arg1 : i32, i32
  }
  func.func @transform_3(%arg0: i32, %arg1: i32) -> (i32, i32) {
    %c0_i32 = arith.constant 0 : i32
    %c0_i32_0 = arith.constant 0 : i32
    return %c0_i32, %arg1 : i32, i32
  }
  func.func @transform_4(%arg0: i32, %arg1: i32) -> (i32, i32) {
    %c0_i32 = arith.constant 0 : i32
    return %arg0, %arg1 : i32, i32
  }
}

module attributes {stable_mosaic.version = 11 : i64} {
  func.func @_gemm_fused_kernel(%arg0: i32, %arg1: i32, %arg2: memref<16x2304xbf16, #tpu.memory_space<vmem>>, %arg3: memref<2304x256xbf16, #tpu.memory_space<vmem>>, %arg4: memref<1x256xf32, #tpu.memory_space<vmem>>, %arg5: memref<1x256xf32, #tpu.memory_space<vmem>>, %arg6: memref<16x256xbf16, #tpu.memory_space<vmem>>) attributes {dimension_semantics = [#tpu.dimension_semantics<parallel>, #tpu.dimension_semantics<parallel>], iteration_bounds = array<i64: 2, 2>, scalar_prefetch = 0 : i64, scratch_operands = 0 : i64, tpu.core_type = #tpu.core_type<tc>, window_params = [{transform_indices = @transform_0, window_bounds = array<i64: 16, 2304>}, {transform_indices = @transform_1, window_bounds = array<i64: 2304, 256>}, {transform_indices = @transform_2, window_bounds = array<i64: 1, 256>}, {transform_indices = @transform_3, window_bounds = array<i64: 1, 256>}, {transform_indices = @transform_4, window_bounds = array<i64: 16, 256>}]} {
    %c0 = arith.constant 0 : index
    %c0_0 = arith.constant 0 : index
    %0 = vector.load %arg2[%c0, %c0_0] : memref<16x2304xbf16, #tpu.memory_space<vmem>>, vector<16x2304xbf16>
    %c0_1 = arith.constant 0 : index
    %c0_2 = arith.constant 0 : index
    %1 = vector.load %arg3[%c0_1, %c0_2] : memref<2304x256xbf16, #tpu.memory_space<vmem>>, vector<2304x256xbf16>
    %cst = arith.constant dense<0.000000e+00> : vector<16x256xf32>
    %2 = tpu.matmul %0, %1, %cst {dimension_numbers = #tpu.dot_dimension_numbers<[1], [0], [0], [1], [0, 0, 1, 1], [], []>} : vector<16x2304xbf16>, vector<2304x256xbf16>, vector<16x256xf32> -> vector<16x256xf32>
    %c0_3 = arith.constant 0 : index
    %c0_4 = arith.constant 0 : index
    %3 = vector.load %arg4[%c0_3, %c0_4] : memref<1x256xf32, #tpu.memory_space<vmem>>, vector<1x256xf32>
    %4 = vector.broadcast %3 : vector<1x256xf32> to vector<16x256xf32>
    %5 = arith.mulf %2, %4 : vector<16x256xf32>
    %c0_5 = arith.constant 0 : index
    %c0_6 = arith.constant 0 : index
    %6 = vector.load %arg5[%c0_5, %c0_6] : memref<1x256xf32, #tpu.memory_space<vmem>>, vector<1x256xf32>
    %7 = vector.broadcast %6 : vector<1x256xf32> to vector<16x256xf32>
    %8 = arith.addf %5, %7 : vector<16x256xf32>
    %cst_7 = arith.constant 0.000000e+00 : f32
    %9 = vector.broadcast %cst_7 : f32 to vector<16x256xf32>
    %10 = arith.maximumf %8, %9 : vector<16x256xf32>
    %11 = arith.truncf %10 : vector<16x256xf32> to vector<16x256xbf16>
    %c0_8 = arith.constant 0 : index
    %c0_9 = arith.constant 0 : index
    %12 = vector.load %arg6[%c0_8, %c0_9] : memref<16x256xbf16, #tpu.memory_space<vmem>>, vector<16x256xbf16>
    tpu.vector_store %arg6[%c0_8, %c0_9], %11 {strides = array<i32>} : memref<16x256xbf16, #tpu.memory_space<vmem>>, vector<16x256xbf16>,
    return
  }
  func.func @transform_0(%arg0: i32, %arg1: i32) -> (i32, i32) {
    %c0_i32 = arith.constant 0 : i32
    %c0_i32_0 = arith.constant 0 : i32
    return %arg0, %c0_i32 : i32, i32
  }
  func.func @transform_1(%arg0: i32, %arg1: i32) -> (i32, i32) {
    %c0_i32 = arith.constant 0 : i32
    %c0_i32_0 = arith.constant 0 : i32
    return %c0_i32, %arg1 : i32, i32
  }
  func.func @transform_2(%arg0: i32, %arg1: i32) -> (i32, i32) {
    %c0_i32 = arith.constant 0 : i32
    %c0_i32_0 = arith.constant 0 : i32
    return %c0_i32, %arg1 : i32, i32
  }
  func.func @transform_3(%arg0: i32, %arg1: i32) -> (i32, i32) {
    %c0_i32 = arith.constant 0 : i32
    %c0_i32_0 = arith.constant 0 : i32
    return %c0_i32, %arg1 : i32, i32
  }
  func.func @transform_4(%arg0: i32, %arg1: i32) -> (i32, i32) {
    %c0_i32 = arith.constant 0 : i32
    return %arg0, %arg1 : i32, i32
  }
}

module attributes {stable_mosaic.version = 11 : i64} {
  func.func @_gemm_fused_kernel(%arg0: i32, %arg1: i32, %arg2: memref<64x1152xbf16, #tpu.memory_space<vmem>>, %arg3: memref<1152x128xbf16, #tpu.memory_space<vmem>>, %arg4: memref<1x128xf32, #tpu.memory_space<vmem>>, %arg5: memref<1x128xf32, #tpu.memory_space<vmem>>, %arg6: memref<64x128xbf16, #tpu.memory_space<vmem>>) attributes {dimension_semantics = [#tpu.dimension_semantics<parallel>, #tpu.dimension_semantics<parallel>], iteration_bounds = array<i64: 2, 2>, scalar_prefetch = 0 : i64, scratch_operands = 0 : i64, tpu.core_type = #tpu.core_type<tc>, window_params = [{transform_indices = @transform_0, window_bounds = array<i64: 64, 1152>}, {transform_indices = @transform_1, window_bounds = array<i64: 1152, 128>}, {transform_indices = @transform_2, window_bounds = array<i64: 1, 128>}, {transform_indices = @transform_3, window_bounds = array<i64: 1, 128>}, {transform_indices = @transform_4, window_bounds = array<i64: 64, 128>}]} {
    %c0 = arith.constant 0 : index
    %c0_0 = arith.constant 0 : index
    %0 = vector.load %arg2[%c0, %c0_0] : memref<64x1152xbf16, #tpu.memory_space<vmem>>, vector<64x1152xbf16>
    %c0_1 = arith.constant 0 : index
    %c0_2 = arith.constant 0 : index
    %1 = vector.load %arg3[%c0_1, %c0_2] : memref<1152x128xbf16, #tpu.memory_space<vmem>>, vector<1152x128xbf16>
    %cst = arith.constant dense<0.000000e+00> : vector<64x128xf32>
    %2 = tpu.matmul %0, %1, %cst {dimension_numbers = #tpu.dot_dimension_numbers<[1], [0], [0], [1], [0, 0, 1, 1], [], []>} : vector<64x1152xbf16>, vector<1152x128xbf16>, vector<64x128xf32> -> vector<64x128xf32>
    %c0_3 = arith.constant 0 : index
    %c0_4 = arith.constant 0 : index
    %3 = vector.load %arg4[%c0_3, %c0_4] : memref<1x128xf32, #tpu.memory_space<vmem>>, vector<1x128xf32>
    %4 = vector.broadcast %3 : vector<1x128xf32> to vector<64x128xf32>
    %5 = arith.mulf %2, %4 : vector<64x128xf32>
    %c0_5 = arith.constant 0 : index
    %c0_6 = arith.constant 0 : index
    %6 = vector.load %arg5[%c0_5, %c0_6] : memref<1x128xf32, #tpu.memory_space<vmem>>, vector<1x128xf32>
    %7 = vector.broadcast %6 : vector<1x128xf32> to vector<64x128xf32>
    %8 = arith.addf %5, %7 : vector<64x128xf32>
    %cst_7 = arith.constant 0.000000e+00 : f32
    %9 = vector.broadcast %cst_7 : f32 to vector<64x128xf32>
    %10 = arith.maximumf %8, %9 : vector<64x128xf32>
    %11 = arith.truncf %10 : vector<64x128xf32> to vector<64x128xbf16>
    %c0_8 = arith.constant 0 : index
    %c0_9 = arith.constant 0 : index
    %12 = vector.load %arg6[%c0_8, %c0_9] : memref<64x128xbf16, #tpu.memory_space<vmem>>, vector<64x128xbf16>
    tpu.vector_store %arg6[%c0_8, %c0_9], %11 {strides = array<i32>} : memref<64x128xbf16, #tpu.memory_space<vmem>>, vector<64x128xbf16>,
    return
  }
  func.func @transform_0(%arg0: i32, %arg1: i32) -> (i32, i32) {
    %c0_i32 = arith.constant 0 : i32
    %c0_i32_0 = arith.constant 0 : i32
    return %arg0, %c0_i32 : i32, i32
  }
  func.func @transform_1(%arg0: i32, %arg1: i32) -> (i32, i32) {
    %c0_i32 = arith.constant 0 : i32
    %c0_i32_0 = arith.constant 0 : i32
    return %c0_i32, %arg1 : i32, i32
  }
  func.func @transform_2(%arg0: i32, %arg1: i32) -> (i32, i32) {
    %c0_i32 = arith.constant 0 : i32
    %c0_i32_0 = arith.constant 0 : i32
    return %c0_i32, %arg1 : i32, i32
  }
  func.func @transform_3(%arg0: i32, %arg1: i32) -> (i32, i32) {
    %c0_i32 = arith.constant 0 : i32
    %c0_i32_0 = arith.constant 0 : i32
    return %c0_i32, %arg1 : i32, i32
  }
  func.func @transform_4(%arg0: i32, %arg1: i32) -> (i32, i32) {
    %c0_i32 = arith.constant 0 : i32
    return %arg0, %arg1 : i32, i32
  }
}

module attributes {stable_mosaic.version = 11 : i64} {
  func.func @_gemm_fused_kernel(%arg0: i32, %arg1: i32, %arg2: memref<256x576xbf16, #tpu.memory_space<vmem>>, %arg3: memref<576x128xbf16, #tpu.memory_space<vmem>>, %arg4: memref<1x128xf32, #tpu.memory_space<vmem>>, %arg5: memref<1x128xf32, #tpu.memory_space<vmem>>, %arg6: memref<256x128xbf16, #tpu.memory_space<vmem>>) attributes {dimension_semantics = [#tpu.dimension_semantics<parallel>, #tpu.dimension_semantics<parallel>], iteration_bounds = array<i64: 2, 2>, scalar_prefetch = 0 : i64, scratch_operands = 0 : i64, tpu.core_type = #tpu.core_type<tc>, window_params = [{transform_indices = @transform_0, window_bounds = array<i64: 256, 576>}, {transform_indices = @transform_1, window_bounds = array<i64: 576, 128>}, {transform_indices = @transform_2, window_bounds = array<i64: 1, 128>}, {transform_indices = @transform_3, window_bounds = array<i64: 1, 128>}, {transform_indices = @transform_4, window_bounds = array<i64: 256, 128>}]} {
    %c0 = arith.constant 0 : index
    %c0_0 = arith.constant 0 : index
    %0 = vector.load %arg2[%c0, %c0_0] : memref<256x576xbf16, #tpu.memory_space<vmem>>, vector<256x576xbf16>
    %c0_1 = arith.constant 0 : index
    %c0_2 = arith.constant 0 : index
    %1 = vector.load %arg3[%c0_1, %c0_2] : memref<576x128xbf16, #tpu.memory_space<vmem>>, vector<576x128xbf16>
    %cst = arith.constant dense<0.000000e+00> : vector<256x128xf32>
    %2 = tpu.matmul %0, %1, %cst {dimension_numbers = #tpu.dot_dimension_numbers<[1], [0], [0], [1], [0, 0, 1, 1], [], []>} : vector<256x576xbf16>, vector<576x128xbf16>, vector<256x128xf32> -> vector<256x128xf32>
    %c0_3 = arith.constant 0 : index
    %c0_4 = arith.constant 0 : index
    %3 = vector.load %arg4[%c0_3, %c0_4] : memref<1x128xf32, #tpu.memory_space<vmem>>, vector<1x128xf32>
    %4 = vector.broadcast %3 : vector<1x128xf32> to vector<256x128xf32>
    %5 = arith.mulf %2, %4 : vector<256x128xf32>
    %c0_5 = arith.constant 0 : index
    %c0_6 = arith.constant 0 : index
    %6 = vector.load %arg5[%c0_5, %c0_6] : memref<1x128xf32, #tpu.memory_space<vmem>>, vector<1x128xf32>
    %7 = vector.broadcast %6 : vector<1x128xf32> to vector<256x128xf32>
    %8 = arith.addf %5, %7 : vector<256x128xf32>
    %cst_7 = arith.constant 0.000000e+00 : f32
    %9 = vector.broadcast %cst_7 : f32 to vector<256x128xf32>
    %10 = arith.maximumf %8, %9 : vector<256x128xf32>
    %11 = arith.truncf %10 : vector<256x128xf32> to vector<256x128xbf16>
    %c0_8 = arith.constant 0 : index
    %c0_9 = arith.constant 0 : index
    %12 = vector.load %arg6[%c0_8, %c0_9] : memref<256x128xbf16, #tpu.memory_space<vmem>>, vector<256x128xbf16>
    tpu.vector_store %arg6[%c0_8, %c0_9], %11 {strides = array<i32>} : memref<256x128xbf16, #tpu.memory_space<vmem>>, vector<256x128xbf16>,
    return
  }
  func.func @transform_0(%arg0: i32, %arg1: i32) -> (i32, i32) {
    %c0_i32 = arith.constant 0 : i32
    %c0_i32_0 = arith.constant 0 : i32
    return %arg0, %c0_i32 : i32, i32
  }
  func.func @transform_1(%arg0: i32, %arg1: i32) -> (i32, i32) {
    %c0_i32 = arith.constant 0 : i32
    %c0_i32_0 = arith.constant 0 : i32
    return %c0_i32, %arg1 : i32, i32
  }
  func.func @transform_2(%arg0: i32, %arg1: i32) -> (i32, i32) {
    %c0_i32 = arith.constant 0 : i32
    %c0_i32_0 = arith.constant 0 : i32
    return %c0_i32, %arg1 : i32, i32
  }
  func.func @transform_3(%arg0: i32, %arg1: i32) -> (i32, i32) {
    %c0_i32 = arith.constant 0 : i32
    %c0_i32_0 = arith.constant 0 : i32
    return %c0_i32, %arg1 : i32, i32
  }
  func.func @transform_4(%arg0: i32, %arg1: i32) -> (i32, i32) {
    %c0_i32 = arith.constant 0 : i32
    return %arg0, %arg1 : i32, i32
  }
}

module attributes {stable_mosaic.version = 11 : i64} {
  func.func @_gemm_fused_kernel(%arg0: i32, %arg1: i32, %arg2: memref<512x576xbf16, #tpu.memory_space<vmem>>, %arg3: memref<576x4xbf16, #tpu.memory_space<vmem>>, %arg4: memref<1x4xf32, #tpu.memory_space<vmem>>, %arg5: memref<1x4xf32, #tpu.memory_space<vmem>>, %arg6: memref<512x4xf32, #tpu.memory_space<vmem>>) attributes {dimension_semantics = [#tpu.dimension_semantics<parallel>, #tpu.dimension_semantics<parallel>], iteration_bounds = array<i64: 4, 1>, scalar_prefetch = 0 : i64, scratch_operands = 0 : i64, tpu.core_type = #tpu.core_type<tc>, window_params = [{transform_indices = @transform_0, window_bounds = array<i64: 512, 576>}, {transform_indices = @transform_1, window_bounds = array<i64: 576, 4>}, {transform_indices = @transform_2, window_bounds = array<i64: 1, 4>}, {transform_indices = @transform_3, window_bounds = array<i64: 1, 4>}, {transform_indices = @transform_4, window_bounds = array<i64: 512, 4>}]} {
    %c0 = arith.constant 0 : index
    %c0_0 = arith.constant 0 : index
    %0 = vector.load %arg2[%c0, %c0_0] : memref<512x576xbf16, #tpu.memory_space<vmem>>, vector<512x576xbf16>
    %c0_1 = arith.constant 0 : index
    %c0_2 = arith.constant 0 : index
    %1 = vector.load %arg3[%c0_1, %c0_2] : memref<576x4xbf16, #tpu.memory_space<vmem>>, vector<576x4xbf16>
    %cst = arith.constant dense<0.000000e+00> : vector<512x4xf32>
    %2 = tpu.matmul %0, %1, %cst {dimension_numbers = #tpu.dot_dimension_numbers<[1], [0], [0], [1], [0, 0, 1, 1], [], []>} : vector<512x576xbf16>, vector<576x4xbf16>, vector<512x4xf32> -> vector<512x4xf32>
    %c0_3 = arith.constant 0 : index
    %c0_4 = arith.constant 0 : index
    %3 = vector.load %arg4[%c0_3, %c0_4] : memref<1x4xf32, #tpu.memory_space<vmem>>, vector<1x4xf32>
    %4 = vector.broadcast %3 : vector<1x4xf32> to vector<512x4xf32>
    %5 = arith.mulf %2, %4 : vector<512x4xf32>
    %c0_5 = arith.constant 0 : index
    %c0_6 = arith.constant 0 : index
    %6 = vector.load %arg5[%c0_5, %c0_6] : memref<1x4xf32, #tpu.memory_space<vmem>>, vector<1x4xf32>
    %7 = vector.broadcast %6 : vector<1x4xf32> to vector<512x4xf32>
    %8 = arith.addf %5, %7 : vector<512x4xf32>
    %9 = math.tanh %8 : vector<512x4xf32>
    %c0_7 = arith.constant 0 : index
    %c0_8 = arith.constant 0 : index
    %10 = vector.load %arg6[%c0_7, %c0_8] : memref<512x4xf32, #tpu.memory_space<vmem>>, vector<512x4xf32>
    tpu.vector_store %arg6[%c0_7, %c0_8], %9 {strides = array<i32>} : memref<512x4xf32, #tpu.memory_space<vmem>>, vector<512x4xf32>,
    return
  }
  func.func @transform_0(%arg0: i32, %arg1: i32) -> (i32, i32) {
    %c0_i32 = arith.constant 0 : i32
    %c0_i32_0 = arith.constant 0 : i32
    return %arg0, %c0_i32 : i32, i32
  }
  func.func @transform_1(%arg0: i32, %arg1: i32) -> (i32, i32) {
    %c0_i32 = arith.constant 0 : i32
    %c0_i32_0 = arith.constant 0 : i32
    return %c0_i32, %arg1 : i32, i32
  }
  func.func @transform_2(%arg0: i32, %arg1: i32) -> (i32, i32) {
    %c0_i32 = arith.constant 0 : i32
    %c0_i32_0 = arith.constant 0 : i32
    return %c0_i32, %arg1 : i32, i32
  }
  func.func @transform_3(%arg0: i32, %arg1: i32) -> (i32, i32) {
    %c0_i32 = arith.constant 0 : i32
    %c0_i32_0 = arith.constant 0 : i32
    return %c0_i32, %arg1 : i32, i32
  }
  func.func @transform_4(%arg0: i32, %arg1: i32) -> (i32, i32) {
    %c0_i32 = arith.constant 0 : i32
    return %arg0, %arg1 : i32, i32
  }
}

</mosaic_0001>

<bundles_post_ra>
// kernel: forward.5
= control target key start
LH: loop header
LB: loop body
LE: loop exit
PB: predicated region body
PF: predicated region fallthrough
CT: control target
= control target key end

     0   :  { %9 = vsyncpa [#allocation3], 0  ;;  %s1108_s0 = inlined_call_operand.vmem [shape: bf16[2,16], index: 0, kind: input, shape index: {}]   ;;  %s1109_s1 = inlined_call_operand.hbm [shape: bf16[16,4096], index: 1, kind: input, shape index: {}]   ;;  %s1110_s2 = inlined_call_operand.hbm [shape: f32[1,4096], index: 2, kind: input, shape index: {}]   ;;  %s1111_s3 = inlined_call_operand.hbm [shape: f32[1,4096], index: 3, kind: input, shape index: {}]   ;;  %s1112_s4 = inlined_call_operand.vmem [shape: bf16[2,4096], index: 4, kind: output, shape index: {}]  }
   0x1   :  { %11 = vsyncpa [#allocation3 + $0x1], 0 }
   0x2   :  { %12 = vsyncpa [#allocation5], 0 }
   0x3   :  { %14 = vsyncpa [#allocation5 + $0x1], 0  ;;  %s954_s15 = smov 0   ;;  %s956_s16 = smov 0  }
   0x4   :  { %s958_s17 = smov 0   ;;  %s960_s18 = smov 0  }
   0x5   :  { %s962_s19 = smov 0   ;;  %s964_s20 = smov 0  }
   0x6 LB: > { %s1113_s21 = sadd.s32 4294967295, %s919_s20   ;;  %s29_s22 = sadd.s32 1, %s915_s19  ;;  %s919_s20 = sphi %s964_s20, %s20_s20   ;;  %s915_s19 = sphi %s962_s19, %s1122_s19   ;;  %s911_s18 = sphi %s960_s18, %s1121_s18   ;;  %s907_s17 = sphi %s958_s17, %s1120_s17   ;;  %s903_s16 = sphi %s956_s16, %s1119_s16   ;;  %s899_s15 = sphi %s954_s15, %s1118_s15  }
   0x7   : > { %p30_p0 = scmp.ge.s32.totalorder %s29_s22, 8  ;;  %s65_s23 = sadd.s32 1, %s907_s17 }
   0x8   : > { %p72_p1 = scmp.ne.s32.totalorder %s907_s17, %s903_s16  ;;  %p73_p2 = scmp.eq.s32.totalorder %s919_s20, 0 }
   0x9   : > { %s1124_s22 = smov (%p30_p0, %s29_s22), 0  ;;  %p78_p4 = scmp.ne.s32.totalorder %s903_s16, %s899_s15 }
   0xa   : > { %p74_p3 = por %p73_p2, %p72_p1  ;;  %s62_s24 = ssub.s32 %s915_s19, %s1124_s22 }
   0xb   : > { %p79_p5 = scmp.eq.s32.totalorder %s1113_s21, 0  ;;  %p63_p6 = scmp.eq.s32.totalorder %s62_s24, 0 }
   0xc   : > { %p721_p8 = scmp.lt.s32.totalorder %s919_s20, 8  ;;  %s1004_s27 = sand.u32 1, %s907_s17  }
   0xd   : > { %p995_p7 = por %p79_p5, %p78_p4  ;;  %s677_s29 = sshll.u32 %s1004_s27, 5 }
   0xe   : > { %s1001_s26 = scalar_select %p63_p6, %s907_s17, %s65_s23  }
   0xf   : > { %p1006_p9 = pnand %p721_p8, %p74_p3  ;;  %s192_s30 = scalar_lea.vmem [#allocation2], %s677_s29 }
  0x10   : > { %s199_s5 = sshll.u32 %s192_s30, 4  ;;  %s209_s6 = sand.u32 1, %s919_s20   ;;  %s1012_s5 = int_to_ptr.vmem [resolvable:$true] %s199_s5 }
  0x11   : > { %s680_s7 = sshll.u32 %s1004_s27, 2  ;;  %s703_s8 = sshll.u32 %s915_s19, 6 }
  0x12   : > { %s219_s11 = scalar_lea.hbm %s1110_s2, %s703_s8  ;;  %s213_s12 = scalar_lea.vmem [#allocation4], %s680_s7 }
  0x13   : > { %s221_s13 = sshll.u32 %s213_s12, 4  ;;  %s1024_s23 = scalar_lea.hbm %s1111_s3, %s703_s8  ;;  %s222_s13 = int_to_ptr.vmem [resolvable:$true] %s221_s13 }
  0x14   : > { %s1026_s24 = scalar_lea.sflag [#allocation5], %s209_s6  ;;  %p783_p10 = pneg %p1006_p9 }
  0x15   : > { %s794_s29 = scalar_lea.vmem %s222_s13, 64  ;;  %s921_s30 = smov [#allocation4]  }
  0x16   : > { %p795_p11 = scmp.ne.s32.totalorder %s222_s13, %s794_s29  ;;  %s799_s9 = sshll.u32 %s921_s30, 4  ;;  %s800_s9 = int_to_ptr.vmem [resolvable:$false] %s799_s9 }
  0x17   : > { %s801_s10 = scalar_lea.vmem %s800_s9, 128  ;;  %p802_p0 = scmp.lt.s32.totalorder %s222_s13, %s800_s9 }
  0x18   : > { %p797_p12 = pnand %p795_p11, %p783_p10  ;;  %p803_p1 = scmp.lt.s32.totalorder %s801_s10, %s794_s29 }
  0x1a   : > { %p798_p13 = pneg %p797_p12  ;;  %p804_p2 = por %p803_p1, %p802_p0 }
  0x1c   : > { %p805_p3 = pnand %p804_p2, %p798_p13 }
  0x1e   : > { %808 = shalt.err (!%p805_p3)
}
  0x1f   : > { %717 = dma.hbm_to_vmem [thread:$0]  (!%p1006_p9), %s219_s11, 64, %s222_s13, %s1026_s24  }
  0x20   : > { %p686_p4 = scmp.ge.s32.totalorder %s919_s20, 1  ;;  %p245_p5 = scmp.lt.s32.totalorder %s919_s20, 9 }
  0x21   : > { %s702_s6 = sshll.u32 %s915_s19, 8  ;;  %s189_s29 = scalar_lea.sflag [#allocation3], %s1004_s27 }
  0x22   : > { %p1039_p6 = pnand %p686_p4, %p245_p5  ;;  %s198_s15 = scalar_lea.hbm %s1109_s1, %s702_s6 }
  0x23   : > { %s822_s30 = scalar_lea.vmem %s1012_s5, 512  ;;  %s922_s9 = smov [#allocation2]  }
  0x24   : > { %p823_p8 = scmp.ne.s32.totalorder %s1012_s5, %s822_s30  ;;  %s827_s11 = sshll.u32 %s922_s9, 4  ;;  %s828_s11 = int_to_ptr.vmem [resolvable:$false] %s827_s11 }
  0x25   : > { %s829_s13 = scalar_lea.vmem %s828_s11, 1024  ;;  %p830_p13 = scmp.lt.s32.totalorder %s1012_s5, %s828_s11 }
  0x26   : > { %p825_p11 = pnand %p823_p8, %p783_p10  ;;  %p831_p0 = scmp.lt.s32.totalorder %s829_s13, %s822_s30 }
  0x28   : > { %p826_p12 = pneg %p825_p11  ;;  %p832_p1 = por %p831_p0, %p830_p13 }
  0x2a   : > { %p833_p2 = pnand %p832_p1, %p826_p12 }
  0x2c   : > { %836 = shalt.err (!%p833_p2)
}
  0x2d   : > { %s923_s10 = smov 2048   ;;  %s924_s6 = smov 256  }
  0x2e   : > { %s925_s12 = smov 16   ;;  %s232_s14 = scalar_lea.vmem [#allocation6], %s680_s7 }
  0x2f   : > { %714 = dma.hbm_to_vmem [thread:$0]  (!%p1006_p9), %s198_s15, 512, %s1012_s5, %s189_s29, %s923_s10, %s924_s6, %s925_s12  }
  0x30   : > { %s240_s21 = sshll.u32 %s232_s14, 4  ;;  %s926_s30 = smov [#allocation6]   ;;  %s241_s21 = int_to_ptr.vmem [resolvable:$true] %s240_s21 }
  0x31   : > { %s850_s9 = scalar_lea.vmem %s241_s21, 64  ;;  %s855_s11 = sshll.u32 %s926_s30, 4  ;;  %s856_s11 = int_to_ptr.vmem [resolvable:$false] %s855_s11 }
  0x32   : > { %p851_p3 = scmp.ne.s32.totalorder %s241_s21, %s850_s9  ;;  %s857_s13 = scalar_lea.vmem %s856_s11, 128 }
  0x33   : > { %p858_p8 = scmp.lt.s32.totalorder %s241_s21, %s856_s11  ;;  %p859_p11 = scmp.lt.s32.totalorder %s857_s13, %s850_s9 }
  0x34   : > { %p853_p4 = pnand %p851_p3, %p783_p10 }
  0x35   : > { %p860_p12 = por %p859_p11, %p858_p8 }
  0x36   : > { %p854_p5 = pneg %p853_p4 }
  0x38   : > { %p861_p13 = pnand %p860_p12, %p854_p5 }
  0x3a   : > { %864 = shalt.err (!%p861_p13)
}
  0x3b   : > { %720 = dma.hbm_to_vmem [thread:$0]  (!%p1006_p9), %s1024_s23, 64, %s241_s21, %s1026_s24  }
  0x3c   : > { %249 = sbr.rel (%p1039_p6) target bundleno = 284 (0x11c), region = 36  ;;  %s1068_s27 = sand.u32 (!%p1039_p6), 1, %s903_s16  }
  0x3d   : > { %s687_s5 = sshll.u32 (!%p1039_p6), %s1068_s27, 5  ;;  %s252_s7 = scalar_lea.sflag (!%p1039_p6), [#allocation3], %s1068_s27 }
  0x3e   : > { %s255_s15 = scalar_lea.vmem (!%p1039_p6), [#allocation2], %s687_s5 }
  0x41   : > { %890 = dma.done.wait (%p995_p7), %s252_s7, 512  }
  0x42   : > { %892 = vsyncadd (%p995_p7), %s252_s7, 4294966784  ;;  %s1117_s28 = sadd.s32 4294967295, %s919_s20   ;;  %s688_s23 = sshll.u32 %s1068_s27, 2 }
  0x43   : > { %s260_s21 = sand.u32 1, %s1117_s28   ;;  %s264_s8 = scalar_lea.vmem [#allocation4], %s688_s23 }
  0x44   : > { %s261_s24 = scalar_lea.sflag [#allocation5], %s260_s21 }
  0x45   : > { %894 = dma.done.wait (%p995_p7), %s261_s24, 128  }
  0x46   : > { %896 = vsyncadd (%p995_p7), %s261_s24, 4294967168  ;;  %v927_v0 = vmov 0   ;;  %v775_v1 = vld [vmem:[%s255_s15 + $0x4] ss:$16 sps:$4 sm:$0xff]   ;;  %v777_v2 = vld [vmem:[%s255_s15 + $0xc] ss:$16 sps:$4 sm:$0xff]   ;;  %v443_v6 = vlaneseq }
  0x47   : > { %391 = vmatprep.mubr.bf16.mxu0 %v927_v0  ;;  %432 = vmatprep.mubr.bf16.mxu1 %v927_v0  ;;  %v779_v3 = vld [vmem:[%s255_s15] ss:$16 sps:$4 sm:$0xff]   ;;  %v780_v4 = vld [vmem:[%s255_s15 + $0x8] ss:$16 sps:$4 sm:$0xff]   ;;  %vm355_vm0 = vcmask 130048   ;;  %s273_s25 = scalar_lea.vmem [#allocation6], %s688_s23 }
  0x48   : > { %373 = vmatprep.subr.bf16.mxu0 %v775_v1  ;;  %414 = vmatprep.subr.bf16.mxu1 %v777_v2  ;;  %v330_v5 = vld [vmem:[%s1108_s0] sm:$0x1]  ;;  %v444_v7 = vshrl.u32 %v443_v6, 7  ;;  %v467_v13 = vld [vmem:[%s273_s25] sm:$0xf]  ;;  %s690_s6 = sshll.u32 %s911_s18, 2 }
  0x49   : > { %374 = vmatpush1.bf16.msra.mxu0 %v779_v3  ;;  %415 = vmatpush1.bf16.msra.mxu1 %v780_v4  ;;  %v441_v10 = vld [vmem:[%s264_s8] sm:$0xf]  ;;  %v928_v16 = vmov 1966171168   ;;  %p323_p7 = scmp.lt.s32.totalorder %s690_s6, 31 }
  0x4a   : > { %v445_v8 = vsub.s32 0, %v444_v7  ;;  %v453_v9 = vsub.s32 2, %v444_v7  ;;  %v449_v11 = vsub.s32 1, %v444_v7  ;;  %v457_v12 = vsub.s32 3, %v444_v7 }
  0x4b   : > { %v508_v17 = vunpack.c.l.s4 %v928_v16  ;;  %s1126_s6 = smov (!%p323_p7, %s690_s6), 31 }
  0x4c   : > { %695 = vmatmul.mubr.msk.bf16.vlgmr.msra.gmra.mxu0 %vm355_vm0, %v330_v5  ;;  %696 = vmatmul.mubr.msk.bf16.vlgmr.msra.gmra.mxu1 %vm355_vm0, %v330_v5  ;;  %v446_v14 = vrot.slane %v441_v10, %v445_v8  ;;  %v454_v15 = vrot.slane %v441_v10, %v453_v9  ;;  %v472_v18 = vrot.slane %v467_v13, %v445_v8  ;;  %s327_s14 = scalar_lea.vmem %s1112_s4, %s1126_s6 }
  0x4d   : > { %v480_v19 = vrot.slane %v467_v13, %v453_v9  ;;  %v450_v20 = vrot.slane %v441_v10, %v449_v11  ;;  %v458_v21 = vrot.slane %v441_v10, %v457_v12  ;;  %v476_v26 = vrot.slane %v467_v13, %v449_v11 }
  0x4e   : > { %v484_v27 = vrot.slane %v467_v13, %v457_v12  ;;  %v509_v29 = vunpack.c.0.s8 %v508_v17 }
  0x50   : > { %v512_v39 = vsub.s32 %v509_v29, %v444_v7 }
 0x10c   : > { %v393_v22 = vpop.f32.mrf.mxu0  ;;  %v434_v23 = vpop.f32.mrf.mxu1 }
 0x10d   : > { %v463_v24 = vmul.f32 %v446_v14, %v393_v22  ;;  %v465_v25 = vmul.f32 %v454_v15, %v434_v23 }
 0x10e   : > { %v395_v28 = vpop.f32.mrf.mxu0  ;;  %v436_v30 = vpop.f32.mrf.mxu1 }
 0x10f   : > { %v489_v31 = vadd.f32 %v472_v18, %v463_v24  ;;  %v491_v32 = vadd.f32 %v480_v19, %v465_v25  ;;  %v464_v33 = vmul.f32 %v450_v20, %v395_v28  ;;  %v466_v34 = vmul.f32 %v458_v21, %v436_v30 }
 0x110   : > { %v397_v35 = vpop.f32.mrf.mxu0  ;;  %v438_v36 = vpop.f32.mrf.mxu1 }
 0x111   : > { %v490_v37 = vadd.f32 %v476_v26, %v464_v33  ;;  %v492_v38 = vadd.f32 %v484_v27, %v466_v34  ;;  %v493_v42 = vmax.f32 %v489_v31, 0.0  ;;  %v495_v43 = vmax.f32 %v491_v32, 0.0 }
 0x112   : > { %v398_v40 = vpop.f32.mrf.mxu0  ;;  %v439_v41 = vpop.f32.mrf.mxu1 }
 0x113   : > { %v494_v44 = vmax.f32 %v490_v37, 0.0  ;;  %v496_v45 = vmax.f32 %v492_v38, 0.0 }
 0x115   : > { %v697_v46 = vpack.c.bf16 %v494_v44, %v493_v42  ;;  %v698_v47 = vpack.c.bf16 %v496_v45, %v495_v43 }
 0x117   : > { %v513_v48 = vrot.slane %v697_v46, %v512_v39  ;;  %v520_v49 = vrot.slane %v698_v47, %v512_v39 }
 0x119   : > { %v521_v50 = vcombine.low %v513_v48, %v520_v49 }
 0x11b   : > { %699 = vst.sshfl [vmem:[%s327_s14] sm:$0x55 pattern:$0x73625140] %v521_v50 }
 0x11c PF: > { %s20_s20 = sadd.s32 1, %s919_s20   ;;  %s1118_s15 = smov %s903_s16 }
 0x11d   : > { %p17_p9 = scmp.ge.s32.totalorder %s20_s20, 10   ;;  %s1119_s16 = smov %s907_s17 }
 0x11e   : > { %s1120_s17 = smov %s1001_s26  ;;  %s1121_s18 = smov %s915_s19 }
 0x11f   : > { %s1122_s19 = smov %s1124_s22  ;;  %19 = sbr.rel (!%p17_p9) target bundleno = 6 (0x6), region = 103 }
 0x124   :  { %559 = vsyncpa [#allocation3], 1 }
 0x125   :  { %561 = vsyncpa [#allocation3 + $0x1], 1 }
 0x126   :  { %562 = vsyncpa [#allocation5], 1 }
 0x127   :  { %564 = vsyncpa [#allocation5 + $0x1], 1 }

// kernel: forward.6
= control target key start
LH: loop header
LB: loop body
LE: loop exit
PB: predicated region body
PF: predicated region fallthrough
CT: control target
= control target key end

     0   :  { %s4414_s0 = inlined_call_operand.vmem [shape: bf16[32,2304], index: 0, kind: input, shape index: {}]   ;;  %s4415_s1 = inlined_call_operand.hbm [shape: bf16[2304,512], index: 1, kind: input, shape index: {}]   ;;  %s4416_s2 = inlined_call_operand.hbm [shape: f32[1,512], index: 2, kind: input, shape index: {}]   ;;  %s4417_s3 = inlined_call_operand.hbm [shape: f32[1,512], index: 3, kind: input, shape index: {}]   ;;  %s4418_s4 = inlined_call_operand.vmem [shape: bf16[32,512], index: 4, kind: output, shape index: {}]  }
   0x1   :  { %4424 = sst [smem:[#allocation17_spill]] %s4416_s2 }
   0x2   :  { %9 = vsyncpa [#allocation3], 0 }
   0x3   :  { %11 = vsyncpa [#allocation3 + $0x1], 0 }
   0x4   :  { %12 = vsyncpa [#allocation5], 0 }
   0x5   :  { %14 = vsyncpa [#allocation5 + $0x1], 0  ;;  %s3887_s15 = smov 0   ;;  %s3889_s16 = smov 0  }
   0x6   :  { %s3891_s17 = smov 0   ;;  %s3893_s18 = smov 0  }
   0x7   :  { %s3895_s19 = smov 0   ;;  %s3897_s20 = smov 0  }
   0x8   :  { %s3899_s21 = smov 0   ;;  %s3901_s22 = smov 0  }
   0x9   :  { %s3903_s23 = smov 0   ;;  %s3905_s24 = smov 0  }
   0xa LB: > { %4425 = sst [smem:[#allocation10_spill]] %s3822_s16  ;;  %s3936_s25 = sadd.s32 4294967295, %s3854_s24   ;;  %s3854_s24 = sphi %s3905_s24, %s20_s24   ;;  %s3850_s23 = sphi %s3903_s23, %s4444_s23   ;;  %s3846_s22 = sphi %s3901_s22, %s4448_s22   ;;  %s3842_s21 = sphi %s3899_s21, %s4442_s21   ;;  %s3838_s20 = sphi %s3897_s20, %s4447_s20   ;;  %s3834_s19 = sphi %s3895_s19, %s4441_s19   ;;  %s3830_s18 = sphi %s3893_s18, %s4446_s18   ;;  %s3826_s17 = sphi %s3891_s17, %s4445_s17   ;;  %s3822_s16 = sphi %s3889_s16, %s4439_s16   ;;  %s3818_s15 = sphi %s3887_s15, %s4438_s15  }
   0xb   : > { %4426 = sst [smem:[#allocation11_spill]] %s3834_s19  ;;  %s29_s26 = sadd.s32 1, %s3846_s22 }
   0xc   : > { %4427 = sst [smem:[#allocation12_spill]] %s3850_s23  ;;  %p30_p0 = scmp.ge.s32.totalorder %s29_s26, 2 }
   0xd   : > { %s32_s27 = sadd.s32 1, %s3850_s23  ;;  %s65_s28 = sadd.s32 1, %s3834_s19 }
   0xe   : > { %p72_p1 = scmp.ne.s32.totalorder %s3834_s19, %s3830_s18  ;;  %s4450_s26 = smov (%p30_p0, %s29_s26), 0 }
   0xf   : > { %4428 = sst [smem:[#allocation13_spill]] %s4450_s26  ;;  %s4452_s27 = smov (!%p30_p0, %s32_s27), %s3850_s23 }
  0x10   : > { %s62_s29 = ssub.s32 %s3846_s22, %s4450_s26  ;;  %p73_p2 = scmp.eq.s32.totalorder %s3854_s24, 0 }
  0x11   : > { %p34_p3 = scmp.ge.s32.totalorder %s4452_s27, 2  ;;  %p63_p4 = scmp.eq.s32.totalorder %s62_s29, 0 }
  0x12   : > { %p3949_p5 = por %p73_p2, %p72_p1  ;;  %p78_p6 = scmp.ne.s32.totalorder %s3830_s18, %s3826_s17 }
  0x13   : > { %s4454_s27 = smov (%p34_p3, %s4452_s27), 0  ;;  %p79_p7 = scmp.eq.s32.totalorder %s3936_s25, 0 }
  0x14   : > { %4430 = sst [smem:[#allocation14_spill]] %s4454_s27  ;;  %s140_s6 = ssub.s32 %s3850_s23, %s4454_s27 }
  0x15   : > { %s3957_s5 = scalar_select %p63_p4, %s3834_s19, %s65_s28  }
  0x16   : > { %s142_s7 = sor.u32 %s140_s6, %s62_s29  ;;  %s145_s8 = sadd.s32 1, %s3822_s16 }
  0x17   : > { %4431 = sst [smem:[#allocation15_spill]] %s3957_s5  ;;  %p3963_p8 = por %p79_p7, %p78_p6 }
  0x18   : > { %p143_p9 = scmp.eq.s32.totalorder %s142_s7, 0  ;;  %p155_p10 = scmp.ne.s32.totalorder %s3822_s16, %s3818_s15 }
  0x19   : > { %p156_p11 = scmp.eq.s32.totalorder %s3936_s25, 3  ;;  %p3141_p13 = scmp.lt.s32.totalorder %s3854_s24, 4 }
  0x1a   : > { %s3971_s10 = scalar_select %p143_p9, %s3822_s16, %s145_s8  }
  0x1b   : > { %p3973_p12 = por %p156_p11, %p155_p10  ;;  %s3979_s12 = sand.u32 1, %s3834_s19  }
  0x1c   : > { %4433 = sst [smem:[#allocation16_spill]] %s3971_s10  ;;  %s3122_s13 = smul.u32 2304, %s3979_s12 }
  0x1d   : > { %p3984_p0 = pnand %p3141_p13, %p3949_p5  ;;  %s213_s17 = sand.u32 1, %s3854_s24  }
  0x1e   : > { %s196_s28 = scalar_lea.vmem [#allocation2], %s3122_s13  ;;  %s2789_s6 = sshll.u32 %s3979_s12, 1 }
  0x1f   : > { %s203_s29 = sshll.u32 %s196_s28, 4  ;;  %s3117_s7 = sshll.u32 %s3846_s22, 5  ;;  %s3989_s29 = int_to_ptr.vmem [resolvable:$true] %s203_s29 }
  0x20   : > { %s4436_s2 = sld [smem:[#allocation17_spill]]  ;;  %s217_s23 = scalar_lea.vmem [#allocation4], %s2789_s6 }
  0x21   : > { %s225_s5 = sshll.u32 %s217_s23, 4  ;;  %s3996_s30 = scalar_lea.sflag [#allocation5], %s213_s17  ;;  %s226_s5 = int_to_ptr.vmem [resolvable:$true] %s225_s5 }
  0x22   : > { %p3686_p1 = pneg %p3984_p0  ;;  %s3697_s19 = scalar_lea.vmem %s226_s5, 32 }
  0x23   : > { %p3698_p2 = scmp.ne.s32.totalorder %s226_s5, %s3697_s19  ;;  %s3856_s13 = smov [#allocation4]  }
  0x24   : > { %s3702_s28 = sshll.u32 %s3856_s13, 4  ;;  %s3703_s28 = int_to_ptr.vmem [resolvable:$false] %s3702_s28 }
  0x25   : > { %p3700_p3 = pnand %p3698_p2, %p3686_p1  ;;  %s3704_s10 = scalar_lea.vmem %s3703_s28, 64 }
  0x26   : > { %s223_s26 = scalar_lea.hbm %s4436_s2, %s3117_s7  ;;  %p3705_p5 = scmp.lt.s32.totalorder %s226_s5, %s3703_s28 }
  0x27   : > { %p3701_p4 = pneg %p3700_p3  ;;  %p3706_p6 = scmp.lt.s32.totalorder %s3704_s10, %s3697_s19 }
  0x29   : > { %p3707_p7 = por %p3706_p6, %p3705_p5 }
  0x2b   : > { %p3708_p9 = pnand %p3707_p7, %p3701_p4 }
  0x2d   : > { %3711 = shalt.err (!%p3708_p9)
}
  0x2e   : > { %3137 = dma.hbm_to_vmem [thread:$0]  (!%p3984_p0), %s223_s26, 32, %s226_s5, %s3996_s30  }
  0x2f   : > { %s4009_s17 = scalar_lea.hbm %s4417_s3, %s3117_s7  ;;  %p2795_p10 = scmp.ge.s32.totalorder %s3854_s24, 1 }
  0x30   : > { %p249_p11 = scmp.lt.s32.totalorder %s3854_s24, 5  ;;  %s3116_s10 = sshll.u32 %s3846_s22, 7 }
  0x31   : > { %s202_s28 = scalar_lea.hbm %s4415_s1, %s3116_s10  ;;  %s236_s2 = scalar_lea.vmem [#allocation6], %s2789_s6 }
  0x32   : > { %p4013_p13 = pnand %p2795_p10, %p249_p11  ;;  %s244_s16 = sshll.u32 %s236_s2, 4  ;;  %s245_s16 = int_to_ptr.vmem [resolvable:$true] %s244_s16 }
  0x33   : > { %s193_s26 = scalar_lea.sflag [#allocation3], %s3979_s12  ;;  %s3725_s5 = scalar_lea.vmem %s3989_s29, 36864 }
  0x34   : > { %p3726_p2 = scmp.ne.s32.totalorder %s3989_s29, %s3725_s5  ;;  %s3857_s7 = smov [#allocation2]  }
  0x35   : > { %s3730_s23 = sshll.u32 %s3857_s7, 4  ;;  %s3731_s23 = int_to_ptr.vmem [resolvable:$false] %s3730_s23 }
  0x36   : > { %p3728_p3 = pnand %p3726_p2, %p3686_p1  ;;  %s3732_s27 = scalar_lea.vmem %s3731_s23, 73728 }
  0x37   : > { %p3733_p5 = scmp.lt.s32.totalorder %s3989_s29, %s3731_s23  ;;  %p3734_p6 = scmp.lt.s32.totalorder %s3732_s27, %s3725_s5 }
  0x38   : > { %p3729_p4 = pneg %p3728_p3 }
  0x39   : > { %p3735_p7 = por %p3734_p6, %p3733_p5 }
  0x3b   : > { %p3736_p9 = pnand %p3735_p7, %p3729_p4 }
  0x3d   : > { %3739 = shalt.err (!%p3736_p9)
}
  0x3e   : > { %s3858_s8 = smov 256   ;;  %s3859_s2 = smov 128  }
  0x3f   : > { %s3860_s12 = smov 8   ;;  %s3753_s6 = scalar_lea.vmem %s245_s16, 32 }
  0x40   : > { %3134 = dma.hbm_to_vmem [thread:$0]  (!%p3984_p0), %s202_s28, 36864, %s3989_s29, %s193_s26, %s3858_s8, %s3859_s2, %s3860_s12  }
  0x41   : > { %p3754_p10 = scmp.ne.s32.totalorder %s245_s16, %s3753_s6  ;;  %s3861_s10 = smov [#allocation6]  }
  0x42   : > { %s3758_s13 = sshll.u32 %s3861_s10, 4  ;;  %s3759_s13 = int_to_ptr.vmem [resolvable:$false] %s3758_s13 }
  0x43   : > { %p3756_p11 = pnand %p3754_p10, %p3686_p1  ;;  %s3760_s5 = scalar_lea.vmem %s3759_s13, 64 }
  0x44   : > { %p3761_p3 = scmp.lt.s32.totalorder %s245_s16, %s3759_s13  ;;  %p3762_p4 = scmp.lt.s32.totalorder %s3760_s5, %s3753_s6 }
  0x45   : > { %p3757_p2 = pneg %p3756_p11 }
  0x46   : > { %p3763_p5 = por %p3762_p4, %p3761_p3 }
  0x48   : > { %p3764_p6 = pnand %p3763_p5, %p3757_p2 }
  0x4a   : > { %3767 = shalt.err (!%p3764_p6)
}
  0x4b   : > { %3140 = dma.hbm_to_vmem [thread:$0]  (!%p3984_p0), %s4009_s17, 32, %s245_s16, %s3996_s30  }
  0x4c   : > { %253 = sbr.rel (%p4013_p13) target bundleno = 624 (0x270), region = 36  ;;  %s4041_s29 = sand.u32 (!%p4013_p13), 1, %s3830_s18  }
  0x4d   : > { %s3123_s28 = smul.u32 (!%p4013_p13), 2304, %s4041_s29  ;;  %s256_s26 = scalar_lea.sflag (!%p4013_p13), [#allocation3], %s4041_s29 }
  0x4f   : > { %s4045_s7 = scalar_lea.vmem (!%p4013_p13), [#allocation2], %s3123_s28 }
  0x51   : > { %3809 = dma.done.wait (%p3963_p8), %s256_s26, 36864  }
  0x52   : > { %3811 = vsyncadd (%p3963_p8), %s256_s26, 4294930432  ;;  %s264_s16 = sand.u32 1, %s3936_s25   ;;  %s2796_s14 = sshll.u32 %s4041_s29, 1 }
  0x53   : > { %s265_s30 = scalar_lea.sflag [#allocation5], %s264_s16  ;;  %s4055_s17 = scalar_lea.vmem [#allocation4], %s2796_s14 }
  0x54   : > { %3813 = dma.done.wait (%p3963_p8), %s265_s30, 64  }
  0x55   : > { %3815 = vsyncadd (%p3963_p8), %s265_s30, 4294967232  ;;  %v3225_v0 = vld [vmem:[%s4045_s7 + $0x74] ss:$8 sps:$4 sm:$0xff]   ;;  %v3229_v2 = vld [vmem:[%s4045_s7 + $0x70] ss:$8 sps:$4 sm:$0xff]   ;;  %s2799_s25 = sshll.u32 %s3842_s21, 1 }
  0x56   : > { %v3227_v1 = vld [vmem:[%s4045_s7 + $0x174] ss:$8 sps:$4 sm:$0xff]   ;;  %2165 = vmatprep.subr.bf16.mxu0 %v3225_v0  ;;  %v3230_v3 = vld [vmem:[%s4045_s7 + $0x170] ss:$8 sps:$4 sm:$0xff]   ;;  %v3231_v4 = vld [vmem:[%s4045_s7 + $0x64] ss:$8 sps:$4 sm:$0xff]  }
  0x57   : > { %2208 = vmatprep.subr.bf16.mxu1 %v3227_v1  ;;  %2166 = vmatpush1.bf16.msra.mxu0 %v3229_v2  ;;  %v3233_v5 = vld [vmem:[%s4045_s7 + $0x164] ss:$8 sps:$4 sm:$0xff]   ;;  %v3235_v6 = vld [vmem:[%s4045_s7 + $0x60] ss:$8 sps:$4 sm:$0xff]   ;;  %v3237_v8 = vld [vmem:[%s4045_s7 + $0x54] ss:$8 sps:$4 sm:$0xff]  }
  0x58   : > { %2209 = vmatpush1.bf16.msra.mxu1 %v3230_v3  ;;  %2167 = vmatprep.subr.bf16.mxu0 %v3231_v4  ;;  %v3236_v7 = vld [vmem:[%s4045_s7 + $0x160] ss:$8 sps:$4 sm:$0xff]   ;;  %v3239_v9 = vld [vmem:[%s4045_s7 + $0x154] ss:$8 sps:$4 sm:$0xff]   ;;  %v3241_v10 = vld [vmem:[%s4045_s7 + $0x50] ss:$8 sps:$4 sm:$0xff]  }
  0x59   : > { %2210 = vmatprep.subr.bf16.mxu1 %v3233_v5  ;;  %v3242_v11 = vld [vmem:[%s4045_s7 + $0x150] ss:$8 sps:$4 sm:$0xff]   ;;  %v3243_v12 = vld [vmem:[%s4045_s7 + $0x44] ss:$8 sps:$4 sm:$0xff]   ;;  %v3247_v14 = vld [vmem:[%s4045_s7 + $0x40] ss:$8 sps:$4 sm:$0xff]  }
  0x5a   : > { %v3245_v13 = vld [vmem:[%s4045_s7 + $0x144] ss:$8 sps:$4 sm:$0xff]   ;;  %v3248_v15 = vld [vmem:[%s4045_s7 + $0x140] ss:$8 sps:$4 sm:$0xff]   ;;  %v3249_v16 = vld [vmem:[%s4045_s7 + $0x34] ss:$8 sps:$4 sm:$0xff]  }
  0x5b   : > { %2168 = vmatpush1.bf16.msra.mxu0 %v3235_v6  ;;  %v3251_v17 = vld [vmem:[%s4045_s7 + $0x134] ss:$8 sps:$4 sm:$0xff]   ;;  %v3253_v18 = vld [vmem:[%s4045_s7 + $0x30] ss:$8 sps:$4 sm:$0xff]   ;;  %v3255_v20 = vld [vmem:[%s4045_s7 + $0x24] ss:$8 sps:$4 sm:$0xff]  }
  0x5c   : > { %2211 = vmatpush1.bf16.msra.mxu1 %v3236_v7  ;;  %2169 = vmatprep.subr.bf16.mxu0 %v3237_v8  ;;  %v3254_v19 = vld [vmem:[%s4045_s7 + $0x130] ss:$8 sps:$4 sm:$0xff]   ;;  %v3257_v21 = vld [vmem:[%s4045_s7 + $0x124] ss:$8 sps:$4 sm:$0xff]   ;;  %v3259_v22 = vld [vmem:[%s4045_s7 + $0x20] ss:$8 sps:$4 sm:$0xff]  }
  0x5d   : > { %2212 = vmatprep.subr.bf16.mxu1 %v3239_v9  ;;  %v3260_v23 = vld [vmem:[%s4045_s7 + $0x120] ss:$8 sps:$4 sm:$0xff]   ;;  %v3261_v24 = vld [vmem:[%s4045_s7 + $0x14] ss:$8 sps:$4 sm:$0xff]   ;;  %v3265_v26 = vld [vmem:[%s4045_s7 + $0x10] ss:$8 sps:$4 sm:$0xff]  }
  0x5e   : > { %v3263_v25 = vld [vmem:[%s4045_s7 + $0x114] ss:$8 sps:$4 sm:$0xff]   ;;  %v3266_v27 = vld [vmem:[%s4045_s7 + $0x110] ss:$8 sps:$4 sm:$0xff]   ;;  %v3267_v28 = vld [vmem:[%s4045_s7 + $0x4] ss:$8 sps:$4 sm:$0xff]  }
  0x5f   : > { %2170 = vmatpush1.bf16.msra.mxu0 %v3241_v10  ;;  %v3269_v29 = vld [vmem:[%s4045_s7 + $0x104] ss:$8 sps:$4 sm:$0xff]   ;;  %v3271_v30 = vld [vmem:[%s4045_s7] ss:$8 sps:$4 sm:$0xff]   ;;  %v3273_v32 = vld [vmem:[%s4045_s7 + $0xf4] ss:$8 sps:$4 sm:$0xff]  }
  0x60   : > { %2213 = vmatpush1.bf16.msra.mxu1 %v3242_v11  ;;  %2171 = vmatprep.subr.bf16.mxu0 %v3243_v12  ;;  %v3272_v31 = vld [vmem:[%s4045_s7 + $0x100] ss:$8 sps:$4 sm:$0xff]   ;;  %p318_p8 = scmp.lt.s32.totalorder %s2799_s25, 3  ;;  %v3275_v33 = vld [vmem:[%s4045_s7 + $0x1f4] ss:$8 sps:$4 sm:$0xff]   ;;  %s277_s8 = scalar_lea.vmem [#allocation6], %s2796_s14 }
  0x61   : > { %2214 = vmatprep.subr.bf16.mxu1 %v3245_v13  ;;  %v3277_v34 = vld [vmem:[%s4045_s7 + $0xf0] ss:$8 sps:$4 sm:$0xff]   ;;  %v3279_v36 = vld [vmem:[%s4045_s7 + $0xe4] ss:$8 sps:$4 sm:$0xff]   ;;  %v3283_v38 = vld [vmem:[%s4045_s7 + $0xe0] ss:$8 sps:$4 sm:$0xff]  }
  0x62   : > { %v3278_v35 = vld [vmem:[%s4045_s7 + $0x1f0] ss:$8 sps:$4 sm:$0xff]   ;;  %s4456_s25 = smov (!%p318_p8, %s2799_s25), 3  ;;  %v3281_v37 = vld [vmem:[%s4045_s7 + $0x1e4] ss:$8 sps:$4 sm:$0xff]   ;;  %s314_s2 = sand.u32 1, %s3818_s15  }
  0x63   : > { %2172 = vmatpush1.bf16.msra.mxu0 %v3247_v14  ;;  %v3284_v39 = vld [vmem:[%s4045_s7 + $0x1e0] ss:$8 sps:$4 sm:$0xff]   ;;  %v3285_v40 = vld [vmem:[%s4045_s7 + $0xd4] ss:$8 sps:$4 sm:$0xff]   ;;  %s3124_s9 = smul.u32 72, %s4456_s25  ;;  %s2798_s12 = sshll.u32 %s314_s2, 4 }
  0x64   : > { %2215 = vmatpush1.bf16.msra.mxu1 %v3248_v15  ;;  %2173 = vmatprep.subr.bf16.mxu0 %v3249_v16  ;;  %v3287_v41 = vld [vmem:[%s4045_s7 + $0x1d4] ss:$8 sps:$4 sm:$0xff]   ;;  %v3289_v42 = vld [vmem:[%s4045_s7 + $0xd0] ss:$8 sps:$4 sm:$0xff]   ;;  %v3291_v44 = vld [vmem:[%s4045_s7 + $0xc4] ss:$8 sps:$4 sm:$0xff]  }
  0x65   : > { %2216 = vmatprep.subr.bf16.mxu1 %v3251_v17  ;;  %v3290_v43 = vld [vmem:[%s4045_s7 + $0x1d0] ss:$8 sps:$4 sm:$0xff]   ;;  %s4110_s27 = scalar_lea.vmem %s4414_s0, %s3124_s9  ;;  %v3293_v45 = vld [vmem:[%s4045_s7 + $0x1c4] ss:$8 sps:$4 sm:$0xff]   ;;  %v3295_v46 = vld [vmem:[%s4045_s7 + $0xc0] ss:$8 sps:$4 sm:$0xff]  }
  0x66   : > { %v3296_v47 = vld [vmem:[%s4045_s7 + $0x1c0] ss:$8 sps:$4 sm:$0xff]   ;;  %v3297_v48 = vld [vmem:[%s4045_s7 + $0xb4] ss:$8 sps:$4 sm:$0xff]   ;;  %v3323_v49 = vld [vmem:[%s4110_s27 + $0x4] ss:$72 sps:$4 sm:$0xff]  }
  0x67   : > { %2174 = vmatpush1.bf16.msra.mxu0 %v3253_v18  ;;  %v3299_v50 = vld [vmem:[%s4045_s7 + $0x1b4] ss:$8 sps:$4 sm:$0xff]   ;;  %2197 = vmatprep.mubr.bf16.mxu0 %v3323_v49  ;;  %v3301_v52 = vld [vmem:[%s4045_s7 + $0xb0] ss:$8 sps:$4 sm:$0xff]   ;;  %v3303_v54 = vld [vmem:[%s4045_s7 + $0xa4] ss:$8 sps:$4 sm:$0xff]  }
  0x68   : > { %2217 = vmatpush1.bf16.msra.mxu1 %v3254_v19  ;;  %2175 = vmatprep.subr.bf16.mxu0 %v3255_v20  ;;  %v3326_v51 = vld [vmem:[%s4110_s27 + $0xc] ss:$72 sps:$4 sm:$0xff]   ;;  %v3302_v53 = vld [vmem:[%s4045_s7 + $0x1b0] ss:$8 sps:$4 sm:$0xff]   ;;  %v3307_v56 = vld [vmem:[%s4045_s7 + $0xa0] ss:$8 sps:$4 sm:$0xff]  }
  0x69   : > { %2218 = vmatprep.subr.bf16.mxu1 %v3257_v21  ;;  %2240 = vmatprep.mubr.bf16.mxu1 %v3326_v51  ;;  %v3305_v55 = vld [vmem:[%s4045_s7 + $0x1a4] ss:$8 sps:$4 sm:$0xff]   ;;  %v3308_v57 = vld [vmem:[%s4045_s7 + $0x1a0] ss:$8 sps:$4 sm:$0xff]   ;;  %v3309_v58 = vld [vmem:[%s4045_s7 + $0x94] ss:$8 sps:$4 sm:$0xff]  }
  0x6a   : > { %v3311_v59 = vld [vmem:[%s4045_s7 + $0x194] ss:$8 sps:$4 sm:$0xff]   ;;  %v3313_v60 = vld [vmem:[%s4045_s7 + $0x90] ss:$8 sps:$4 sm:$0xff]   ;;  %v3315_v62 = vld [vmem:[%s4045_s7 + $0x84] ss:$8 sps:$4 sm:$0xff]  }
  0x6b   : > { %2176 = vmatpush1.bf16.msra.mxu0 %v3259_v22  ;;  %v3314_v61 = vld [vmem:[%s4045_s7 + $0x190] ss:$8 sps:$4 sm:$0xff]   ;;  %v3317_v63 = vld [vmem:[%s4045_s7 + $0x184] ss:$8 sps:$4 sm:$0xff]   ;;  %v3319_v0 = vld [vmem:[%s4045_s7 + $0x80] ss:$8 sps:$4 sm:$0xff]  }
  0x6c   : > { %2219 = vmatpush1.bf16.msra.mxu1 %v3260_v23  ;;  %2177 = vmatprep.subr.bf16.mxu0 %v3261_v24  ;;  %v3320_v1 = vld [vmem:[%s4045_s7 + $0x180] ss:$8 sps:$4 sm:$0xff]   ;;  %v3329_v2 = vld [vmem:[%s4045_s7 + $0x274] ss:$8 sps:$4 sm:$0xff]   ;;  %v3327_v6 = vld [vmem:[%s4045_s7 + $0x270] ss:$8 sps:$4 sm:$0xff]  }
  0x6d   : > { %2220 = vmatprep.subr.bf16.mxu1 %v3263_v25  ;;  %v3332_v3 = vld [vmem:[%s4045_s7 + $0x374] ss:$8 sps:$4 sm:$0xff]   ;;  %v3321_v4 = vld [vmem:[%s4110_s27] ss:$72 sps:$4 sm:$0xff]   ;;  %v3330_v7 = vld [vmem:[%s4045_s7 + $0x370] ss:$8 sps:$4 sm:$0xff]  }
  0x6e   : > { %v3324_v5 = vld [vmem:[%s4110_s27 + $0x8] ss:$72 sps:$4 sm:$0xff]   ;;  %v3335_v8 = vld [vmem:[%s4045_s7 + $0x264] ss:$8 sps:$4 sm:$0xff]   ;;  %v3341_v12 = vld [vmem:[%s4045_s7 + $0x254] ss:$8 sps:$4 sm:$0xff]  }
  0x6f   : > { %2178 = vmatpush1.bf16.msra.mxu0 %v3265_v26  ;;  %v3338_v9 = vld [vmem:[%s4045_s7 + $0x364] ss:$8 sps:$4 sm:$0xff]   ;;  %v3333_v10 = vld [vmem:[%s4045_s7 + $0x260] ss:$8 sps:$4 sm:$0xff]   ;;  %v3344_v13 = vld [vmem:[%s4045_s7 + $0x354] ss:$8 sps:$4 sm:$0xff]  }
  0x70   : > { %2221 = vmatpush1.bf16.msra.mxu1 %v3266_v27  ;;  %2179 = vmatprep.subr.bf16.mxu0 %v3267_v28  ;;  %v3336_v11 = vld [vmem:[%s4045_s7 + $0x360] ss:$8 sps:$4 sm:$0xff]   ;;  %v3339_v14 = vld [vmem:[%s4045_s7 + $0x250] ss:$8 sps:$4 sm:$0xff]   ;;  %v3347_v16 = vld [vmem:[%s4045_s7 + $0x244] ss:$8 sps:$4 sm:$0xff]  }
  0x71   : > { %2222 = vmatprep.subr.bf16.mxu1 %v3269_v29  ;;  %v3342_v15 = vld [vmem:[%s4045_s7 + $0x350] ss:$8 sps:$4 sm:$0xff]   ;;  %v3350_v17 = vld [vmem:[%s4045_s7 + $0x344] ss:$8 sps:$4 sm:$0xff]   ;;  %v3345_v18 = vld [vmem:[%s4045_s7 + $0x240] ss:$8 sps:$4 sm:$0xff]  }
  0x72   : > { %v3348_v19 = vld [vmem:[%s4045_s7 + $0x340] ss:$8 sps:$4 sm:$0xff]   ;;  %v3353_v20 = vld [vmem:[%s4045_s7 + $0x234] ss:$8 sps:$4 sm:$0xff]   ;;  %v3351_v22 = vld [vmem:[%s4045_s7 + $0x230] ss:$8 sps:$4 sm:$0xff]  }
  0x73   : > { %2180 = vmatpush1.bf16.msra.mxu0 %v3271_v30  ;;  %v3356_v21 = vld [vmem:[%s4045_s7 + $0x334] ss:$8 sps:$4 sm:$0xff]   ;;  %v3354_v23 = vld [vmem:[%s4045_s7 + $0x330] ss:$8 sps:$4 sm:$0xff]   ;;  %v3359_v24 = vld [vmem:[%s4045_s7 + $0x224] ss:$8 sps:$4 sm:$0xff]  }
  0x74   : > { %2223 = vmatpush1.bf16.msra.mxu1 %v3272_v31  ;;  %2181 = vmatprep.subr.bf16.mxu0 %v3273_v32  ;;  %v3362_v25 = vld [vmem:[%s4045_s7 + $0x324] ss:$8 sps:$4 sm:$0xff]   ;;  %v3357_v26 = vld [vmem:[%s4045_s7 + $0x220] ss:$8 sps:$4 sm:$0xff]   ;;  %v3365_v28 = vld [vmem:[%s4045_s7 + $0x214] ss:$8 sps:$4 sm:$0xff]  }
  0x75   : > { %2224 = vmatprep.subr.bf16.mxu1 %v3275_v33  ;;  %v3360_v27 = vld [vmem:[%s4045_s7 + $0x320] ss:$8 sps:$4 sm:$0xff]   ;;  %v3368_v29 = vld [vmem:[%s4045_s7 + $0x314] ss:$8 sps:$4 sm:$0xff]   ;;  %v3363_v30 = vld [vmem:[%s4045_s7 + $0x210] ss:$8 sps:$4 sm:$0xff]  }
  0x76   : > { %v3366_v31 = vld [vmem:[%s4045_s7 + $0x310] ss:$8 sps:$4 sm:$0xff]   ;;  %v3371_v32 = vld [vmem:[%s4045_s7 + $0x204] ss:$8 sps:$4 sm:$0xff]   ;;  %s316_s6 = scalar_lea.vmem [#allocation7], %s2798_s12  ;;  %s3111_s15 = sshll.u32 (%p3973_p12), %s3838_s20, 1 }
  0x77   : > { %2182 = vmatpush2.bf16.msra.mxu0 %v3277_v34  ;;  %v3374_v33 = vld [vmem:[%s4045_s7 + $0x304] ss:$8 sps:$4 sm:$0xff]   ;;  %v3425_v34 = vld [vmem:[%s4110_s27 + $0x14] ss:$72 sps:$4 sm:$0xff]   ;;  %v3390_v49 = vld [vmem:[%s4045_s7 + $0x3d0] ss:$8 sps:$4 sm:$0xff]  }
  0x78   : > { %2225 = vmatpush2.bf16.msra.mxu1 %v3278_v35  ;;  %2183 = vmatprep.subr.bf16.mxu0 %v3279_v36  ;;  %v3369_v35 = vld [vmem:[%s4045_s7 + $0x200] ss:$8 sps:$4 sm:$0xff]   ;;  %v3398_v51 = vld [vmem:[%s4045_s7 + $0x3c4] ss:$8 sps:$4 sm:$0xff]   ;;  %s3121_s10 = sshll.u32 (%p3973_p12), %s3842_s21, 3 }
  0x79   : > { %2226 = vmatprep.subr.bf16.mxu1 %v3281_v37  ;;  %v3372_v36 = vld [vmem:[%s4045_s7 + $0x300] ss:$8 sps:$4 sm:$0xff]   ;;  %v3431_v37 = vld [vmem:[%s4110_s27 + $0x1c] ss:$72 sps:$4 sm:$0xff]   ;;  %s2612_s13 = sadd.s32 (%p3973_p12), %s3121_s10, %s3111_s15 }
  0x7a   : > { %s3113_s5 = sshll.u32 (%p3973_p12), %s2612_s13, 2 }
  0x7b   : > { %2184 = vmatpush2.bf16.msra.mxu0 %v3283_v38  ;;  %v3377_v38 = vld [vmem:[%s4045_s7 + $0x2f4] ss:$8 sps:$4 sm:$0xff]   ;;  %s2614_s26 = scalar_lea.vmem (%p3973_p12), %s4418_s4, %s3113_s5 }
  0x7c   : > { %2227 = vmatpush2.bf16.msra.mxu1 %v3284_v39  ;;  %2185 = vmatprep.subr.bf16.mxu0 %v3285_v40  ;;  %v3380_v39 = vld [vmem:[%s4045_s7 + $0x3f4] ss:$8 sps:$4 sm:$0xff]   ;;  %v3375_v40 = vld [vmem:[%s4045_s7 + $0x2f0] ss:$8 sps:$4 sm:$0xff]  }
  0x7d   : > { %2228 = vmatprep.subr.bf16.mxu1 %v3287_v41  ;;  %v3378_v41 = vld [vmem:[%s4045_s7 + $0x3f0] ss:$8 sps:$4 sm:$0xff]  }
  0x7f   : > { %2186 = vmatpush2.bf16.msra.mxu0 %v3289_v42  ;;  %v3383_v42 = vld [vmem:[%s4045_s7 + $0x2e4] ss:$8 sps:$4 sm:$0xff]  }
  0x80   : > { %2229 = vmatpush2.bf16.msra.mxu1 %v3290_v43  ;;  %2187 = vmatprep.subr.bf16.mxu0 %v3291_v44  ;;  %v3386_v43 = vld [vmem:[%s4045_s7 + $0x3e4] ss:$8 sps:$4 sm:$0xff]   ;;  %v3381_v44 = vld [vmem:[%s4045_s7 + $0x2e0] ss:$8 sps:$4 sm:$0xff]  }
  0x81   : > { %2230 = vmatprep.subr.bf16.mxu1 %v3293_v45  ;;  %v3384_v45 = vld [vmem:[%s4045_s7 + $0x3e0] ss:$8 sps:$4 sm:$0xff]  }
  0x83   : > { %2188 = vmatpush2.bf16.msra.mxu0 %v3295_v46  ;;  %v3389_v46 = vld [vmem:[%s4045_s7 + $0x2d4] ss:$8 sps:$4 sm:$0xff]  }
  0x84   : > { %2231 = vmatpush2.bf16.msra.mxu1 %v3296_v47  ;;  %2189 = vmatprep.subr.bf16.mxu0 %v3297_v48  ;;  %v3392_v47 = vld [vmem:[%s4045_s7 + $0x3d4] ss:$8 sps:$4 sm:$0xff]   ;;  %v3387_v48 = vld [vmem:[%s4045_s7 + $0x2d0] ss:$8 sps:$4 sm:$0xff]  }
  0x85   : > { %2232 = vmatprep.subr.bf16.mxu1 %v3299_v50  ;;  %v3395_v50 = vld [vmem:[%s4045_s7 + $0x2c4] ss:$8 sps:$4 sm:$0xff]  }
  0x87   : > { %2190 = vmatpush2.bf16.msra.mxu0 %v3301_v52  ;;  %v3393_v52 = vld [vmem:[%s4045_s7 + $0x2c0] ss:$8 sps:$4 sm:$0xff]  }
  0x88   : > { %2233 = vmatpush2.bf16.msra.mxu1 %v3302_v53  ;;  %2191 = vmatprep.subr.bf16.mxu0 %v3303_v54  ;;  %v3396_v53 = vld [vmem:[%s4045_s7 + $0x3c0] ss:$8 sps:$4 sm:$0xff]   ;;  %v3401_v54 = vld [vmem:[%s4045_s7 + $0x2b4] ss:$8 sps:$4 sm:$0xff]  }
  0x89   : > { %2234 = vmatprep.subr.bf16.mxu1 %v3305_v55  ;;  %v3404_v55 = vld [vmem:[%s4045_s7 + $0x3b4] ss:$8 sps:$4 sm:$0xff]  }
  0x8b   : > { %2192 = vmatpush2.bf16.msra.mxu0 %v3307_v56  ;;  %v3399_v56 = vld [vmem:[%s4045_s7 + $0x2b0] ss:$8 sps:$4 sm:$0xff]  }
  0x8c   : > { %2235 = vmatpush2.bf16.msra.mxu1 %v3308_v57  ;;  %2193 = vmatprep.subr.bf16.mxu0 %v3309_v58  ;;  %v3402_v57 = vld [vmem:[%s4045_s7 + $0x3b0] ss:$8 sps:$4 sm:$0xff]   ;;  %v3407_v58 = vld [vmem:[%s4045_s7 + $0x2a4] ss:$8 sps:$4 sm:$0xff]  }
  0x8d   : > { %2236 = vmatprep.subr.bf16.mxu1 %v3311_v59  ;;  %v3410_v59 = vld [vmem:[%s4045_s7 + $0x3a4] ss:$8 sps:$4 sm:$0xff]  }
  0x8f   : > { %2194 = vmatpush2.bf16.msra.mxu0 %v3313_v60  ;;  %v3405_v60 = vld [vmem:[%s4045_s7 + $0x2a0] ss:$8 sps:$4 sm:$0xff]  }
  0x90   : > { %2237 = vmatpush2.bf16.msra.mxu1 %v3314_v61  ;;  %2195 = vmatprep.subr.bf16.mxu0 %v3315_v62  ;;  %v3408_v61 = vld [vmem:[%s4045_s7 + $0x3a0] ss:$8 sps:$4 sm:$0xff]   ;;  %v3413_v62 = vld [vmem:[%s4045_s7 + $0x294] ss:$8 sps:$4 sm:$0xff]  }
  0x91   : > { %2238 = vmatprep.subr.bf16.mxu1 %v3317_v63  ;;  %v3416_v63 = vld [vmem:[%s4045_s7 + $0x394] ss:$8 sps:$4 sm:$0xff]  }
  0x93   : > { %2196 = vmatpush2.bf16.msra.mxu0 %v3319_v0  ;;  %v3411_v0 = vld [vmem:[%s4045_s7 + $0x290] ss:$8 sps:$4 sm:$0xff]  }
  0x94   : > { %2239 = vmatpush2.bf16.msra.mxu1 %v3320_v1  ;;  %2251 = vmatprep.subr.bf16.mxu0 %v3329_v2  ;;  %v3414_v1 = vld [vmem:[%s4045_s7 + $0x390] ss:$8 sps:$4 sm:$0xff]   ;;  %v3419_v2 = vld [vmem:[%s4045_s7 + $0x284] ss:$8 sps:$4 sm:$0xff]  }
  0x95   : > { %2294 = vmatprep.subr.bf16.mxu1 %v3332_v3  ;;  %v3422_v3 = vld [vmem:[%s4045_s7 + $0x384] ss:$8 sps:$4 sm:$0xff]  }
  0x96   : > { %2198 = vmatmul.mubr.bf16.vlgmr.msra.gmra.mxu0 %v3321_v4  ;;  %v3417_v4 = vld [vmem:[%s4045_s7 + $0x280] ss:$8 sps:$4 sm:$0xff]  }
  0x97   : > { %2241 = vmatmul.mubr.bf16.vlgmr.msra.gmra.mxu1 %v3324_v5  ;;  %2252 = vmatpush1.bf16.msra.mxu0 %v3327_v6  ;;  %v3420_v5 = vld [vmem:[%s4045_s7 + $0x380] ss:$8 sps:$4 sm:$0xff]   ;;  %v3428_v6 = vld [vmem:[%s4045_s7 + $0x474] ss:$8 sps:$4 sm:$0xff]  }
  0x98   : > { %2295 = vmatpush1.bf16.msra.mxu1 %v3330_v7  ;;  %2253 = vmatprep.subr.bf16.mxu0 %v3335_v8  ;;  %v3434_v7 = vld [vmem:[%s4045_s7 + $0x574] ss:$8 sps:$4 sm:$0xff]   ;;  %v3423_v8 = vld [vmem:[%s4110_s27 + $0x10] ss:$72 sps:$4 sm:$0xff]  }
  0x99   : > { %2296 = vmatprep.subr.bf16.mxu1 %v3338_v9  ;;  %2283 = vmatprep.mubr.bf16.mxu0 %v3425_v34  ;;  %v3426_v9 = vld [vmem:[%s4045_s7 + $0x470] ss:$8 sps:$4 sm:$0xff]   ;;  %v3467_v34 = vld [vmem:[%s4045_s7 + $0x414] ss:$8 sps:$4 sm:$0xff]  }
  0x9a   : > { %2326 = vmatprep.mubr.bf16.mxu1 %v3431_v37  ;;  %v3468_v37 = vld [vmem:[%s4045_s7 + $0x510] ss:$8 sps:$4 sm:$0xff]  }
  0x9b   : > { %2254 = vmatpush1.bf16.msra.mxu0 %v3333_v10  ;;  %v3429_v10 = vld [vmem:[%s4110_s27 + $0x18] ss:$72 sps:$4 sm:$0xff]  }
  0x9c   : > { %2297 = vmatpush1.bf16.msra.mxu1 %v3336_v11  ;;  %2255 = vmatprep.subr.bf16.mxu0 %v3341_v12  ;;  %v3432_v11 = vld [vmem:[%s4045_s7 + $0x570] ss:$8 sps:$4 sm:$0xff]   ;;  %v3437_v12 = vld [vmem:[%s4045_s7 + $0x464] ss:$8 sps:$4 sm:$0xff]  }
  0x9d   : > { %2298 = vmatprep.subr.bf16.mxu1 %v3344_v13  ;;  %v3440_v13 = vld [vmem:[%s4045_s7 + $0x564] ss:$8 sps:$4 sm:$0xff]  }
  0x9f   : > { %2256 = vmatpush1.bf16.msra.mxu0 %v3339_v14  ;;  %v3435_v14 = vld [vmem:[%s4045_s7 + $0x460] ss:$8 sps:$4 sm:$0xff]  }
  0xa0   : > { %2299 = vmatpush1.bf16.msra.mxu1 %v3342_v15  ;;  %2257 = vmatprep.subr.bf16.mxu0 %v3347_v16  ;;  %v3438_v15 = vld [vmem:[%s4045_s7 + $0x560] ss:$8 sps:$4 sm:$0xff]   ;;  %v3443_v16 = vld [vmem:[%s4045_s7 + $0x454] ss:$8 sps:$4 sm:$0xff]  }
  0xa1   : > { %2300 = vmatprep.subr.bf16.mxu1 %v3350_v17  ;;  %v3446_v17 = vld [vmem:[%s4045_s7 + $0x554] ss:$8 sps:$4 sm:$0xff]  }
  0xa3   : > { %2258 = vmatpush1.bf16.msra.mxu0 %v3345_v18  ;;  %v3441_v18 = vld [vmem:[%s4045_s7 + $0x450] ss:$8 sps:$4 sm:$0xff]  }
  0xa4   : > { %2301 = vmatpush1.bf16.msra.mxu1 %v3348_v19  ;;  %2259 = vmatprep.subr.bf16.mxu0 %v3353_v20  ;;  %v3527_v19 = vld [vmem:[%s4110_s27 + $0x24] ss:$72 sps:$4 sm:$0xff]   ;;  %v3444_v20 = vld [vmem:[%s4045_s7 + $0x550] ss:$8 sps:$4 sm:$0xff]  }
  0xa5   : > { %2302 = vmatprep.subr.bf16.mxu1 %v3356_v21  ;;  %v3449_v21 = vld [vmem:[%s4045_s7 + $0x444] ss:$8 sps:$4 sm:$0xff]  }
  0xa7   : > { %2260 = vmatpush1.bf16.msra.mxu0 %v3351_v22  ;;  %v3452_v22 = vld [vmem:[%s4045_s7 + $0x544] ss:$8 sps:$4 sm:$0xff]  }
  0xa8   : > { %2303 = vmatpush1.bf16.msra.mxu1 %v3354_v23  ;;  %2261 = vmatprep.subr.bf16.mxu0 %v3359_v24  ;;  %v3533_v23 = vld [vmem:[%s4110_s27 + $0x2c] ss:$72 sps:$4 sm:$0xff]   ;;  %v3447_v24 = vld [vmem:[%s4045_s7 + $0x440] ss:$8 sps:$4 sm:$0xff]  }
  0xa9   : > { %2304 = vmatprep.subr.bf16.mxu1 %v3362_v25  ;;  %v3450_v25 = vld [vmem:[%s4045_s7 + $0x540] ss:$8 sps:$4 sm:$0xff]  }
  0xab   : > { %2262 = vmatpush1.bf16.msra.mxu0 %v3357_v26  ;;  %v3455_v26 = vld [vmem:[%s4045_s7 + $0x434] ss:$8 sps:$4 sm:$0xff]  }
  0xac   : > { %2305 = vmatpush1.bf16.msra.mxu1 %v3360_v27  ;;  %2263 = vmatprep.subr.bf16.mxu0 %v3365_v28  ;;  %v3458_v27 = vld [vmem:[%s4045_s7 + $0x534] ss:$8 sps:$4 sm:$0xff]   ;;  %v3453_v28 = vld [vmem:[%s4045_s7 + $0x430] ss:$8 sps:$4 sm:$0xff]  }
  0xad   : > { %2306 = vmatprep.subr.bf16.mxu1 %v3368_v29  ;;  %v3456_v29 = vld [vmem:[%s4045_s7 + $0x530] ss:$8 sps:$4 sm:$0xff]  }
  0xaf   : > { %2264 = vmatpush1.bf16.msra.mxu0 %v3363_v30  ;;  %v3461_v30 = vld [vmem:[%s4045_s7 + $0x424] ss:$8 sps:$4 sm:$0xff]  }
  0xb0   : > { %2307 = vmatpush1.bf16.msra.mxu1 %v3366_v31  ;;  %2265 = vmatprep.subr.bf16.mxu0 %v3371_v32  ;;  %v3464_v31 = vld [vmem:[%s4045_s7 + $0x524] ss:$8 sps:$4 sm:$0xff]   ;;  %v3459_v32 = vld [vmem:[%s4045_s7 + $0x420] ss:$8 sps:$4 sm:$0xff]  }
  0xb1   : > { %2308 = vmatprep.subr.bf16.mxu1 %v3374_v33  ;;  %v3462_v33 = vld [vmem:[%s4045_s7 + $0x520] ss:$8 sps:$4 sm:$0xff]  }
  0xb3   : > { %2266 = vmatpush1.bf16.msra.mxu0 %v3369_v35  ;;  %v3470_v35 = vld [vmem:[%s4045_s7 + $0x514] ss:$8 sps:$4 sm:$0xff]  }
  0xb4   : > { %2309 = vmatpush1.bf16.msra.mxu1 %v3372_v36  ;;  %2267 = vmatprep.subr.bf16.mxu0 %v3377_v38  ;;  %v3465_v36 = vld [vmem:[%s4045_s7 + $0x410] ss:$8 sps:$4 sm:$0xff]   ;;  %v3473_v38 = vld [vmem:[%s4045_s7 + $0x404] ss:$8 sps:$4 sm:$0xff]  }
  0xb5   : > { %2310 = vmatprep.subr.bf16.mxu1 %v3380_v39  ;;  %v3476_v39 = vld [vmem:[%s4045_s7 + $0x504] ss:$8 sps:$4 sm:$0xff]  }
  0xb7   : > { %2268 = vmatpush2.bf16.msra.mxu0 %v3375_v40  ;;  %v3471_v40 = vld [vmem:[%s4045_s7 + $0x400] ss:$8 sps:$4 sm:$0xff]  }
  0xb8   : > { %2311 = vmatpush2.bf16.msra.mxu1 %v3378_v41  ;;  %2269 = vmatprep.subr.bf16.mxu0 %v3383_v42  ;;  %v3474_v41 = vld [vmem:[%s4045_s7 + $0x500] ss:$8 sps:$4 sm:$0xff]   ;;  %v3479_v42 = vld [vmem:[%s4045_s7 + $0x4f4] ss:$8 sps:$4 sm:$0xff]  }
  0xb9   : > { %2312 = vmatprep.subr.bf16.mxu1 %v3386_v43  ;;  %v3482_v43 = vld [vmem:[%s4045_s7 + $0x5f4] ss:$8 sps:$4 sm:$0xff]  }
  0xbb   : > { %2270 = vmatpush2.bf16.msra.mxu0 %v3381_v44  ;;  %v3477_v44 = vld [vmem:[%s4045_s7 + $0x4f0] ss:$8 sps:$4 sm:$0xff]  }
  0xbc   : > { %2313 = vmatpush2.bf16.msra.mxu1 %v3384_v45  ;;  %2271 = vmatprep.subr.bf16.mxu0 %v3389_v46  ;;  %v3480_v45 = vld [vmem:[%s4045_s7 + $0x5f0] ss:$8 sps:$4 sm:$0xff]   ;;  %v3485_v46 = vld [vmem:[%s4045_s7 + $0x4e4] ss:$8 sps:$4 sm:$0xff]  }
  0xbd   : > { %2314 = vmatprep.subr.bf16.mxu1 %v3392_v47  ;;  %v3488_v47 = vld [vmem:[%s4045_s7 + $0x5e4] ss:$8 sps:$4 sm:$0xff]  }
  0xbf   : > { %2272 = vmatpush2.bf16.msra.mxu0 %v3387_v48  ;;  %v3483_v48 = vld [vmem:[%s4045_s7 + $0x4e0] ss:$8 sps:$4 sm:$0xff]  }
  0xc0   : > { %2315 = vmatpush2.bf16.msra.mxu1 %v3390_v49  ;;  %2273 = vmatprep.subr.bf16.mxu0 %v3395_v50  ;;  %v3486_v49 = vld [vmem:[%s4045_s7 + $0x5e0] ss:$8 sps:$4 sm:$0xff]   ;;  %v3491_v50 = vld [vmem:[%s4045_s7 + $0x4d4] ss:$8 sps:$4 sm:$0xff]  }
  0xc1   : > { %2316 = vmatprep.subr.bf16.mxu1 %v3398_v51  ;;  %v3494_v51 = vld [vmem:[%s4045_s7 + $0x5d4] ss:$8 sps:$4 sm:$0xff]  }
  0xc3   : > { %2274 = vmatpush2.bf16.msra.mxu0 %v3393_v52  ;;  %v3489_v52 = vld [vmem:[%s4045_s7 + $0x4d0] ss:$8 sps:$4 sm:$0xff]  }
  0xc4   : > { %2317 = vmatpush2.bf16.msra.mxu1 %v3396_v53  ;;  %2275 = vmatprep.subr.bf16.mxu0 %v3401_v54  ;;  %v3492_v53 = vld [vmem:[%s4045_s7 + $0x5d0] ss:$8 sps:$4 sm:$0xff]   ;;  %v3497_v54 = vld [vmem:[%s4045_s7 + $0x4c4] ss:$8 sps:$4 sm:$0xff]  }
  0xc5   : > { %2318 = vmatprep.subr.bf16.mxu1 %v3404_v55  ;;  %v3500_v55 = vld [vmem:[%s4045_s7 + $0x5c4] ss:$8 sps:$4 sm:$0xff]  }
  0xc7   : > { %2276 = vmatpush2.bf16.msra.mxu0 %v3399_v56  ;;  %v3495_v56 = vld [vmem:[%s4045_s7 + $0x4c0] ss:$8 sps:$4 sm:$0xff]  }
  0xc8   : > { %2319 = vmatpush2.bf16.msra.mxu1 %v3402_v57  ;;  %2277 = vmatprep.subr.bf16.mxu0 %v3407_v58  ;;  %v3498_v57 = vld [vmem:[%s4045_s7 + $0x5c0] ss:$8 sps:$4 sm:$0xff]   ;;  %v3503_v58 = vld [vmem:[%s4045_s7 + $0x4b4] ss:$8 sps:$4 sm:$0xff]  }
  0xc9   : > { %2320 = vmatprep.subr.bf16.mxu1 %v3410_v59  ;;  %v3506_v59 = vld [vmem:[%s4045_s7 + $0x5b4] ss:$8 sps:$4 sm:$0xff]  }
  0xcb   : > { %2278 = vmatpush2.bf16.msra.mxu0 %v3405_v60  ;;  %v3501_v60 = vld [vmem:[%s4045_s7 + $0x4b0] ss:$8 sps:$4 sm:$0xff]  }
  0xcc   : > { %2321 = vmatpush2.bf16.msra.mxu1 %v3408_v61  ;;  %2279 = vmatprep.subr.bf16.mxu0 %v3413_v62  ;;  %v3504_v61 = vld [vmem:[%s4045_s7 + $0x5b0] ss:$8 sps:$4 sm:$0xff]   ;;  %v3509_v62 = vld [vmem:[%s4045_s7 + $0x4a4] ss:$8 sps:$4 sm:$0xff]  }
  0xcd   : > { %2322 = vmatprep.subr.bf16.mxu1 %v3416_v63  ;;  %v3512_v63 = vld [vmem:[%s4045_s7 + $0x5a4] ss:$8 sps:$4 sm:$0xff]  }
  0xcf   : > { %2280 = vmatpush2.bf16.msra.mxu0 %v3411_v0  ;;  %v3507_v0 = vld [vmem:[%s4045_s7 + $0x4a0] ss:$8 sps:$4 sm:$0xff]  }
  0xd0   : > { %2323 = vmatpush2.bf16.msra.mxu1 %v3414_v1  ;;  %2281 = vmatprep.subr.bf16.mxu0 %v3419_v2  ;;  %v3510_v1 = vld [vmem:[%s4045_s7 + $0x5a0] ss:$8 sps:$4 sm:$0xff]   ;;  %v3515_v2 = vld [vmem:[%s4045_s7 + $0x494] ss:$8 sps:$4 sm:$0xff]  }
  0xd1   : > { %2324 = vmatprep.subr.bf16.mxu1 %v3422_v3  ;;  %v3518_v3 = vld [vmem:[%s4045_s7 + $0x594] ss:$8 sps:$4 sm:$0xff]  }
  0xd3   : > { %2282 = vmatpush2.bf16.msra.mxu0 %v3417_v4  ;;  %v3513_v4 = vld [vmem:[%s4045_s7 + $0x490] ss:$8 sps:$4 sm:$0xff]  }
  0xd4   : > { %2325 = vmatpush2.bf16.msra.mxu1 %v3420_v5  ;;  %2337 = vmatprep.subr.bf16.mxu0 %v3428_v6  ;;  %v3516_v5 = vld [vmem:[%s4045_s7 + $0x590] ss:$8 sps:$4 sm:$0xff]   ;;  %v3521_v6 = vld [vmem:[%s4045_s7 + $0x484] ss:$8 sps:$4 sm:$0xff]  }
  0xd5   : > { %2380 = vmatprep.subr.bf16.mxu1 %v3434_v7  ;;  %v3524_v7 = vld [vmem:[%s4045_s7 + $0x584] ss:$8 sps:$4 sm:$0xff]  }
  0xd6   : > { %2284 = vmatmul.mubr.bf16.vlgmr.msra.gmra.mxu0 %v3423_v8  ;;  %v3519_v8 = vld [vmem:[%s4045_s7 + $0x480] ss:$8 sps:$4 sm:$0xff]  }
  0xd7   : > { %2327 = vmatmul.mubr.bf16.vlgmr.msra.gmra.mxu1 %v3429_v10  ;;  %2338 = vmatpush1.bf16.msra.mxu0 %v3426_v9  ;;  %v3522_v9 = vld [vmem:[%s4045_s7 + $0x580] ss:$8 sps:$4 sm:$0xff]   ;;  %v3530_v10 = vld [vmem:[%s4045_s7 + $0x674] ss:$8 sps:$4 sm:$0xff]  }
  0xd8   : > { %2381 = vmatpush1.bf16.msra.mxu1 %v3432_v11  ;;  %2339 = vmatprep.subr.bf16.mxu0 %v3437_v12  ;;  %v3536_v11 = vld [vmem:[%s4045_s7 + $0x774] ss:$8 sps:$4 sm:$0xff]   ;;  %v3525_v12 = vld [vmem:[%s4110_s27 + $0x20] ss:$72 sps:$4 sm:$0xff]  }
  0xd9   : > { %2382 = vmatprep.subr.bf16.mxu1 %v3440_v13  ;;  %2369 = vmatprep.mubr.bf16.mxu0 %v3527_v19  ;;  %v3528_v13 = vld [vmem:[%s4045_s7 + $0x670] ss:$8 sps:$4 sm:$0xff]   ;;  %v3635_v19 = vld [vmem:[%s4110_s27 + $0x3c] ss:$72 sps:$4 sm:$0xff]  }
  0xda   : > { %2412 = vmatprep.mubr.bf16.mxu1 %v3533_v23  ;;  %v3548_v23 = vld [vmem:[%s4045_s7 + $0x754] ss:$8 sps:$4 sm:$0xff]  }
  0xdb   : > { %2340 = vmatpush1.bf16.msra.mxu0 %v3435_v14  ;;  %v3531_v14 = vld [vmem:[%s4110_s27 + $0x28] ss:$72 sps:$4 sm:$0xff]  }
  0xdc   : > { %2383 = vmatpush1.bf16.msra.mxu1 %v3438_v15  ;;  %2341 = vmatprep.subr.bf16.mxu0 %v3443_v16  ;;  %v3534_v15 = vld [vmem:[%s4045_s7 + $0x770] ss:$8 sps:$4 sm:$0xff]   ;;  %v3539_v16 = vld [vmem:[%s4045_s7 + $0x664] ss:$8 sps:$4 sm:$0xff]  }
  0xdd   : > { %2384 = vmatprep.subr.bf16.mxu1 %v3446_v17  ;;  %v3542_v17 = vld [vmem:[%s4045_s7 + $0x764] ss:$8 sps:$4 sm:$0xff]  }
  0xdf   : > { %2342 = vmatpush1.bf16.msra.mxu0 %v3441_v18  ;;  %v3629_v18 = vld [vmem:[%s4110_s27 + $0x34] ss:$72 sps:$4 sm:$0xff]  }
  0xe0   : > { %2385 = vmatpush1.bf16.msra.mxu1 %v3444_v20  ;;  %2343 = vmatprep.subr.bf16.mxu0 %v3449_v21  ;;  %v3537_v20 = vld [vmem:[%s4045_s7 + $0x660] ss:$8 sps:$4 sm:$0xff]  }
  0xe1   : > { %2386 = vmatprep.subr.bf16.mxu1 %v3452_v22  ;;  %v3540_v21 = vld [vmem:[%s4045_s7 + $0x760] ss:$8 sps:$4 sm:$0xff]   ;;  %v3545_v22 = vld [vmem:[%s4045_s7 + $0x654] ss:$8 sps:$4 sm:$0xff]  }
  0xe3   : > { %2344 = vmatpush1.bf16.msra.mxu0 %v3447_v24  ;;  %v3543_v24 = vld [vmem:[%s4045_s7 + $0x650] ss:$8 sps:$4 sm:$0xff]  }
  0xe4   : > { %2387 = vmatpush1.bf16.msra.mxu1 %v3450_v25  ;;  %2345 = vmatprep.subr.bf16.mxu0 %v3455_v26  ;;  %v3546_v25 = vld [vmem:[%s4045_s7 + $0x750] ss:$8 sps:$4 sm:$0xff]   ;;  %v3551_v26 = vld [vmem:[%s4045_s7 + $0x644] ss:$8 sps:$4 sm:$0xff]  }
  0xe5   : > { %2388 = vmatprep.subr.bf16.mxu1 %v3458_v27  ;;  %v3554_v27 = vld [vmem:[%s4045_s7 + $0x744] ss:$8 sps:$4 sm:$0xff]  }
  0xe7   : > { %2346 = vmatpush1.bf16.msra.mxu0 %v3453_v28  ;;  %v3549_v28 = vld [vmem:[%s4045_s7 + $0x640] ss:$8 sps:$4 sm:$0xff]  }
  0xe8   : > { %2389 = vmatpush1.bf16.msra.mxu1 %v3456_v29  ;;  %2347 = vmatprep.subr.bf16.mxu0 %v3461_v30  ;;  %v3552_v29 = vld [vmem:[%s4045_s7 + $0x740] ss:$8 sps:$4 sm:$0xff]   ;;  %v3557_v30 = vld [vmem:[%s4045_s7 + $0x634] ss:$8 sps:$4 sm:$0xff]  }
  0xe9   : > { %2390 = vmatprep.subr.bf16.mxu1 %v3464_v31  ;;  %v3560_v31 = vld [vmem:[%s4045_s7 + $0x734] ss:$8 sps:$4 sm:$0xff]  }
  0xeb   : > { %2348 = vmatpush1.bf16.msra.mxu0 %v3459_v32  ;;  %v3555_v32 = vld [vmem:[%s4045_s7 + $0x630] ss:$8 sps:$4 sm:$0xff]  }
  0xec   : > { %2391 = vmatpush1.bf16.msra.mxu1 %v3462_v33  ;;  %2349 = vmatprep.subr.bf16.mxu0 %v3467_v34  ;;  %v3558_v33 = vld [vmem:[%s4045_s7 + $0x730] ss:$8 sps:$4 sm:$0xff]   ;;  %v3563_v34 = vld [vmem:[%s4045_s7 + $0x624] ss:$8 sps:$4 sm:$0xff]  }
  0xed   : > { %2392 = vmatprep.subr.bf16.mxu1 %v3470_v35  ;;  %v3566_v35 = vld [vmem:[%s4045_s7 + $0x724] ss:$8 sps:$4 sm:$0xff]  }
  0xef   : > { %2350 = vmatpush1.bf16.msra.mxu0 %v3465_v36  ;;  %v3561_v36 = vld [vmem:[%s4045_s7 + $0x620] ss:$8 sps:$4 sm:$0xff]  }
  0xf0   : > { %2393 = vmatpush1.bf16.msra.mxu1 %v3468_v37  ;;  %2351 = vmatprep.subr.bf16.mxu0 %v3473_v38  ;;  %v3564_v37 = vld [vmem:[%s4045_s7 + $0x720] ss:$8 sps:$4 sm:$0xff]   ;;  %v3569_v38 = vld [vmem:[%s4045_s7 + $0x614] ss:$8 sps:$4 sm:$0xff]  }
  0xf1   : > { %2394 = vmatprep.subr.bf16.mxu1 %v3476_v39  ;;  %v3572_v39 = vld [vmem:[%s4045_s7 + $0x714] ss:$8 sps:$4 sm:$0xff]  }
  0xf3   : > { %2352 = vmatpush1.bf16.msra.mxu0 %v3471_v40  ;;  %v3567_v40 = vld [vmem:[%s4045_s7 + $0x610] ss:$8 sps:$4 sm:$0xff]  }
  0xf4   : > { %2395 = vmatpush1.bf16.msra.mxu1 %v3474_v41  ;;  %2353 = vmatprep.subr.bf16.mxu0 %v3479_v42  ;;  %v3570_v41 = vld [vmem:[%s4045_s7 + $0x710] ss:$8 sps:$4 sm:$0xff]   ;;  %v3575_v42 = vld [vmem:[%s4045_s7 + $0x604] ss:$8 sps:$4 sm:$0xff]  }
  0xf5   : > { %2396 = vmatprep.subr.bf16.mxu1 %v3482_v43  ;;  %v3578_v43 = vld [vmem:[%s4045_s7 + $0x704] ss:$8 sps:$4 sm:$0xff]  }
  0xf7   : > { %2354 = vmatpush2.bf16.msra.mxu0 %v3477_v44  ;;  %v3573_v44 = vld [vmem:[%s4045_s7 + $0x600] ss:$8 sps:$4 sm:$0xff]  }
  0xf8   : > { %2397 = vmatpush2.bf16.msra.mxu1 %v3480_v45  ;;  %2355 = vmatprep.subr.bf16.mxu0 %v3485_v46  ;;  %v3576_v45 = vld [vmem:[%s4045_s7 + $0x700] ss:$8 sps:$4 sm:$0xff]   ;;  %v3581_v46 = vld [vmem:[%s4045_s7 + $0x6f4] ss:$8 sps:$4 sm:$0xff]  }
  0xf9   : > { %2398 = vmatprep.subr.bf16.mxu1 %v3488_v47  ;;  %v3584_v47 = vld [vmem:[%s4045_s7 + $0x7f4] ss:$8 sps:$4 sm:$0xff]  }
  0xfb   : > { %2356 = vmatpush2.bf16.msra.mxu0 %v3483_v48  ;;  %v3579_v48 = vld [vmem:[%s4045_s7 + $0x6f0] ss:$8 sps:$4 sm:$0xff]  }
  0xfc   : > { %2399 = vmatpush2.bf16.msra.mxu1 %v3486_v49  ;;  %2357 = vmatprep.subr.bf16.mxu0 %v3491_v50  ;;  %v3582_v49 = vld [vmem:[%s4045_s7 + $0x7f0] ss:$8 sps:$4 sm:$0xff]   ;;  %v3587_v50 = vld [vmem:[%s4045_s7 + $0x6e4] ss:$8 sps:$4 sm:$0xff]  }
  0xfd   : > { %2400 = vmatprep.subr.bf16.mxu1 %v3494_v51  ;;  %v3590_v51 = vld [vmem:[%s4045_s7 + $0x7e4] ss:$8 sps:$4 sm:$0xff]  }
  0xff   : > { %2358 = vmatpush2.bf16.msra.mxu0 %v3489_v52  ;;  %v3585_v52 = vld [vmem:[%s4045_s7 + $0x6e0] ss:$8 sps:$4 sm:$0xff]  }
 0x100   : > { %2401 = vmatpush2.bf16.msra.mxu1 %v3492_v53  ;;  %2359 = vmatprep.subr.bf16.mxu0 %v3497_v54  ;;  %v3588_v53 = vld [vmem:[%s4045_s7 + $0x7e0] ss:$8 sps:$4 sm:$0xff]   ;;  %v3593_v54 = vld [vmem:[%s4045_s7 + $0x6d4] ss:$8 sps:$4 sm:$0xff]  }
 0x101   : > { %2402 = vmatprep.subr.bf16.mxu1 %v3500_v55  ;;  %v3596_v55 = vld [vmem:[%s4045_s7 + $0x7d4] ss:$8 sps:$4 sm:$0xff]  }
 0x103   : > { %2360 = vmatpush2.bf16.msra.mxu0 %v3495_v56  ;;  %v3591_v56 = vld [vmem:[%s4045_s7 + $0x6d0] ss:$8 sps:$4 sm:$0xff]  }
 0x104   : > { %2403 = vmatpush2.bf16.msra.mxu1 %v3498_v57  ;;  %2361 = vmatprep.subr.bf16.mxu0 %v3503_v58  ;;  %v3594_v57 = vld [vmem:[%s4045_s7 + $0x7d0] ss:$8 sps:$4 sm:$0xff]   ;;  %v3599_v58 = vld [vmem:[%s4045_s7 + $0x6c4] ss:$8 sps:$4 sm:$0xff]  }
 0x105   : > { %2404 = vmatprep.subr.bf16.mxu1 %v3506_v59  ;;  %v3602_v59 = vld [vmem:[%s4045_s7 + $0x7c4] ss:$8 sps:$4 sm:$0xff]  }
 0x107   : > { %2362 = vmatpush2.bf16.msra.mxu0 %v3501_v60  ;;  %v3597_v60 = vld [vmem:[%s4045_s7 + $0x6c0] ss:$8 sps:$4 sm:$0xff]  }
 0x108   : > { %2405 = vmatpush2.bf16.msra.mxu1 %v3504_v61  ;;  %2363 = vmatprep.subr.bf16.mxu0 %v3509_v62  ;;  %v3600_v61 = vld [vmem:[%s4045_s7 + $0x7c0] ss:$8 sps:$4 sm:$0xff]   ;;  %v3605_v62 = vld [vmem:[%s4045_s7 + $0x6b4] ss:$8 sps:$4 sm:$0xff]  }
 0x109   : > { %2406 = vmatprep.subr.bf16.mxu1 %v3512_v63  ;;  %v3608_v63 = vld [vmem:[%s4045_s7 + $0x7b4] ss:$8 sps:$4 sm:$0xff]  }
 0x10b   : > { %2364 = vmatpush2.bf16.msra.mxu0 %v3507_v0  ;;  %v3603_v0 = vld [vmem:[%s4045_s7 + $0x6b0] ss:$8 sps:$4 sm:$0xff]  }
 0x10c   : > { %2407 = vmatpush2.bf16.msra.mxu1 %v3510_v1  ;;  %2365 = vmatprep.subr.bf16.mxu0 %v3515_v2  ;;  %v3606_v1 = vld [vmem:[%s4045_s7 + $0x7b0] ss:$8 sps:$4 sm:$0xff]   ;;  %v3611_v2 = vld [vmem:[%s4045_s7 + $0x6a4] ss:$8 sps:$4 sm:$0xff]  }
 0x10d   : > { %2408 = vmatprep.subr.bf16.mxu1 %v3518_v3  ;;  %v3614_v3 = vld [vmem:[%s4045_s7 + $0x7a4] ss:$8 sps:$4 sm:$0xff]  }
 0x10f   : > { %2366 = vmatpush2.bf16.msra.mxu0 %v3513_v4  ;;  %v3609_v4 = vld [vmem:[%s4045_s7 + $0x6a0] ss:$8 sps:$4 sm:$0xff]  }
 0x110   : > { %2409 = vmatpush2.bf16.msra.mxu1 %v3516_v5  ;;  %2367 = vmatprep.subr.bf16.mxu0 %v3521_v6  ;;  %v3612_v5 = vld [vmem:[%s4045_s7 + $0x7a0] ss:$8 sps:$4 sm:$0xff]   ;;  %v3617_v6 = vld [vmem:[%s4045_s7 + $0x694] ss:$8 sps:$4 sm:$0xff]  }
 0x111   : > { %2410 = vmatprep.subr.bf16.mxu1 %v3524_v7  ;;  %v3620_v7 = vld [vmem:[%s4045_s7 + $0x794] ss:$8 sps:$4 sm:$0xff]  }
 0x113   : > { %2368 = vmatpush2.bf16.msra.mxu0 %v3519_v8  ;;  %v3615_v8 = vld [vmem:[%s4045_s7 + $0x690] ss:$8 sps:$4 sm:$0xff]  }
 0x114   : > { %2411 = vmatpush2.bf16.msra.mxu1 %v3522_v9  ;;  %2423 = vmatprep.subr.bf16.mxu0 %v3530_v10  ;;  %v3618_v9 = vld [vmem:[%s4045_s7 + $0x790] ss:$8 sps:$4 sm:$0xff]   ;;  %v3623_v10 = vld [vmem:[%s4045_s7 + $0x684] ss:$8 sps:$4 sm:$0xff]  }
 0x115   : > { %2466 = vmatprep.subr.bf16.mxu1 %v3536_v11  ;;  %v3626_v11 = vld [vmem:[%s4045_s7 + $0x784] ss:$8 sps:$4 sm:$0xff]  }
 0x116   : > { %2370 = vmatmul.mubr.bf16.vlgmr.msra.gmra.mxu0 %v3525_v12  ;;  %v3621_v12 = vld [vmem:[%s4045_s7 + $0x680] ss:$8 sps:$4 sm:$0xff]  }
 0x117   : > { %2413 = vmatmul.mubr.bf16.vlgmr.msra.gmra.mxu1 %v3531_v14  ;;  %2424 = vmatpush1.bf16.msra.mxu0 %v3528_v13  ;;  %v3624_v13 = vld [vmem:[%s4045_s7 + $0x780] ss:$8 sps:$4 sm:$0xff]   ;;  %v3632_v14 = vld [vmem:[%s4045_s7 + $0x874] ss:$8 sps:$4 sm:$0xff]  }
 0x118   : > { %2467 = vmatpush1.bf16.msra.mxu1 %v3534_v15  ;;  %2425 = vmatprep.subr.bf16.mxu0 %v3539_v16  ;;  %v3627_v15 = vld [vmem:[%s4110_s27 + $0x30] ss:$72 sps:$4 sm:$0xff]  }
 0x119   : > { %2468 = vmatprep.subr.bf16.mxu1 %v3542_v17  ;;  %2455 = vmatprep.mubr.bf16.mxu0 %v3629_v18  ;;  %v3633_v16 = vld [vmem:[%s4110_s27 + $0x38] ss:$72 sps:$4 sm:$0xff]   ;;  %v3683_v18 = vld [vmem:[%s4110_s27 + $0x44] ss:$72 sps:$4 sm:$0xff]  }
 0x11a   : > { %2498 = vmatprep.mubr.bf16.mxu1 %v3635_v19  ;;  %v3630_v17 = vld [vmem:[%s4045_s7 + $0x870] ss:$8 sps:$4 sm:$0xff]   ;;  %v3638_v19 = vld [vmem:[%s4045_s7 + $0x864] ss:$8 sps:$4 sm:$0xff]  }
 0x11b   : > { %2426 = vmatpush1.bf16.msra.mxu0 %v3537_v20  ;;  %v3636_v20 = vld [vmem:[%s4045_s7 + $0x860] ss:$8 sps:$4 sm:$0xff]  }
 0x11c   : > { %2469 = vmatpush1.bf16.msra.mxu1 %v3540_v21  ;;  %2427 = vmatprep.subr.bf16.mxu0 %v3545_v22  ;;  %v3641_v21 = vld [vmem:[%s4045_s7 + $0x854] ss:$8 sps:$4 sm:$0xff]   ;;  %v3639_v22 = vld [vmem:[%s4045_s7 + $0x850] ss:$8 sps:$4 sm:$0xff]  }
 0x11d   : > { %2470 = vmatprep.subr.bf16.mxu1 %v3548_v23  ;;  %v3644_v23 = vld [vmem:[%s4045_s7 + $0x844] ss:$8 sps:$4 sm:$0xff]  }
 0x11f   : > { %2428 = vmatpush1.bf16.msra.mxu0 %v3543_v24  ;;  %v3642_v24 = vld [vmem:[%s4045_s7 + $0x840] ss:$8 sps:$4 sm:$0xff]  }
 0x120   : > { %2471 = vmatpush1.bf16.msra.mxu1 %v3546_v25  ;;  %2429 = vmatprep.subr.bf16.mxu0 %v3551_v26  ;;  %v3647_v25 = vld [vmem:[%s4045_s7 + $0x834] ss:$8 sps:$4 sm:$0xff]   ;;  %v3645_v26 = vld [vmem:[%s4045_s7 + $0x830] ss:$8 sps:$4 sm:$0xff]  }
 0x121   : > { %2472 = vmatprep.subr.bf16.mxu1 %v3554_v27  ;;  %v3650_v27 = vld [vmem:[%s4045_s7 + $0x824] ss:$8 sps:$4 sm:$0xff]  }
 0x123   : > { %2430 = vmatpush1.bf16.msra.mxu0 %v3549_v28  ;;  %v3648_v28 = vld [vmem:[%s4045_s7 + $0x820] ss:$8 sps:$4 sm:$0xff]  }
 0x124   : > { %2473 = vmatpush1.bf16.msra.mxu1 %v3552_v29  ;;  %2431 = vmatprep.subr.bf16.mxu0 %v3557_v30  ;;  %v3653_v29 = vld [vmem:[%s4045_s7 + $0x814] ss:$8 sps:$4 sm:$0xff]   ;;  %v3651_v30 = vld [vmem:[%s4045_s7 + $0x810] ss:$8 sps:$4 sm:$0xff]  }
 0x125   : > { %2474 = vmatprep.subr.bf16.mxu1 %v3560_v31  ;;  %v3656_v31 = vld [vmem:[%s4045_s7 + $0x804] ss:$8 sps:$4 sm:$0xff]  }
 0x127   : > { %2432 = vmatpush1.bf16.msra.mxu0 %v3555_v32  ;;  %v3654_v32 = vld [vmem:[%s4045_s7 + $0x800] ss:$8 sps:$4 sm:$0xff]  }
 0x128   : > { %2475 = vmatpush1.bf16.msra.mxu1 %v3558_v33  ;;  %2433 = vmatprep.subr.bf16.mxu0 %v3563_v34  ;;  %v3659_v33 = vld [vmem:[%s4045_s7 + $0x8f4] ss:$8 sps:$4 sm:$0xff]   ;;  %v3657_v34 = vld [vmem:[%s4045_s7 + $0x8f0] ss:$8 sps:$4 sm:$0xff]  }
 0x129   : > { %2476 = vmatprep.subr.bf16.mxu1 %v3566_v35  ;;  %v3662_v35 = vld [vmem:[%s4045_s7 + $0x8e4] ss:$8 sps:$4 sm:$0xff]  }
 0x12b   : > { %2434 = vmatpush1.bf16.msra.mxu0 %v3561_v36  ;;  %v3660_v36 = vld [vmem:[%s4045_s7 + $0x8e0] ss:$8 sps:$4 sm:$0xff]  }
 0x12c   : > { %2477 = vmatpush1.bf16.msra.mxu1 %v3564_v37  ;;  %2435 = vmatprep.subr.bf16.mxu0 %v3569_v38  ;;  %v3665_v37 = vld [vmem:[%s4045_s7 + $0x8d4] ss:$8 sps:$4 sm:$0xff]   ;;  %v3663_v38 = vld [vmem:[%s4045_s7 + $0x8d0] ss:$8 sps:$4 sm:$0xff]  }
 0x12d   : > { %2478 = vmatprep.subr.bf16.mxu1 %v3572_v39  ;;  %v3668_v39 = vld [vmem:[%s4045_s7 + $0x8c4] ss:$8 sps:$4 sm:$0xff]  }
 0x12f   : > { %2436 = vmatpush1.bf16.msra.mxu0 %v3567_v40  ;;  %v3666_v40 = vld [vmem:[%s4045_s7 + $0x8c0] ss:$8 sps:$4 sm:$0xff]  }
 0x130   : > { %2479 = vmatpush1.bf16.msra.mxu1 %v3570_v41  ;;  %2437 = vmatprep.subr.bf16.mxu0 %v3575_v42  ;;  %v3671_v41 = vld [vmem:[%s4045_s7 + $0x8b4] ss:$8 sps:$4 sm:$0xff]   ;;  %v3669_v42 = vld [vmem:[%s4045_s7 + $0x8b0] ss:$8 sps:$4 sm:$0xff]  }
 0x131   : > { %2480 = vmatprep.subr.bf16.mxu1 %v3578_v43  ;;  %v3674_v43 = vld [vmem:[%s4045_s7 + $0x8a4] ss:$8 sps:$4 sm:$0xff]  }
 0x133   : > { %2438 = vmatpush1.bf16.msra.mxu0 %v3573_v44  ;;  %v3672_v44 = vld [vmem:[%s4045_s7 + $0x8a0] ss:$8 sps:$4 sm:$0xff]  }
 0x134   : > { %2481 = vmatpush1.bf16.msra.mxu1 %v3576_v45  ;;  %2439 = vmatprep.subr.bf16.mxu0 %v3581_v46  ;;  %v3677_v45 = vld [vmem:[%s4045_s7 + $0x894] ss:$8 sps:$4 sm:$0xff]   ;;  %v3675_v46 = vld [vmem:[%s4045_s7 + $0x890] ss:$8 sps:$4 sm:$0xff]  }
 0x135   : > { %2482 = vmatprep.subr.bf16.mxu1 %v3584_v47  ;;  %v3680_v47 = vld [vmem:[%s4045_s7 + $0x884] ss:$8 sps:$4 sm:$0xff]  }
 0x137   : > { %2440 = vmatpush2.bf16.msra.mxu0 %v3579_v48  ;;  %v3678_v48 = vld [vmem:[%s4045_s7 + $0x880] ss:$8 sps:$4 sm:$0xff]  }
 0x138   : > { %2483 = vmatpush2.bf16.msra.mxu1 %v3582_v49  ;;  %2441 = vmatprep.subr.bf16.mxu0 %v3587_v50  ;;  %v3681_v49 = vld [vmem:[%s4110_s27 + $0x40] ss:$72 sps:$4 sm:$0xff]  }
 0x139   : > { %2484 = vmatprep.subr.bf16.mxu1 %v3590_v51 }
 0x13b   : > { %2442 = vmatpush2.bf16.msra.mxu0 %v3585_v52 }
 0x13c   : > { %2485 = vmatpush2.bf16.msra.mxu1 %v3588_v53  ;;  %2443 = vmatprep.subr.bf16.mxu0 %v3593_v54 }
 0x13d   : > { %2486 = vmatprep.subr.bf16.mxu1 %v3596_v55 }
 0x13f   : > { %2444 = vmatpush2.bf16.msra.mxu0 %v3591_v56 }
 0x140   : > { %2487 = vmatpush2.bf16.msra.mxu1 %v3594_v57  ;;  %2445 = vmatprep.subr.bf16.mxu0 %v3599_v58 }
 0x141   : > { %2488 = vmatprep.subr.bf16.mxu1 %v3602_v59 }
 0x143   : > { %2446 = vmatpush2.bf16.msra.mxu0 %v3597_v60 }
 0x144   : > { %2489 = vmatpush2.bf16.msra.mxu1 %v3600_v61  ;;  %2447 = vmatprep.subr.bf16.mxu0 %v3605_v62 }
 0x145   : > { %2490 = vmatprep.subr.bf16.mxu1 %v3608_v63 }
 0x147   : > { %2448 = vmatpush2.bf16.msra.mxu0 %v3603_v0 }
 0x148   : > { %2491 = vmatpush2.bf16.msra.mxu1 %v3606_v1  ;;  %2449 = vmatprep.subr.bf16.mxu0 %v3611_v2 }
 0x149   : > { %2492 = vmatprep.subr.bf16.mxu1 %v3614_v3 }
 0x14b   : > { %2450 = vmatpush2.bf16.msra.mxu0 %v3609_v4 }
 0x14c   : > { %2493 = vmatpush2.bf16.msra.mxu1 %v3612_v5  ;;  %2451 = vmatprep.subr.bf16.mxu0 %v3617_v6 }
 0x14d   : > { %2494 = vmatprep.subr.bf16.mxu1 %v3620_v7 }
 0x14f   : > { %2452 = vmatpush2.bf16.msra.mxu0 %v3615_v8 }
 0x150   : > { %2495 = vmatpush2.bf16.msra.mxu1 %v3618_v9  ;;  %2453 = vmatprep.subr.bf16.mxu0 %v3623_v10 }
 0x151   : > { %2496 = vmatprep.subr.bf16.mxu1 %v3626_v11 }
 0x153   : > { %2454 = vmatpush2.bf16.msra.mxu0 %v3621_v12 }
 0x154   : > { %2497 = vmatpush2.bf16.msra.mxu1 %v3624_v13  ;;  %2509 = vmatprep.subr.bf16.mxu0 %v3632_v14 }
 0x156   : > { %2456 = vmatmul.mubr.bf16.vlgmr.msra.gmra.mxu0 %v3627_v15  ;;  %v2199_v50 = vpop.f32.mrf.mxu0 }
 0x157   : > { %2499 = vmatmul.mubr.bf16.vlgmr.msra.gmra.mxu1 %v3633_v16  ;;  %2510 = vmatpush1.bf16.msra.mxu0 %v3630_v17  ;;  %v2242_v51 = vpop.f32.mrf.mxu1 }
 0x158   : > { %2541 = vmatprep.mubr.bf16.mxu0 %v3683_v18  ;;  %2511 = vmatprep.subr.bf16.mxu0 %v3638_v19  ;;  %v2201_v52 = vpop.f32.mrf.mxu0  ;;  %v2243_v7 = vadd.f32 %v2242_v51, %v2199_v50  ;;  %v2554_v18 = vlaneseq }
 0x159   : > { %v2244_v53 = vpop.f32.mrf.mxu1 }
 0x15a   : > { %v2203_v54 = vpop.f32.mrf.mxu0  ;;  %v2245_v8 = vadd.f32 %v2244_v53, %v2201_v52 }
 0x15b   : > { %2512 = vmatpush1.bf16.msra.mxu0 %v3636_v20  ;;  %v2246_v55 = vpop.f32.mrf.mxu1 }
 0x15c   : > { %2513 = vmatprep.subr.bf16.mxu0 %v3641_v21  ;;  %v2205_v56 = vpop.f32.mrf.mxu0  ;;  %v2247_v12 = vadd.f32 %v2246_v55, %v2203_v54 }
 0x15d   : > { %v2248_v58 = vpop.f32.mrf.mxu1 }
 0x15e   : > { %v2249_v15 = vadd.f32 %v2248_v58, %v2205_v56 }
 0x15f   : > { %2514 = vmatpush1.bf16.msra.mxu0 %v3639_v22 }
 0x160   : > { %2515 = vmatprep.subr.bf16.mxu0 %v3644_v23 }
 0x163   : > { %2516 = vmatpush1.bf16.msra.mxu0 %v3642_v24 }
 0x164   : > { %2517 = vmatprep.subr.bf16.mxu0 %v3647_v25 }
 0x167   : > { %2518 = vmatpush1.bf16.msra.mxu0 %v3645_v26 }
 0x168   : > { %2519 = vmatprep.subr.bf16.mxu0 %v3650_v27  ;;  %v2555_v27 = vshrl.u32 %v2554_v18, 7 }
 0x16b   : > { %2520 = vmatpush1.bf16.msra.mxu0 %v3648_v28 }
 0x16c   : > { %2521 = vmatprep.subr.bf16.mxu0 %v3653_v29 }
 0x16f   : > { %2522 = vmatpush1.bf16.msra.mxu0 %v3651_v30 }
 0x170   : > { %2523 = vmatprep.subr.bf16.mxu0 %v3656_v31 }
 0x173   : > { %2524 = vmatpush1.bf16.msra.mxu0 %v3654_v32 }
 0x174   : > { %2525 = vmatprep.subr.bf16.mxu0 %v3659_v33 }
 0x177   : > { %2526 = vmatpush2.bf16.msra.mxu0 %v3657_v34 }
 0x178   : > { %2527 = vmatprep.subr.bf16.mxu0 %v3662_v35 }
 0x17b   : > { %2528 = vmatpush2.bf16.msra.mxu0 %v3660_v36  ;;  %v2556_v36 = vsub.s32 0, %v2555_v27 }
 0x17c   : > { %2529 = vmatprep.subr.bf16.mxu0 %v3665_v37  ;;  %v2552_v37 = vld [vmem:[%s4055_s17] sm:$0x3] }
 0x17f   : > { %2530 = vmatpush2.bf16.msra.mxu0 %v3663_v38 }
 0x180   : > { %2531 = vmatprep.subr.bf16.mxu0 %v3668_v39 }
 0x183   : > { %2532 = vmatpush2.bf16.msra.mxu0 %v3666_v40  ;;  %v2568_v40 = vld [vmem:[%s277_s8] sm:$0x3] }
 0x184   : > { %2533 = vmatprep.subr.bf16.mxu0 %v3671_v41  ;;  %v2560_v41 = vsub.s32 1, %v2555_v27 }
 0x186   : > { %v2561_v53 = vrot.slane %v2552_v37, %v2560_v41 }
 0x187   : > { %2534 = vmatpush2.bf16.msra.mxu0 %v3669_v42 }
 0x188   : > { %2535 = vmatprep.subr.bf16.mxu0 %v3674_v43 }
 0x18b   : > { %2536 = vmatpush2.bf16.msra.mxu0 %v3672_v44 }
 0x18c   : > { %2537 = vmatprep.subr.bf16.mxu0 %v3677_v45 }
 0x18f   : > { %2538 = vmatpush2.bf16.msra.mxu0 %v3675_v46 }
 0x190   : > { %2539 = vmatprep.subr.bf16.mxu0 %v3680_v47  ;;  %v2557_v47 = vrot.slane %v2552_v37, %v2556_v36 }
 0x193   : > { %2540 = vmatpush2.bf16.msra.mxu0 %v3678_v48 }
 0x196   : > { %2542 = vmatmul.mubr.bf16.vlgmr.msra.gmra.mxu0 %v3681_v49  ;;  %v2285_v57 = vpop.f32.mrf.mxu0  ;;  %v2573_v49 = vrot.slane %v2568_v40, %v2556_v36 }
 0x197   : > { %v2328_v60 = vpop.f32.mrf.mxu1  ;;  %v2286_v9 = vadd.f32 %v2285_v57, %v2243_v7 }
 0x198   : > { %v2287_v59 = vpop.f32.mrf.mxu0 }
 0x199   : > { %v2330_v62 = vpop.f32.mrf.mxu1  ;;  %v2288_v13 = vadd.f32 %v2287_v59, %v2245_v8  ;;  %v2329_v16 = vadd.f32 %v2328_v60, %v2286_v9  ;;  %v2577_v59 = vrot.slane %v2568_v40, %v2560_v41 }
 0x19a   : > { %v2289_v61 = vpop.f32.mrf.mxu0 }
 0x19b   : > { %v2332_v0 = vpop.f32.mrf.mxu1  ;;  %v2290_v17 = vadd.f32 %v2289_v61, %v2247_v12  ;;  %v2331_v20 = vadd.f32 %v2330_v62, %v2288_v13 }
 0x19c   : > { %v2291_v63 = vpop.f32.mrf.mxu0 }
 0x19d   : > { %v2334_v2 = vpop.f32.mrf.mxu1  ;;  %v2292_v21 = vadd.f32 %v2291_v63, %v2249_v15  ;;  %v2333_v25 = vadd.f32 %v2332_v0, %v2290_v17 }
 0x19f   : > { %v2335_v28 = vadd.f32 %v2334_v2, %v2292_v21 }
 0x1d6   : > { %v2371_v1 = vpop.f32.mrf.mxu0 }
 0x1d7   : > { %v2414_v4 = vpop.f32.mrf.mxu1  ;;  %v2372_v22 = vadd.f32 %v2371_v1, %v2329_v16 }
 0x1d8   : > { %v2373_v3 = vpop.f32.mrf.mxu0 }
 0x1d9   : > { %v2416_v6 = vpop.f32.mrf.mxu1  ;;  %v2374_v26 = vadd.f32 %v2373_v3, %v2331_v20  ;;  %v2415_v29 = vadd.f32 %v2414_v4, %v2372_v22 }
 0x1da   : > { %v2375_v5 = vpop.f32.mrf.mxu0 }
 0x1db   : > { %v2418_v11 = vpop.f32.mrf.mxu1  ;;  %v2376_v30 = vadd.f32 %v2375_v5, %v2333_v25  ;;  %v2417_v33 = vadd.f32 %v2416_v6, %v2374_v26 }
 0x1dc   : > { %v2377_v10 = vpop.f32.mrf.mxu0 }
 0x1dd   : > { %v2420_v19 = vpop.f32.mrf.mxu1  ;;  %v2378_v34 = vadd.f32 %v2377_v10, %v2335_v28  ;;  %v2419_v38 = vadd.f32 %v2418_v11, %v2376_v30 }
 0x1df   : > { %v2421_v44 = vadd.f32 %v2420_v19, %v2378_v34 }
 0x216   : > { %v2457_v14 = vpop.f32.mrf.mxu0 }
 0x217   : > { %v2500_v24 = vpop.f32.mrf.mxu1  ;;  %v2458_v35 = vadd.f32 %v2457_v14, %v2415_v29 }
 0x218   : > { %v2459_v23 = vpop.f32.mrf.mxu0 }
 0x219   : > { %v2502_v32 = vpop.f32.mrf.mxu1  ;;  %v2460_v39 = vadd.f32 %v2459_v23, %v2417_v33  ;;  %v2501_v45 = vadd.f32 %v2500_v24, %v2458_v35 }
 0x21a   : > { %v2461_v31 = vpop.f32.mrf.mxu0 }
 0x21b   : > { %v2504_v43 = vpop.f32.mrf.mxu1  ;;  %v2462_v46 = vadd.f32 %v2461_v31, %v2419_v38  ;;  %v2503_v50 = vadd.f32 %v2502_v32, %v2460_v39 }
 0x21c   : > { %v2463_v42 = vpop.f32.mrf.mxu0 }
 0x21d   : > { %v2464_v51 = vadd.f32 %v2463_v42, %v2421_v44  ;;  %v2506_v54 = vpop.f32.mrf.mxu1  ;;  %v2505_v56 = vadd.f32 %v2504_v43, %v2462_v46 }
 0x21f   : > { %v2507_v61 = vadd.f32 %v2506_v54, %v2464_v51 }
 0x256   : > { %v2543_v48 = vpop.f32.mrf.mxu0 }
 0x257   : > { %v2544_v52 = vadd.f32 %v2543_v48, %v2501_v45 }
 0x258   : > { %v2545_v55 = vpop.f32.mrf.mxu0 }
 0x259   : > { %v2564_v57 = vmul.f32 %v2557_v47, %v2544_v52  ;;  %v2546_v58 = vadd.f32 %v2545_v55, %v2503_v50 }
 0x25a   : > { %v2547_v60 = vpop.f32.mrf.mxu0 }
 0x25b   : > { %v2580_v62 = vadd.f32 %v2573_v49, %v2564_v57  ;;  %v2565_v63 = vmul.f32 %v2561_v53, %v2546_v58  ;;  %v2548_v0 = vadd.f32 %v2547_v60, %v2505_v56 }
 0x25c   : > { %v2549_v1 = vpop.f32.mrf.mxu0 }
 0x25d   : > { %v2581_v2 = vadd.f32 %v2577_v59, %v2565_v63  ;;  %v2566_v3 = vmul.f32 %v2557_v47, %v2548_v0  ;;  %v2550_v4 = vadd.f32 %v2549_v1, %v2507_v61  ;;  %v2584_v5 = vmax.f32 %v2580_v62, 0.0 }
 0x25f   : > { %v2585_v6 = vmax.f32 %v2581_v2, 0.0  ;;  %v2582_v7 = vadd.f32 %v2573_v49, %v2566_v3  ;;  %v2567_v8 = vmul.f32 %v2561_v53, %v2550_v4 }
 0x261   : > { %v3119_v9 = vpack.c.bf16 %v2585_v6, %v2584_v5  ;;  %v2583_v10 = vadd.f32 %v2577_v59, %v2567_v8  ;;  %v2586_v11 = vmax.f32 %v2582_v7, 0.0 }
 0x263   : > { %2600 = vst [vmem:[%s316_s6] sm:$0xff] %v3119_v9  ;;  %v2587_v12 = vmax.f32 %v2583_v10, 0.0  ;;  %2608 = sbr.rel (!%p3973_p12) target bundleno = 624 (0x270), region = 52 }
 0x265   : > { %v3120_v13 = vpack.c.bf16 %v2587_v12, %v2586_v11 }
 0x267   : > { %2601 = vst [vmem:[%s316_s6 + $0x8] sm:$0xff] %v3120_v13 }
 0x26a   : > { %v2645_v14 = vld [vmem:[%s316_s6] sm:$0xff] }
 0x26b   : > { %2646 = vst [vmem:[%s2614_s26] sm:$0xff] %v2645_v14 }
 0x26e   : > { %v2647_v15 = vld [vmem:[%s316_s6 + $0x8] sm:$0xff] }
 0x26f   : > { %2648 = vst [vmem:[%s2614_s26 + $0x10] sm:$0xff] %v2647_v15 }
 0x270 PF: > { %s20_s24 = sadd.s32 1, %s3854_s24   ;;  %s4438_s15 = sld [smem:[#allocation10_spill]] }
 0x271   : > { %p17_p0 = scmp.ge.s32.totalorder %s20_s24, 6   ;;  %s4439_s16 = sld [smem:[#allocation16_spill]] }
 0x272   : > { %s4440_s20 = sld [smem:[#allocation11_spill]]  ;;  %s4445_s17 = smov %s3830_s18 }
 0x273   : > { %s4441_s19 = sld [smem:[#allocation15_spill]] }
 0x274   : > { %s4442_s21 = sld [smem:[#allocation12_spill]] }
 0x275   : > { %s4443_s11 = sld [smem:[#allocation13_spill]] }
 0x276   : > { %s4444_s23 = sld [smem:[#allocation14_spill]] }
 0x277   :  { %19 = sbr.rel (!%p17_p0) target bundleno = 10 (0xa), region = 141 }
 0x278   : > { %s4446_s18 = smov %s4440_s20  ;;  %s4447_s20 = smov %s3846_s22 }
 0x27b   : > { %s4448_s22 = smov %s4443_s11 }
 0x27c   :  { %2664 = vsyncpa [#allocation3], 1 }
 0x27d   :  { %2666 = vsyncpa [#allocation3 + $0x1], 1 }
 0x27e   :  { %2667 = vsyncpa [#allocation5], 1 }
 0x27f   :  { %2669 = vsyncpa [#allocation5 + $0x1], 1 }

// kernel: forward.7
= control target key start
LH: loop header
LB: loop body
LE: loop exit
PB: predicated region body
PF: predicated region fallthrough
CT: control target
= control target key end

     0   :  { %s2933_s15 = smov 0   ;;  %s2935_s16 = smov 0   ;;  %s3521_s0 = inlined_call_operand.vmem [shape: bf16[128,1152], index: 0, kind: input, shape index: {}]   ;;  %s3522_s1 = inlined_call_operand.vmem [shape: bf16[1152,256], index: 1, kind: input, shape index: {}]   ;;  %s3523_s2 = inlined_call_operand.vmem [shape: f32[1,256], index: 2, kind: input, shape index: {}]   ;;  %s3524_s3 = inlined_call_operand.vmem [shape: f32[1,256], index: 3, kind: input, shape index: {}]   ;;  %s3525_s4 = inlined_call_operand.vmem [shape: bf16[128,256], index: 4, kind: output, shape index: {}]  }
   0x1   :  { %s2937_s17 = smov 0   ;;  %s2939_s18 = smov 0  }
   0x2   :  { %s2941_s19 = smov 0   ;;  %s2943_s20 = smov 0  }
   0x3   :  { %s2945_s21 = smov 0   ;;  %s2947_s22 = smov 0  }
   0x4   :  { %s2949_s23 = smov 0  }
   0x5 LB: > { %s2260_s24 = sadd.s32 4294967295, %s2906_s23   ;;  %s23_s25 = sadd.s32 1, %s2898_s21  ;;  %s2906_s23 = sphi %s2949_s23, %s14_s23   ;;  %s2902_s22 = sphi %s2947_s22, %s3544_s22   ;;  %s2898_s21 = sphi %s2945_s21, %s3543_s21   ;;  %s2894_s20 = sphi %s2943_s20, %s3542_s20   ;;  %s2890_s19 = sphi %s2941_s19, %s3541_s19   ;;  %s2886_s18 = sphi %s2939_s18, %s3540_s18   ;;  %s2882_s17 = sphi %s2937_s17, %s3539_s17   ;;  %s2878_s16 = sphi %s2935_s16, %s3538_s16   ;;  %s2874_s15 = sphi %s2933_s15, %s3537_s15  }
   0x6   : > { %p24_p0 = scmp.ge.s32.totalorder %s23_s25, 2  ;;  %s26_s26 = sadd.s32 1, %s2902_s22 }
   0x7   : > { %s59_s27 = sadd.s32 1, %s2886_s18  ;;  %p66_p1 = scmp.ne.s32.totalorder %s2886_s18, %s2882_s17 }
   0x8   : > { %s3546_s25 = smov (%p24_p0, %s23_s25), 0  ;;  %s3548_s26 = smov (!%p24_p0, %s26_s26), %s2902_s22 }
   0x9   : > { %s56_s28 = ssub.s32 %s2898_s21, %s3546_s25  ;;  %p67_p2 = scmp.eq.s32.totalorder %s2906_s23, 0 }
   0xa   : > { %p28_p3 = scmp.ge.s32.totalorder %s3548_s26, 2  ;;  %p57_p4 = scmp.eq.s32.totalorder %s56_s28, 0 }
   0xb   : > { %p68_p5 = por %p67_p2, %p66_p1  ;;  %s139_s29 = sadd.s32 1, %s2878_s16 }
   0xc   : > { %s3550_s26 = smov (%p28_p3, %s3548_s26), 0  ;;  %p149_p6 = scmp.ne.s32.totalorder %s2878_s16, %s2874_s15 }
   0xd   : > { %s2994_s30 = scalar_select %p57_p4, %s2886_s18, %s59_s27  }
   0xe   : > { %s134_s5 = ssub.s32 %s2902_s22, %s3550_s26  ;;  %p150_p7 = scmp.eq.s32.totalorder %s2260_s24, 3 }
   0xf   : > { %s136_s6 = sor.u32 %s134_s5, %s56_s28  ;;  %p2263_p10 = scmp.ge.s32.totalorder %s2906_s23, 4 }
  0x10   : > { %p137_p8 = scmp.eq.s32.totalorder %s136_s6, 0  ;;  %p3000_p9 = por %p150_p7, %p149_p6 }
  0x11   : > { %172 = sbr.rel (%p2263_p10) target bundleno = 122 (0x7a), region = 16 }
  0x12   : > { %s3005_s8 = scalar_select %p137_p8, %s2878_s16, %s139_s29  }
  0x16   : > { %185 = sbr.rel (!%p68_p5) target bundleno = 122 (0x7a), region = 24  ;;  %s187_s9 = sand.u32 (%p68_p5), 1, %s2886_s18  }
  0x17   : > { %s2264_s10 = sshll.u32 (%p68_p5), %s2898_s21, 2  ;;  %s2637_s11 = smul.u32 (%p68_p5), 576, %s187_s9 }
  0x18   : > { %s3013_s14 = scalar_lea.vmem (%p68_p5), %s3522_s1, %s2264_s10 }
  0x19   : > { %v208_v0 = vld [vmem:[%s3013_s14] sm:$0xf] (%p68_p5)  ;;  %v210_v1 = vld [vmem:[%s3013_s14 + $0x8] sm:$0xf] (%p68_p5)  ;;  %v212_v2 = vld [vmem:[%s3013_s14 + $0x10] sm:$0xf] (%p68_p5) }
  0x1a   : > { %v214_v3 = vld [vmem:[%s3013_s14 + $0x18] sm:$0xf] (%p68_p5)  ;;  %v216_v4 = vld [vmem:[%s3013_s14 + $0x20] sm:$0xf] (%p68_p5)  ;;  %s3020_s24 = scalar_lea.vmem (%p68_p5), [#allocation2], %s2637_s11 }
  0x1b   : > { %209 = vst [vmem:[%s3020_s24] sm:$0xf] %v208_v0  ;;  %211 = vst [vmem:[%s3020_s24 + $0x4] sm:$0xf] %v210_v1  ;;  %v218_v5 = vld [vmem:[%s3013_s14 + $0x28] sm:$0xf] }
  0x1c   : > { %213 = vst [vmem:[%s3020_s24 + $0x8] sm:$0xf] %v212_v2  ;;  %215 = vst [vmem:[%s3020_s24 + $0xc] sm:$0xf] %v214_v3  ;;  %v220_v6 = vld [vmem:[%s3013_s14 + $0x30] sm:$0xf] }
  0x1d   : > { %217 = vst [vmem:[%s3020_s24 + $0x10] sm:$0xf] %v216_v4  ;;  %v222_v7 = vld [vmem:[%s3013_s14 + $0x38] sm:$0xf]  ;;  %219 = vst [vmem:[%s3020_s24 + $0x14] sm:$0xf] %v218_v5 }
  0x1e   : > { %221 = vst [vmem:[%s3020_s24 + $0x18] sm:$0xf] %v220_v6  ;;  %223 = vst [vmem:[%s3020_s24 + $0x1c] sm:$0xf] %v222_v7  ;;  %v224_v8 = vld [vmem:[%s3013_s14 + $0x40] sm:$0xf] }
  0x1f   : > { %v226_v9 = vld [vmem:[%s3013_s14 + $0x48] sm:$0xf]  ;;  %v228_v10 = vld [vmem:[%s3013_s14 + $0x50] sm:$0xf]  ;;  %225 = vst [vmem:[%s3020_s24 + $0x20] sm:$0xf] %v224_v8 }
  0x20   : > { %227 = vst [vmem:[%s3020_s24 + $0x24] sm:$0xf] %v226_v9  ;;  %229 = vst [vmem:[%s3020_s24 + $0x28] sm:$0xf] %v228_v10  ;;  %v230_v11 = vld [vmem:[%s3013_s14 + $0x58] sm:$0xf] }
  0x21   : > { %v232_v12 = vld [vmem:[%s3013_s14 + $0x60] sm:$0xf]  ;;  %v234_v13 = vld [vmem:[%s3013_s14 + $0x68] sm:$0xf]  ;;  %231 = vst [vmem:[%s3020_s24 + $0x2c] sm:$0xf] %v230_v11 }
  0x22   : > { %233 = vst [vmem:[%s3020_s24 + $0x30] sm:$0xf] %v232_v12  ;;  %235 = vst [vmem:[%s3020_s24 + $0x34] sm:$0xf] %v234_v13  ;;  %v236_v14 = vld [vmem:[%s3013_s14 + $0x70] sm:$0xf] }
  0x23   : > { %v238_v15 = vld [vmem:[%s3013_s14 + $0x78] sm:$0xf]  ;;  %v240_v16 = vld [vmem:[%s3013_s14 + $0x80] sm:$0xf]  ;;  %237 = vst [vmem:[%s3020_s24 + $0x38] sm:$0xf] %v236_v14 }
  0x24   : > { %239 = vst [vmem:[%s3020_s24 + $0x3c] sm:$0xf] %v238_v15  ;;  %241 = vst [vmem:[%s3020_s24 + $0x40] sm:$0xf] %v240_v16  ;;  %v242_v17 = vld [vmem:[%s3013_s14 + $0x88] sm:$0xf] }
  0x25   : > { %v244_v18 = vld [vmem:[%s3013_s14 + $0x90] sm:$0xf]  ;;  %v246_v19 = vld [vmem:[%s3013_s14 + $0x98] sm:$0xf]  ;;  %243 = vst [vmem:[%s3020_s24 + $0x44] sm:$0xf] %v242_v17 }
  0x26   : > { %245 = vst [vmem:[%s3020_s24 + $0x48] sm:$0xf] %v244_v18  ;;  %247 = vst [vmem:[%s3020_s24 + $0x4c] sm:$0xf] %v246_v19  ;;  %v248_v20 = vld [vmem:[%s3013_s14 + $0xa0] sm:$0xf] }
  0x27   : > { %v250_v21 = vld [vmem:[%s3013_s14 + $0xa8] sm:$0xf]  ;;  %v252_v22 = vld [vmem:[%s3013_s14 + $0xb0] sm:$0xf]  ;;  %249 = vst [vmem:[%s3020_s24 + $0x50] sm:$0xf] %v248_v20 }
  0x28   : > { %251 = vst [vmem:[%s3020_s24 + $0x54] sm:$0xf] %v250_v21  ;;  %253 = vst [vmem:[%s3020_s24 + $0x58] sm:$0xf] %v252_v22  ;;  %v254_v23 = vld [vmem:[%s3013_s14 + $0xb8] sm:$0xf] }
  0x29   : > { %v256_v24 = vld [vmem:[%s3013_s14 + $0xc0] sm:$0xf]  ;;  %v258_v25 = vld [vmem:[%s3013_s14 + $0xc8] sm:$0xf]  ;;  %255 = vst [vmem:[%s3020_s24 + $0x5c] sm:$0xf] %v254_v23 }
  0x2a   : > { %257 = vst [vmem:[%s3020_s24 + $0x60] sm:$0xf] %v256_v24  ;;  %259 = vst [vmem:[%s3020_s24 + $0x64] sm:$0xf] %v258_v25  ;;  %v260_v26 = vld [vmem:[%s3013_s14 + $0xd0] sm:$0xf] }
  0x2b   : > { %v262_v27 = vld [vmem:[%s3013_s14 + $0xd8] sm:$0xf]  ;;  %v264_v28 = vld [vmem:[%s3013_s14 + $0xe0] sm:$0xf]  ;;  %261 = vst [vmem:[%s3020_s24 + $0x68] sm:$0xf] %v260_v26 }
  0x2c   : > { %263 = vst [vmem:[%s3020_s24 + $0x6c] sm:$0xf] %v262_v27  ;;  %265 = vst [vmem:[%s3020_s24 + $0x70] sm:$0xf] %v264_v28  ;;  %v266_v29 = vld [vmem:[%s3013_s14 + $0xe8] sm:$0xf] }
  0x2d   : > { %v268_v30 = vld [vmem:[%s3013_s14 + $0xf0] sm:$0xf]  ;;  %v270_v31 = vld [vmem:[%s3013_s14 + $0xf8] sm:$0xf]  ;;  %267 = vst [vmem:[%s3020_s24 + $0x74] sm:$0xf] %v266_v29 }
  0x2e   : > { %269 = vst [vmem:[%s3020_s24 + $0x78] sm:$0xf] %v268_v30  ;;  %271 = vst [vmem:[%s3020_s24 + $0x7c] sm:$0xf] %v270_v31  ;;  %v272_v32 = vld [vmem:[%s3013_s14 + $0x100] sm:$0xf] }
  0x2f   : > { %v274_v33 = vld [vmem:[%s3013_s14 + $0x108] sm:$0xf]  ;;  %v276_v34 = vld [vmem:[%s3013_s14 + $0x110] sm:$0xf]  ;;  %273 = vst [vmem:[%s3020_s24 + $0x80] sm:$0xf] %v272_v32 }
  0x30   : > { %275 = vst [vmem:[%s3020_s24 + $0x84] sm:$0xf] %v274_v33  ;;  %277 = vst [vmem:[%s3020_s24 + $0x88] sm:$0xf] %v276_v34  ;;  %v278_v35 = vld [vmem:[%s3013_s14 + $0x118] sm:$0xf] }
  0x31   : > { %v280_v36 = vld [vmem:[%s3013_s14 + $0x120] sm:$0xf]  ;;  %v282_v37 = vld [vmem:[%s3013_s14 + $0x128] sm:$0xf]  ;;  %279 = vst [vmem:[%s3020_s24 + $0x8c] sm:$0xf] %v278_v35 }
  0x32   : > { %281 = vst [vmem:[%s3020_s24 + $0x90] sm:$0xf] %v280_v36  ;;  %283 = vst [vmem:[%s3020_s24 + $0x94] sm:$0xf] %v282_v37  ;;  %v284_v38 = vld [vmem:[%s3013_s14 + $0x130] sm:$0xf] }
  0x33   : > { %v286_v39 = vld [vmem:[%s3013_s14 + $0x138] sm:$0xf]  ;;  %v288_v40 = vld [vmem:[%s3013_s14 + $0x140] sm:$0xf]  ;;  %285 = vst [vmem:[%s3020_s24 + $0x98] sm:$0xf] %v284_v38 }
  0x34   : > { %287 = vst [vmem:[%s3020_s24 + $0x9c] sm:$0xf] %v286_v39  ;;  %289 = vst [vmem:[%s3020_s24 + $0xa0] sm:$0xf] %v288_v40  ;;  %v290_v41 = vld [vmem:[%s3013_s14 + $0x148] sm:$0xf] }
  0x35   : > { %v292_v42 = vld [vmem:[%s3013_s14 + $0x150] sm:$0xf]  ;;  %v294_v43 = vld [vmem:[%s3013_s14 + $0x158] sm:$0xf]  ;;  %291 = vst [vmem:[%s3020_s24 + $0xa4] sm:$0xf] %v290_v41 }
  0x36   : > { %293 = vst [vmem:[%s3020_s24 + $0xa8] sm:$0xf] %v292_v42  ;;  %295 = vst [vmem:[%s3020_s24 + $0xac] sm:$0xf] %v294_v43  ;;  %v296_v44 = vld [vmem:[%s3013_s14 + $0x160] sm:$0xf] }
  0x37   : > { %v298_v45 = vld [vmem:[%s3013_s14 + $0x168] sm:$0xf]  ;;  %v300_v46 = vld [vmem:[%s3013_s14 + $0x170] sm:$0xf]  ;;  %297 = vst [vmem:[%s3020_s24 + $0xb0] sm:$0xf] %v296_v44 }
  0x38   : > { %299 = vst [vmem:[%s3020_s24 + $0xb4] sm:$0xf] %v298_v45  ;;  %301 = vst [vmem:[%s3020_s24 + $0xb8] sm:$0xf] %v300_v46  ;;  %v302_v47 = vld [vmem:[%s3013_s14 + $0x178] sm:$0xf] }
  0x39   : > { %v304_v48 = vld [vmem:[%s3013_s14 + $0x180] sm:$0xf]  ;;  %v306_v49 = vld [vmem:[%s3013_s14 + $0x188] sm:$0xf]  ;;  %303 = vst [vmem:[%s3020_s24 + $0xbc] sm:$0xf] %v302_v47 }
  0x3a   : > { %305 = vst [vmem:[%s3020_s24 + $0xc0] sm:$0xf] %v304_v48  ;;  %307 = vst [vmem:[%s3020_s24 + $0xc4] sm:$0xf] %v306_v49  ;;  %v308_v50 = vld [vmem:[%s3013_s14 + $0x190] sm:$0xf] }
  0x3b   : > { %v310_v51 = vld [vmem:[%s3013_s14 + $0x198] sm:$0xf]  ;;  %v312_v52 = vld [vmem:[%s3013_s14 + $0x1a0] sm:$0xf]  ;;  %309 = vst [vmem:[%s3020_s24 + $0xc8] sm:$0xf] %v308_v50 }
  0x3c   : > { %311 = vst [vmem:[%s3020_s24 + $0xcc] sm:$0xf] %v310_v51  ;;  %313 = vst [vmem:[%s3020_s24 + $0xd0] sm:$0xf] %v312_v52  ;;  %v314_v53 = vld [vmem:[%s3013_s14 + $0x1a8] sm:$0xf] }
  0x3d   : > { %v316_v54 = vld [vmem:[%s3013_s14 + $0x1b0] sm:$0xf]  ;;  %v318_v55 = vld [vmem:[%s3013_s14 + $0x1b8] sm:$0xf]  ;;  %315 = vst [vmem:[%s3020_s24 + $0xd4] sm:$0xf] %v314_v53 }
  0x3e   : > { %317 = vst [vmem:[%s3020_s24 + $0xd8] sm:$0xf] %v316_v54  ;;  %319 = vst [vmem:[%s3020_s24 + $0xdc] sm:$0xf] %v318_v55  ;;  %v320_v56 = vld [vmem:[%s3013_s14 + $0x1c0] sm:$0xf] }
  0x3f   : > { %v322_v57 = vld [vmem:[%s3013_s14 + $0x1c8] sm:$0xf]  ;;  %v324_v58 = vld [vmem:[%s3013_s14 + $0x1d0] sm:$0xf]  ;;  %321 = vst [vmem:[%s3020_s24 + $0xe0] sm:$0xf] %v320_v56 }
  0x40   : > { %323 = vst [vmem:[%s3020_s24 + $0xe4] sm:$0xf] %v322_v57  ;;  %325 = vst [vmem:[%s3020_s24 + $0xe8] sm:$0xf] %v324_v58  ;;  %v326_v59 = vld [vmem:[%s3013_s14 + $0x1d8] sm:$0xf] }
  0x41   : > { %v328_v60 = vld [vmem:[%s3013_s14 + $0x1e0] sm:$0xf]  ;;  %v330_v61 = vld [vmem:[%s3013_s14 + $0x1e8] sm:$0xf]  ;;  %327 = vst [vmem:[%s3020_s24 + $0xec] sm:$0xf] %v326_v59 }
  0x42   : > { %329 = vst [vmem:[%s3020_s24 + $0xf0] sm:$0xf] %v328_v60  ;;  %331 = vst [vmem:[%s3020_s24 + $0xf4] sm:$0xf] %v330_v61  ;;  %v332_v62 = vld [vmem:[%s3013_s14 + $0x1f0] sm:$0xf] }
  0x43   : > { %v334_v63 = vld [vmem:[%s3013_s14 + $0x1f8] sm:$0xf]  ;;  %v336_v0 = vld [vmem:[%s3013_s14 + $0x200] sm:$0xf]  ;;  %333 = vst [vmem:[%s3020_s24 + $0xf8] sm:$0xf] %v332_v62 }
  0x44   : > { %335 = vst [vmem:[%s3020_s24 + $0xfc] sm:$0xf] %v334_v63  ;;  %337 = vst [vmem:[%s3020_s24 + $0x100] sm:$0xf] %v336_v0  ;;  %v338_v1 = vld [vmem:[%s3013_s14 + $0x208] sm:$0xf] }
  0x45   : > { %v340_v2 = vld [vmem:[%s3013_s14 + $0x210] sm:$0xf]  ;;  %v342_v3 = vld [vmem:[%s3013_s14 + $0x218] sm:$0xf]  ;;  %339 = vst [vmem:[%s3020_s24 + $0x104] sm:$0xf] %v338_v1 }
  0x46   : > { %341 = vst [vmem:[%s3020_s24 + $0x108] sm:$0xf] %v340_v2  ;;  %343 = vst [vmem:[%s3020_s24 + $0x10c] sm:$0xf] %v342_v3  ;;  %v344_v4 = vld [vmem:[%s3013_s14 + $0x220] sm:$0xf] }
  0x47   : > { %v346_v5 = vld [vmem:[%s3013_s14 + $0x228] sm:$0xf]  ;;  %v348_v6 = vld [vmem:[%s3013_s14 + $0x230] sm:$0xf]  ;;  %345 = vst [vmem:[%s3020_s24 + $0x110] sm:$0xf] %v344_v4 }
  0x48   : > { %347 = vst [vmem:[%s3020_s24 + $0x114] sm:$0xf] %v346_v5  ;;  %349 = vst [vmem:[%s3020_s24 + $0x118] sm:$0xf] %v348_v6  ;;  %v350_v7 = vld [vmem:[%s3013_s14 + $0x238] sm:$0xf] }
  0x49   : > { %v352_v8 = vld [vmem:[%s3013_s14 + $0x240] sm:$0xf]  ;;  %v354_v9 = vld [vmem:[%s3013_s14 + $0x248] sm:$0xf]  ;;  %351 = vst [vmem:[%s3020_s24 + $0x11c] sm:$0xf] %v350_v7 }
  0x4a   : > { %353 = vst [vmem:[%s3020_s24 + $0x120] sm:$0xf] %v352_v8  ;;  %355 = vst [vmem:[%s3020_s24 + $0x124] sm:$0xf] %v354_v9  ;;  %v356_v10 = vld [vmem:[%s3013_s14 + $0x250] sm:$0xf] }
  0x4b   : > { %v358_v11 = vld [vmem:[%s3013_s14 + $0x258] sm:$0xf]  ;;  %v360_v12 = vld [vmem:[%s3013_s14 + $0x260] sm:$0xf]  ;;  %357 = vst [vmem:[%s3020_s24 + $0x128] sm:$0xf] %v356_v10 }
  0x4c   : > { %359 = vst [vmem:[%s3020_s24 + $0x12c] sm:$0xf] %v358_v11  ;;  %361 = vst [vmem:[%s3020_s24 + $0x130] sm:$0xf] %v360_v12  ;;  %v362_v13 = vld [vmem:[%s3013_s14 + $0x268] sm:$0xf] }
  0x4d   : > { %v364_v14 = vld [vmem:[%s3013_s14 + $0x270] sm:$0xf]  ;;  %v366_v15 = vld [vmem:[%s3013_s14 + $0x278] sm:$0xf]  ;;  %363 = vst [vmem:[%s3020_s24 + $0x134] sm:$0xf] %v362_v13 }
  0x4e   : > { %365 = vst [vmem:[%s3020_s24 + $0x138] sm:$0xf] %v364_v14  ;;  %367 = vst [vmem:[%s3020_s24 + $0x13c] sm:$0xf] %v366_v15  ;;  %v368_v16 = vld [vmem:[%s3013_s14 + $0x280] sm:$0xf] }
  0x4f   : > { %v370_v17 = vld [vmem:[%s3013_s14 + $0x288] sm:$0xf]  ;;  %v372_v18 = vld [vmem:[%s3013_s14 + $0x290] sm:$0xf]  ;;  %369 = vst [vmem:[%s3020_s24 + $0x140] sm:$0xf] %v368_v16 }
  0x50   : > { %371 = vst [vmem:[%s3020_s24 + $0x144] sm:$0xf] %v370_v17  ;;  %373 = vst [vmem:[%s3020_s24 + $0x148] sm:$0xf] %v372_v18  ;;  %v374_v19 = vld [vmem:[%s3013_s14 + $0x298] sm:$0xf] }
  0x51   : > { %v376_v20 = vld [vmem:[%s3013_s14 + $0x2a0] sm:$0xf]  ;;  %v378_v21 = vld [vmem:[%s3013_s14 + $0x2a8] sm:$0xf]  ;;  %375 = vst [vmem:[%s3020_s24 + $0x14c] sm:$0xf] %v374_v19 }
  0x52   : > { %377 = vst [vmem:[%s3020_s24 + $0x150] sm:$0xf] %v376_v20  ;;  %379 = vst [vmem:[%s3020_s24 + $0x154] sm:$0xf] %v378_v21  ;;  %v380_v22 = vld [vmem:[%s3013_s14 + $0x2b0] sm:$0xf] }
  0x53   : > { %v382_v23 = vld [vmem:[%s3013_s14 + $0x2b8] sm:$0xf]  ;;  %v384_v24 = vld [vmem:[%s3013_s14 + $0x2c0] sm:$0xf]  ;;  %381 = vst [vmem:[%s3020_s24 + $0x158] sm:$0xf] %v380_v22 }
  0x54   : > { %383 = vst [vmem:[%s3020_s24 + $0x15c] sm:$0xf] %v382_v23  ;;  %385 = vst [vmem:[%s3020_s24 + $0x160] sm:$0xf] %v384_v24  ;;  %v386_v25 = vld [vmem:[%s3013_s14 + $0x2c8] sm:$0xf] }
  0x55   : > { %v388_v26 = vld [vmem:[%s3013_s14 + $0x2d0] sm:$0xf]  ;;  %v390_v27 = vld [vmem:[%s3013_s14 + $0x2d8] sm:$0xf]  ;;  %387 = vst [vmem:[%s3020_s24 + $0x164] sm:$0xf] %v386_v25 }
  0x56   : > { %389 = vst [vmem:[%s3020_s24 + $0x168] sm:$0xf] %v388_v26  ;;  %391 = vst [vmem:[%s3020_s24 + $0x16c] sm:$0xf] %v390_v27  ;;  %v392_v28 = vld [vmem:[%s3013_s14 + $0x2e0] sm:$0xf] }
  0x57   : > { %v394_v29 = vld [vmem:[%s3013_s14 + $0x2e8] sm:$0xf]  ;;  %v396_v30 = vld [vmem:[%s3013_s14 + $0x2f0] sm:$0xf]  ;;  %393 = vst [vmem:[%s3020_s24 + $0x170] sm:$0xf] %v392_v28 }
  0x58   : > { %395 = vst [vmem:[%s3020_s24 + $0x174] sm:$0xf] %v394_v29  ;;  %397 = vst [vmem:[%s3020_s24 + $0x178] sm:$0xf] %v396_v30  ;;  %v398_v31 = vld [vmem:[%s3013_s14 + $0x2f8] sm:$0xf] }
  0x59   : > { %v400_v32 = vld [vmem:[%s3013_s14 + $0x300] sm:$0xf]  ;;  %v402_v33 = vld [vmem:[%s3013_s14 + $0x308] sm:$0xf]  ;;  %399 = vst [vmem:[%s3020_s24 + $0x17c] sm:$0xf] %v398_v31 }
  0x5a   : > { %401 = vst [vmem:[%s3020_s24 + $0x180] sm:$0xf] %v400_v32  ;;  %403 = vst [vmem:[%s3020_s24 + $0x184] sm:$0xf] %v402_v33  ;;  %v404_v34 = vld [vmem:[%s3013_s14 + $0x310] sm:$0xf] }
  0x5b   : > { %v406_v35 = vld [vmem:[%s3013_s14 + $0x318] sm:$0xf]  ;;  %v408_v36 = vld [vmem:[%s3013_s14 + $0x320] sm:$0xf]  ;;  %405 = vst [vmem:[%s3020_s24 + $0x188] sm:$0xf] %v404_v34 }
  0x5c   : > { %407 = vst [vmem:[%s3020_s24 + $0x18c] sm:$0xf] %v406_v35  ;;  %409 = vst [vmem:[%s3020_s24 + $0x190] sm:$0xf] %v408_v36  ;;  %v410_v37 = vld [vmem:[%s3013_s14 + $0x328] sm:$0xf] }
  0x5d   : > { %v412_v38 = vld [vmem:[%s3013_s14 + $0x330] sm:$0xf]  ;;  %v414_v39 = vld [vmem:[%s3013_s14 + $0x338] sm:$0xf]  ;;  %411 = vst [vmem:[%s3020_s24 + $0x194] sm:$0xf] %v410_v37 }
  0x5e   : > { %413 = vst [vmem:[%s3020_s24 + $0x198] sm:$0xf] %v412_v38  ;;  %415 = vst [vmem:[%s3020_s24 + $0x19c] sm:$0xf] %v414_v39  ;;  %v416_v40 = vld [vmem:[%s3013_s14 + $0x340] sm:$0xf] }
  0x5f   : > { %v418_v41 = vld [vmem:[%s3013_s14 + $0x348] sm:$0xf]  ;;  %v420_v42 = vld [vmem:[%s3013_s14 + $0x350] sm:$0xf]  ;;  %417 = vst [vmem:[%s3020_s24 + $0x1a0] sm:$0xf] %v416_v40 }
  0x60   : > { %419 = vst [vmem:[%s3020_s24 + $0x1a4] sm:$0xf] %v418_v41  ;;  %421 = vst [vmem:[%s3020_s24 + $0x1a8] sm:$0xf] %v420_v42  ;;  %v422_v43 = vld [vmem:[%s3013_s14 + $0x358] sm:$0xf] }
  0x61   : > { %v424_v44 = vld [vmem:[%s3013_s14 + $0x360] sm:$0xf]  ;;  %v426_v45 = vld [vmem:[%s3013_s14 + $0x368] sm:$0xf]  ;;  %423 = vst [vmem:[%s3020_s24 + $0x1ac] sm:$0xf] %v422_v43 }
  0x62   : > { %425 = vst [vmem:[%s3020_s24 + $0x1b0] sm:$0xf] %v424_v44  ;;  %427 = vst [vmem:[%s3020_s24 + $0x1b4] sm:$0xf] %v426_v45  ;;  %v428_v46 = vld [vmem:[%s3013_s14 + $0x370] sm:$0xf] }
  0x63   : > { %v430_v47 = vld [vmem:[%s3013_s14 + $0x378] sm:$0xf]  ;;  %v432_v48 = vld [vmem:[%s3013_s14 + $0x380] sm:$0xf]  ;;  %429 = vst [vmem:[%s3020_s24 + $0x1b8] sm:$0xf] %v428_v46 }
  0x64   : > { %431 = vst [vmem:[%s3020_s24 + $0x1bc] sm:$0xf] %v430_v47  ;;  %433 = vst [vmem:[%s3020_s24 + $0x1c0] sm:$0xf] %v432_v48  ;;  %v434_v49 = vld [vmem:[%s3013_s14 + $0x388] sm:$0xf] }
  0x65   : > { %v436_v50 = vld [vmem:[%s3013_s14 + $0x390] sm:$0xf]  ;;  %v438_v51 = vld [vmem:[%s3013_s14 + $0x398] sm:$0xf]  ;;  %435 = vst [vmem:[%s3020_s24 + $0x1c4] sm:$0xf] %v434_v49 }
  0x66   : > { %437 = vst [vmem:[%s3020_s24 + $0x1c8] sm:$0xf] %v436_v50  ;;  %439 = vst [vmem:[%s3020_s24 + $0x1cc] sm:$0xf] %v438_v51  ;;  %v440_v52 = vld [vmem:[%s3013_s14 + $0x3a0] sm:$0xf] }
  0x67   : > { %v442_v53 = vld [vmem:[%s3013_s14 + $0x3a8] sm:$0xf]  ;;  %v444_v54 = vld [vmem:[%s3013_s14 + $0x3b0] sm:$0xf]  ;;  %441 = vst [vmem:[%s3020_s24 + $0x1d0] sm:$0xf] %v440_v52 }
  0x68   : > { %443 = vst [vmem:[%s3020_s24 + $0x1d4] sm:$0xf] %v442_v53  ;;  %445 = vst [vmem:[%s3020_s24 + $0x1d8] sm:$0xf] %v444_v54  ;;  %v446_v55 = vld [vmem:[%s3013_s14 + $0x3b8] sm:$0xf] }
  0x69   : > { %v448_v56 = vld [vmem:[%s3013_s14 + $0x3c0] sm:$0xf]  ;;  %v450_v57 = vld [vmem:[%s3013_s14 + $0x3c8] sm:$0xf]  ;;  %447 = vst [vmem:[%s3020_s24 + $0x1dc] sm:$0xf] %v446_v55 }
  0x6a   : > { %449 = vst [vmem:[%s3020_s24 + $0x1e0] sm:$0xf] %v448_v56  ;;  %451 = vst [vmem:[%s3020_s24 + $0x1e4] sm:$0xf] %v450_v57  ;;  %v452_v58 = vld [vmem:[%s3013_s14 + $0x3d0] sm:$0xf] }
  0x6b   : > { %v454_v59 = vld [vmem:[%s3013_s14 + $0x3d8] sm:$0xf]  ;;  %v456_v60 = vld [vmem:[%s3013_s14 + $0x3e0] sm:$0xf]  ;;  %453 = vst [vmem:[%s3020_s24 + $0x1e8] sm:$0xf] %v452_v58 }
  0x6c   : > { %455 = vst [vmem:[%s3020_s24 + $0x1ec] sm:$0xf] %v454_v59  ;;  %457 = vst [vmem:[%s3020_s24 + $0x1f0] sm:$0xf] %v456_v60  ;;  %v458_v61 = vld [vmem:[%s3013_s14 + $0x3e8] sm:$0xf] }
  0x6d   : > { %v460_v62 = vld [vmem:[%s3013_s14 + $0x3f0] sm:$0xf]  ;;  %v462_v63 = vld [vmem:[%s3013_s14 + $0x3f8] sm:$0xf]  ;;  %459 = vst [vmem:[%s3020_s24 + $0x1f4] sm:$0xf] %v458_v61 }
  0x6e   : > { %461 = vst [vmem:[%s3020_s24 + $0x1f8] sm:$0xf] %v460_v62  ;;  %463 = vst [vmem:[%s3020_s24 + $0x1fc] sm:$0xf] %v462_v63  ;;  %v464_v0 = vld [vmem:[%s3013_s14 + $0x400] sm:$0xf] }
  0x6f   : > { %v466_v1 = vld [vmem:[%s3013_s14 + $0x408] sm:$0xf]  ;;  %v468_v2 = vld [vmem:[%s3013_s14 + $0x410] sm:$0xf]  ;;  %465 = vst [vmem:[%s3020_s24 + $0x200] sm:$0xf] %v464_v0 }
  0x70   : > { %467 = vst [vmem:[%s3020_s24 + $0x204] sm:$0xf] %v466_v1  ;;  %469 = vst [vmem:[%s3020_s24 + $0x208] sm:$0xf] %v468_v2  ;;  %v470_v3 = vld [vmem:[%s3013_s14 + $0x418] sm:$0xf] }
  0x71   : > { %v472_v4 = vld [vmem:[%s3013_s14 + $0x420] sm:$0xf]  ;;  %v474_v5 = vld [vmem:[%s3013_s14 + $0x428] sm:$0xf]  ;;  %471 = vst [vmem:[%s3020_s24 + $0x20c] sm:$0xf] %v470_v3 }
  0x72   : > { %473 = vst [vmem:[%s3020_s24 + $0x210] sm:$0xf] %v472_v4  ;;  %475 = vst [vmem:[%s3020_s24 + $0x214] sm:$0xf] %v474_v5  ;;  %v476_v6 = vld [vmem:[%s3013_s14 + $0x430] sm:$0xf] }
  0x73   : > { %v478_v7 = vld [vmem:[%s3013_s14 + $0x438] sm:$0xf]  ;;  %v480_v8 = vld [vmem:[%s3013_s14 + $0x440] sm:$0xf]  ;;  %477 = vst [vmem:[%s3020_s24 + $0x218] sm:$0xf] %v476_v6 }
  0x74   : > { %479 = vst [vmem:[%s3020_s24 + $0x21c] sm:$0xf] %v478_v7  ;;  %481 = vst [vmem:[%s3020_s24 + $0x220] sm:$0xf] %v480_v8  ;;  %v482_v9 = vld [vmem:[%s3013_s14 + $0x448] sm:$0xf] }
  0x75   : > { %v484_v10 = vld [vmem:[%s3013_s14 + $0x450] sm:$0xf]  ;;  %v486_v11 = vld [vmem:[%s3013_s14 + $0x458] sm:$0xf]  ;;  %483 = vst [vmem:[%s3020_s24 + $0x224] sm:$0xf] %v482_v9 }
  0x76   : > { %485 = vst [vmem:[%s3020_s24 + $0x228] sm:$0xf] %v484_v10  ;;  %487 = vst [vmem:[%s3020_s24 + $0x22c] sm:$0xf] %v486_v11  ;;  %v488_v12 = vld [vmem:[%s3013_s14 + $0x460] sm:$0xf] }
  0x77   : > { %v490_v13 = vld [vmem:[%s3013_s14 + $0x468] sm:$0xf]  ;;  %v492_v14 = vld [vmem:[%s3013_s14 + $0x470] sm:$0xf]  ;;  %489 = vst [vmem:[%s3020_s24 + $0x230] sm:$0xf] %v488_v12 }
  0x78   : > { %491 = vst [vmem:[%s3020_s24 + $0x234] sm:$0xf] %v490_v13  ;;  %493 = vst [vmem:[%s3020_s24 + $0x238] sm:$0xf] %v492_v14  ;;  %v494_v15 = vld [vmem:[%s3013_s14 + $0x478] sm:$0xf] }
  0x79   : > { %495 = vst [vmem:[%s3020_s24 + $0x23c] sm:$0xf] %v494_v15 }
  0x7a PF: > { %p2265_p11 = scmp.ge.s32.totalorder %s2906_s23, 1  ;;  %p818_p12 = scmp.lt.s32.totalorder %s2906_s23, 5 }
  0x7c   : > { %p819_p13 = pnand %p2265_p11, %p818_p12 }
  0x7e   : > { %822 = sbr.rel (%p819_p13) target bundleno = 455 (0x1c7), region = 73 }
  0x83   : > { %s825_s27 = sand.u32 1, %s2882_s17   ;;  %s2267_s17 = sshll.u32 %s2894_s20, 3 }
  0x84   : > { %s2638_s28 = smul.u32 576, %s825_s27  ;;  %p862_p0 = scmp.lt.s32.totalorder %s2267_s17, 15 }
  0x85   : > { %p868_p1 = scmp.lt.s32.totalorder %s2890_s19, 1 }
  0x86   : > { %s3308_s29 = scalar_lea.vmem [#allocation2], %s2638_s28  ;;  %s3552_s17 = smov (!%p862_p0, %s2267_s17), 15 }
  0x87   : > { %v2712_v16 = vld [vmem:[%s3308_s29 + $0x78] sm:$0xff]   ;;  %v2716_v20 = vld [vmem:[%s3308_s29 + $0x70] sm:$0xff]   ;;  %v2720_v24 = vld [vmem:[%s3308_s29 + $0x68] sm:$0xff]   ;;  %s2639_s5 = smul.u32 36, %s3552_s17 }
  0x88   : > { %v2713_v17 = vld [vmem:[%s3308_s29 + $0xf8] sm:$0xff]   ;;  %2425 = vmatprep.subr.bf16.mxu0 %v2712_v16  ;;  %v2717_v21 = vld [vmem:[%s3308_s29 + $0xf0] sm:$0xff]   ;;  %v2721_v25 = vld [vmem:[%s3308_s29 + $0xe8] sm:$0xff]   ;;  %s3460_s11 = scalar_select %p868_p1, %s2890_s19, 1 }
  0x89   : > { %v2714_v18 = vld [vmem:[%s3308_s29 + $0x38] sm:$0xff]   ;;  %2465 = vmatprep.subr.bf16.mxu1 %v2713_v17  ;;  %v2718_v22 = vld [vmem:[%s3308_s29 + $0x30] sm:$0xff]   ;;  %v2722_v26 = vld [vmem:[%s3308_s29 + $0x28] sm:$0xff]   ;;  %s3344_s10 = scalar_lea.vmem %s3521_s0, %s2639_s5  ;;  %s2401_s5 = sshll.u32 (%p3000_p9), %s2894_s20, 4 }
  0x8a   : > { %v2715_v19 = vld [vmem:[%s3308_s29 + $0xb8] sm:$0xff]   ;;  %2426 = vmatpush3.bf16.msra.mxu0 %v2714_v18  ;;  %v2719_v23 = vld [vmem:[%s3308_s29 + $0xb0] sm:$0xff]   ;;  %v2723_v27 = vld [vmem:[%s3308_s29 + $0xa8] sm:$0xff]   ;;  %s870_s14 = scalar_lea.vmem %s3523_s2, %s3460_s11  ;;  %s873_s28 = scalar_lea.vmem %s3524_s3, %s3460_s11 }
  0x8b   : > { %2466 = vmatpush3.bf16.msra.mxu1 %v2715_v19  ;;  %2427 = vmatprep.subr.bf16.mxu0 %v2716_v20  ;;  %v2724_v28 = vld [vmem:[%s3308_s29 + $0x60] sm:$0xff]   ;;  %v2728_v32 = vld [vmem:[%s3308_s29 + $0x58] sm:$0xff]   ;;  %v2732_v36 = vld [vmem:[%s3308_s29 + $0x50] sm:$0xff]   ;;  %s2088_s6 = sadd.s32 (%p3000_p9), %s2890_s19, %s2401_s5 }
  0x8c   : > { %2467 = vmatprep.subr.bf16.mxu1 %v2717_v21  ;;  %v2725_v29 = vld [vmem:[%s3308_s29 + $0xe0] sm:$0xff]   ;;  %v2729_v33 = vld [vmem:[%s3308_s29 + $0xd8] sm:$0xff]   ;;  %v2733_v37 = vld [vmem:[%s3308_s29 + $0xd0] sm:$0xff]   ;;  %s2390_s9 = sshll.u32 (%p3000_p9), %s2088_s6, 2 }
  0x8d   : > { %v2726_v30 = vld [vmem:[%s3308_s29 + $0x20] sm:$0xff]   ;;  %v2730_v34 = vld [vmem:[%s3308_s29 + $0x18] sm:$0xff]   ;;  %v2734_v38 = vld [vmem:[%s3308_s29 + $0x10] sm:$0xff]   ;;  %s2090_s12 = scalar_lea.vmem (%p3000_p9), %s3525_s4, %s2390_s9 }
  0x8e   : > { %2428 = vmatpush3.bf16.msra.mxu0 %v2718_v22  ;;  %v2727_v31 = vld [vmem:[%s3308_s29 + $0xa0] sm:$0xff]   ;;  %v2731_v35 = vld [vmem:[%s3308_s29 + $0x98] sm:$0xff]   ;;  %v2735_v39 = vld [vmem:[%s3308_s29 + $0x90] sm:$0xff]  }
  0x8f   : > { %2468 = vmatpush3.bf16.msra.mxu1 %v2719_v23  ;;  %2429 = vmatprep.subr.bf16.mxu0 %v2720_v24  ;;  %v2736_v40 = vld [vmem:[%s3308_s29 + $0x48] sm:$0xff]   ;;  %v2740_v44 = vld [vmem:[%s3308_s29 + $0x40] sm:$0xff]   ;;  %v2750_v52 = vld [vmem:[%s3308_s29 + $0x178] sm:$0xff]  }
  0x90   : > { %2469 = vmatprep.subr.bf16.mxu1 %v2721_v25  ;;  %v2737_v41 = vld [vmem:[%s3308_s29 + $0xc8] sm:$0xff]   ;;  %v2741_v45 = vld [vmem:[%s3308_s29 + $0xc0] sm:$0xff]   ;;  %v2751_v53 = vld [vmem:[%s3308_s29 + $0x1f8] sm:$0xff]  }
  0x91   : > { %v2738_v42 = vld [vmem:[%s3308_s29 + $0x8] sm:$0xff]   ;;  %v2742_v46 = vld [vmem:[%s3308_s29] sm:$0xff]   ;;  %v2752_v54 = vld [vmem:[%s3308_s29 + $0x138] sm:$0xff]  }
  0x92   : > { %2430 = vmatpush3.bf16.msra.mxu0 %v2722_v26  ;;  %v2739_v43 = vld [vmem:[%s3308_s29 + $0x88] sm:$0xff]   ;;  %v2743_v47 = vld [vmem:[%s3308_s29 + $0x80] sm:$0xff]   ;;  %v2753_v55 = vld [vmem:[%s3308_s29 + $0x1b8] sm:$0xff]  }
  0x93   : > { %2470 = vmatpush3.bf16.msra.mxu1 %v2723_v27  ;;  %2431 = vmatprep.subr.bf16.mxu0 %v2724_v28  ;;  %v2744_v48 = vld [vmem:[%s3344_s10] ss:$36 sps:$4 sm:$0xff]   ;;  %v2747_v50 = vld [vmem:[%s3344_s10 + $0x8] ss:$36 sps:$4 sm:$0xff]   ;;  %v2754_v56 = vld [vmem:[%s3308_s29 + $0x170] sm:$0xff]  }
  0x94   : > { %2471 = vmatprep.subr.bf16.mxu1 %v2725_v29  ;;  %v2746_v49 = vld [vmem:[%s3344_s10 + $0x4] ss:$36 sps:$4 sm:$0xff]   ;;  %v2749_v51 = vld [vmem:[%s3344_s10 + $0xc] ss:$36 sps:$4 sm:$0xff]   ;;  %v2760_v61 = vld [vmem:[%s3344_s10 + $0x54] ss:$36 sps:$4 sm:$0xff]  }
  0x95   : > { %1708 = vmatprep.mubr.bf16.mxu0 %v2746_v49  ;;  %1773 = vmatprep.mubr.bf16.mxu1 %v2749_v51  ;;  %v2755_v57 = vld [vmem:[%s3308_s29 + $0x1f0] sm:$0xff]   ;;  %v2762_v62 = vld [vmem:[%s3344_s10 + $0x48] ss:$36 sps:$4 sm:$0xff]   ;;  %v2768_v4 = vld [vmem:[%s3308_s29 + $0x160] sm:$0xff]  }
  0x96   : > { %2432 = vmatpush3.bf16.msra.mxu0 %v2726_v30  ;;  %v2756_v58 = vld [vmem:[%s3308_s29 + $0x130] sm:$0xff]   ;;  %v2764_v0 = vld [vmem:[%s3308_s29 + $0x168] sm:$0xff]   ;;  %v2769_v5 = vld [vmem:[%s3308_s29 + $0x1e0] sm:$0xff]  }
  0x97   : > { %2472 = vmatpush3.bf16.msra.mxu1 %v2727_v31  ;;  %2433 = vmatprep.subr.bf16.mxu0 %v2728_v32  ;;  %v2757_v59 = vld [vmem:[%s3308_s29 + $0x1b0] sm:$0xff]   ;;  %v2765_v1 = vld [vmem:[%s3308_s29 + $0x1e8] sm:$0xff]   ;;  %v2770_v6 = vld [vmem:[%s3308_s29 + $0x120] sm:$0xff]  }
  0x98   : > { %2473 = vmatprep.subr.bf16.mxu1 %v2729_v33  ;;  %v2758_v60 = vld [vmem:[%s3344_s10 + $0x4c] ss:$36 sps:$4 sm:$0xff]   ;;  %v2771_v7 = vld [vmem:[%s3308_s29 + $0x1a0] sm:$0xff]   ;;  %v2772_v8 = vld [vmem:[%s3344_s10 + $0x94] ss:$36 sps:$4 sm:$0xff]  }
  0x99   : > { %v2763_v63 = vld [vmem:[%s3344_s10 + $0x50] ss:$36 sps:$4 sm:$0xff]   ;;  %v2766_v2 = vld [vmem:[%s3308_s29 + $0x128] sm:$0xff]   ;;  %v2774_v9 = vld [vmem:[%s3344_s10 + $0x9c] ss:$36 sps:$4 sm:$0xff]  }
  0x9a   : > { %2434 = vmatpush3.bf16.msra.mxu0 %v2730_v34  ;;  %v2767_v3 = vld [vmem:[%s3308_s29 + $0x1a8] sm:$0xff]   ;;  %v2776_v10 = vld [vmem:[%s3344_s10 + $0x90] ss:$36 sps:$4 sm:$0xff]   ;;  %v2777_v11 = vld [vmem:[%s3344_s10 + $0x98] ss:$36 sps:$4 sm:$0xff]  }
  0x9b   : > { %2474 = vmatpush3.bf16.msra.mxu1 %v2731_v35  ;;  %2435 = vmatprep.subr.bf16.mxu0 %v2732_v36  ;;  %v2778_v12 = vld [vmem:[%s3308_s29 + $0x158] sm:$0xff]   ;;  %v2782_v16 = vld [vmem:[%s3308_s29 + $0x150] sm:$0xff]   ;;  %v2788_v21 = vld [vmem:[%s3344_s10 + $0xe4] ss:$36 sps:$4 sm:$0xff]  }
  0x9c   : > { %2475 = vmatprep.subr.bf16.mxu1 %v2733_v37  ;;  %v2779_v13 = vld [vmem:[%s3308_s29 + $0x1d8] sm:$0xff]   ;;  %v2783_v17 = vld [vmem:[%s3308_s29 + $0x1d0] sm:$0xff]   ;;  %v2791_v23 = vld [vmem:[%s3344_s10 + $0xe0] ss:$36 sps:$4 sm:$0xff]  }
  0x9d   : > { %v2780_v14 = vld [vmem:[%s3308_s29 + $0x118] sm:$0xff]   ;;  %v2784_v18 = vld [vmem:[%s3308_s29 + $0x110] sm:$0xff]   ;;  %v2792_v24 = vld [vmem:[%s3308_s29 + $0x148] sm:$0xff]  }
  0x9e   : > { %2436 = vmatpush3.bf16.msra.mxu0 %v2734_v38  ;;  %v2781_v15 = vld [vmem:[%s3308_s29 + $0x198] sm:$0xff]   ;;  %v2785_v19 = vld [vmem:[%s3308_s29 + $0x190] sm:$0xff]   ;;  %v2793_v25 = vld [vmem:[%s3308_s29 + $0x1c8] sm:$0xff]  }
  0x9f   : > { %2476 = vmatpush3.bf16.msra.mxu1 %v2735_v39  ;;  %2437 = vmatprep.subr.bf16.mxu0 %v2736_v40  ;;  %v2786_v20 = vld [vmem:[%s3344_s10 + $0xdc] ss:$36 sps:$4 sm:$0xff]   ;;  %v2794_v26 = vld [vmem:[%s3308_s29 + $0x108] sm:$0xff]   ;;  %v2800_v32 = vld [vmem:[%s3344_s10 + $0x10] ss:$36 sps:$4 sm:$0xff]  }
  0xa0   : > { %2477 = vmatprep.subr.bf16.mxu1 %v2737_v41  ;;  %v2790_v22 = vld [vmem:[%s3344_s10 + $0xd8] ss:$36 sps:$4 sm:$0xff]   ;;  %v2795_v27 = vld [vmem:[%s3308_s29 + $0x188] sm:$0xff]   ;;  %v2796_v28 = vld [vmem:[%s3308_s29 + $0x140] sm:$0xff]  }
  0xa1   : > { %v2797_v29 = vld [vmem:[%s3308_s29 + $0x1c0] sm:$0xff]   ;;  %v2802_v33 = vld [vmem:[%s3344_s10 + $0x14] ss:$36 sps:$4 sm:$0xff]   ;;  %v2824_v49 = vld [vmem:[%s3344_s10 + $0xec] ss:$36 sps:$4 sm:$0xff]  }
  0xa2   : > { %2438 = vmatpush3.bf16.msra.mxu0 %v2738_v42  ;;  %v2798_v30 = vld [vmem:[%s3308_s29 + $0x100] sm:$0xff]   ;;  %v2803_v34 = vld [vmem:[%s3344_s10 + $0x18] ss:$36 sps:$4 sm:$0xff]   ;;  %v2807_v37 = vld [vmem:[%s3308_s29 + $0x230] sm:$0xff]  }
  0xa3   : > { %2478 = vmatpush3.bf16.msra.mxu1 %v2739_v43  ;;  %2439 = vmatprep.subr.bf16.mxu0 %v2740_v44  ;;  %v2799_v31 = vld [vmem:[%s3308_s29 + $0x180] sm:$0xff]   ;;  %v2806_v36 = vld [vmem:[%s3308_s29 + $0x238] sm:$0xff]   ;;  %v2814_v42 = vld [vmem:[%s3308_s29 + $0x228] sm:$0xff]  }
  0xa4   : > { %2479 = vmatprep.subr.bf16.mxu1 %v2741_v45  ;;  %v2805_v35 = vld [vmem:[%s3344_s10 + $0x1c] ss:$36 sps:$4 sm:$0xff]   ;;  %v2810_v39 = vld [vmem:[%s3344_s10 + $0x64] ss:$36 sps:$4 sm:$0xff]   ;;  %v2818_v44 = vld [vmem:[%s3344_s10 + $0xac] ss:$36 sps:$4 sm:$0xff]  }
  0xa5   : > { %v2808_v38 = vld [vmem:[%s3344_s10 + $0x5c] ss:$36 sps:$4 sm:$0xff]   ;;  %v2816_v43 = vld [vmem:[%s3344_s10 + $0xa4] ss:$36 sps:$4 sm:$0xff]   ;;  %v2823_v51 = vld [vmem:[%s3308_s29 + $0x210] sm:$0xff]  }
  0xa6   : > { %2440 = vmatpush3.bf16.msra.mxu0 %v2742_v46  ;;  %v2812_v40 = vld [vmem:[%s3344_s10 + $0x58] ss:$36 sps:$4 sm:$0xff]   ;;  %v2813_v41 = vld [vmem:[%s3344_s10 + $0x60] ss:$36 sps:$4 sm:$0xff]  }
  0xa7   : > { %2480 = vmatpush3.bf16.msra.mxu1 %v2743_v47  ;;  %2505 = vmatprep.subr.bf16.mxu0 %v2750_v52  ;;  %v2815_v45 = vld [vmem:[%s3308_s29 + $0x220] sm:$0xff]   ;;  %v2821_v47 = vld [vmem:[%s3344_s10 + $0xa8] ss:$36 sps:$4 sm:$0xff]  }
  0xa8   : > { %2545 = vmatprep.subr.bf16.mxu1 %v2751_v53  ;;  %v2820_v46 = vld [vmem:[%s3344_s10 + $0xa0] ss:$36 sps:$4 sm:$0xff]   ;;  %v2828_v52 = vld [vmem:[%s3344_s10 + $0xe8] ss:$36 sps:$4 sm:$0xff]  }
  0xa9   : > { %1709 = vmatmul.mubr.bf16.vlgmr.msra.gmra.mxu0 %v2744_v48  ;;  %v2822_v48 = vld [vmem:[%s3308_s29 + $0x218] sm:$0xff]   ;;  %v2830_v53 = vld [vmem:[%s3308_s29 + $0x208] sm:$0xff]  }
  0xaa   : > { %1774 = vmatmul.mubr.bf16.vlgmr.msra.gmra.mxu1 %v2747_v50  ;;  %2506 = vmatpush3.bf16.msra.mxu0 %v2752_v54  ;;  %v2826_v50 = vld [vmem:[%s3344_s10 + $0xf4] ss:$36 sps:$4 sm:$0xff]  }
  0xab   : > { %2546 = vmatpush3.bf16.msra.mxu1 %v2753_v55  ;;  %2507 = vmatprep.subr.bf16.mxu0 %v2754_v56  ;;  %v2829_v54 = vld [vmem:[%s3344_s10 + $0xf0] ss:$36 sps:$4 sm:$0xff]   ;;  %v2832_v55 = vld [vmem:[%s3344_s10 + $0x20] ss:$36 sps:$4 sm:$0xff]  }
  0xac   : > { %2547 = vmatprep.subr.bf16.mxu1 %v2755_v57  ;;  %1716 = vmatprep.mubr.bf16.mxu0 %v2758_v60  ;;  %v2833_v56 = vld [vmem:[%s3344_s10 + $0xb0] ss:$36 sps:$4 sm:$0xff]   ;;  %v2831_v57 = vld [vmem:[%s3308_s29 + $0x200] sm:$0xff]   ;;  %s858_s29 = sand.u32 1, %s2874_s15  }
  0xad   : > { %1781 = vmatprep.mubr.bf16.mxu1 %v2760_v61  ;;  %s2266_s17 = sshll.u32 %s858_s29, 5 }
  0xae   : > { %2508 = vmatpush3.bf16.msra.mxu0 %v2756_v58  ;;  %v2834_v58 = vld [vmem:[%s3344_s10 + $0x68] ss:$36 sps:$4 sm:$0xff]   ;;  %s860_s15 = scalar_lea.vmem [#allocation3], %s2266_s17 }
  0xaf   : > { %2548 = vmatpush3.bf16.msra.mxu1 %v2757_v59  ;;  %2509 = vmatprep.subr.bf16.mxu0 %v2764_v0  ;;  %v2835_v59 = vld [vmem:[%s3344_s10 + $0xf8] ss:$36 sps:$4 sm:$0xff]  }
  0xb0   : > { %2549 = vmatprep.subr.bf16.mxu1 %v2765_v1 }
  0xb1   : > { %1717 = vmatmul.mubr.bf16.gmra.mxu0 %v2762_v62 }
  0xb2   : > { %1782 = vmatmul.mubr.bf16.gmra.mxu1 %v2763_v63  ;;  %2510 = vmatpush3.bf16.msra.mxu0 %v2766_v2 }
  0xb3   : > { %2550 = vmatpush3.bf16.msra.mxu1 %v2767_v3  ;;  %2511 = vmatprep.subr.bf16.mxu0 %v2768_v4 }
  0xb4   : > { %2551 = vmatprep.subr.bf16.mxu1 %v2769_v5  ;;  %1724 = vmatprep.mubr.bf16.mxu0 %v2772_v8 }
  0xb5   : > { %1789 = vmatprep.mubr.bf16.mxu1 %v2774_v9 }
  0xb6   : > { %2512 = vmatpush3.bf16.msra.mxu0 %v2770_v6 }
  0xb7   : > { %2552 = vmatpush3.bf16.msra.mxu1 %v2771_v7  ;;  %2513 = vmatprep.subr.bf16.mxu0 %v2778_v12 }
  0xb8   : > { %2553 = vmatprep.subr.bf16.mxu1 %v2779_v13 }
  0xb9   : > { %1725 = vmatmul.mubr.bf16.gmra.mxu0 %v2776_v10 }
  0xba   : > { %1790 = vmatmul.mubr.bf16.gmra.mxu1 %v2777_v11  ;;  %2514 = vmatpush3.bf16.msra.mxu0 %v2780_v14 }
  0xbb   : > { %2554 = vmatpush3.bf16.msra.mxu1 %v2781_v15  ;;  %2515 = vmatprep.subr.bf16.mxu0 %v2782_v16 }
  0xbc   : > { %2555 = vmatprep.subr.bf16.mxu1 %v2783_v17  ;;  %1732 = vmatprep.mubr.bf16.mxu0 %v2786_v20 }
  0xbd   : > { %1797 = vmatprep.mubr.bf16.mxu1 %v2788_v21 }
  0xbe   : > { %2516 = vmatpush3.bf16.msra.mxu0 %v2784_v18 }
  0xbf   : > { %2556 = vmatpush3.bf16.msra.mxu1 %v2785_v19  ;;  %2517 = vmatprep.subr.bf16.mxu0 %v2792_v24 }
  0xc0   : > { %2557 = vmatprep.subr.bf16.mxu1 %v2793_v25 }
  0xc1   : > { %1733 = vmatmul.mubr.bf16.gmra.mxu0 %v2790_v22 }
  0xc2   : > { %1798 = vmatmul.mubr.bf16.gmra.mxu1 %v2791_v23  ;;  %2518 = vmatpush3.bf16.msra.mxu0 %v2794_v26 }
  0xc3   : > { %2558 = vmatpush3.bf16.msra.mxu1 %v2795_v27  ;;  %2519 = vmatprep.subr.bf16.mxu0 %v2796_v28 }
  0xc4   : > { %2559 = vmatprep.subr.bf16.mxu1 %v2797_v29  ;;  %1838 = vmatprep.mubr.bf16.mxu0 %v2802_v33 }
  0xc5   : > { %1903 = vmatprep.mubr.bf16.mxu1 %v2805_v35 }
  0xc6   : > { %2520 = vmatpush3.bf16.msra.mxu0 %v2798_v30 }
  0xc7   : > { %2560 = vmatpush3.bf16.msra.mxu1 %v2799_v31  ;;  %2597 = vmatprep.subr.bf16.mxu0 %v2806_v36 }
  0xc8   : > { %2621 = vmatprep.subr.bf16.mxu1 %v2806_v36 }
  0xc9   : > { %1839 = vmatmul.mubr.bf16.vlgmr.msra.gmra.mxu0 %v2800_v32 }
  0xca   : > { %1904 = vmatmul.mubr.bf16.vlgmr.msra.gmra.mxu1 %v2803_v34  ;;  %2598 = vmatpush3.bf16.msra.mxu0 %v2806_v36 }
  0xcb   : > { %2629 = vmatpush3.bf16.msra.mxu1 %v2806_v36  ;;  %2599 = vmatprep.subr.bf16.mxu0 %v2807_v37 }
  0xcc   : > { %2622 = vmatprep.subr.bf16.mxu1 %v2807_v37  ;;  %1846 = vmatprep.mubr.bf16.mxu0 %v2808_v38 }
  0xcd   : > { %1911 = vmatprep.mubr.bf16.mxu1 %v2810_v39 }
  0xce   : > { %2600 = vmatpush3.bf16.msra.mxu0 %v2807_v37 }
  0xcf   : > { %2630 = vmatpush3.bf16.msra.mxu1 %v2807_v37  ;;  %2601 = vmatprep.subr.bf16.mxu0 %v2814_v42 }
  0xd0   : > { %2623 = vmatprep.subr.bf16.mxu1 %v2814_v42 }
  0xd1   : > { %1847 = vmatmul.mubr.bf16.gmra.mxu0 %v2812_v40 }
  0xd2   : > { %1912 = vmatmul.mubr.bf16.gmra.mxu1 %v2813_v41  ;;  %1854 = vmatprep.mubr.bf16.mxu0 %v2816_v43 }
  0xd3   : > { %2602 = vmatpush3.bf16.msra.mxu0 %v2814_v42  ;;  %1919 = vmatprep.mubr.bf16.mxu1 %v2818_v44 }
  0xd4   : > { %2631 = vmatpush3.bf16.msra.mxu1 %v2814_v42  ;;  %2603 = vmatprep.subr.bf16.mxu0 %v2815_v45 }
  0xd5   : > { %2624 = vmatprep.subr.bf16.mxu1 %v2815_v45 }
  0xd7   : > { %2604 = vmatpush3.bf16.msra.mxu0 %v2815_v45 }
  0xd8   : > { %2632 = vmatpush3.bf16.msra.mxu1 %v2815_v45  ;;  %2605 = vmatprep.subr.bf16.mxu0 %v2822_v48 }
  0xd9   : > { %1855 = vmatmul.mubr.bf16.gmra.mxu0 %v2820_v46  ;;  %2625 = vmatprep.subr.bf16.mxu1 %v2822_v48 }
  0xda   : > { %1920 = vmatmul.mubr.bf16.gmra.mxu1 %v2821_v47  ;;  %1862 = vmatprep.mubr.bf16.mxu0 %v2824_v49 }
  0xdb   : > { %2606 = vmatpush3.bf16.msra.mxu0 %v2822_v48  ;;  %1927 = vmatprep.mubr.bf16.mxu1 %v2826_v50 }
  0xdc   : > { %2633 = vmatpush3.bf16.msra.mxu1 %v2822_v48  ;;  %2607 = vmatprep.subr.bf16.mxu0 %v2823_v51 }
  0xdd   : > { %2626 = vmatprep.subr.bf16.mxu1 %v2823_v51 }
  0xdf   : > { %2608 = vmatpush3.bf16.msra.mxu0 %v2823_v51 }
  0xe0   : > { %2634 = vmatpush3.bf16.msra.mxu1 %v2823_v51  ;;  %2609 = vmatprep.subr.bf16.mxu0 %v2830_v53 }
  0xe1   : > { %1863 = vmatmul.mubr.bf16.gmra.mxu0 %v2828_v52  ;;  %2627 = vmatprep.subr.bf16.mxu1 %v2830_v53 }
  0xe2   : > { %1928 = vmatmul.mubr.bf16.gmra.mxu1 %v2829_v54  ;;  %2613 = vmatprep.mubr.bf16.mxu0 %v2832_v55 }
  0xe3   : > { %2610 = vmatpush3.bf16.msra.mxu0 %v2830_v53  ;;  %2617 = vmatprep.mubr.bf16.mxu1 %v2833_v56 }
  0xe4   : > { %2635 = vmatpush3.bf16.msra.mxu1 %v2830_v53  ;;  %2611 = vmatprep.subr.bf16.mxu0 %v2831_v57 }
  0xe5   : > { %2628 = vmatprep.subr.bf16.mxu1 %v2831_v57 }
  0xe7   : > { %2612 = vmatpush3.bf16.msra.mxu0 %v2831_v57 }
  0xe8   : > { %2636 = vmatpush3.bf16.msra.mxu1 %v2831_v57 }
  0xea   : > { %2614 = vmatmul.mubr.bf16.vlgmr.msra.gmra.mxu0 %v2834_v58 }
  0xeb   : > { %2618 = vmatmul.mubr.bf16.vlgmr.msra.gmra.mxu1 %v2835_v59 }
 0x169   : > { %v2441_v60 = vpop.f32.mrf.mxu0 }
 0x16a   : > { %v2481_v61 = vpop.f32.mrf.mxu1 }
 0x16b   : > { %v2442_v62 = vpop.f32.mrf.mxu0 }
 0x16c   : > { %v2482_v63 = vpop.f32.mrf.mxu1  ;;  %v2443_v49 = vadd.f32 %v2442_v62, %v2441_v60 }
 0x16d   : > { %v3424_v0 = vpop.f32.mrf.mxu0  ;;  %v2483_v50 = vadd.f32 %v2482_v63, %v2481_v61 }
 0x16e   : > { %v3426_v1 = vpop.f32.mrf.mxu1 }
 0x16f   : > { %v3428_v2 = vpop.f32.mrf.mxu0  ;;  %v1776_v60 = vadd.f32 %v2483_v50, %v2443_v49 }
 0x170   : > { %v3430_v3 = vpop.f32.mrf.mxu1 }
 0x171   : > { %v2447_v4 = vpop.f32.mrf.mxu0 }
 0x172   : > { %v2487_v5 = vpop.f32.mrf.mxu1 }
 0x173   : > { %v2448_v6 = vpop.f32.mrf.mxu0 }
 0x174   : > { %v2488_v7 = vpop.f32.mrf.mxu1  ;;  %v2449_v53 = vadd.f32 %v2448_v6, %v2447_v4 }
 0x175   : > { %v2450_v8 = vpop.f32.mrf.mxu0  ;;  %v2489_v54 = vadd.f32 %v2488_v7, %v2487_v5 }
 0x176   : > { %v2490_v9 = vpop.f32.mrf.mxu1 }
 0x177   : > { %v2451_v10 = vpop.f32.mrf.mxu0  ;;  %v1784_v4 = vadd.f32 %v2489_v54, %v2449_v53 }
 0x178   : > { %v2491_v11 = vpop.f32.mrf.mxu1  ;;  %v2452_v57 = vadd.f32 %v2451_v10, %v2450_v8  ;;  %v2446_v8 = vadd.f32 %v3428_v2, %v3424_v0 }
 0x179   : > { %v2453_v12 = vpop.f32.mrf.mxu0  ;;  %v2492_v58 = vadd.f32 %v2491_v11, %v2490_v9  ;;  %v2486_v9 = vadd.f32 %v3430_v3, %v3426_v1 }
 0x17a   : > { %v2493_v13 = vpop.f32.mrf.mxu1 }
 0x17b   : > { %v2454_v14 = vpop.f32.mrf.mxu0  ;;  %v1787_v10 = vadd.f32 %v2492_v58, %v2452_v57 }
 0x17c   : > { %v2494_v15 = vpop.f32.mrf.mxu1 }
 0x17d   : > { %v3432_v16 = vpop.f32.mrf.mxu0 }
 0x17e   : > { %v3434_v17 = vpop.f32.mrf.mxu1 }
 0x17f   : > { %v3436_v18 = vpop.f32.mrf.mxu0 }
 0x180   : > { %v3438_v19 = vpop.f32.mrf.mxu1 }
 0x181   : > { %v2459_v20 = vpop.f32.mrf.mxu0 }
 0x182   : > { %v2499_v21 = vpop.f32.mrf.mxu1 }
 0x183   : > { %v2460_v22 = vpop.f32.mrf.mxu0 }
 0x184   : > { %v2500_v23 = vpop.f32.mrf.mxu1  ;;  %v2461_v55 = vadd.f32 %v2460_v22, %v2459_v20  ;;  %v2458_v22 = vadd.f32 %v3436_v18, %v3432_v16 }
 0x185   : > { %v2462_v24 = vpop.f32.mrf.mxu0  ;;  %v2501_v56 = vadd.f32 %v2500_v23, %v2499_v21  ;;  %v2498_v23 = vadd.f32 %v3438_v19, %v3434_v17 }
 0x186   : > { %v2502_v25 = vpop.f32.mrf.mxu1 }
 0x187   : > { %v2463_v26 = vpop.f32.mrf.mxu0  ;;  %v1800_v5 = vadd.f32 %v2501_v56, %v2461_v55 }
 0x188   : > { %v2503_v27 = vpop.f32.mrf.mxu1  ;;  %v2464_v61 = vadd.f32 %v2463_v26, %v2462_v24 }
 0x189   : > { %v2521_v28 = vpop.f32.mrf.mxu0  ;;  %v2504_v62 = vadd.f32 %v2503_v27, %v2502_v25 }
 0x18a   : > { %v3440_v29 = vpop.f32.mrf.mxu1 }
 0x18b   : > { %v2522_v30 = vpop.f32.mrf.mxu0  ;;  %v1803_v24 = vadd.f32 %v2504_v62, %v2464_v61 }
 0x18c   : > { %v3442_v31 = vpop.f32.mrf.mxu1  ;;  %v2523_v6 = vadd.f32 %v2522_v30, %v2521_v28  ;;  %v1779_v28 = vadd.f32 %v2486_v9, %v2446_v8 }
 0x18d   : > { %v2524_v32 = vpop.f32.mrf.mxu0  ;;  %v2563_v17 = vadd.f32 %v3442_v31, %v3440_v29 }
 0x18e   : > { %v3444_v33 = vpop.f32.mrf.mxu1  ;;  %v1841_v1 = vadd.f32 %v2523_v6, %v1776_v60  ;;  %v2378_v60 = vld [vmem:[%s873_s28] ss:$0 sm:$0xff] }
 0x18f   : > { %3527 = vst [vmem:[#allocation4_spill] sm:$0xff] %v3444_v33  ;;  %v2525_v34 = vpop.f32.mrf.mxu0  ;;  %v2455_v33 = vadd.f32 %v2454_v14, %v2453_v12 }
 0x190   : > { %v3446_v35 = vpop.f32.mrf.mxu1  ;;  %v2526_v3 = vadd.f32 %v2525_v34, %v2524_v32 }
 0x191   : > { %3528 = vst [vmem:[#allocation5_spill] sm:$0xff] %v3446_v35  ;;  %v2527_v36 = vpop.f32.mrf.mxu0 }
 0x192   : > { %v2567_v37 = vpop.f32.mrf.mxu1 }
 0x193   : > { %v2528_v38 = vpop.f32.mrf.mxu0 }
 0x194   : > { %v2568_v39 = vpop.f32.mrf.mxu1 }
 0x195   : > { %v2530_v40 = vpop.f32.mrf.mxu0  ;;  %v2569_v26 = vadd.f32 %v2568_v39, %v2567_v37  ;;  %v2377_v39 = vld [vmem:[%s870_s14] ss:$0 sm:$0xff] }
 0x196   : > { %v3448_v41 = vpop.f32.mrf.mxu1 }
 0x197   : > { %3529 = vst [vmem:[#allocation6_spill] sm:$0xff] %v3448_v41  ;;  %v2531_v42 = vpop.f32.mrf.mxu0  ;;  %v2529_v41 = vadd.f32 %v2528_v38, %v2527_v36  ;;  %v1795_v38 = vadd.f32 %v2498_v23, %v2458_v22 }
 0x198   : > { %v3450_v43 = vpop.f32.mrf.mxu1  ;;  %v2532_v20 = vadd.f32 %v2531_v42, %v2530_v40  ;;  %v1844_v40 = vadd.f32 %v2526_v3, %v1779_v28 }
 0x199   : > { %3530 = vst [vmem:[#allocation7_spill] sm:$0xff] %v3450_v43  ;;  %v2533_v44 = vpop.f32.mrf.mxu0  ;;  %v2495_v43 = vadd.f32 %v2494_v15, %v2493_v13  ;;  %v1849_v15 = vadd.f32 %v2529_v41, %v1784_v4 }
 0x19a   : > { %v2573_v45 = vpop.f32.mrf.mxu1  ;;  %v1852_v19 = vadd.f32 %v2532_v20, %v1787_v10 }
 0x19b   : > { %v2534_v46 = vpop.f32.mrf.mxu0  ;;  %v1792_v14 = vadd.f32 %v2495_v43, %v2455_v33  ;;  %v1914_v36 = vadd.f32 %v2569_v26, %v1849_v15 }
 0x19c   : > { %v2574_v47 = vpop.f32.mrf.mxu1  ;;  %v2535_v11 = vadd.f32 %v2534_v46, %v2533_v44 }
 0x19d   : > { %v2536_v48 = vpop.f32.mrf.mxu0  ;;  %v2575_v32 = vadd.f32 %v2574_v47, %v2573_v45  ;;  %v3534_v45 = vld [vmem:[#allocation4_spill] sm:$0xff]  ;;  %v3535_v47 = vld [vmem:[#allocation5_spill] sm:$0xff] }
 0x19e   : > { %v3452_v51 = vpop.f32.mrf.mxu1  ;;  %v1857_v30 = vadd.f32 %v2535_v11, %v1792_v14  ;;  %v3532_v41 = vld [vmem:[#allocation6_spill] sm:$0xff] }
 0x19f   : > { %3531 = vst [vmem:[#allocation8_spill] sm:$0xff] %v3452_v51  ;;  %v2537_v52 = vpop.f32.mrf.mxu0 }
 0x1a0   : > { %v3455_v59 = vpop.f32.mrf.mxu1  ;;  %v2538_v33 = vadd.f32 %v2537_v52, %v2536_v48  ;;  %v3533_v42 = vld [vmem:[#allocation7_spill] sm:$0xff]  ;;  %v1906_v48 = vadd.f32 %v2563_v17, %v1841_v1  ;;  %v1922_v50 = vadd.f32 %v2575_v32, %v1857_v30  ;;  %v2566_v52 = vadd.f32 %v3535_v47, %v3534_v45 }
 0x1a1   : > { %v2539_v35 = vpop.f32.mrf.mxu0  ;;  %v2572_v43 = vadd.f32 %v3533_v42, %v3532_v41 }
 0x1a2   : > { %v2579_v63 = vpop.f32.mrf.mxu1  ;;  %v1860_v29 = vadd.f32 %v2538_v33, %v1795_v38 }
 0x1a3   : > { %v2540_v51 = vpop.f32.mrf.mxu0  ;;  %v1917_v56 = vadd.f32 %v2572_v43, %v1852_v19 }
 0x1a4   : > { %v2541_v7 = vadd.f32 %v2540_v51, %v2539_v35  ;;  %v2580_v12 = vpop.f32.mrf.mxu1 }
 0x1a5   : > { %v2542_v13 = vpop.f32.mrf.mxu0  ;;  %v2581_v0 = vadd.f32 %v2580_v12, %v2579_v63 }
 0x1a6   : > { %v1865_v21 = vadd.f32 %v2541_v7, %v1800_v5  ;;  %v2582_v2 = vpop.f32.mrf.mxu1  ;;  %v3536_v57 = vld [vmem:[#allocation8_spill] sm:$0xff]  ;;  %v1909_v7 = vadd.f32 %v2566_v52, %v1844_v40 }
 0x1a7   : > { %v2543_v25 = vpop.f32.mrf.mxu0  ;;  %v2578_v58 = vadd.f32 %v3455_v59, %v3536_v57 }
 0x1a8   : > { %v2544_v27 = vadd.f32 %v2543_v25, %v2542_v13  ;;  %v2583_v16 = vpop.f32.mrf.mxu1  ;;  %v1930_v18 = vadd.f32 %v2581_v0, %v1865_v21 }
 0x1a9   : > { %v2584_v34 = vadd.f32 %v2583_v16, %v2582_v2  ;;  %v1925_v11 = vadd.f32 %v2578_v58, %v1860_v29 }
 0x1aa   : > { %v1868_v35 = vadd.f32 %v2544_v27, %v1803_v24  ;;  %v2615_v37 = vpop.f32.mrf.mxu0 }
 0x1ab   : > { %v1979_v44 = vadd.f32 %v2615_v37, %v1914_v36  ;;  %v2619_v46 = vpop.f32.mrf.mxu1 }
 0x1ac   : > { %v1995_v31 = vadd.f32 %v2619_v46, %v1930_v18  ;;  %v1970_v49 = vpop.f32.mrf.mxu0  ;;  %v1933_v51 = vadd.f32 %v2584_v34, %v1868_v35 }
 0x1ad   : > { %v2010_v53 = vmul.f32 %v2377_v39, %v1979_v44  ;;  %v1971_v54 = vadd.f32 %v1970_v49, %v1906_v48  ;;  %v1986_v55 = vpop.f32.mrf.mxu1 }
 0x1ae   : > { %v2014_v61 = vmul.f32 %v2377_v39, %v1995_v31  ;;  %v1987_v62 = vadd.f32 %v1986_v55, %v1922_v50  ;;  %v2616_v63 = vpop.f32.mrf.mxu0 }
 0x1af   : > { %v2008_v4 = vmul.f32 %v2377_v39, %v1971_v54  ;;  %v1982_v5 = vadd.f32 %v2616_v63, %v1917_v56  ;;  %v2620_v6 = vpop.f32.mrf.mxu1  ;;  %v2025_v12 = vadd.f32 %v2378_v60, %v2010_v53 }
 0x1b0   : > { %v2012_v8 = vmul.f32 %v2377_v39, %v1987_v62  ;;  %v1998_v9 = vadd.f32 %v2620_v6, %v1933_v51  ;;  %v1973_v10 = vpop.f32.mrf.mxu0  ;;  %v2029_v20 = vadd.f32 %v2378_v60, %v2014_v61 }
 0x1b1   : > { %v2011_v13 = vmul.f32 %v2377_v39, %v1982_v5  ;;  %v1974_v14 = vadd.f32 %v1973_v10, %v1909_v7  ;;  %v1989_v15 = vpop.f32.mrf.mxu1  ;;  %v2023_v22 = vadd.f32 %v2378_v60, %v2008_v4  ;;  %v2033_v1 = vmax.f32 %v2025_v12, 0.0 }
 0x1b2   : > { %v2015_v21 = vmul.f32 %v2377_v39, %v1998_v9  ;;  %v1990_v59 = vadd.f32 %v1989_v15, %v1925_v11  ;;  %v2027_v0 = vadd.f32 %v2378_v60, %v2012_v8  ;;  %v2037_v27 = vmax.f32 %v2029_v20, 0.0 }
 0x1b3   : > { %v2026_v23 = vadd.f32 %v2378_v60, %v2011_v13  ;;  %v2009_v24 = vmul.f32 %v2377_v39, %v1974_v14  ;;  %v2031_v33 = vmax.f32 %v2023_v22, 0.0 }
 0x1b4   : > { %v2030_v2 = vadd.f32 %v2378_v60, %v2015_v21  ;;  %v2013_v25 = vmul.f32 %v2377_v39, %v1990_v59  ;;  %v2035_v17 = vmax.f32 %v2027_v0, 0.0 }
 0x1b5   : > { %v2034_v3 = vmax.f32 %v2026_v23, 0.0  ;;  %v2024_v26 = vadd.f32 %v2378_v60, %v2009_v24 }
 0x1b6   : > { %v2038_v28 = vmax.f32 %v2030_v2, 0.0  ;;  %v2028_v30 = vadd.f32 %v2378_v60, %v2013_v25 }
 0x1b7   : > { %v2410_v16 = vpack.c.bf16 %v2034_v3, %v2033_v1  ;;  %v2032_v18 = vmax.f32 %v2024_v26, 0.0 }
 0x1b8   : > { %v2420_v19 = vpack.c.bf16 %v2038_v28, %v2037_v27  ;;  %v2036_v35 = vmax.f32 %v2028_v30, 0.0  ;;  %2085 = sbr.rel (!%p3000_p9) target bundleno = 455 (0x1c7), region = 81 }
 0x1b9   : > { %2422 = vst [vmem:[%s860_s15 + $0x8] sm:$0xff] %v2410_v16   ;;  %v2405_v36 = vpack.c.bf16 %v2032_v18, %v2031_v33 }
 0x1ba   : > { %2424 = vst [vmem:[%s860_s15 + $0x18] sm:$0xff] %v2420_v19   ;;  %v2415_v38 = vpack.c.bf16 %v2036_v35, %v2035_v17 }
 0x1bb   : > { %2406 = vst [vmem:[%s860_s15] sm:$0xff] %v2405_v36  }
 0x1bc   : > { %2423 = vst [vmem:[%s860_s15 + $0x10] sm:$0xff] %v2415_v38  }
 0x1c0   : > { %v2111_v37 = vld [vmem:[%s860_s15 + $0x8] sm:$0xf]  ;;  %v2113_v39 = vld [vmem:[%s860_s15 + $0xc] sm:$0xf] }
 0x1c1   : > { %v2119_v42 = vld [vmem:[%s860_s15 + $0x18] sm:$0xf]  ;;  %v2121_v43 = vld [vmem:[%s860_s15 + $0x1c] sm:$0xf]  ;;  %2112 = vst [vmem:[%s2090_s12 + $0x10] sm:$0xf] %v2111_v37 }
 0x1c2   : > { %v2107_v32 = vld [vmem:[%s860_s15] sm:$0xf]  ;;  %v2109_v34 = vld [vmem:[%s860_s15 + $0x4] sm:$0xf]  ;;  %2114 = vst [vmem:[%s2090_s12 + $0x18] sm:$0xf] %v2113_v39 }
 0x1c3   : > { %v2115_v40 = vld [vmem:[%s860_s15 + $0x10] sm:$0xf]  ;;  %v2117_v41 = vld [vmem:[%s860_s15 + $0x14] sm:$0xf]  ;;  %2108 = vst [vmem:[%s2090_s12] sm:$0xf] %v2107_v32 }
 0x1c4   : > { %2110 = vst [vmem:[%s2090_s12 + $0x8] sm:$0xf] %v2109_v34  ;;  %2116 = vst [vmem:[%s2090_s12 + $0x20] sm:$0xf] %v2115_v40 }
 0x1c5   : > { %2118 = vst [vmem:[%s2090_s12 + $0x28] sm:$0xf] %v2117_v41  ;;  %2120 = vst [vmem:[%s2090_s12 + $0x30] sm:$0xf] %v2119_v42 }
 0x1c6   : > { %2122 = vst [vmem:[%s2090_s12 + $0x38] sm:$0xf] %v2121_v43 }
 0x1c7 PF: > { %s14_s23 = sadd.s32 1, %s2906_s23   ;;  %s3537_s15 = smov %s2878_s16 }
 0x1c8   : > { %p11_p2 = scmp.ge.s32.totalorder %s14_s23, 6   ;;  %s3538_s16 = smov %s3005_s8 }
 0x1c9   : > { %s3539_s17 = smov %s2886_s18  ;;  %s3540_s18 = smov %s2994_s30 }
 0x1ca   : > { %s3541_s19 = smov %s2898_s21  ;;  %s3542_s20 = smov %s2902_s22 }
 0x1cb   : > { %s3543_s21 = smov %s3546_s25  ;;  %s3544_s22 = smov %s3550_s26 }
 0x1cc   :  { %13 = sbr.rel (!%p11_p2) target bundleno = 5 (0x5), region = 162 }

// kernel: forward.8
= control target key start
LH: loop header
LB: loop body
LE: loop exit
PB: predicated region body
PF: predicated region fallthrough
CT: control target
= control target key end

     0   :  { %s3380_s15 = smov 0   ;;  %s3382_s16 = smov 0   ;;  %s4168_s0 = inlined_call_operand.vmem [shape: bf16[512,576], index: 0, kind: input, shape index: {}]   ;;  %s4169_s1 = inlined_call_operand.vmem [shape: bf16[576,256], index: 1, kind: input, shape index: {}]   ;;  %s4170_s2 = inlined_call_operand.vmem [shape: f32[1,256], index: 2, kind: input, shape index: {}]   ;;  %s4171_s3 = inlined_call_operand.vmem [shape: f32[1,256], index: 3, kind: input, shape index: {}]   ;;  %s4172_s4 = inlined_call_operand.vmem [shape: bf16[512,256], index: 4, kind: output, shape index: {}]  }
   0x1   :  { %s3384_s17 = smov 0   ;;  %s3386_s18 = smov 0  }
   0x2   :  { %s3388_s19 = smov 0   ;;  %s3390_s20 = smov 0  }
   0x3   :  { %s3392_s21 = smov 0   ;;  %s3394_s22 = smov 0  }
   0x4   :  { %s3396_s23 = smov 0  }
   0x5 LB: > { %s2451_s24 = sadd.s32 4294967295, %s3353_s23   ;;  %s23_s25 = sadd.s32 1, %s3345_s21  ;;  %s3353_s23 = sphi %s3396_s23, %s14_s23   ;;  %s3349_s22 = sphi %s3394_s22, %s4219_s22   ;;  %s3345_s21 = sphi %s3392_s21, %s4218_s21   ;;  %s3341_s20 = sphi %s3390_s20, %s4217_s20   ;;  %s3337_s19 = sphi %s3388_s19, %s4216_s19   ;;  %s3333_s18 = sphi %s3386_s18, %s4215_s18   ;;  %s3329_s17 = sphi %s3384_s17, %s4214_s17   ;;  %s3325_s16 = sphi %s3382_s16, %s4213_s16   ;;  %s3321_s15 = sphi %s3380_s15, %s4212_s15  }
   0x6   : > { %p24_p0 = scmp.ge.s32.totalorder %s23_s25, 2  ;;  %s26_s26 = sadd.s32 1, %s3349_s22 }
   0x7   : > { %s59_s27 = sadd.s32 1, %s3333_s18  ;;  %p66_p1 = scmp.ne.s32.totalorder %s3333_s18, %s3329_s17 }
   0x8   : > { %s4221_s25 = smov (%p24_p0, %s23_s25), 0  ;;  %s4223_s26 = smov (!%p24_p0, %s26_s26), %s3349_s22 }
   0x9   : > { %s56_s28 = ssub.s32 %s3345_s21, %s4221_s25  ;;  %p67_p2 = scmp.eq.s32.totalorder %s3353_s23, 0 }
   0xa   : > { %p28_p3 = scmp.ge.s32.totalorder %s4223_s26, 2  ;;  %p57_p4 = scmp.eq.s32.totalorder %s56_s28, 0 }
   0xb   : > { %p68_p5 = por %p67_p2, %p66_p1  ;;  %s139_s29 = sadd.s32 1, %s3325_s16 }
   0xc   : > { %s4225_s26 = smov (%p28_p3, %s4223_s26), 0  ;;  %p149_p6 = scmp.ne.s32.totalorder %s3325_s16, %s3321_s15 }
   0xd   : > { %s3441_s30 = scalar_select %p57_p4, %s3333_s18, %s59_s27  }
   0xe   : > { %s134_s5 = ssub.s32 %s3349_s22, %s4225_s26  ;;  %p150_p7 = scmp.eq.s32.totalorder %s2451_s24, 3 }
   0xf   : > { %s136_s6 = sor.u32 %s134_s5, %s56_s28  ;;  %p2454_p10 = scmp.ge.s32.totalorder %s3353_s23, 4 }
  0x10   : > { %p137_p8 = scmp.eq.s32.totalorder %s136_s6, 0  ;;  %p3447_p9 = por %p150_p7, %p149_p6 }
  0x11   : > { %172 = sbr.rel (%p2454_p10) target bundleno = 74 (0x4a), region = 16 }
  0x12   : > { %s3452_s8 = scalar_select %p137_p8, %s3325_s16, %s139_s29  }
  0x16   : > { %185 = sbr.rel (!%p68_p5) target bundleno = 74 (0x4a), region = 24  ;;  %s187_s9 = sand.u32 (%p68_p5), 1, %s3333_s18  }
  0x17   : > { %s2455_s10 = sshll.u32 (%p68_p5), %s3345_s21, 2  ;;  %s3060_s11 = smul.u32 (%p68_p5), 288, %s187_s9 }
  0x18   : > { %s3460_s14 = scalar_lea.vmem (%p68_p5), %s4169_s1, %s2455_s10 }
  0x19   : > { %v208_v0 = vld [vmem:[%s3460_s14] sm:$0xf] (%p68_p5)  ;;  %v210_v1 = vld [vmem:[%s3460_s14 + $0x8] sm:$0xf] (%p68_p5)  ;;  %v212_v2 = vld [vmem:[%s3460_s14 + $0x10] sm:$0xf] (%p68_p5) }
  0x1a   : > { %v214_v3 = vld [vmem:[%s3460_s14 + $0x18] sm:$0xf] (%p68_p5)  ;;  %v216_v4 = vld [vmem:[%s3460_s14 + $0x20] sm:$0xf] (%p68_p5)  ;;  %s3467_s24 = scalar_lea.vmem (%p68_p5), [#allocation2], %s3060_s11 }
  0x1b   : > { %209 = vst [vmem:[%s3467_s24] sm:$0xf] %v208_v0  ;;  %211 = vst [vmem:[%s3467_s24 + $0x4] sm:$0xf] %v210_v1  ;;  %v218_v5 = vld [vmem:[%s3460_s14 + $0x28] sm:$0xf] }
  0x1c   : > { %213 = vst [vmem:[%s3467_s24 + $0x8] sm:$0xf] %v212_v2  ;;  %215 = vst [vmem:[%s3467_s24 + $0xc] sm:$0xf] %v214_v3  ;;  %v220_v6 = vld [vmem:[%s3460_s14 + $0x30] sm:$0xf] }
  0x1d   : > { %217 = vst [vmem:[%s3467_s24 + $0x10] sm:$0xf] %v216_v4  ;;  %v222_v7 = vld [vmem:[%s3460_s14 + $0x38] sm:$0xf]  ;;  %219 = vst [vmem:[%s3467_s24 + $0x14] sm:$0xf] %v218_v5 }
  0x1e   : > { %221 = vst [vmem:[%s3467_s24 + $0x18] sm:$0xf] %v220_v6  ;;  %223 = vst [vmem:[%s3467_s24 + $0x1c] sm:$0xf] %v222_v7  ;;  %v224_v8 = vld [vmem:[%s3460_s14 + $0x40] sm:$0xf] }
  0x1f   : > { %v226_v9 = vld [vmem:[%s3460_s14 + $0x48] sm:$0xf]  ;;  %v228_v10 = vld [vmem:[%s3460_s14 + $0x50] sm:$0xf]  ;;  %225 = vst [vmem:[%s3467_s24 + $0x20] sm:$0xf] %v224_v8 }
  0x20   : > { %227 = vst [vmem:[%s3467_s24 + $0x24] sm:$0xf] %v226_v9  ;;  %229 = vst [vmem:[%s3467_s24 + $0x28] sm:$0xf] %v228_v10  ;;  %v230_v11 = vld [vmem:[%s3460_s14 + $0x58] sm:$0xf] }
  0x21   : > { %v232_v12 = vld [vmem:[%s3460_s14 + $0x60] sm:$0xf]  ;;  %v234_v13 = vld [vmem:[%s3460_s14 + $0x68] sm:$0xf]  ;;  %231 = vst [vmem:[%s3467_s24 + $0x2c] sm:$0xf] %v230_v11 }
  0x22   : > { %233 = vst [vmem:[%s3467_s24 + $0x30] sm:$0xf] %v232_v12  ;;  %235 = vst [vmem:[%s3467_s24 + $0x34] sm:$0xf] %v234_v13  ;;  %v236_v14 = vld [vmem:[%s3460_s14 + $0x70] sm:$0xf] }
  0x23   : > { %v238_v15 = vld [vmem:[%s3460_s14 + $0x78] sm:$0xf]  ;;  %v240_v16 = vld [vmem:[%s3460_s14 + $0x80] sm:$0xf]  ;;  %237 = vst [vmem:[%s3467_s24 + $0x38] sm:$0xf] %v236_v14 }
  0x24   : > { %239 = vst [vmem:[%s3467_s24 + $0x3c] sm:$0xf] %v238_v15  ;;  %241 = vst [vmem:[%s3467_s24 + $0x40] sm:$0xf] %v240_v16  ;;  %v242_v17 = vld [vmem:[%s3460_s14 + $0x88] sm:$0xf] }
  0x25   : > { %v244_v18 = vld [vmem:[%s3460_s14 + $0x90] sm:$0xf]  ;;  %v246_v19 = vld [vmem:[%s3460_s14 + $0x98] sm:$0xf]  ;;  %243 = vst [vmem:[%s3467_s24 + $0x44] sm:$0xf] %v242_v17 }
  0x26   : > { %245 = vst [vmem:[%s3467_s24 + $0x48] sm:$0xf] %v244_v18  ;;  %247 = vst [vmem:[%s3467_s24 + $0x4c] sm:$0xf] %v246_v19  ;;  %v248_v20 = vld [vmem:[%s3460_s14 + $0xa0] sm:$0xf] }
  0x27   : > { %v250_v21 = vld [vmem:[%s3460_s14 + $0xa8] sm:$0xf]  ;;  %v252_v22 = vld [vmem:[%s3460_s14 + $0xb0] sm:$0xf]  ;;  %249 = vst [vmem:[%s3467_s24 + $0x50] sm:$0xf] %v248_v20 }
  0x28   : > { %251 = vst [vmem:[%s3467_s24 + $0x54] sm:$0xf] %v250_v21  ;;  %253 = vst [vmem:[%s3467_s24 + $0x58] sm:$0xf] %v252_v22  ;;  %v254_v23 = vld [vmem:[%s3460_s14 + $0xb8] sm:$0xf] }
  0x29   : > { %v256_v24 = vld [vmem:[%s3460_s14 + $0xc0] sm:$0xf]  ;;  %v258_v25 = vld [vmem:[%s3460_s14 + $0xc8] sm:$0xf]  ;;  %255 = vst [vmem:[%s3467_s24 + $0x5c] sm:$0xf] %v254_v23 }
  0x2a   : > { %257 = vst [vmem:[%s3467_s24 + $0x60] sm:$0xf] %v256_v24  ;;  %259 = vst [vmem:[%s3467_s24 + $0x64] sm:$0xf] %v258_v25  ;;  %v260_v26 = vld [vmem:[%s3460_s14 + $0xd0] sm:$0xf] }
  0x2b   : > { %v262_v27 = vld [vmem:[%s3460_s14 + $0xd8] sm:$0xf]  ;;  %v264_v28 = vld [vmem:[%s3460_s14 + $0xe0] sm:$0xf]  ;;  %261 = vst [vmem:[%s3467_s24 + $0x68] sm:$0xf] %v260_v26 }
  0x2c   : > { %263 = vst [vmem:[%s3467_s24 + $0x6c] sm:$0xf] %v262_v27  ;;  %265 = vst [vmem:[%s3467_s24 + $0x70] sm:$0xf] %v264_v28  ;;  %v266_v29 = vld [vmem:[%s3460_s14 + $0xe8] sm:$0xf] }
  0x2d   : > { %v268_v30 = vld [vmem:[%s3460_s14 + $0xf0] sm:$0xf]  ;;  %v270_v31 = vld [vmem:[%s3460_s14 + $0xf8] sm:$0xf]  ;;  %267 = vst [vmem:[%s3467_s24 + $0x74] sm:$0xf] %v266_v29 }
  0x2e   : > { %269 = vst [vmem:[%s3467_s24 + $0x78] sm:$0xf] %v268_v30  ;;  %271 = vst [vmem:[%s3467_s24 + $0x7c] sm:$0xf] %v270_v31  ;;  %v272_v32 = vld [vmem:[%s3460_s14 + $0x100] sm:$0xf] }
  0x2f   : > { %v274_v33 = vld [vmem:[%s3460_s14 + $0x108] sm:$0xf]  ;;  %v276_v34 = vld [vmem:[%s3460_s14 + $0x110] sm:$0xf]  ;;  %273 = vst [vmem:[%s3467_s24 + $0x80] sm:$0xf] %v272_v32 }
  0x30   : > { %275 = vst [vmem:[%s3467_s24 + $0x84] sm:$0xf] %v274_v33  ;;  %277 = vst [vmem:[%s3467_s24 + $0x88] sm:$0xf] %v276_v34  ;;  %v278_v35 = vld [vmem:[%s3460_s14 + $0x118] sm:$0xf] }
  0x31   : > { %v280_v36 = vld [vmem:[%s3460_s14 + $0x120] sm:$0xf]  ;;  %v282_v37 = vld [vmem:[%s3460_s14 + $0x128] sm:$0xf]  ;;  %279 = vst [vmem:[%s3467_s24 + $0x8c] sm:$0xf] %v278_v35 }
  0x32   : > { %281 = vst [vmem:[%s3467_s24 + $0x90] sm:$0xf] %v280_v36  ;;  %283 = vst [vmem:[%s3467_s24 + $0x94] sm:$0xf] %v282_v37  ;;  %v284_v38 = vld [vmem:[%s3460_s14 + $0x130] sm:$0xf] }
  0x33   : > { %v286_v39 = vld [vmem:[%s3460_s14 + $0x138] sm:$0xf]  ;;  %v288_v40 = vld [vmem:[%s3460_s14 + $0x140] sm:$0xf]  ;;  %285 = vst [vmem:[%s3467_s24 + $0x98] sm:$0xf] %v284_v38 }
  0x34   : > { %287 = vst [vmem:[%s3467_s24 + $0x9c] sm:$0xf] %v286_v39  ;;  %289 = vst [vmem:[%s3467_s24 + $0xa0] sm:$0xf] %v288_v40  ;;  %v290_v41 = vld [vmem:[%s3460_s14 + $0x148] sm:$0xf] }
  0x35   : > { %v292_v42 = vld [vmem:[%s3460_s14 + $0x150] sm:$0xf]  ;;  %v294_v43 = vld [vmem:[%s3460_s14 + $0x158] sm:$0xf]  ;;  %291 = vst [vmem:[%s3467_s24 + $0xa4] sm:$0xf] %v290_v41 }
  0x36   : > { %293 = vst [vmem:[%s3467_s24 + $0xa8] sm:$0xf] %v292_v42  ;;  %295 = vst [vmem:[%s3467_s24 + $0xac] sm:$0xf] %v294_v43  ;;  %v296_v44 = vld [vmem:[%s3460_s14 + $0x160] sm:$0xf] }
  0x37   : > { %v298_v45 = vld [vmem:[%s3460_s14 + $0x168] sm:$0xf]  ;;  %v300_v46 = vld [vmem:[%s3460_s14 + $0x170] sm:$0xf]  ;;  %297 = vst [vmem:[%s3467_s24 + $0xb0] sm:$0xf] %v296_v44 }
  0x38   : > { %299 = vst [vmem:[%s3467_s24 + $0xb4] sm:$0xf] %v298_v45  ;;  %301 = vst [vmem:[%s3467_s24 + $0xb8] sm:$0xf] %v300_v46  ;;  %v302_v47 = vld [vmem:[%s3460_s14 + $0x178] sm:$0xf] }
  0x39   : > { %v304_v48 = vld [vmem:[%s3460_s14 + $0x180] sm:$0xf]  ;;  %v306_v49 = vld [vmem:[%s3460_s14 + $0x188] sm:$0xf]  ;;  %303 = vst [vmem:[%s3467_s24 + $0xbc] sm:$0xf] %v302_v47 }
  0x3a   : > { %305 = vst [vmem:[%s3467_s24 + $0xc0] sm:$0xf] %v304_v48  ;;  %307 = vst [vmem:[%s3467_s24 + $0xc4] sm:$0xf] %v306_v49  ;;  %v308_v50 = vld [vmem:[%s3460_s14 + $0x190] sm:$0xf] }
  0x3b   : > { %v310_v51 = vld [vmem:[%s3460_s14 + $0x198] sm:$0xf]  ;;  %v312_v52 = vld [vmem:[%s3460_s14 + $0x1a0] sm:$0xf]  ;;  %309 = vst [vmem:[%s3467_s24 + $0xc8] sm:$0xf] %v308_v50 }
  0x3c   : > { %311 = vst [vmem:[%s3467_s24 + $0xcc] sm:$0xf] %v310_v51  ;;  %313 = vst [vmem:[%s3467_s24 + $0xd0] sm:$0xf] %v312_v52  ;;  %v314_v53 = vld [vmem:[%s3460_s14 + $0x1a8] sm:$0xf] }
  0x3d   : > { %v316_v54 = vld [vmem:[%s3460_s14 + $0x1b0] sm:$0xf]  ;;  %v318_v55 = vld [vmem:[%s3460_s14 + $0x1b8] sm:$0xf]  ;;  %315 = vst [vmem:[%s3467_s24 + $0xd4] sm:$0xf] %v314_v53 }
  0x3e   : > { %317 = vst [vmem:[%s3467_s24 + $0xd8] sm:$0xf] %v316_v54  ;;  %319 = vst [vmem:[%s3467_s24 + $0xdc] sm:$0xf] %v318_v55  ;;  %v320_v56 = vld [vmem:[%s3460_s14 + $0x1c0] sm:$0xf] }
  0x3f   : > { %v322_v57 = vld [vmem:[%s3460_s14 + $0x1c8] sm:$0xf]  ;;  %v324_v58 = vld [vmem:[%s3460_s14 + $0x1d0] sm:$0xf]  ;;  %321 = vst [vmem:[%s3467_s24 + $0xe0] sm:$0xf] %v320_v56 }
  0x40   : > { %323 = vst [vmem:[%s3467_s24 + $0xe4] sm:$0xf] %v322_v57  ;;  %325 = vst [vmem:[%s3467_s24 + $0xe8] sm:$0xf] %v324_v58  ;;  %v326_v59 = vld [vmem:[%s3460_s14 + $0x1d8] sm:$0xf] }
  0x41   : > { %v328_v60 = vld [vmem:[%s3460_s14 + $0x1e0] sm:$0xf]  ;;  %v330_v61 = vld [vmem:[%s3460_s14 + $0x1e8] sm:$0xf]  ;;  %327 = vst [vmem:[%s3467_s24 + $0xec] sm:$0xf] %v326_v59 }
  0x42   : > { %329 = vst [vmem:[%s3467_s24 + $0xf0] sm:$0xf] %v328_v60  ;;  %331 = vst [vmem:[%s3467_s24 + $0xf4] sm:$0xf] %v330_v61  ;;  %v332_v62 = vld [vmem:[%s3460_s14 + $0x1f0] sm:$0xf] }
  0x43   : > { %v334_v63 = vld [vmem:[%s3460_s14 + $0x1f8] sm:$0xf]  ;;  %v336_v0 = vld [vmem:[%s3460_s14 + $0x200] sm:$0xf]  ;;  %333 = vst [vmem:[%s3467_s24 + $0xf8] sm:$0xf] %v332_v62 }
  0x44   : > { %335 = vst [vmem:[%s3467_s24 + $0xfc] sm:$0xf] %v334_v63  ;;  %337 = vst [vmem:[%s3467_s24 + $0x100] sm:$0xf] %v336_v0  ;;  %v338_v1 = vld [vmem:[%s3460_s14 + $0x208] sm:$0xf] }
  0x45   : > { %v340_v2 = vld [vmem:[%s3460_s14 + $0x210] sm:$0xf]  ;;  %v342_v3 = vld [vmem:[%s3460_s14 + $0x218] sm:$0xf]  ;;  %339 = vst [vmem:[%s3467_s24 + $0x104] sm:$0xf] %v338_v1 }
  0x46   : > { %341 = vst [vmem:[%s3467_s24 + $0x108] sm:$0xf] %v340_v2  ;;  %343 = vst [vmem:[%s3467_s24 + $0x10c] sm:$0xf] %v342_v3  ;;  %v344_v4 = vld [vmem:[%s3460_s14 + $0x220] sm:$0xf] }
  0x47   : > { %v346_v5 = vld [vmem:[%s3460_s14 + $0x228] sm:$0xf]  ;;  %v348_v6 = vld [vmem:[%s3460_s14 + $0x230] sm:$0xf]  ;;  %345 = vst [vmem:[%s3467_s24 + $0x110] sm:$0xf] %v344_v4 }
  0x48   : > { %347 = vst [vmem:[%s3467_s24 + $0x114] sm:$0xf] %v346_v5  ;;  %349 = vst [vmem:[%s3467_s24 + $0x118] sm:$0xf] %v348_v6  ;;  %v350_v7 = vld [vmem:[%s3460_s14 + $0x238] sm:$0xf] }
  0x49   : > { %351 = vst [vmem:[%s3467_s24 + $0x11c] sm:$0xf] %v350_v7 }
  0x4a PF: > { %p2456_p11 = scmp.ge.s32.totalorder %s3353_s23, 1  ;;  %p530_p12 = scmp.lt.s32.totalorder %s3353_s23, 5 }
  0x4c   : > { %p531_p13 = pnand %p2456_p11, %p530_p12 }
  0x4e   : > { %534 = sbr.rel (%p531_p13) target bundleno = 494 (0x1ee), region = 73 }
  0x53   : > { %s537_s27 = sand.u32 1, %s3329_s17   ;;  %s2458_s29 = sshll.u32 %s3341_s20, 5  ;;  %vm1372_vm0 = vcmask 523264  }
  0x54   : > { %s3061_s28 = smul.u32 288, %s537_s27  ;;  %p574_p0 = scmp.lt.s32.totalorder %s2458_s29, 63 }
  0x55   : > { %p580_p1 = scmp.lt.s32.totalorder %s3337_s19, 1 }
  0x56   : > { %s3612_s5 = scalar_lea.vmem [#allocation2], %s3061_s28  ;;  %s4227_s29 = smov (!%p574_p0, %s2458_s29), 63 }
  0x57   : > { %v3135_v8 = vld [vmem:[%s3612_s5 + $0x78] sm:$0xff]   ;;  %v3137_v10 = vld [vmem:[%s3612_s5 + $0x70] sm:$0xff]   ;;  %v3139_v12 = vld [vmem:[%s3612_s5 + $0x68] sm:$0xff]   ;;  %s3062_s17 = smul.u32 20, %s4227_s29  ;;  %s570_s29 = sand.u32 1, %s3321_s15  }
  0x58   : > { %v3136_v9 = vld [vmem:[%s3612_s5 + $0x38] sm:$0xff]   ;;  %2760 = vmatprep.subr.bf16.mxu0 %v3135_v8  ;;  %3044 = vmatprep.subr.bf16.mxu1 %v3135_v8  ;;  %v3138_v11 = vld [vmem:[%s3612_s5 + $0x30] sm:$0xff]   ;;  %v3140_v13 = vld [vmem:[%s3612_s5 + $0x28] sm:$0xff]   ;;  %s581_s11 = scalar_select %p580_p1, %s3337_s19, 1 }
  0x59   : > { %2761 = vmatpush3.bf16.msra.mxu0 %v3136_v9  ;;  %3052 = vmatpush3.bf16.msra.mxu1 %v3136_v9  ;;  %v3141_v14 = vld [vmem:[%s3612_s5 + $0x60] sm:$0xff]   ;;  %v3143_v16 = vld [vmem:[%s3612_s5 + $0x58] sm:$0xff]   ;;  %s3626_s10 = scalar_lea.vmem %s4168_s0, %s3062_s17  ;;  %v3145_v18 = vld [vmem:[%s3612_s5 + $0x50] sm:$0xff]   ;;  %s2664_s17 = sshll.u32 (%p3447_p9), %s3341_s20, 6 }
  0x5a   : > { %2762 = vmatprep.subr.bf16.mxu0 %v3137_v10  ;;  %3045 = vmatprep.subr.bf16.mxu1 %v3137_v10  ;;  %v3142_v15 = vld [vmem:[%s3612_s5 + $0x20] sm:$0xff]   ;;  %v3144_v17 = vld [vmem:[%s3612_s5 + $0x18] sm:$0xff]   ;;  %v3146_v21 = vld [vmem:[%s3612_s5 + $0x10] sm:$0xff]   ;;  %s582_s14 = scalar_lea.vmem %s4170_s2, %s581_s11  ;;  %s585_s28 = scalar_lea.vmem %s4171_s3, %s581_s11 }
  0x5b   : > { %v3153_v19 = vld [vmem:[%s3626_s10 + $0x4] ss:$20 sps:$4 sm:$0xff]   ;;  %v3147_v22 = vld [vmem:[%s3612_s5 + $0x48] sm:$0xff]   ;;  %v3151_v28 = vld [vmem:[%s3626_s10] ss:$20 sps:$4 sm:$0xff]   ;;  %s2183_s6 = sadd.s32 (%p3447_p9), %s3337_s19, %s2664_s17 }
  0x5c   : > { %v3156_v20 = vld [vmem:[%s3626_s10 + $0x1e4] ss:$20 sps:$4 sm:$0xff]   ;;  %1453 = vmatprep.mubr.bf16.mxu0 %v3153_v19  ;;  %v3148_v23 = vld [vmem:[%s3612_s5 + $0x8] sm:$0xff]   ;;  %v3154_v29 = vld [vmem:[%s3626_s10 + $0x1e0] ss:$20 sps:$4 sm:$0xff]   ;;  %s2629_s7 = sshll.u32 (%p3447_p9), %s2183_s6, 2 }
  0x5d   : > { %2763 = vmatpush3.bf16.msra.mxu0 %v3138_v11  ;;  %3053 = vmatpush3.bf16.msra.mxu1 %v3138_v11  ;;  %v3149_v24 = vld [vmem:[%s3612_s5 + $0x40] sm:$0xff]   ;;  %v3157_v26 = vld [vmem:[%s3612_s5 + $0xf8] sm:$0xff]   ;;  %v3159_v31 = vld [vmem:[%s3612_s5 + $0xf0] sm:$0xff]   ;;  %s4082_s11 = scalar_lea.vmem (%p3447_p9), %s4172_s4, %s2629_s7 }
  0x5e   : > { %2764 = vmatprep.subr.bf16.mxu0 %v3139_v12  ;;  %3046 = vmatprep.subr.bf16.mxu1 %v3139_v12  ;;  %v3150_v25 = vld [vmem:[%s3612_s5] sm:$0xff]   ;;  %v3160_v27 = vld [vmem:[%s3612_s5 + $0x118] sm:$0xff]   ;;  %v3161_v34 = vld [vmem:[%s3612_s5 + $0xb0] sm:$0xff]  }
  0x5f   : > { %1549 = vmatprep.mubr.bf16.mxu1 %v3156_v20  ;;  %v3158_v30 = vld [vmem:[%s3612_s5 + $0xb8] sm:$0xff]   ;;  %v3162_v32 = vld [vmem:[%s3626_s10 + $0x2c] ss:$20 sps:$4 sm:$0xff]   ;;  %v3172_v40 = vld [vmem:[%s3626_s10 + $0x54] ss:$20 sps:$4 sm:$0xff]  }
  0x60   : > { %v3164_v33 = vld [vmem:[%s3626_s10 + $0x20c] ss:$20 sps:$4 sm:$0xff]   ;;  %v3166_v35 = vld [vmem:[%s3626_s10 + $0x28] ss:$20 sps:$4 sm:$0xff]   ;;  %v3191_v43 = vld [vmem:[%s3612_s5 + $0x110] sm:$0xff]  }
  0x61   : > { %2765 = vmatpush3.bf16.msra.mxu0 %v3140_v13  ;;  %3054 = vmatpush3.bf16.msra.mxu1 %v3140_v13  ;;  %v3168_v36 = vld [vmem:[%s3612_s5 + $0xe8] sm:$0xff]   ;;  %v3170_v39 = vld [vmem:[%s3612_s5 + $0xe0] sm:$0xff]   ;;  %v3178_v45 = vld [vmem:[%s3612_s5 + $0xd8] sm:$0xff]  }
  0x62   : > { %2766 = vmatprep.subr.bf16.mxu0 %v3141_v14  ;;  %3047 = vmatprep.subr.bf16.mxu1 %v3141_v14  ;;  %v3167_v37 = vld [vmem:[%s3626_s10 + $0x208] ss:$20 sps:$4 sm:$0xff]   ;;  %v3171_v42 = vld [vmem:[%s3612_s5 + $0xa0] sm:$0xff]   ;;  %v3180_v48 = vld [vmem:[%s3612_s5 + $0xd0] sm:$0xff]  }
  0x63   : > { %v3169_v38 = vld [vmem:[%s3612_s5 + $0xa8] sm:$0xff]   ;;  %v3176_v44 = vld [vmem:[%s3626_s10 + $0x50] ss:$20 sps:$4 sm:$0xff]   ;;  %v3179_v47 = vld [vmem:[%s3612_s5 + $0x98] sm:$0xff]  }
  0x64   : > { %v3174_v41 = vld [vmem:[%s3626_s10 + $0x234] ss:$20 sps:$4 sm:$0xff]   ;;  %v3177_v46 = vld [vmem:[%s3626_s10 + $0x230] ss:$20 sps:$4 sm:$0xff]   ;;  %v3186_v52 = vld [vmem:[%s3626_s10 + $0x78] ss:$20 sps:$4 sm:$0xff]  }
  0x65   : > { %2767 = vmatpush3.bf16.msra.mxu0 %v3142_v15  ;;  %3055 = vmatpush3.bf16.msra.mxu1 %v3142_v15  ;;  %v3182_v49 = vld [vmem:[%s3626_s10 + $0x7c] ss:$20 sps:$4 sm:$0xff]   ;;  %v3187_v53 = vld [vmem:[%s3626_s10 + $0x258] ss:$20 sps:$4 sm:$0xff]   ;;  %v3190_v57 = vld [vmem:[%s3612_s5 + $0xc0] sm:$0xff]  }
  0x66   : > { %2768 = vmatprep.subr.bf16.mxu0 %v3143_v16  ;;  %3048 = vmatprep.subr.bf16.mxu1 %v3143_v16  ;;  %v3184_v50 = vld [vmem:[%s3626_s10 + $0x25c] ss:$20 sps:$4 sm:$0xff]   ;;  %v3188_v54 = vld [vmem:[%s3612_s5 + $0xc8] sm:$0xff]   ;;  %v3193_v58 = vld [vmem:[%s3626_s10 + $0xa4] ss:$20 sps:$4 sm:$0xff]  }
  0x67   : > { %v3181_v51 = vld [vmem:[%s3612_s5 + $0x90] sm:$0xff]   ;;  %v3211_v55 = vld [vmem:[%s3612_s5 + $0x108] sm:$0xff]   ;;  %v3192_v60 = vld [vmem:[%s3612_s5 + $0x80] sm:$0xff]  }
  0x68   : > { %v3189_v56 = vld [vmem:[%s3612_s5 + $0x88] sm:$0xff]   ;;  %v3198_v62 = vld [vmem:[%s3626_s10 + $0xa0] ss:$20 sps:$4 sm:$0xff]   ;;  %v3204_v3 = vld [vmem:[%s3626_s10 + $0x30] ss:$20 sps:$4 sm:$0xff]  }
  0x69   : > { %2769 = vmatpush3.bf16.msra.mxu0 %v3144_v17  ;;  %3056 = vmatpush3.bf16.msra.mxu1 %v3144_v17  ;;  %v3197_v59 = vld [vmem:[%s3626_s10 + $0xc] ss:$20 sps:$4 sm:$0xff]   ;;  %v3195_v61 = vld [vmem:[%s3626_s10 + $0x8] ss:$20 sps:$4 sm:$0xff]   ;;  %v3209_v6 = vld [vmem:[%s3626_s10 + $0xf0] ss:$20 sps:$4 sm:$0xff]  }
  0x6a   : > { %2770 = vmatprep.subr.bf16.mxu0 %v3145_v18  ;;  %3049 = vmatprep.subr.bf16.mxu1 %v3145_v18  ;;  %v3199_v63 = vld [vmem:[%s3626_s10 + $0xcc] ss:$20 sps:$4 sm:$0xff]   ;;  %v3201_v1 = vld [vmem:[%s3626_s10 + $0x34] ss:$20 sps:$4 sm:$0xff]   ;;  %v3207_v5 = vld [vmem:[%s3626_s10 + $0x5c] ss:$20 sps:$4 sm:$0xff]  }
  0x6b   : > { %v3230_v0 = vld [vmem:[%s3612_s5 + $0x100] sm:$0xff]   ;;  %v3203_v2 = vld [vmem:[%s3626_s10 + $0xc8] ss:$20 sps:$4 sm:$0xff]   ;;  %v3210_v7 = vld [vmem:[%s3626_s10 + $0x58] ss:$20 sps:$4 sm:$0xff]   ;;  %s2457_s5 = sshll.u32 %s570_s29, 7 }
  0x6c   : > { %v3205_v4 = vld [vmem:[%s3626_s10 + $0xf4] ss:$20 sps:$4 sm:$0xff]   ;;  %v3212_v8 = vld [vmem:[%s3626_s10 + $0x11c] ss:$20 sps:$4 sm:$0xff]   ;;  %v3214_v9 = vld [vmem:[%s3626_s10 + $0x84] ss:$20 sps:$4 sm:$0xff]  }
  0x6d   : > { %2771 = vmatpush3.bf16.msra.mxu0 %v3146_v21  ;;  %3057 = vmatpush3.bf16.msra.mxu1 %v3146_v21  ;;  %v3216_v10 = vld [vmem:[%s3626_s10 + $0x118] ss:$20 sps:$4 sm:$0xff]   ;;  %v3217_v11 = vld [vmem:[%s3626_s10 + $0x80] ss:$20 sps:$4 sm:$0xff]   ;;  %v3223_v15 = vld [vmem:[%s3626_s10 + $0xa8] ss:$20 sps:$4 sm:$0xff]  }
  0x6e   : > { %2772 = vmatprep.subr.bf16.mxu0 %v3147_v22  ;;  %3050 = vmatprep.subr.bf16.mxu1 %v3147_v22  ;;  %v3218_v12 = vld [vmem:[%s3626_s10 + $0x144] ss:$20 sps:$4 sm:$0xff]   ;;  %v3220_v13 = vld [vmem:[%s3626_s10 + $0xac] ss:$20 sps:$4 sm:$0xff]   ;;  %v3226_v17 = vld [vmem:[%s3626_s10 + $0xd4] ss:$20 sps:$4 sm:$0xff]  }
  0x6f   : > { %v3222_v14 = vld [vmem:[%s3626_s10 + $0x140] ss:$20 sps:$4 sm:$0xff]   ;;  %v3228_v18 = vld [vmem:[%s3626_s10 + $0x168] ss:$20 sps:$4 sm:$0xff]   ;;  %v3229_v19 = vld [vmem:[%s3626_s10 + $0xd0] ss:$20 sps:$4 sm:$0xff]  }
  0x70   : > { %v3224_v16 = vld [vmem:[%s3626_s10 + $0x16c] ss:$20 sps:$4 sm:$0xff]   ;;  %v3231_v20 = vld [vmem:[%s3626_s10 + $0x194] ss:$20 sps:$4 sm:$0xff]   ;;  %v3233_v21 = vld [vmem:[%s3626_s10 + $0xfc] ss:$20 sps:$4 sm:$0xff]  }
  0x71   : > { %2773 = vmatpush3.bf16.msra.mxu0 %v3148_v23  ;;  %3058 = vmatpush3.bf16.msra.mxu1 %v3148_v23  ;;  %v3235_v22 = vld [vmem:[%s3626_s10 + $0x190] ss:$20 sps:$4 sm:$0xff]   ;;  %v3236_v23 = vld [vmem:[%s3626_s10 + $0xf8] ss:$20 sps:$4 sm:$0xff]   ;;  %s3933_s15 = scalar_lea.vmem [#allocation3], %s2457_s5 }
  0x72   : > { %2774 = vmatprep.subr.bf16.mxu0 %v3149_v24  ;;  %3051 = vmatprep.subr.bf16.mxu1 %v3149_v24  ;;  %v3237_v24 = vld [vmem:[%s3626_s10 + $0x1bc] ss:$20 sps:$4 sm:$0xff]  }
  0x75   : > { %2775 = vmatpush3.bf16.msra.mxu0 %v3150_v25  ;;  %3059 = vmatpush3.bf16.msra.mxu1 %v3150_v25  ;;  %v3239_v25 = vld [vmem:[%s3626_s10 + $0x124] ss:$20 sps:$4 sm:$0xff]  }
  0x76   : > { %2872 = vmatprep.subr.bf16.mxu1 %v3157_v26  ;;  %3004 = vmatprep.subr.bf16.mxu0 %v3160_v27  ;;  %v3241_v26 = vld [vmem:[%s3626_s10 + $0x1b8] ss:$20 sps:$4 sm:$0xff]  }
  0x78   : > { %1454 = vmatmul.mubr.bf16.vlgmr.msra.gmra.mxu0 %v3151_v28  ;;  %1550 = vmatmul.mubr.bf16.vlgmr.msra.gmra.mxu1 %v3154_v29  ;;  %v3243_v28 = vld [vmem:[%s3626_s10 + $0x14c] ss:$20 sps:$4 sm:$0xff]   ;;  %v3245_v29 = vld [vmem:[%s3626_s10 + $0x10] ss:$20 sps:$4 sm:$0xff]  }
  0x79   : > { %2873 = vmatpush3.bf16.msra.mxu1 %v3158_v30  ;;  %3005 = vmatpush3.bf16.msra.mxu0 %v3160_v27  ;;  %v3242_v27 = vld [vmem:[%s3626_s10 + $0x120] ss:$20 sps:$4 sm:$0xff]   ;;  %v3246_v30 = vld [vmem:[%s3626_s10 + $0x148] ss:$20 sps:$4 sm:$0xff]  }
  0x7a   : > { %2874 = vmatprep.subr.bf16.mxu1 %v3159_v31  ;;  %1461 = vmatprep.mubr.bf16.mxu0 %v3162_v32  ;;  %v3247_v31 = vld [vmem:[%s3626_s10 + $0x38] ss:$20 sps:$4 sm:$0xff]   ;;  %v3248_v32 = vld [vmem:[%s3626_s10 + $0x174] ss:$20 sps:$4 sm:$0xff]  }
  0x7b   : > { %1557 = vmatprep.mubr.bf16.mxu1 %v3164_v33  ;;  %3006 = vmatprep.subr.bf16.mxu0 %v3191_v43  ;;  %v3250_v33 = vld [vmem:[%s3626_s10 + $0x60] ss:$20 sps:$4 sm:$0xff]  }
  0x7d   : > { %2875 = vmatpush3.bf16.msra.mxu1 %v3161_v34  ;;  %3007 = vmatpush3.bf16.msra.mxu0 %v3191_v43  ;;  %v3251_v34 = vld [vmem:[%s3626_s10 + $0x170] ss:$20 sps:$4 sm:$0xff]   ;;  %v3262_v43 = vld [vmem:[%s3626_s10 + $0x128] ss:$20 sps:$4 sm:$0xff]  }
  0x7e   : > { %2876 = vmatprep.subr.bf16.mxu1 %v3168_v36  ;;  %3008 = vmatprep.subr.bf16.mxu0 %v3211_v55  ;;  %v3253_v36 = vld [vmem:[%s3626_s10 + $0x19c] ss:$20 sps:$4 sm:$0xff]  }
  0x80   : > { %1462 = vmatmul.mubr.bf16.gmra.mxu0 %v3166_v35  ;;  %1558 = vmatmul.mubr.bf16.gmra.mxu1 %v3167_v37  ;;  %v3252_v35 = vld [vmem:[%s3626_s10 + $0x88] ss:$20 sps:$4 sm:$0xff]   ;;  %v3255_v37 = vld [vmem:[%s3626_s10 + $0xb0] ss:$20 sps:$4 sm:$0xff]  }
  0x81   : > { %2877 = vmatpush3.bf16.msra.mxu1 %v3169_v38  ;;  %1469 = vmatprep.mubr.bf16.mxu0 %v3172_v40  ;;  %v3256_v38 = vld [vmem:[%s3626_s10 + $0x198] ss:$20 sps:$4 sm:$0xff]  }
  0x82   : > { %2878 = vmatprep.subr.bf16.mxu1 %v3170_v39  ;;  %1565 = vmatprep.mubr.bf16.mxu1 %v3174_v41  ;;  %v3257_v39 = vld [vmem:[%s3626_s10 + $0xd8] ss:$20 sps:$4 sm:$0xff]   ;;  %v3260_v41 = vld [vmem:[%s3626_s10 + $0x100] ss:$20 sps:$4 sm:$0xff]  }
  0x83   : > { %3009 = vmatpush3.bf16.msra.mxu0 %v3211_v55  ;;  %v3258_v40 = vld [vmem:[%s3626_s10 + $0x1c4] ss:$20 sps:$4 sm:$0xff]  }
  0x84   : > { %3010 = vmatprep.subr.bf16.mxu0 %v3230_v0  ;;  %v3277_v55 = vld [vmem:[%s3626_s10 + $0x218] ss:$20 sps:$4 sm:$0xff]  }
  0x85   : > { %2879 = vmatpush3.bf16.msra.mxu1 %v3171_v42  ;;  %v3261_v42 = vld [vmem:[%s3626_s10 + $0x1c0] ss:$20 sps:$4 sm:$0xff]  }
  0x86   : > { %2880 = vmatprep.subr.bf16.mxu1 %v3178_v45  ;;  %v3265_v45 = vld [vmem:[%s3626_s10 + $0x150] ss:$20 sps:$4 sm:$0xff]  }
  0x87   : > { %3011 = vmatpush3.bf16.msra.mxu0 %v3230_v0 }
  0x88   : > { %1470 = vmatmul.mubr.bf16.gmra.mxu0 %v3176_v44  ;;  %1566 = vmatmul.mubr.bf16.gmra.mxu1 %v3177_v46  ;;  %v3263_v44 = vld [vmem:[%s3626_s10 + $0x1ec] ss:$20 sps:$4 sm:$0xff]   ;;  %v3266_v46 = vld [vmem:[%s3626_s10 + $0x1e8] ss:$20 sps:$4 sm:$0xff]  }
  0x89   : > { %2881 = vmatpush3.bf16.msra.mxu1 %v3179_v47  ;;  %1477 = vmatprep.mubr.bf16.mxu0 %v3182_v49  ;;  %v3267_v47 = vld [vmem:[%s3626_s10 + $0x178] ss:$20 sps:$4 sm:$0xff]   ;;  %v3270_v49 = vld [vmem:[%s3626_s10 + $0x1a0] ss:$20 sps:$4 sm:$0xff]  }
  0x8a   : > { %2882 = vmatprep.subr.bf16.mxu1 %v3180_v48  ;;  %1573 = vmatprep.mubr.bf16.mxu1 %v3184_v50  ;;  %v3268_v48 = vld [vmem:[%s3626_s10 + $0x214] ss:$20 sps:$4 sm:$0xff]   ;;  %v3271_v50 = vld [vmem:[%s3626_s10 + $0x210] ss:$20 sps:$4 sm:$0xff]  }
  0x8d   : > { %2883 = vmatpush3.bf16.msra.mxu1 %v3181_v51  ;;  %v3272_v51 = vld [vmem:[%s3626_s10 + $0x1c8] ss:$20 sps:$4 sm:$0xff]  }
  0x8e   : > { %2884 = vmatprep.subr.bf16.mxu1 %v3188_v54  ;;  %v3276_v54 = vld [vmem:[%s3626_s10 + $0x238] ss:$20 sps:$4 sm:$0xff]  }
  0x90   : > { %1478 = vmatmul.mubr.bf16.gmra.mxu0 %v3186_v52  ;;  %1574 = vmatmul.mubr.bf16.gmra.mxu1 %v3187_v53  ;;  %v3273_v52 = vld [vmem:[%s3626_s10 + $0x23c] ss:$20 sps:$4 sm:$0xff]  }
  0x91   : > { %2885 = vmatpush3.bf16.msra.mxu1 %v3189_v56  ;;  %1485 = vmatprep.mubr.bf16.mxu0 %v3193_v58  ;;  %v3275_v53 = vld [vmem:[%s3626_s10 + $0x1f0] ss:$20 sps:$4 sm:$0xff]   ;;  %v3281_v58 = vld [vmem:[%s3626_s10 + $0x260] ss:$20 sps:$4 sm:$0xff]  }
  0x92   : > { %2886 = vmatprep.subr.bf16.mxu1 %v3190_v57  ;;  %1614 = vmatprep.mubr.bf16.mxu1 %v3197_v59  ;;  %v3278_v56 = vld [vmem:[%s3626_s10 + $0x264] ss:$20 sps:$4 sm:$0xff]   ;;  %v3280_v57 = vld [vmem:[%s3626_s10 + $0x240] ss:$20 sps:$4 sm:$0xff]   ;;  %v3282_v59 = vld [vmem:[%s3626_s10 + $0x268] ss:$20 sps:$4 sm:$0xff]  }
  0x95   : > { %2887 = vmatpush3.bf16.msra.mxu1 %v3192_v60 }
  0x98   : > { %1486 = vmatmul.mubr.bf16.gmra.mxu0 %v3198_v62  ;;  %1615 = vmatmul.mubr.bf16.vlgmr.msra.gmra.mxu1 %v3195_v61 }
  0x99   : > { %1493 = vmatprep.mubr.bf16.mxu0 %v3199_v63  ;;  %1622 = vmatprep.mubr.bf16.mxu1 %v3201_v1 }
  0xa0   : > { %1494 = vmatmul.mubr.bf16.gmra.mxu0 %v3203_v2  ;;  %1623 = vmatmul.mubr.bf16.gmra.mxu1 %v3204_v3 }
  0xa1   : > { %1501 = vmatprep.mubr.bf16.mxu0 %v3205_v4  ;;  %1630 = vmatprep.mubr.bf16.mxu1 %v3207_v5 }
  0xa8   : > { %1502 = vmatmul.mubr.bf16.gmra.mxu0 %v3209_v6  ;;  %1631 = vmatmul.mubr.bf16.gmra.mxu1 %v3210_v7 }
  0xa9   : > { %1509 = vmatprep.mubr.bf16.mxu0 %v3212_v8  ;;  %1638 = vmatprep.mubr.bf16.mxu1 %v3214_v9 }
  0xb0   : > { %1510 = vmatmul.mubr.bf16.gmra.mxu0 %v3216_v10  ;;  %1639 = vmatmul.mubr.bf16.gmra.mxu1 %v3217_v11 }
  0xb1   : > { %1517 = vmatprep.mubr.bf16.mxu0 %v3218_v12  ;;  %1646 = vmatprep.mubr.bf16.mxu1 %v3220_v13 }
  0xb8   : > { %1518 = vmatmul.mubr.bf16.gmra.mxu0 %v3222_v14  ;;  %1647 = vmatmul.mubr.bf16.gmra.mxu1 %v3223_v15 }
  0xb9   : > { %1525 = vmatprep.mubr.bf16.mxu0 %v3224_v16  ;;  %1654 = vmatprep.mubr.bf16.mxu1 %v3226_v17 }
  0xc0   : > { %1526 = vmatmul.mubr.bf16.gmra.mxu0 %v3228_v18  ;;  %1655 = vmatmul.mubr.bf16.gmra.mxu1 %v3229_v19 }
  0xc1   : > { %1533 = vmatprep.mubr.bf16.mxu0 %v3231_v20  ;;  %1662 = vmatprep.mubr.bf16.mxu1 %v3233_v21 }
  0xc8   : > { %1534 = vmatmul.mubr.bf16.gmra.mxu0 %v3235_v22  ;;  %1663 = vmatmul.mubr.bf16.gmra.mxu1 %v3236_v23 }
  0xc9   : > { %1541 = vmatprep.mubr.bf16.mxu0 %v3237_v24  ;;  %1670 = vmatprep.mubr.bf16.mxu1 %v3239_v25 }
  0xd0   : > { %1542 = vmatmul.mubr.bf16.gmra.mxu0 %v3241_v26  ;;  %1671 = vmatmul.mubr.bf16.gmra.mxu1 %v3242_v27 }
  0xd1   : > { %1678 = vmatprep.mubr.bf16.mxu1 %v3243_v28  ;;  %3012 = vmatprep.mubr.msk.bf16.mxu0 %vm1372_vm0, %v3245_v29 }
  0xd8   : > { %1679 = vmatmul.mubr.bf16.gmra.mxu1 %v3246_v30  ;;  %3013 = vmatmul.mubr.msk.bf16.vlgmr.msra.gmra.mxu0 %vm1372_vm0, %v3247_v31 }
  0xd9   : > { %1686 = vmatprep.mubr.bf16.mxu1 %v3248_v32  ;;  %3016 = vmatprep.mubr.msk.bf16.mxu0 %vm1372_vm0, %v3250_v33 }
  0xe0   : > { %1687 = vmatmul.mubr.bf16.gmra.mxu1 %v3251_v34  ;;  %3017 = vmatmul.mubr.msk.bf16.gmra.mxu0 %vm1372_vm0, %v3252_v35 }
  0xe1   : > { %1694 = vmatprep.mubr.bf16.mxu1 %v3253_v36  ;;  %3020 = vmatprep.mubr.msk.bf16.mxu0 %vm1372_vm0, %v3255_v37 }
  0xe8   : > { %1695 = vmatmul.mubr.bf16.gmra.mxu1 %v3256_v38  ;;  %3021 = vmatmul.mubr.msk.bf16.gmra.mxu0 %vm1372_vm0, %v3257_v39 }
  0xe9   : > { %1702 = vmatprep.mubr.bf16.mxu1 %v3258_v40  ;;  %3024 = vmatprep.mubr.msk.bf16.mxu0 %vm1372_vm0, %v3260_v41 }
  0xf0   : > { %1703 = vmatmul.mubr.bf16.gmra.mxu1 %v3261_v42  ;;  %3025 = vmatmul.mubr.msk.bf16.gmra.mxu0 %vm1372_vm0, %v3262_v43 }
  0xf1   : > { %1710 = vmatprep.mubr.bf16.mxu1 %v3263_v44  ;;  %3028 = vmatprep.mubr.msk.bf16.mxu0 %vm1372_vm0, %v3265_v45 }
  0xf8   : > { %1711 = vmatmul.mubr.bf16.gmra.mxu1 %v3266_v46  ;;  %3029 = vmatmul.mubr.msk.bf16.gmra.mxu0 %vm1372_vm0, %v3267_v47 }
  0xf9   : > { %1718 = vmatprep.mubr.bf16.mxu1 %v3268_v48  ;;  %3032 = vmatprep.mubr.msk.bf16.mxu0 %vm1372_vm0, %v3270_v49 }
 0x100   : > { %1719 = vmatmul.mubr.bf16.gmra.mxu1 %v3271_v50  ;;  %3033 = vmatmul.mubr.msk.bf16.gmra.mxu0 %vm1372_vm0, %v3272_v51 }
 0x101   : > { %1726 = vmatprep.mubr.bf16.mxu1 %v3273_v52  ;;  %3036 = vmatprep.mubr.msk.bf16.mxu0 %vm1372_vm0, %v3275_v53 }
 0x108   : > { %1727 = vmatmul.mubr.bf16.gmra.mxu1 %v3276_v54  ;;  %3037 = vmatmul.mubr.msk.bf16.gmra.mxu0 %vm1372_vm0, %v3277_v55 }
 0x109   : > { %1734 = vmatprep.mubr.bf16.mxu1 %v3278_v56  ;;  %3040 = vmatprep.mubr.msk.bf16.mxu0 %vm1372_vm0, %v3280_v57 }
 0x110   : > { %1735 = vmatmul.mubr.bf16.gmra.mxu1 %v3281_v58  ;;  %3041 = vmatmul.mubr.msk.bf16.gmra.mxu0 %vm1372_vm0, %v3282_v59 }
 0x138   : > { %v2776_v60 = vpop.f32.mrf.mxu0  ;;  %v2848_v61 = vpop.f32.mrf.mxu1 }
 0x13a   : > { %v2777_v62 = vpop.f32.mrf.mxu0  ;;  %v2849_v63 = vpop.f32.mrf.mxu1 }
 0x13b   : > { %v2778_v0 = vadd.f32 %v2777_v62, %v2776_v60  ;;  %v3751_v1 = vadd.f32 %v2849_v63, %v2848_v61 }
 0x13c   : > { %v2779_v2 = vpop.f32.mrf.mxu0  ;;  %v2851_v3 = vpop.f32.mrf.mxu1 }
 0x13d   : > { %4174 = vst [vmem:[#allocation4_spill] sm:$0xff] %v3751_v1 }
 0x13e   : > { %v2780_v4 = vpop.f32.mrf.mxu0  ;;  %v2852_v5 = vpop.f32.mrf.mxu1 }
 0x13f   : > { %v3753_v6 = vadd.f32 %v2780_v4, %v2779_v2  ;;  %v3755_v7 = vadd.f32 %v2852_v5, %v2851_v3 }
 0x140   : > { %v2782_v8 = vpop.f32.mrf.mxu0  ;;  %v2854_v9 = vpop.f32.mrf.mxu1 }
 0x141   : > { %4175 = vst [vmem:[#allocation5_spill] sm:$0xff] %v3755_v7 }
 0x142   : > { %v2783_v10 = vpop.f32.mrf.mxu0  ;;  %v2855_v11 = vpop.f32.mrf.mxu1 }
 0x143   : > { %v3757_v12 = vadd.f32 %v2783_v10, %v2782_v8  ;;  %v3759_v13 = vadd.f32 %v2855_v11, %v2854_v9 }
 0x144   : > { %v2785_v14 = vpop.f32.mrf.mxu0  ;;  %v2857_v15 = vpop.f32.mrf.mxu1 }
 0x145   : > { %4176 = vst [vmem:[#allocation6_spill] sm:$0xff] %v3759_v13 }
 0x146   : > { %v2786_v16 = vpop.f32.mrf.mxu0  ;;  %v2858_v17 = vpop.f32.mrf.mxu1 }
 0x147   : > { %v3761_v18 = vadd.f32 %v2786_v16, %v2785_v14  ;;  %v3763_v19 = vadd.f32 %v2858_v17, %v2857_v15 }
 0x148   : > { %v2788_v20 = vpop.f32.mrf.mxu0  ;;  %v2860_v21 = vpop.f32.mrf.mxu1 }
 0x149   : > { %4177 = vst [vmem:[#allocation7_spill] sm:$0xff] %v3763_v19 }
 0x14a   : > { %v2789_v22 = vpop.f32.mrf.mxu0  ;;  %v2861_v23 = vpop.f32.mrf.mxu1 }
 0x14b   : > { %v3765_v24 = vadd.f32 %v2789_v22, %v2788_v20  ;;  %v3767_v25 = vadd.f32 %v2861_v23, %v2860_v21 }
 0x14c   : > { %v2791_v26 = vpop.f32.mrf.mxu0  ;;  %v2863_v27 = vpop.f32.mrf.mxu1 }
 0x14d   : > { %4178 = vst [vmem:[#allocation8_spill] sm:$0xff] %v3767_v25 }
 0x14e   : > { %v2792_v28 = vpop.f32.mrf.mxu0  ;;  %v2864_v29 = vpop.f32.mrf.mxu1 }
 0x14f   : > { %v3769_v30 = vadd.f32 %v2792_v28, %v2791_v26  ;;  %v3771_v31 = vadd.f32 %v2864_v29, %v2863_v27 }
 0x150   : > { %v2794_v32 = vpop.f32.mrf.mxu0  ;;  %v2866_v33 = vpop.f32.mrf.mxu1 }
 0x151   : > { %4179 = vst [vmem:[#allocation9_spill] sm:$0xff] %v3771_v31 }
 0x152   : > { %v2795_v34 = vpop.f32.mrf.mxu0  ;;  %v2867_v35 = vpop.f32.mrf.mxu1 }
 0x153   : > { %v3773_v36 = vadd.f32 %v2795_v34, %v2794_v32  ;;  %v3775_v37 = vadd.f32 %v2867_v35, %v2866_v33 }
 0x154   : > { %v2797_v38 = vpop.f32.mrf.mxu0  ;;  %v2869_v39 = vpop.f32.mrf.mxu1 }
 0x155   : > { %4180 = vst [vmem:[#allocation10_spill] sm:$0xff] %v3775_v37 }
 0x156   : > { %v2798_v40 = vpop.f32.mrf.mxu0  ;;  %v2870_v41 = vpop.f32.mrf.mxu1 }
 0x157   : > { %v3777_v42 = vadd.f32 %v2798_v40, %v2797_v38  ;;  %v3779_v43 = vadd.f32 %v2870_v41, %v2869_v39 }
 0x158   : > { %v2800_v44 = vpop.f32.mrf.mxu0  ;;  %v2888_v45 = vpop.f32.mrf.mxu1 }
 0x159   : > { %4181 = vst [vmem:[#allocation11_spill] sm:$0xff] %v3779_v43 }
 0x15a   : > { %v2801_v46 = vpop.f32.mrf.mxu0  ;;  %v2889_v47 = vpop.f32.mrf.mxu1 }
 0x15b   : > { %v3781_v48 = vadd.f32 %v2801_v46, %v2800_v44  ;;  %v2890_v49 = vadd.f32 %v2889_v47, %v2888_v45 }
 0x15c   : > { %v2803_v50 = vpop.f32.mrf.mxu0  ;;  %v3783_v51 = vpop.f32.mrf.mxu1 }
 0x15d   : > { %v3785_v52 = vadd.f32 %v2890_v49, %v2778_v0 }
 0x15e   : > { %v2804_v53 = vpop.f32.mrf.mxu0  ;;  %v3787_v54 = vpop.f32.mrf.mxu1 }
 0x15f   : > { %v3789_v55 = vadd.f32 %v2804_v53, %v2803_v50 }
 0x160   : > { %v2806_v56 = vpop.f32.mrf.mxu0  ;;  %v2894_v57 = vpop.f32.mrf.mxu1 }
 0x162   : > { %v2807_v58 = vpop.f32.mrf.mxu0  ;;  %v2895_v59 = vpop.f32.mrf.mxu1 }
 0x163   : > { %v3791_v60 = vadd.f32 %v2807_v58, %v2806_v56  ;;  %v2896_v25 = vadd.f32 %v2895_v59, %v2894_v57  ;;  %v2893_v59 = vadd.f32 %v3787_v54, %v3783_v51 }
 0x164   : > { %v2809_v61 = vpop.f32.mrf.mxu0  ;;  %v2897_v62 = vpop.f32.mrf.mxu1 }
 0x166   : > { %v2810_v63 = vpop.f32.mrf.mxu0  ;;  %v2898_v2 = vpop.f32.mrf.mxu1 }
 0x167   : > { %v3793_v3 = vadd.f32 %v2810_v63, %v2809_v61 }
 0x168   : > { %v2812_v4 = vpop.f32.mrf.mxu0  ;;  %v3795_v0 = vpop.f32.mrf.mxu1 }
 0x16a   : > { %v2813_v5 = vpop.f32.mrf.mxu0  ;;  %v3797_v8 = vpop.f32.mrf.mxu1 }
 0x16b   : > { %v3799_v9 = vadd.f32 %v2813_v5, %v2812_v4 }
 0x16c   : > { %v2815_v10 = vpop.f32.mrf.mxu0  ;;  %v3801_v11 = vpop.f32.mrf.mxu1 }
 0x16e   : > { %v2816_v14 = vpop.f32.mrf.mxu0  ;;  %v3803_v15 = vpop.f32.mrf.mxu1 }
 0x16f   : > { %v3805_v16 = vadd.f32 %v2816_v14, %v2815_v10 }
 0x170   : > { %v3807_v17 = vpop.f32.mrf.mxu0  ;;  %v2906_v20 = vpop.f32.mrf.mxu1 }
 0x172   : > { %v3809_v21 = vpop.f32.mrf.mxu0  ;;  %v2907_v22 = vpop.f32.mrf.mxu1 }
 0x174   : > { %v3811_v23 = vpop.f32.mrf.mxu0  ;;  %v2909_v26 = vpop.f32.mrf.mxu1 }
 0x176   : > { %v3813_v27 = vpop.f32.mrf.mxu0  ;;  %v2910_v28 = vpop.f32.mrf.mxu1 }
 0x177   : > { %v2911_v51 = vadd.f32 %v2910_v28, %v2909_v26 }
 0x178   : > { %v2824_v29 = vpop.f32.mrf.mxu0  ;;  %v3815_v32 = vpop.f32.mrf.mxu1 }
 0x17a   : > { %v2825_v33 = vpop.f32.mrf.mxu0  ;;  %v3817_v34 = vpop.f32.mrf.mxu1 }
 0x17b   : > { %v3819_v35 = vadd.f32 %v2825_v33, %v2824_v29 }
 0x17c   : > { %v3821_v38 = vpop.f32.mrf.mxu0  ;;  %v3823_v39 = vpop.f32.mrf.mxu1 }
 0x17d   : > { %4182 = vst [vmem:[#allocation12_spill] sm:$0xff] %v3819_v35  ;;  %4183 = vst [vmem:[#allocation13_spill] sm:$0xff] %v3821_v38 }
 0x17e   : > { %v3825_v40 = vpop.f32.mrf.mxu0  ;;  %v3827_v41 = vpop.f32.mrf.mxu1 }
 0x17f   : > { %4184 = vst [vmem:[#allocation14_spill] sm:$0xff] %v3825_v40 }
 0x180   : > { %v3829_v44 = vpop.f32.mrf.mxu0  ;;  %v3831_v45 = vpop.f32.mrf.mxu1 }
 0x182   : > { %v3833_v46 = vpop.f32.mrf.mxu0  ;;  %v2919_v47 = vpop.f32.mrf.mxu1 }
 0x184   : > { %v3835_v49 = vpop.f32.mrf.mxu0  ;;  %v3837_v50 = vpop.f32.mrf.mxu1 }
 0x186   : > { %v3839_v53 = vpop.f32.mrf.mxu0  ;;  %v3841_v56 = vpop.f32.mrf.mxu1 }
 0x188   : > { %v3843_v58 = vpop.f32.mrf.mxu0  ;;  %v3845_v61 = vpop.f32.mrf.mxu1 }
 0x189   : > { %4185 = vst [vmem:[#allocation15_spill] sm:$0xff] %v3843_v58 }
 0x18a   : > { %v3847_v63 = vpop.f32.mrf.mxu0  ;;  %v3849_v4 = vpop.f32.mrf.mxu1 }
 0x18b   : > { %4186 = vst [vmem:[#allocation16_spill] sm:$0xff] %v3847_v63 }
 0x18c   : > { %v3851_v5 = vpop.f32.mrf.mxu0  ;;  %v3853_v10 = vpop.f32.mrf.mxu1 }
 0x18d   : > { %4187 = vst [vmem:[#allocation17_spill] sm:$0xff] %v3851_v5  ;;  %v1625_v5 = vadd.f32 %v2896_v25, %v3757_v12 }
 0x18e   : > { %v3856_v14 = vpop.f32.mrf.mxu0  ;;  %v3858_v29 = vpop.f32.mrf.mxu1 }
 0x18f   : > { %4188 = vst [vmem:[#allocation18_spill] sm:$0xff] %v3856_v14  ;;  %v2899_v14 = vadd.f32 %v2898_v2, %v2897_v62  ;;  %v2908_v62 = vadd.f32 %v2907_v22, %v2906_v20  ;;  %v1620_v22 = vadd.f32 %v2893_v59, %v3753_v6 }
 0x190   : > { %v3860_v33 = vpop.f32.mrf.mxu0  ;;  %v3862_v43 = vpop.f32.mrf.mxu1 }
 0x191   : > { %4189 = vst [vmem:[#allocation19_spill] sm:$0xff] %v3860_v33  ;;  %v1628_v2 = vadd.f32 %v2899_v14, %v3761_v18  ;;  %v3895_v33 = vld [vmem:[%s585_s28] ss:$0 sm:$0xff]  ;;  %v1641_v14 = vadd.f32 %v2908_v62, %v3773_v36 }
 0x192   : > { %v3865_v31 = vpop.f32.mrf.mxu0  ;;  %v3867_v37 = vpop.f32.mrf.mxu1 }
 0x193   : > { %4190 = vst [vmem:[#allocation20_spill] sm:$0xff] %v3865_v31  ;;  %v3883_v31 = vld [vmem:[%s582_s14] ss:$0 sm:$0xff] }
 0x194   : > { %v3869_v7 = vpop.f32.mrf.mxu0  ;;  %v3871_v19 = vpop.f32.mrf.mxu1 }
 0x195   : > { %4191 = vst [vmem:[#allocation21_spill] sm:$0xff] %v3869_v7 }
 0x196   : > { %v3876_v1 = vpop.f32.mrf.mxu0  ;;  %v3878_v13 = vpop.f32.mrf.mxu1 }
 0x197   : > { %4192 = vst [vmem:[#allocation22_spill] sm:$0xff] %v3876_v1 }
 0x198   : > { %v3881_v63 = vpop.f32.mrf.mxu1  ;;  %v3014_v58 = vpop.f32.mrf.mxu0 }
 0x199   : > { %v1786_v57 = vadd.f32 %v3014_v58, %v1625_v5  ;;  %v2902_v58 = vadd.f32 %v3797_v8, %v3795_v0  ;;  %v2905_v8 = vadd.f32 %v3803_v15, %v3801_v11 }
 0x19a   : > { %v3890_v1 = vpop.f32.mrf.mxu1  ;;  %v1777_v7 = vpop.f32.mrf.mxu0 }
 0x19b   : > { %v1913_v12 = vmul.f32 %v3883_v31, %v1786_v57  ;;  %v1778_v25 = vadd.f32 %v1777_v7, %v3785_v52  ;;  %v1633_v6 = vadd.f32 %v2902_v58, %v3765_v24 }
 0x19c   : > { %v3897_v35 = vpop.f32.mrf.mxu1  ;;  %v3015_v40 = vpop.f32.mrf.mxu0 }
 0x19d   : > { %v1789_v5 = vadd.f32 %v3015_v40, %v1628_v2  ;;  %v1911_v54 = vmul.f32 %v3883_v31, %v1778_v25  ;;  %v1952_v18 = vadd.f32 %v3895_v33, %v1913_v12  ;;  %v2920_v40 = vadd.f32 %v2919_v47, %v3831_v45 }
 0x19e   : > { %v3903_v20 = vpop.f32.mrf.mxu1  ;;  %v1780_v7 = vpop.f32.mrf.mxu0  ;;  %v1644_v25 = vadd.f32 %v2911_v51, %v3777_v42  ;;  %v2914_v45 = vadd.f32 %v3817_v34, %v3815_v32  ;;  %v2923_v42 = vadd.f32 %v3841_v56, %v3837_v50 }
 0x19f   : > { %v1914_v52 = vmul.f32 %v3883_v31, %v1789_v5  ;;  %v1781_v57 = vadd.f32 %v1780_v7, %v1620_v22  ;;  %v1950_v59 = vadd.f32 %v3895_v33, %v1911_v54  ;;  %v1984_v2 = vmax.f32 %v1952_v18, 0.0 }
 0x1a0   : > { %v3909_v38 = vpop.f32.mrf.mxu1  ;;  %v3018_v0 = vpop.f32.mrf.mxu0  ;;  %v1636_v54 = vadd.f32 %v2905_v8, %v3769_v30  ;;  %v1657_v30 = vadd.f32 %v2920_v40, %v3791_v60 }
 0x1a1   : > { %v1953_v26 = vadd.f32 %v3895_v33, %v1914_v52  ;;  %v1802_v28 = vadd.f32 %v3018_v0, %v1641_v14  ;;  %v1912_v12 = vmul.f32 %v3883_v31, %v1781_v57  ;;  %v1982_v51 = vmax.f32 %v1950_v59, 0.0 }
 0x1a2   : > { %v3918_v36 = vpop.f32.mrf.mxu1  ;;  %v1793_v62 = vpop.f32.mrf.mxu0  ;;  %v1649_v59 = vadd.f32 %v2914_v45, %v3781_v48  ;;  %v2820_v48 = vadd.f32 %v3809_v21, %v3807_v17 }
 0x1a3   : > { %v1985_v5 = vmax.f32 %v1953_v26, 0.0  ;;  %v1917_v11 = vmul.f32 %v3883_v31, %v1802_v28  ;;  %v1794_v15 = vadd.f32 %v1793_v62, %v1633_v6  ;;  %v1951_v22 = vadd.f32 %v3895_v33, %v1912_v12 }
 0x1a4   : > { %v3923_v7 = vpop.f32.mrf.mxu1  ;;  %v3019_v24 = vpop.f32.mrf.mxu0  ;;  %v2917_v26 = vadd.f32 %v3827_v41, %v3823_v39  ;;  %v2932_v12 = vadd.f32 %v3867_v37, %v3862_v43 }
 0x1a5   : > { %v2673_v47 = vpack.c.bf16 %v1985_v5, %v1984_v2  ;;  %v1805_v58 = vadd.f32 %v3019_v24, %v1644_v25  ;;  %v1983_v18 = vmax.f32 %v1951_v22, 0.0  ;;  %v1915_v52 = vmul.f32 %v3883_v31, %v1794_v15 }
 0x1a6   : > { %v3931_v14 = vpop.f32.mrf.mxu1  ;;  %v1796_v57 = vpop.f32.mrf.mxu0  ;;  %v1956_v32 = vadd.f32 %v3895_v33, %v1917_v11  ;;  %v1660_v2 = vadd.f32 %v2923_v42, %v3793_v3  ;;  %v2926_v22 = vadd.f32 %v3849_v4, %v3845_v61  ;;  %v1652_v3 = vadd.f32 %v2917_v26, %v3789_v55 }
 0x1a7   : > { %2745 = vst [vmem:[%s3933_s15 + $0x8] sm:$0xff] %v2673_v47   ;;  %v1918_v34 = vmul.f32 %v3883_v31, %v1805_v58  ;;  %v2668_v0 = vpack.c.bf16 %v1983_v18, %v1982_v51  ;;  %v1797_v50 = vadd.f32 %v1796_v57, %v1636_v54  ;;  %v1954_v62 = vadd.f32 %v3895_v33, %v1915_v52 }
 0x1a8   : > { %v3939_v56 = vpop.f32.mrf.mxu1  ;;  %v3022_v8 = vpop.f32.mrf.mxu0  ;;  %v1988_v5 = vmax.f32 %v1956_v32, 0.0  ;;  %v2935_v47 = vadd.f32 %v3878_v13, %v3871_v19  ;;  %v1673_v4 = vadd.f32 %v2932_v12, %v2820_v48  ;;  %v2823_v55 = vadd.f32 %v3813_v27, %v3811_v23 }
 0x1a9   : > { %v1957_v28 = vadd.f32 %v3895_v33, %v1918_v34  ;;  %v1818_v6 = vadd.f32 %v3022_v8, %v1657_v30  ;;  %2669 = vst [vmem:[%s3933_s15] sm:$0xff] %v2668_v0   ;;  %v1916_v60 = vmul.f32 %v3883_v31, %v1797_v50  ;;  %v1986_v58 = vmax.f32 %v1954_v62, 0.0 }
 0x1aa   : > { %v3950_v40 = vpop.f32.mrf.mxu1  ;;  %v1809_v25 = vpop.f32.mrf.mxu0  ;;  %v2929_v57 = vadd.f32 %v3858_v29, %v3853_v10  ;;  %v1665_v30 = vadd.f32 %v2926_v22, %v3799_v9  ;;  %v2944_v0 = vadd.f32 %v3918_v36, %v3909_v38  ;;  %v1676_v26 = vadd.f32 %v2935_v47, %v2823_v55  ;;  %v4193_v22 = vld [vmem:[#allocation13_spill] sm:$0xff] }
 0x1ab   : > { %v1989_v39 = vmax.f32 %v1957_v28, 0.0  ;;  %v1921_v41 = vmul.f32 %v3883_v31, %v1818_v6  ;;  %v1810_v11 = vadd.f32 %v1809_v25, %v1649_v59  ;;  %v1955_v37 = vadd.f32 %v3895_v33, %v1916_v60 }
 0x1ac   : > { %v3957_v43 = vpop.f32.mrf.mxu1  ;;  %v3023_v15 = vpop.f32.mrf.mxu0  ;;  %v2832_v9 = vadd.f32 %v3833_v46, %v3829_v44  ;;  %v2938_v12 = vadd.f32 %v3890_v1, %v3881_v63  ;;  %v1668_v25 = vadd.f32 %v2929_v57, %v3805_v16  ;;  %v2835_v63 = vadd.f32 %v3839_v53, %v3835_v49 }
 0x1ad   : > { %v2683_v24 = vpack.c.bf16 %v1989_v39, %v1988_v5  ;;  %v1821_v45 = vadd.f32 %v3023_v15, %v1660_v2  ;;  %v1987_v54 = vmax.f32 %v1955_v37, 0.0  ;;  %v1919_v42 = vmul.f32 %v3883_v31, %v1810_v11 }
 0x1ae   : > { %v3965_v17 = vpop.f32.mrf.mxu1  ;;  %v1812_v21 = vpop.f32.mrf.mxu0  ;;  %v1960_v51 = vadd.f32 %v3895_v33, %v1921_v41  ;;  %v2947_v2 = vadd.f32 %v3931_v14, %v3923_v7  ;;  %v1689_v1 = vadd.f32 %v2944_v0, %v2832_v9  ;;  %v2941_v16 = vadd.f32 %v3903_v20, %v3897_v35  ;;  %v4199_v9 = vld [vmem:[#allocation16_spill] sm:$0xff] }
 0x1af   : > { %2747 = vst [vmem:[%s3933_s15 + $0x18] sm:$0xff] %v2683_v24   ;;  %v1922_v61 = vmul.f32 %v3883_v31, %v1821_v45  ;;  %v2678_v18 = vpack.c.bf16 %v1987_v54, %v1986_v58  ;;  %v1813_v52 = vadd.f32 %v1812_v21, %v1652_v3  ;;  %v1958_v50 = vadd.f32 %v3895_v33, %v1919_v42  ;;  %v4194_v24 = vld [vmem:[#allocation14_spill] sm:$0xff]  ;;  %v4195_v58 = vld [vmem:[#allocation12_spill] sm:$0xff] }
 0x1b0   : > { %v2954_v13 = vpop.f32.mrf.mxu1  ;;  %v3026_v19 = vpop.f32.mrf.mxu0  ;;  %v1992_v28 = vmax.f32 %v1960_v51, 0.0  ;;  %v2829_v45 = vadd.f32 %v4194_v24, %v4193_v22  ;;  %v1681_v54 = vadd.f32 %v2938_v12, %v4195_v58  ;;  %v1692_v20 = vadd.f32 %v2947_v2, %v2835_v63 }
 0x1b1   : > { %v1961_v32 = vadd.f32 %v3895_v33, %v1922_v61  ;;  %v1834_v34 = vadd.f32 %v3026_v19, %v1673_v4  ;;  %2746 = vst [vmem:[%s3933_s15 + $0x10] sm:$0xff] %v2678_v18   ;;  %v1920_v23 = vmul.f32 %v3883_v31, %v1813_v52  ;;  %v1990_v5 = vmax.f32 %v1958_v50, 0.0  ;;  %v4196_v18 = vld [vmem:[#allocation19_spill] sm:$0xff]  ;;  %v4197_v52 = vld [vmem:[#allocation20_spill] sm:$0xff] }
 0x1b2   : > { %v2955_v27 = vpop.f32.mrf.mxu1  ;;  %v1825_v8 = vpop.f32.mrf.mxu0  ;;  %v2844_v19 = vadd.f32 %v4197_v52, %v4196_v18  ;;  %v4204_v52 = vld [vmem:[#allocation6_spill] sm:$0xff] }
 0x1b3   : > { %v1993_v6 = vmax.f32 %v1961_v32, 0.0  ;;  %v1925_v10 = vmul.f32 %v3883_v31, %v1834_v34  ;;  %v1826_v29 = vadd.f32 %v1825_v8, %v1665_v30  ;;  %v1959_v59 = vadd.f32 %v3895_v33, %v1920_v23 }
 0x1b4   : > { %v2957_v38 = vpop.f32.mrf.mxu1  ;;  %v3027_v36 = vpop.f32.mrf.mxu0  ;;  %v2956_v42 = vadd.f32 %v2955_v27, %v2954_v13  ;;  %v1684_v34 = vadd.f32 %v2941_v16, %v2829_v45  ;;  %v2950_v30 = vadd.f32 %v3950_v40, %v3939_v56  ;;  %v4200_v56 = vld [vmem:[#allocation17_spill] sm:$0xff]  ;;  %v4201_v40 = vld [vmem:[#allocation18_spill] sm:$0xff] }
 0x1b5   : > { %v2693_v62 = vpack.c.bf16 %v1993_v6, %v1992_v28  ;;  %v1837_v60 = vadd.f32 %v3027_v36, %v1676_v26  ;;  %v1991_v39 = vmax.f32 %v1959_v59, 0.0  ;;  %v1923_v41 = vmul.f32 %v3883_v31, %v1826_v29  ;;  %v4198_v29 = vld [vmem:[#allocation15_spill] sm:$0xff] }
 0x1b6   : > { %v2958_v11 = vpop.f32.mrf.mxu1  ;;  %v1828_v44 = vpop.f32.mrf.mxu0  ;;  %v1964_v46 = vadd.f32 %v3895_v33, %v1925_v10  ;;  %v2838_v59 = vadd.f32 %v4199_v9, %v4198_v29  ;;  %v1705_v12 = vadd.f32 %v2956_v42, %v2844_v19 }
 0x1b7   : > { %2749 = vst [vmem:[%s3933_s15 + $0x28] sm:$0xff] %v2693_v62   ;;  %v1926_v48 = vmul.f32 %v3883_v31, %v1837_v60  ;;  %v2688_v7 = vpack.c.bf16 %v1991_v39, %v1990_v5  ;;  %v1829_v14 = vadd.f32 %v1828_v44, %v1668_v25  ;;  %v1962_v21 = vadd.f32 %v3895_v33, %v1923_v41  ;;  %v4202_v62 = vld [vmem:[#allocation21_spill] sm:$0xff]  ;;  %v4203_v60 = vld [vmem:[#allocation22_spill] sm:$0xff] }
 0x1b8   : > { %v2960_v37 = vpop.f32.mrf.mxu1  ;;  %v3030_v15 = vpop.f32.mrf.mxu0  ;;  %v1996_v51 = vmax.f32 %v1964_v46, 0.0  ;;  %v2959_v50 = vadd.f32 %v2958_v11, %v2957_v38  ;;  %v2841_v38 = vadd.f32 %v4201_v40, %v4200_v56  ;;  %v2847_v25 = vadd.f32 %v4203_v60, %v4202_v62 }
 0x1b9   : > { %v1965_v3 = vadd.f32 %v3895_v33, %v1926_v48  ;;  %v1850_v47 = vadd.f32 %v3030_v15, %v1689_v1  ;;  %2748 = vst [vmem:[%s3933_s15 + $0x20] sm:$0xff] %v2688_v7   ;;  %v1924_v49 = vmul.f32 %v3883_v31, %v1829_v14  ;;  %v1994_v27 = vmax.f32 %v1962_v21, 0.0 }
 0x1ba   : > { %v2961_v53 = vpop.f32.mrf.mxu1  ;;  %v1841_v35 = vpop.f32.mrf.mxu0  ;;  %v2953_v11 = vadd.f32 %v3965_v17, %v3957_v43  ;;  %v1697_v48 = vadd.f32 %v2950_v30, %v2838_v59  ;;  %v1708_v15 = vadd.f32 %v2959_v50, %v2847_v25 }
 0x1bb   : > { %v1997_v61 = vmax.f32 %v1965_v3, 0.0  ;;  %v1929_v4 = vmul.f32 %v3883_v31, %v1850_v47  ;;  %v1842_v55 = vadd.f32 %v1841_v35, %v1681_v54  ;;  %v1963_v57 = vadd.f32 %v3895_v33, %v1924_v49 }
 0x1bc   : > { %v2963_v32 = vpop.f32.mrf.mxu1  ;;  %v3031_v13 = vpop.f32.mrf.mxu0  ;;  %v2962_v58 = vadd.f32 %v2961_v53, %v2960_v37  ;;  %v1700_v21 = vadd.f32 %v2953_v11, %v2841_v38 }
 0x1bd   : > { %v2703_v0 = vpack.c.bf16 %v1997_v61, %v1996_v51  ;;  %v1853_v23 = vadd.f32 %v3031_v13, %v1692_v20  ;;  %v1995_v8 = vmax.f32 %v1963_v57, 0.0  ;;  %v1968_v26 = vadd.f32 %v3895_v33, %v1929_v4 }
 0x1be   : > { %v1927_v28 = vmul.f32 %v3883_v31, %v1842_v55  ;;  %v2964_v6 = vpop.f32.mrf.mxu1  ;;  %v1844_v10 = vpop.f32.mrf.mxu0 }
 0x1bf   : > { %2751 = vst [vmem:[%s3933_s15 + $0x38] sm:$0xff] %v2703_v0   ;;  %v1930_v36 = vmul.f32 %v3883_v31, %v1853_v23  ;;  %v2698_v2 = vpack.c.bf16 %v1995_v8, %v1994_v27  ;;  %v1845_v5 = vadd.f32 %v1844_v10, %v1684_v34  ;;  %v2000_v1 = vmax.f32 %v1968_v26, 0.0  ;;  %v4205_v0 = vld [vmem:[#allocation4_spill] sm:$0xff] }
 0x1c0   : > { %v2966_v39 = vpop.f32.mrf.mxu1  ;;  %v3034_v41 = vpop.f32.mrf.mxu0  ;;  %v1966_v63 = vadd.f32 %v3895_v33, %v1927_v28  ;;  %v1713_v50 = vadd.f32 %v2962_v58, %v4205_v0  ;;  %v2965_v23 = vadd.f32 %v2964_v6, %v2963_v32 }
 0x1c1   : > { %v1969_v44 = vadd.f32 %v3895_v33, %v1930_v36  ;;  %v1866_v46 = vadd.f32 %v3034_v41, %v1705_v12  ;;  %2750 = vst [vmem:[%s3933_s15 + $0x30] sm:$0xff] %v2698_v2   ;;  %v1928_v16 = vmul.f32 %v3883_v31, %v1845_v5  ;;  %v4206_v36 = vld [vmem:[#allocation7_spill] sm:$0xff] }
 0x1c2   : > { %v2967_v7 = vpop.f32.mrf.mxu1  ;;  %v1857_v14 = vpop.f32.mrf.mxu0  ;;  %v1998_v49 = vmax.f32 %v1966_v63, 0.0 }
 0x1c3   : > { %v2001_v22 = vmax.f32 %v1969_v44, 0.0  ;;  %v1933_v24 = vmul.f32 %v3883_v31, %v1866_v46  ;;  %v2968_v45 = vadd.f32 %v2967_v7, %v2966_v39  ;;  %v1858_v3 = vadd.f32 %v1857_v14, %v1697_v48  ;;  %v4207_v39 = vld [vmem:[#allocation5_spill] sm:$0xff] }
 0x1c4   : > { %v1967_v43 = vadd.f32 %v3895_v33, %v1928_v16  ;;  %v2969_v17 = vpop.f32.mrf.mxu1  ;;  %v3035_v47 = vpop.f32.mrf.mxu0  ;;  %v1716_v41 = vadd.f32 %v2965_v23, %v4207_v39  ;;  %v2222_v39 = vld [vmem:[%s3933_s15 + $0x28] sm:$0xf] (%p3447_p9) }
 0x1c5   : > { %v2713_v54 = vpack.c.bf16 %v2001_v22, %v2000_v1  ;;  %v1869_v42 = vadd.f32 %v3035_v47, %v1708_v15  ;;  %v1972_v20 = vadd.f32 %v3895_v33, %v1933_v24  ;;  %v1931_v51 = vmul.f32 %v3883_v31, %v1858_v3  ;;  %v4208_v15 = vld [vmem:[#allocation8_spill] sm:$0xff]  ;;  %2223 = vst [vmem:[%s4082_s11 + $0x50] sm:$0xf] (%p3447_p9), %v2222_v39 }
 0x1c6   : > { %v1999_v35 = vmax.f32 %v1967_v43, 0.0  ;;  %v2970_v61 = vpop.f32.mrf.mxu1  ;;  %v1860_v4 = vpop.f32.mrf.mxu0  ;;  %v1721_v19 = vadd.f32 %v2968_v45, %v4204_v52 }
 0x1c7   : > { %2753 = vst [vmem:[%s3933_s15 + $0x48] sm:$0xff] %v2713_v54   ;;  %v1934_v55 = vmul.f32 %v3883_v31, %v1869_v42  ;;  %v2971_v18 = vadd.f32 %v2970_v61, %v2969_v17  ;;  %v1861_v37 = vadd.f32 %v1860_v4, %v1700_v21  ;;  %v2004_v27 = vmax.f32 %v1972_v20, 0.0  ;;  %v4209_v20 = vld [vmem:[#allocation10_spill] sm:$0xff]  ;;  %v4210_v4 = vld [vmem:[#allocation9_spill] sm:$0xff] }
 0x1c8   : > { %v2708_v57 = vpack.c.bf16 %v1999_v35, %v1998_v49  ;;  %v2972_v53 = vpop.f32.mrf.mxu1  ;;  %v3038_v13 = vpop.f32.mrf.mxu0  ;;  %v1970_v8 = vadd.f32 %v3895_v33, %v1931_v51 }
 0x1c9   : > { %v1973_v34 = vadd.f32 %v3895_v33, %v1934_v55  ;;  %v1882_v30 = vadd.f32 %v3038_v13, %v1721_v19  ;;  %v1932_v26 = vmul.f32 %v3883_v31, %v1861_v37  ;;  %v1724_v12 = vadd.f32 %v2971_v18, %v4206_v36 }
 0x1ca   : > { %2752 = vst [vmem:[%s3933_s15 + $0x40] sm:$0xff] %v2708_v57   ;;  %v2973_v28 = vpop.f32.mrf.mxu1  ;;  %v1873_v10 = vpop.f32.mrf.mxu0  ;;  %v2002_v60 = vmax.f32 %v1970_v8, 0.0 }
 0x1cb   : > { %v2005_v29 = vmax.f32 %v1973_v34, 0.0  ;;  %v1937_v9 = vmul.f32 %v3883_v31, %v1882_v30  ;;  %v1874_v59 = vadd.f32 %v1873_v10, %v1713_v50  ;;  %v1971_v56 = vadd.f32 %v3895_v33, %v1932_v26  ;;  %v4211_v50 = vld [vmem:[#allocation11_spill] sm:$0xff] }
 0x1cc   : > { %v2975_v40 = vpop.f32.mrf.mxu1  ;;  %v3039_v38 = vpop.f32.mrf.mxu0  ;;  %v2974_v6 = vadd.f32 %v2973_v28, %v2972_v53 }
 0x1cd   : > { %v2723_v32 = vpack.c.bf16 %v2005_v29, %v2004_v27  ;;  %v1885_v62 = vadd.f32 %v3039_v38, %v1724_v12  ;;  %v2003_v25 = vmax.f32 %v1971_v56, 0.0  ;;  %v1935_v2 = vmul.f32 %v3883_v31, %v1874_v59  ;;  %v2206_v38 = vld [vmem:[%s3933_s15 + $0x8] sm:$0xf] (%p3447_p9) }
 0x1ce   : > { %v2976_v5 = vpop.f32.mrf.mxu1  ;;  %v1876_v11 = vpop.f32.mrf.mxu0  ;;  %v1976_v44 = vadd.f32 %v3895_v33, %v1937_v9  ;;  %v1729_v22 = vadd.f32 %v2974_v6, %v4208_v15  ;;  %v2210_v6 = vld [vmem:[%s3933_s15 + $0x10] sm:$0xf] (%p3447_p9)  ;;  %2207 = vst [vmem:[%s4082_s11 + $0x10] sm:$0xf] (%p3447_p9), %v2206_v38 }
 0x1cf   : > { %2755 = vst [vmem:[%s3933_s15 + $0x58] sm:$0xff] %v2723_v32   ;;  %v1938_v46 = vmul.f32 %v3883_v31, %v1885_v62  ;;  %v2718_v48 = vpack.c.bf16 %v2003_v25, %v2002_v60  ;;  %v1877_v1 = vadd.f32 %v1876_v11, %v1716_v41  ;;  %v2977_v14 = vadd.f32 %v2976_v5, %v2975_v40  ;;  %v2208_v32 = vld [vmem:[%s3933_s15 + $0xc] sm:$0xf] (%p3447_p9)  ;;  %v2212_v62 = vld [vmem:[%s3933_s15 + $0x14] sm:$0xf] (%p3447_p9) }
 0x1d0   : > { %v2978_v63 = vpop.f32.mrf.mxu1  ;;  %v3042_v16 = vpop.f32.mrf.mxu0  ;;  %v1974_v24 = vadd.f32 %v3895_v33, %v1935_v2  ;;  %v2008_v17 = vmax.f32 %v1976_v44, 0.0  ;;  %v2214_v60 = vld [vmem:[%s3933_s15 + $0x18] sm:$0xf] (%p3447_p9)  ;;  %v2216_v25 = vld [vmem:[%s3933_s15 + $0x1c] sm:$0xf] (%p3447_p9) }
 0x1d1   : > { %v1977_v7 = vadd.f32 %v3895_v33, %v1938_v46  ;;  %2754 = vst [vmem:[%s3933_s15 + $0x50] sm:$0xff] %v2718_v48   ;;  %v1936_v45 = vmul.f32 %v3883_v31, %v1877_v1  ;;  %v1732_v55 = vadd.f32 %v2977_v14, %v4210_v4  ;;  %v2218_v2 = vld [vmem:[%s3933_s15 + $0x20] sm:$0xf] (%p3447_p9)  ;;  %v2220_v5 = vld [vmem:[%s3933_s15 + $0x24] sm:$0xf] (%p3447_p9) }
 0x1d2   : > { %v2979_v3 = vpop.f32.mrf.mxu1  ;;  %v1889_v43 = vpop.f32.mrf.mxu0  ;;  %v2006_v18 = vmax.f32 %v1974_v24, 0.0  ;;  %2209 = vst [vmem:[%s4082_s11 + $0x18] sm:$0xf] (%p3447_p9), %v2208_v32  ;;  %2211 = vst [vmem:[%s4082_s11 + $0x20] sm:$0xf] (%p3447_p9), %v2210_v6 }
 0x1d3   : > { %v2009_v47 = vmax.f32 %v1977_v7, 0.0  ;;  %v2980_v58 = vadd.f32 %v2979_v3, %v2978_v63  ;;  %v1890_v54 = vadd.f32 %v1889_v43, %v1729_v22  ;;  %v1975_v42 = vadd.f32 %v3895_v33, %v1936_v45  ;;  %2213 = vst [vmem:[%s4082_s11 + $0x28] sm:$0xf] (%p3447_p9), %v2212_v62  ;;  %2215 = vst [vmem:[%s4082_s11 + $0x30] sm:$0xf] (%p3447_p9), %v2214_v60 }
 0x1d4   : > { %v2981_v21 = vpop.f32.mrf.mxu1  ;;  %v3043_v49 = vpop.f32.mrf.mxu0  ;;  %2217 = vst [vmem:[%s4082_s11 + $0x38] sm:$0xf] (%p3447_p9), %v2216_v25  ;;  %2219 = vst [vmem:[%s4082_s11 + $0x40] sm:$0xf] (%p3447_p9), %v2218_v2  ;;  %v2224_v41 = vld [vmem:[%s3933_s15 + $0x2c] sm:$0xf] (%p3447_p9) }
 0x1d5   : > { %v2733_v35 = vpack.c.bf16 %v2009_v47, %v2008_v17  ;;  %v1737_v51 = vadd.f32 %v2980_v58, %v4209_v20  ;;  %v1939_v61 = vmul.f32 %v3883_v31, %v1890_v54  ;;  %v2007_v52 = vmax.f32 %v1975_v42, 0.0  ;;  %2221 = vst [vmem:[%s4082_s11 + $0x48] sm:$0xf] (%p3447_p9), %v2220_v5  ;;  %v2226_v11 = vld [vmem:[%s3933_s15 + $0x30] sm:$0xf] (%p3447_p9) }
 0x1d6   : > { %v2982_v19 = vpop.f32.mrf.mxu1  ;;  %v1892_v57 = vpop.f32.mrf.mxu0  ;;  %2225 = vst [vmem:[%s4082_s11 + $0x58] sm:$0xf] (%p3447_p9), %v2224_v41  ;;  %2227 = vst [vmem:[%s4082_s11 + $0x60] sm:$0xf] (%p3447_p9), %v2226_v11  ;;  %v2228_v44 = vld [vmem:[%s3933_s15 + $0x34] sm:$0xf] (%p3447_p9) }
 0x1d7   : > { %2757 = vst [vmem:[%s3933_s15 + $0x68] sm:$0xff] %v2733_v35   ;;  %v1898_v37 = vadd.f32 %v3042_v16, %v1737_v51  ;;  %v2983_v53 = vadd.f32 %v2982_v19, %v2981_v21  ;;  %v1893_v13 = vadd.f32 %v1892_v57, %v1732_v55  ;;  %v2728_v34 = vpack.c.bf16 %v2007_v52, %v2006_v18  ;;  %v2230_v46 = vld [vmem:[%s3933_s15 + $0x38] sm:$0xf] (%p3447_p9)  ;;  %v2232_v48 = vld [vmem:[%s3933_s15 + $0x3c] sm:$0xf] (%p3447_p9) }
 0x1d8   : > { %v1978_v0 = vadd.f32 %v3895_v33, %v1939_v61  ;;  %2229 = vst [vmem:[%s4082_s11 + $0x68] sm:$0xf] (%p3447_p9), %v2228_v44  ;;  %2231 = vst [vmem:[%s4082_s11 + $0x70] sm:$0xf] (%p3447_p9), %v2230_v46  ;;  %v2234_v1 = vld [vmem:[%s3933_s15 + $0x40] sm:$0xf] (%p3447_p9) }
 0x1d9   : > { %v1941_v30 = vmul.f32 %v3883_v31, %v1898_v37  ;;  %v1740_v23 = vadd.f32 %v2983_v53, %v4211_v50  ;;  %v1940_v27 = vmul.f32 %v3883_v31, %v1893_v13  ;;  %2756 = vst [vmem:[%s3933_s15 + $0x60] sm:$0xff] %v2728_v34   ;;  %2233 = vst [vmem:[%s4082_s11 + $0x78] sm:$0xf] (%p3447_p9), %v2232_v48  ;;  %v2236_v63 = vld [vmem:[%s3933_s15 + $0x44] sm:$0xf] (%p3447_p9) }
 0x1da   : > { %v2010_v10 = vmax.f32 %v1978_v0, 0.0  ;;  %v2238_v16 = vld [vmem:[%s3933_s15 + $0x48] sm:$0xf] (%p3447_p9)  ;;  %2235 = vst [vmem:[%s4082_s11 + $0x80] sm:$0xf] (%p3447_p9), %v2234_v1 }
 0x1db   : > { %v1901_v8 = vadd.f32 %v3043_v49, %v1740_v23  ;;  %v1979_v26 = vadd.f32 %v3895_v33, %v1940_v27  ;;  %v1980_v28 = vadd.f32 %v3895_v33, %v1941_v30  ;;  %2237 = vst [vmem:[%s4082_s11 + $0x88] sm:$0xf] (%p3447_p9), %v2236_v63  ;;  %2239 = vst [vmem:[%s4082_s11 + $0x90] sm:$0xf] (%p3447_p9), %v2238_v16  ;;  %v2240_v7 = vld [vmem:[%s3933_s15 + $0x4c] sm:$0xf] (%p3447_p9) }
 0x1dc   : > { %v2242_v14 = vld [vmem:[%s3933_s15 + $0x50] sm:$0xf] (%p3447_p9)  ;;  %v2244_v15 = vld [vmem:[%s3933_s15 + $0x54] sm:$0xf] (%p3447_p9)  ;;  %2241 = vst [vmem:[%s4082_s11 + $0x98] sm:$0xf] (%p3447_p9), %v2240_v7 }
 0x1dd   : > { %v1942_v29 = vmul.f32 %v3883_v31, %v1901_v8  ;;  %v2011_v9 = vmax.f32 %v1979_v26, 0.0  ;;  %v2012_v12 = vmax.f32 %v1980_v28, 0.0  ;;  %v2202_v31 = vld [vmem:[%s3933_s15] sm:$0xf] (%p3447_p9)  ;;  %2243 = vst [vmem:[%s4082_s11 + $0xa0] sm:$0xf] (%p3447_p9), %v2242_v14 }
 0x1de   : > { %2203 = vst [vmem:[%s4082_s11] sm:$0xf] (%p3447_p9), %v2202_v31  ;;  %2245 = vst [vmem:[%s4082_s11 + $0xa8] sm:$0xf] (%p3447_p9), %v2244_v15  ;;  %v2246_v22 = vld [vmem:[%s3933_s15 + $0x58] sm:$0xf] (%p3447_p9) }
 0x1df   : > { %v1981_v59 = vadd.f32 %v3895_v33, %v1942_v29  ;;  %v2738_v36 = vpack.c.bf16 %v2011_v9, %v2010_v10  ;;  %v2204_v33 = vld [vmem:[%s3933_s15 + $0x4] sm:$0xf] (%p3447_p9)  ;;  %v2248_v24 = vld [vmem:[%s3933_s15 + $0x5c] sm:$0xf] (%p3447_p9)  ;;  %2247 = vst [vmem:[%s4082_s11 + $0xb0] sm:$0xf] (%p3447_p9), %v2246_v22 }
 0x1e0   : > { %2205 = vst [vmem:[%s4082_s11 + $0x8] sm:$0xf] (%p3447_p9), %v2204_v33  ;;  %v2250_v45 = vld [vmem:[%s3933_s15 + $0x60] sm:$0xf] (%p3447_p9)  ;;  %2249 = vst [vmem:[%s4082_s11 + $0xb8] sm:$0xf] (%p3447_p9), %v2248_v24 }
 0x1e1   : > { %v2013_v56 = vmax.f32 %v1981_v59, 0.0  ;;  %2758 = vst [vmem:[%s3933_s15 + $0x70] sm:$0xff] %v2738_v36   ;;  %2180 = sbr.rel (!%p3447_p9) target bundleno = 494 (0x1ee), region = 81  ;;  %2251 = vst [vmem:[%s4082_s11 + $0xc0] sm:$0xf] (%p3447_p9), %v2250_v45 }
 0x1e2   : > { %v2252_v3 = vld [vmem:[%s3933_s15 + $0x64] sm:$0xf] (%p3447_p9)  ;;  %v2254_v43 = vld [vmem:[%s3933_s15 + $0x68] sm:$0xf] (%p3447_p9)  ;;  %v2256_v17 = vld [vmem:[%s3933_s15 + $0x6c] sm:$0xf] (%p3447_p9) }
 0x1e3   : > { %v2743_v40 = vpack.c.bf16 %v2013_v56, %v2012_v12  ;;  %2253 = vst [vmem:[%s4082_s11 + $0xc8] sm:$0xf] (%p3447_p9), %v2252_v3  ;;  %2255 = vst [vmem:[%s4082_s11 + $0xd0] sm:$0xf] (%p3447_p9), %v2254_v43 }
 0x1e4   : > { %2257 = vst [vmem:[%s4082_s11 + $0xd8] sm:$0xf] (%p3447_p9), %v2256_v17 }
 0x1e5   : > { %2759 = vst [vmem:[%s3933_s15 + $0x78] sm:$0xff] %v2743_v40  }
 0x1e8   : > { %v2258_v47 = vld [vmem:[%s3933_s15 + $0x70] sm:$0xf]  ;;  %v2260_v58 = vld [vmem:[%s3933_s15 + $0x74] sm:$0xf] }
 0x1e9   : > { %2259 = vst [vmem:[%s4082_s11 + $0xe0] sm:$0xf] %v2258_v47  ;;  %2261 = vst [vmem:[%s4082_s11 + $0xe8] sm:$0xf] %v2260_v58 }
 0x1ec   : > { %v2262_v54 = vld [vmem:[%s3933_s15 + $0x78] sm:$0xf]  ;;  %v2264_v42 = vld [vmem:[%s3933_s15 + $0x7c] sm:$0xf] }
 0x1ed   : > { %2263 = vst [vmem:[%s4082_s11 + $0xf0] sm:$0xf] %v2262_v54  ;;  %2265 = vst [vmem:[%s4082_s11 + $0xf8] sm:$0xf] %v2264_v42 }
 0x1ee PF: > { %s14_s23 = sadd.s32 1, %s3353_s23   ;;  %s4212_s15 = smov %s3325_s16 }
 0x1ef   : > { %p11_p2 = scmp.ge.s32.totalorder %s14_s23, 6   ;;  %s4213_s16 = smov %s3452_s8 }
 0x1f0   : > { %s4214_s17 = smov %s3333_s18  ;;  %s4215_s18 = smov %s3441_s30 }
 0x1f1   : > { %s4216_s19 = smov %s3345_s21  ;;  %s4217_s20 = smov %s3349_s22 }
 0x1f2   : > { %s4218_s21 = smov %s4221_s25  ;;  %s4219_s22 = smov %s4225_s26 }
 0x1f3   :  { %13 = sbr.rel (!%p11_p2) target bundleno = 5 (0x5), region = 162 }

// kernel: forward.9
= control target key start
LH: loop header
LB: loop body
LE: loop exit
PB: predicated region body
PF: predicated region fallthrough
CT: control target
= control target key end

     0   :  { %s3749_s15 = smov 0   ;;  %s3751_s16 = smov 0   ;;  %s4770_s0 = inlined_call_operand.vmem [shape: bf16[2048,576], index: 0, kind: input, shape index: {}]   ;;  %s4771_s1 = inlined_call_operand.vmem [shape: bf16[576,4], index: 1, kind: input, shape index: {}]   ;;  %s4772_s2 = inlined_call_operand.vmem [shape: f32[1,4], index: 2, kind: input, shape index: {}]   ;;  %s4773_s3 = inlined_call_operand.vmem [shape: f32[1,4], index: 3, kind: input, shape index: {}]   ;;  %s4774_s4 = inlined_call_operand.vmem [shape: f32[2048,4], index: 4, kind: output, shape index: {}]  }
   0x1   :  { %s3753_s17 = smov 0  }
   0x2 LB: > { %s26_s18 = sadd.s32 1, %s3717_s16  ;;  %p2906_p0 = scmp.ge.s32.totalorder %s3721_s17, 1  ;;  %s3721_s17 = sphi %s3753_s17, %s14_s17   ;;  %s3717_s16 = sphi %s3751_s16, %s4810_s16   ;;  %s3713_s15 = sphi %s3749_s15, %s4809_s15  }
   0x3   : > { %p28_p1 = scmp.ge.s32.totalorder %s26_s18, 4  ;;  %p203_p2 = scmp.lt.s32.totalorder %s3721_s17, 5 }
   0x5   : > { %s4812_s18 = smov (%p28_p1, %s26_s18), 0  ;;  %p204_p3 = pnand %p2906_p0, %p203_p2 }
   0x7   : > { %207 = sbr.rel (%p204_p3) target bundleno = 610 (0x262), region = 36 }
   0xc   : > { %v3309_v0 = vld [vmem:[%s4771_s1 + $0x38] sm:$0xff]   ;;  %v3723_v1 = vmov 0   ;;  %s2907_s21 = sshll.u32 %s3713_s15, 6  ;;  %v3310_v2 = vld [vmem:[%s4771_s1 + $0x30] sm:$0xff]   ;;  %v3311_v3 = vld [vmem:[%s4771_s1 + $0x28] sm:$0xff]   ;;  %vm1550_vm0 = vcmask 523264  }
   0xd   : > { %1647 = vmatprep.subr.bf16.mxu0 %v3723_v1  ;;  %3251 = vmatprep.subr.bf16.mxu1 %v3723_v1  ;;  %p244_p4 = scmp.lt.s32.totalorder %s2907_s21, 255  ;;  %v3312_v4 = vld [vmem:[%s4771_s1 + $0x20] sm:$0xff]   ;;  %v3313_v5 = vld [vmem:[%s4771_s1 + $0x18] sm:$0xff]   ;;  %v3314_v7 = vld [vmem:[%s4771_s1 + $0x10] sm:$0xff]   ;;  %vm2720_vm1 = vcmask 31744  }
   0xe   : > { %1648 = vmatpush1.bf16.msra.mxu0 %v3309_v0  ;;  %3267 = vmatpush1.bf16.msra.mxu1 %v3309_v0  ;;  %v3315_v9 = vld [vmem:[%s4771_s1 + $0x8] sm:$0xff]   ;;  %v3316_v10 = vld [vmem:[%s4771_s1] sm:$0xff]   ;;  %v3317_v11 = vld [vmem:[%s4771_s1 + $0x78] sm:$0xff]  }
   0xf   : > { %1649 = vmatprep.subr.bf16.mxu0 %v3723_v1  ;;  %3252 = vmatprep.subr.bf16.mxu1 %v3723_v1  ;;  %s4814_s21 = smov (!%p244_p4, %s2907_s21), 255  ;;  %v3318_v12 = vld [vmem:[%s4771_s1 + $0x70] sm:$0xff]   ;;  %v3319_v13 = vld [vmem:[%s4771_s1 + $0x68] sm:$0xff]   ;;  %v3320_v14 = vld [vmem:[%s4771_s1 + $0x60] sm:$0xff]  }
  0x10   : > { %s3283_s28 = smul.u32 20, %s4814_s21  ;;  %v3321_v15 = vld [vmem:[%s4771_s1 + $0x58] sm:$0xff]   ;;  %v3322_v16 = vld [vmem:[%s4771_s1 + $0x50] sm:$0xff]   ;;  %v3323_v17 = vld [vmem:[%s4771_s1 + $0x48] sm:$0xff]   ;;  %s2910_s10 = sshll.u32 %s4814_s21, 3 }
  0x11   : > { %v3324_v18 = vld [vmem:[%s4771_s1 + $0x40] sm:$0xff]   ;;  %v3331_v19 = vld [vmem:[%s4771_s1 + $0x118] sm:$0xff]   ;;  %v3380_v25 = vld [vmem:[%s4771_s1 + $0x110] sm:$0xff]   ;;  %s4394_s13 = scalar_lea.vmem %s4774_s4, %s2910_s10 }
  0x12   : > { %1650 = vmatpush1.bf16.msra.mxu0 %v3310_v2  ;;  %3268 = vmatpush1.bf16.msra.mxu1 %v3310_v2  ;;  %s3796_s7 = scalar_lea.vmem %s4770_s0, %s3283_s28  ;;  %v3332_v22 = vld [vmem:[%s4771_s1 + $0xb8] sm:$0xff]   ;;  %v3333_v26 = vld [vmem:[%s4771_s1 + $0xb0] sm:$0xff]   ;;  %v3340_v29 = vld [vmem:[%s4771_s1 + $0xa8] sm:$0xff]  }
  0x13   : > { %1651 = vmatprep.subr.bf16.mxu0 %v3723_v1  ;;  %3253 = vmatprep.subr.bf16.mxu1 %v3723_v1  ;;  %v3327_v6 = vld [vmem:[%s3796_s7 + $0x4] ss:$20 sps:$4 sm:$0xff]   ;;  %v3325_v20 = vld [vmem:[%s3796_s7] ss:$20 sps:$4 sm:$0xff]   ;;  %v3338_v27 = vld [vmem:[%s3796_s7 + $0x28] ss:$20 sps:$4 sm:$0xff]  }
  0x14   : > { %v3330_v8 = vld [vmem:[%s3796_s7 + $0x3c4] ss:$20 sps:$4 sm:$0xff]   ;;  %1679 = vmatprep.mubr.bf16.mxu0 %v3327_v6  ;;  %v3328_v21 = vld [vmem:[%s3796_s7 + $0x3c0] ss:$20 sps:$4 sm:$0xff]   ;;  %v3339_v28 = vld [vmem:[%s3796_s7 + $0x3e8] ss:$20 sps:$4 sm:$0xff]  }
  0x15   : > { %1871 = vmatprep.mubr.bf16.mxu1 %v3330_v8  ;;  %v3334_v23 = vld [vmem:[%s3796_s7 + $0x2c] ss:$20 sps:$4 sm:$0xff]   ;;  %v3342_v31 = vld [vmem:[%s3796_s7 + $0x54] ss:$20 sps:$4 sm:$0xff]   ;;  %v3346_v34 = vld [vmem:[%s3796_s7 + $0x50] ss:$20 sps:$4 sm:$0xff]  }
  0x16   : > { %1652 = vmatpush1.bf16.msra.mxu0 %v3311_v3  ;;  %3269 = vmatpush1.bf16.msra.mxu1 %v3311_v3  ;;  %v3336_v24 = vld [vmem:[%s3796_s7 + $0x3ec] ss:$20 sps:$4 sm:$0xff]   ;;  %v3344_v32 = vld [vmem:[%s3796_s7 + $0x414] ss:$20 sps:$4 sm:$0xff]   ;;  %v3347_v35 = vld [vmem:[%s3796_s7 + $0x410] ss:$20 sps:$4 sm:$0xff]  }
  0x17   : > { %1653 = vmatprep.subr.bf16.mxu0 %v3723_v1  ;;  %3254 = vmatprep.subr.bf16.mxu1 %v3723_v1  ;;  %v3421_v30 = vld [vmem:[%s4771_s1 + $0x108] sm:$0xff]   ;;  %v3341_v33 = vld [vmem:[%s4771_s1 + $0xa0] sm:$0xff]   ;;  %v3348_v36 = vld [vmem:[%s4771_s1 + $0x98] sm:$0xff]  }
  0x18   : > { %v3350_v37 = vld [vmem:[%s3796_s7 + $0x7c] ss:$20 sps:$4 sm:$0xff]   ;;  %v3354_v40 = vld [vmem:[%s3796_s7 + $0x78] ss:$20 sps:$4 sm:$0xff]   ;;  %v3458_v44 = vld [vmem:[%s4771_s1 + $0x100] sm:$0xff]  }
  0x19   : > { %v3352_v38 = vld [vmem:[%s3796_s7 + $0x43c] ss:$20 sps:$4 sm:$0xff]   ;;  %v3355_v41 = vld [vmem:[%s3796_s7 + $0x438] ss:$20 sps:$4 sm:$0xff]   ;;  %v3357_v46 = vld [vmem:[%s4771_s1 + $0x80] sm:$0xff]  }
  0x1a   : > { %1654 = vmatpush1.bf16.msra.mxu0 %v3312_v4  ;;  %3270 = vmatpush1.bf16.msra.mxu1 %v3312_v4  ;;  %v3349_v39 = vld [vmem:[%s4771_s1 + $0x90] sm:$0xff]   ;;  %v3356_v42 = vld [vmem:[%s4771_s1 + $0x88] sm:$0xff]   ;;  %v3358_v43 = vld [vmem:[%s3796_s7 + $0xa4] ss:$20 sps:$4 sm:$0xff]  }
  0x1b   : > { %1655 = vmatprep.subr.bf16.mxu0 %v3723_v1  ;;  %3255 = vmatprep.subr.bf16.mxu1 %v3723_v1  ;;  %v3360_v45 = vld [vmem:[%s3796_s7 + $0x464] ss:$20 sps:$4 sm:$0xff]   ;;  %v3362_v47 = vld [vmem:[%s3796_s7 + $0xa0] ss:$20 sps:$4 sm:$0xff]   ;;  %v3370_v53 = vld [vmem:[%s3796_s7 + $0xc8] ss:$20 sps:$4 sm:$0xff]  }
  0x1c   : > { %v3363_v48 = vld [vmem:[%s3796_s7 + $0x460] ss:$20 sps:$4 sm:$0xff]   ;;  %v3364_v49 = vld [vmem:[%s4771_s1 + $0xf8] sm:$0xff]   ;;  %v3372_v55 = vld [vmem:[%s4771_s1 + $0xe8] sm:$0xff]  }
  0x1d   : > { %v3366_v50 = vld [vmem:[%s3796_s7 + $0xcc] ss:$20 sps:$4 sm:$0xff]   ;;  %v3365_v52 = vld [vmem:[%s4771_s1 + $0xf0] sm:$0xff]   ;;  %v3371_v54 = vld [vmem:[%s3796_s7 + $0x488] ss:$20 sps:$4 sm:$0xff]  }
  0x1e   : > { %1656 = vmatpush1.bf16.msra.mxu0 %v3313_v5  ;;  %3271 = vmatpush1.bf16.msra.mxu1 %v3313_v5  ;;  %v3368_v51 = vld [vmem:[%s3796_s7 + $0x48c] ss:$20 sps:$4 sm:$0xff]   ;;  %v3374_v56 = vld [vmem:[%s3796_s7 + $0xf4] ss:$20 sps:$4 sm:$0xff]   ;;  %v3378_v59 = vld [vmem:[%s3796_s7 + $0xf0] ss:$20 sps:$4 sm:$0xff]  }
  0x1f   : > { %1657 = vmatprep.subr.bf16.mxu0 %v3723_v1  ;;  %3256 = vmatprep.subr.bf16.mxu1 %v3723_v1  ;;  %v3376_v57 = vld [vmem:[%s3796_s7 + $0x4b4] ss:$20 sps:$4 sm:$0xff]   ;;  %v3373_v58 = vld [vmem:[%s4771_s1 + $0xe0] sm:$0xff]   ;;  %v3381_v61 = vld [vmem:[%s4771_s1 + $0xd8] sm:$0xff]  }
  0x20   : > { %v3379_v60 = vld [vmem:[%s3796_s7 + $0x4b0] ss:$20 sps:$4 sm:$0xff]   ;;  %v3387_v2 = vld [vmem:[%s3796_s7 + $0x118] ss:$20 sps:$4 sm:$0xff]   ;;  %v3393_v8 = vld [vmem:[%s3796_s7 + $0x8] ss:$20 sps:$4 sm:$0xff]  }
  0x21   : > { %v3383_v62 = vld [vmem:[%s3796_s7 + $0x11c] ss:$20 sps:$4 sm:$0xff]   ;;  %v3388_v3 = vld [vmem:[%s3796_s7 + $0x4d8] ss:$20 sps:$4 sm:$0xff]  }
  0x22   : > { %1658 = vmatpush1.bf16.msra.mxu0 %v3314_v7  ;;  %3272 = vmatpush1.bf16.msra.mxu1 %v3314_v7  ;;  %v3385_v63 = vld [vmem:[%s3796_s7 + $0x4dc] ss:$20 sps:$4 sm:$0xff]   ;;  %v3389_v4 = vld [vmem:[%s4771_s1 + $0xc8] sm:$0xff]   ;;  %v3391_v5 = vld [vmem:[%s3796_s7 + $0x144] ss:$20 sps:$4 sm:$0xff]  }
  0x23   : > { %1659 = vmatprep.subr.bf16.mxu0 %v3723_v1  ;;  %3257 = vmatprep.subr.bf16.mxu1 %v3723_v1  ;;  %v3382_v0 = vld [vmem:[%s4771_s1 + $0xd0] sm:$0xff]   ;;  %v3395_v6 = vld [vmem:[%s3796_s7 + $0xc] ss:$20 sps:$4 sm:$0xff]  }
  0x24   : > { %v3390_v7 = vld [vmem:[%s4771_s1 + $0xc0] sm:$0xff]  }
  0x26   : > { %1660 = vmatpush1.bf16.msra.mxu0 %v3315_v9  ;;  %3273 = vmatpush1.bf16.msra.mxu1 %v3315_v9  ;;  %v3396_v9 = vld [vmem:[%s3796_s7 + $0x140] ss:$20 sps:$4 sm:$0xff]  }
  0x27   : > { %1661 = vmatprep.subr.bf16.mxu0 %v3723_v1  ;;  %3258 = vmatprep.subr.bf16.mxu1 %v3723_v1 }
  0x2a   : > { %1662 = vmatpush1.bf16.msra.mxu0 %v3316_v10  ;;  %3274 = vmatpush1.bf16.msra.mxu1 %v3316_v10  ;;  %v3397_v10 = vld [vmem:[%s3796_s7 + $0x16c] ss:$20 sps:$4 sm:$0xff]  }
  0x2b   : > { %1663 = vmatprep.subr.bf16.mxu0 %v3723_v1  ;;  %3259 = vmatprep.subr.bf16.mxu1 %v3723_v1 }
  0x2e   : > { %1664 = vmatpush2.bf16.msra.mxu0 %v3317_v11  ;;  %3275 = vmatpush2.bf16.msra.mxu1 %v3317_v11  ;;  %v3399_v11 = vld [vmem:[%s3796_s7 + $0x34] ss:$20 sps:$4 sm:$0xff]  }
  0x2f   : > { %1665 = vmatprep.subr.bf16.mxu0 %v3723_v1  ;;  %3260 = vmatprep.subr.bf16.mxu1 %v3723_v1 }
  0x32   : > { %1666 = vmatpush2.bf16.msra.mxu0 %v3318_v12  ;;  %3276 = vmatpush2.bf16.msra.mxu1 %v3318_v12  ;;  %v3401_v12 = vld [vmem:[%s3796_s7 + $0x168] ss:$20 sps:$4 sm:$0xff]  }
  0x33   : > { %1667 = vmatprep.subr.bf16.mxu0 %v3723_v1  ;;  %3261 = vmatprep.subr.bf16.mxu1 %v3723_v1 }
  0x36   : > { %1668 = vmatpush2.bf16.msra.mxu0 %v3319_v13  ;;  %3277 = vmatpush2.bf16.msra.mxu1 %v3319_v13  ;;  %v3402_v13 = vld [vmem:[%s3796_s7 + $0x30] ss:$20 sps:$4 sm:$0xff]  }
  0x37   : > { %1669 = vmatprep.subr.bf16.mxu0 %v3723_v1  ;;  %3262 = vmatprep.subr.bf16.mxu1 %v3723_v1 }
  0x3a   : > { %1670 = vmatpush2.bf16.msra.mxu0 %v3320_v14  ;;  %3278 = vmatpush2.bf16.msra.mxu1 %v3320_v14  ;;  %v3403_v14 = vld [vmem:[%s3796_s7 + $0x194] ss:$20 sps:$4 sm:$0xff]  }
  0x3b   : > { %1671 = vmatprep.subr.bf16.mxu0 %v3723_v1  ;;  %3263 = vmatprep.subr.bf16.mxu1 %v3723_v1 }
  0x3e   : > { %1672 = vmatpush2.bf16.msra.mxu0 %v3321_v15  ;;  %3279 = vmatpush2.bf16.msra.mxu1 %v3321_v15  ;;  %v3407_v15 = vld [vmem:[%s3796_s7 + $0x190] ss:$20 sps:$4 sm:$0xff]  }
  0x3f   : > { %1673 = vmatprep.subr.bf16.mxu0 %v3723_v1  ;;  %3264 = vmatprep.subr.bf16.mxu1 %v3723_v1 }
  0x42   : > { %1674 = vmatpush2.bf16.msra.mxu0 %v3322_v16  ;;  %3280 = vmatpush2.bf16.msra.mxu1 %v3322_v16  ;;  %v3408_v16 = vld [vmem:[%s3796_s7 + $0x58] ss:$20 sps:$4 sm:$0xff]  }
  0x43   : > { %1675 = vmatprep.subr.bf16.mxu0 %v3723_v1  ;;  %3265 = vmatprep.subr.bf16.mxu1 %v3723_v1 }
  0x46   : > { %1676 = vmatpush2.bf16.msra.mxu0 %v3323_v17  ;;  %3281 = vmatpush2.bf16.msra.mxu1 %v3323_v17  ;;  %v3409_v17 = vld [vmem:[%s3796_s7 + $0x1bc] ss:$20 sps:$4 sm:$0xff]  }
  0x47   : > { %1677 = vmatprep.subr.bf16.mxu0 %v3723_v1  ;;  %3266 = vmatprep.subr.bf16.mxu1 %v3723_v1 }
  0x4a   : > { %1678 = vmatpush2.bf16.msra.mxu0 %v3324_v18  ;;  %3282 = vmatpush2.bf16.msra.mxu1 %v3324_v18  ;;  %v3411_v18 = vld [vmem:[%s3796_s7 + $0x84] ss:$20 sps:$4 sm:$0xff]  }
  0x4b   : > { %1936 = vmatprep.subr.bf16.mxu1 %v3723_v1  ;;  %3179 = vmatprep.subr.bf16.mxu0 %v3331_v19 }
  0x4d   : > { %1680 = vmatmul.mubr.bf16.vlgmr.msra.gmra.mxu0 %v3325_v20  ;;  %1872 = vmatmul.mubr.bf16.vlgmr.msra.gmra.mxu1 %v3328_v21  ;;  %v3414_v20 = vld [vmem:[%s3796_s7 + $0x80] ss:$20 sps:$4 sm:$0xff]   ;;  %v3415_v21 = vld [vmem:[%s3796_s7 + $0x1e4] ss:$20 sps:$4 sm:$0xff]  }
  0x4e   : > { %1937 = vmatpush1.bf16.msra.mxu1 %v3332_v22  ;;  %3180 = vmatpush3.bf16.msra.mxu0 %v3331_v19  ;;  %v3413_v19 = vld [vmem:[%s3796_s7 + $0x1b8] ss:$20 sps:$4 sm:$0xff]  }
  0x4f   : > { %1938 = vmatprep.subr.bf16.mxu1 %v3723_v1  ;;  %1687 = vmatprep.mubr.bf16.mxu0 %v3334_v23  ;;  %v3417_v22 = vld [vmem:[%s3796_s7 + $0xac] ss:$20 sps:$4 sm:$0xff]  }
  0x50   : > { %1879 = vmatprep.mubr.bf16.mxu1 %v3336_v24  ;;  %3181 = vmatprep.subr.bf16.mxu0 %v3380_v25  ;;  %v3419_v23 = vld [vmem:[%s3796_s7 + $0x1e0] ss:$20 sps:$4 sm:$0xff]   ;;  %v3420_v24 = vld [vmem:[%s3796_s7 + $0xa8] ss:$20 sps:$4 sm:$0xff]  }
  0x52   : > { %1939 = vmatpush1.bf16.msra.mxu1 %v3333_v26  ;;  %3182 = vmatpush3.bf16.msra.mxu0 %v3380_v25  ;;  %v3422_v25 = vld [vmem:[%s3796_s7 + $0x20c] ss:$20 sps:$4 sm:$0xff]   ;;  %v3424_v26 = vld [vmem:[%s3796_s7 + $0xd4] ss:$20 sps:$4 sm:$0xff]  }
  0x53   : > { %1940 = vmatprep.subr.bf16.mxu1 %v3723_v1  ;;  %3183 = vmatprep.subr.bf16.mxu0 %v3421_v30 }
  0x55   : > { %1688 = vmatmul.mubr.bf16.gmra.mxu0 %v3338_v27  ;;  %1880 = vmatmul.mubr.bf16.gmra.mxu1 %v3339_v28  ;;  %v3426_v27 = vld [vmem:[%s3796_s7 + $0x208] ss:$20 sps:$4 sm:$0xff]   ;;  %v3427_v28 = vld [vmem:[%s3796_s7 + $0xd0] ss:$20 sps:$4 sm:$0xff]  }
  0x56   : > { %1941 = vmatpush1.bf16.msra.mxu1 %v3340_v29  ;;  %1695 = vmatprep.mubr.bf16.mxu0 %v3342_v31  ;;  %v3428_v29 = vld [vmem:[%s3796_s7 + $0x234] ss:$20 sps:$4 sm:$0xff]   ;;  %v3432_v31 = vld [vmem:[%s3796_s7 + $0x230] ss:$20 sps:$4 sm:$0xff]  }
  0x57   : > { %1942 = vmatprep.subr.bf16.mxu1 %v3723_v1  ;;  %1887 = vmatprep.mubr.bf16.mxu1 %v3344_v32  ;;  %v3433_v32 = vld [vmem:[%s3796_s7 + $0xf8] ss:$20 sps:$4 sm:$0xff]  }
  0x58   : > { %3184 = vmatpush3.bf16.msra.mxu0 %v3421_v30  ;;  %v3430_v30 = vld [vmem:[%s3796_s7 + $0xfc] ss:$20 sps:$4 sm:$0xff]  }
  0x59   : > { %3185 = vmatprep.subr.bf16.mxu0 %v3458_v44 }
  0x5a   : > { %1943 = vmatpush1.bf16.msra.mxu1 %v3341_v33  ;;  %v3434_v33 = vld [vmem:[%s3796_s7 + $0x25c] ss:$20 sps:$4 sm:$0xff]  }
  0x5b   : > { %1944 = vmatprep.subr.bf16.mxu1 %v3723_v1 }
  0x5c   : > { %3186 = vmatpush3.bf16.msra.mxu0 %v3458_v44  ;;  %v3451_v44 = vld [vmem:[%s3796_s7 + $0x170] ss:$20 sps:$4 sm:$0xff]  }
  0x5d   : > { %1696 = vmatmul.mubr.bf16.gmra.mxu0 %v3346_v34  ;;  %1888 = vmatmul.mubr.bf16.gmra.mxu1 %v3347_v35  ;;  %v3436_v34 = vld [vmem:[%s3796_s7 + $0x124] ss:$20 sps:$4 sm:$0xff]  }
  0x5e   : > { %1945 = vmatpush1.bf16.msra.mxu1 %v3348_v36  ;;  %1703 = vmatprep.mubr.bf16.mxu0 %v3350_v37  ;;  %v3438_v35 = vld [vmem:[%s3796_s7 + $0x258] ss:$20 sps:$4 sm:$0xff]   ;;  %v3439_v36 = vld [vmem:[%s3796_s7 + $0x120] ss:$20 sps:$4 sm:$0xff]  }
  0x5f   : > { %1946 = vmatprep.subr.bf16.mxu1 %v3723_v1  ;;  %1895 = vmatprep.mubr.bf16.mxu1 %v3352_v38  ;;  %v3440_v37 = vld [vmem:[%s3796_s7 + $0x284] ss:$20 sps:$4 sm:$0xff]   ;;  %v3442_v38 = vld [vmem:[%s3796_s7 + $0x14c] ss:$20 sps:$4 sm:$0xff]  }
  0x62   : > { %1947 = vmatpush1.bf16.msra.mxu1 %v3349_v39  ;;  %v3444_v39 = vld [vmem:[%s3796_s7 + $0x280] ss:$20 sps:$4 sm:$0xff]  }
  0x63   : > { %1948 = vmatprep.subr.bf16.mxu1 %v3723_v1 }
  0x65   : > { %1704 = vmatmul.mubr.bf16.gmra.mxu0 %v3354_v40  ;;  %1896 = vmatmul.mubr.bf16.gmra.mxu1 %v3355_v41  ;;  %v3445_v40 = vld [vmem:[%s3796_s7 + $0x148] ss:$20 sps:$4 sm:$0xff]   ;;  %v3446_v41 = vld [vmem:[%s3796_s7 + $0x2ac] ss:$20 sps:$4 sm:$0xff]  }
  0x66   : > { %1949 = vmatpush1.bf16.msra.mxu1 %v3356_v42  ;;  %1711 = vmatprep.mubr.bf16.mxu0 %v3358_v43  ;;  %v3448_v42 = vld [vmem:[%s3796_s7 + $0x174] ss:$20 sps:$4 sm:$0xff]  }
  0x67   : > { %1950 = vmatprep.subr.bf16.mxu1 %v3723_v1  ;;  %1903 = vmatprep.mubr.bf16.mxu1 %v3360_v45  ;;  %v3450_v43 = vld [vmem:[%s3796_s7 + $0x2a8] ss:$20 sps:$4 sm:$0xff]  }
  0x68   : > { %v3452_v45 = vld [vmem:[%s3796_s7 + $0x2d4] ss:$20 sps:$4 sm:$0xff]  }
  0x6a   : > { %1951 = vmatpush1.bf16.msra.mxu1 %v3357_v46  ;;  %v3454_v46 = vld [vmem:[%s3796_s7 + $0x19c] ss:$20 sps:$4 sm:$0xff]  }
  0x6b   : > { %1952 = vmatprep.subr.bf16.mxu1 %v3723_v1 }
  0x6d   : > { %1712 = vmatmul.mubr.bf16.gmra.mxu0 %v3362_v47  ;;  %1904 = vmatmul.mubr.bf16.gmra.mxu1 %v3363_v48  ;;  %v3456_v47 = vld [vmem:[%s3796_s7 + $0x2d0] ss:$20 sps:$4 sm:$0xff]   ;;  %v3457_v48 = vld [vmem:[%s3796_s7 + $0x198] ss:$20 sps:$4 sm:$0xff]  }
  0x6e   : > { %1953 = vmatpush2.bf16.msra.mxu1 %v3364_v49  ;;  %1719 = vmatprep.mubr.bf16.mxu0 %v3366_v50  ;;  %v3459_v49 = vld [vmem:[%s3796_s7 + $0x2fc] ss:$20 sps:$4 sm:$0xff]   ;;  %v3461_v50 = vld [vmem:[%s3796_s7 + $0x1c4] ss:$20 sps:$4 sm:$0xff]  }
  0x6f   : > { %1954 = vmatprep.subr.bf16.mxu1 %v3723_v1  ;;  %1911 = vmatprep.mubr.bf16.mxu1 %v3368_v51  ;;  %v3463_v51 = vld [vmem:[%s3796_s7 + $0x2f8] ss:$20 sps:$4 sm:$0xff]  }
  0x72   : > { %1955 = vmatpush2.bf16.msra.mxu1 %v3365_v52  ;;  %v3464_v52 = vld [vmem:[%s3796_s7 + $0x1c0] ss:$20 sps:$4 sm:$0xff]  }
  0x73   : > { %1956 = vmatprep.subr.bf16.mxu1 %v3723_v1 }
  0x75   : > { %1720 = vmatmul.mubr.bf16.gmra.mxu0 %v3370_v53  ;;  %1912 = vmatmul.mubr.bf16.gmra.mxu1 %v3371_v54  ;;  %v3465_v53 = vld [vmem:[%s3796_s7 + $0x324] ss:$20 sps:$4 sm:$0xff]   ;;  %v3467_v54 = vld [vmem:[%s3796_s7 + $0x1ec] ss:$20 sps:$4 sm:$0xff]  }
  0x76   : > { %1957 = vmatpush2.bf16.msra.mxu1 %v3372_v55  ;;  %1727 = vmatprep.mubr.bf16.mxu0 %v3374_v56  ;;  %v3469_v55 = vld [vmem:[%s3796_s7 + $0x320] ss:$20 sps:$4 sm:$0xff]   ;;  %v3470_v56 = vld [vmem:[%s3796_s7 + $0x1e8] ss:$20 sps:$4 sm:$0xff]  }
  0x77   : > { %1958 = vmatprep.subr.bf16.mxu1 %v3723_v1  ;;  %1919 = vmatprep.mubr.bf16.mxu1 %v3376_v57  ;;  %v3471_v57 = vld [vmem:[%s3796_s7 + $0x34c] ss:$20 sps:$4 sm:$0xff]  }
  0x7a   : > { %1959 = vmatpush2.bf16.msra.mxu1 %v3373_v58  ;;  %v3473_v58 = vld [vmem:[%s3796_s7 + $0x214] ss:$20 sps:$4 sm:$0xff]  }
  0x7b   : > { %1960 = vmatprep.subr.bf16.mxu1 %v3723_v1 }
  0x7d   : > { %1728 = vmatmul.mubr.bf16.gmra.mxu0 %v3378_v59  ;;  %1920 = vmatmul.mubr.bf16.gmra.mxu1 %v3379_v60  ;;  %v3475_v59 = vld [vmem:[%s3796_s7 + $0x348] ss:$20 sps:$4 sm:$0xff]   ;;  %v3476_v60 = vld [vmem:[%s3796_s7 + $0x210] ss:$20 sps:$4 sm:$0xff]  }
  0x7e   : > { %1961 = vmatpush2.bf16.msra.mxu1 %v3381_v61  ;;  %1735 = vmatprep.mubr.bf16.mxu0 %v3383_v62  ;;  %v3477_v61 = vld [vmem:[%s3796_s7 + $0x374] ss:$20 sps:$4 sm:$0xff]   ;;  %v3479_v62 = vld [vmem:[%s3796_s7 + $0x23c] ss:$20 sps:$4 sm:$0xff]  }
  0x7f   : > { %1962 = vmatprep.subr.bf16.mxu1 %v3723_v1  ;;  %1927 = vmatprep.mubr.bf16.mxu1 %v3385_v63  ;;  %v3481_v63 = vld [vmem:[%s3796_s7 + $0x370] ss:$20 sps:$4 sm:$0xff]  }
  0x82   : > { %1963 = vmatpush2.bf16.msra.mxu1 %v3382_v0  ;;  %v3482_v0 = vld [vmem:[%s3796_s7 + $0x238] ss:$20 sps:$4 sm:$0xff]  }
  0x83   : > { %1964 = vmatprep.subr.bf16.mxu1 %v3723_v1 }
  0x85   : > { %1736 = vmatmul.mubr.bf16.gmra.mxu0 %v3387_v2  ;;  %1928 = vmatmul.mubr.bf16.gmra.mxu1 %v3388_v3  ;;  %v3483_v2 = vld [vmem:[%s3796_s7 + $0x39c] ss:$20 sps:$4 sm:$0xff]   ;;  %v3485_v3 = vld [vmem:[%s3796_s7 + $0x264] ss:$20 sps:$4 sm:$0xff]  }
  0x86   : > { %1965 = vmatpush2.bf16.msra.mxu1 %v3389_v4  ;;  %1743 = vmatprep.mubr.bf16.mxu0 %v3391_v5  ;;  %v3487_v4 = vld [vmem:[%s3796_s7 + $0x398] ss:$20 sps:$4 sm:$0xff]   ;;  %v3488_v5 = vld [vmem:[%s3796_s7 + $0x260] ss:$20 sps:$4 sm:$0xff]  }
  0x87   : > { %1966 = vmatprep.subr.bf16.mxu1 %v3723_v1  ;;  %1968 = vmatprep.mubr.bf16.mxu1 %v3395_v6  ;;  %v3405_v1 = vld [vmem:[%s3796_s7 + $0x5c] ss:$20 sps:$4 sm:$0xff]   ;;  %v3489_v6 = vld [vmem:[%s3796_s7 + $0x28c] ss:$20 sps:$4 sm:$0xff]  }
  0x8a   : > { %1967 = vmatpush2.bf16.msra.mxu1 %v3390_v7  ;;  %v3491_v7 = vld [vmem:[%s3796_s7 + $0x10] ss:$20 sps:$4 sm:$0xff]  }
  0x8d   : > { %1744 = vmatmul.mubr.bf16.gmra.mxu0 %v3396_v9  ;;  %1969 = vmatmul.mubr.bf16.vlgmr.msra.gmra.mxu1 %v3393_v8  ;;  %v3492_v8 = vld [vmem:[%s3796_s7 + $0x288] ss:$20 sps:$4 sm:$0xff]   ;;  %v3493_v9 = vld [vmem:[%s3796_s7 + $0x38] ss:$20 sps:$4 sm:$0xff]  }
  0x8e   : > { %1751 = vmatprep.mubr.bf16.mxu0 %v3397_v10  ;;  %1976 = vmatprep.mubr.bf16.mxu1 %v3399_v11  ;;  %v3494_v10 = vld [vmem:[%s3796_s7 + $0x2b4] ss:$20 sps:$4 sm:$0xff]  }
  0x8f   : > { %v3496_v11 = vld [vmem:[%s3796_s7 + $0x60] ss:$20 sps:$4 sm:$0xff]  }
  0x95   : > { %1752 = vmatmul.mubr.bf16.gmra.mxu0 %v3401_v12  ;;  %1977 = vmatmul.mubr.bf16.gmra.mxu1 %v3402_v13 }
  0x96   : > { %1759 = vmatprep.mubr.bf16.mxu0 %v3403_v14  ;;  %1984 = vmatprep.mubr.bf16.mxu1 %v3405_v1 }
  0x9d   : > { %1760 = vmatmul.mubr.bf16.gmra.mxu0 %v3407_v15  ;;  %1985 = vmatmul.mubr.bf16.gmra.mxu1 %v3408_v16 }
  0x9e   : > { %1767 = vmatprep.mubr.bf16.mxu0 %v3409_v17  ;;  %1992 = vmatprep.mubr.bf16.mxu1 %v3411_v18  ;;  %v3497_v17 = vld [vmem:[%s3796_s7 + $0x2b0] ss:$20 sps:$4 sm:$0xff]   ;;  %v3498_v18 = vld [vmem:[%s3796_s7 + $0x88] ss:$20 sps:$4 sm:$0xff]  }
  0xa5   : > { %1768 = vmatmul.mubr.bf16.gmra.mxu0 %v3413_v19  ;;  %1993 = vmatmul.mubr.bf16.gmra.mxu1 %v3414_v20  ;;  %v3499_v19 = vld [vmem:[%s3796_s7 + $0x2dc] ss:$20 sps:$4 sm:$0xff]  }
  0xa6   : > { %1775 = vmatprep.mubr.bf16.mxu0 %v3415_v21  ;;  %2000 = vmatprep.mubr.bf16.mxu1 %v3417_v22  ;;  %v3501_v20 = vld [vmem:[%s3796_s7 + $0xb0] ss:$20 sps:$4 sm:$0xff]  }
  0xad   : > { %1776 = vmatmul.mubr.bf16.gmra.mxu0 %v3419_v23  ;;  %2001 = vmatmul.mubr.bf16.gmra.mxu1 %v3420_v24 }
  0xae   : > { %1783 = vmatprep.mubr.bf16.mxu0 %v3422_v25  ;;  %2008 = vmatprep.mubr.bf16.mxu1 %v3424_v26 }
  0xb5   : > { %1784 = vmatmul.mubr.bf16.gmra.mxu0 %v3426_v27  ;;  %2009 = vmatmul.mubr.bf16.gmra.mxu1 %v3427_v28 }
  0xb6   : > { %1791 = vmatprep.mubr.bf16.mxu0 %v3428_v29  ;;  %2016 = vmatprep.mubr.bf16.mxu1 %v3430_v30  ;;  %v3502_v29 = vld [vmem:[%s3796_s7 + $0x2d8] ss:$20 sps:$4 sm:$0xff]  }
  0xb7   : > { %v3503_v30 = vld [vmem:[%s3796_s7 + $0xd8] ss:$20 sps:$4 sm:$0xff]  }
  0xbd   : > { %1792 = vmatmul.mubr.bf16.gmra.mxu0 %v3432_v31  ;;  %2017 = vmatmul.mubr.bf16.gmra.mxu1 %v3433_v32  ;;  %v3504_v31 = vld [vmem:[%s3796_s7 + $0x304] ss:$20 sps:$4 sm:$0xff]   ;;  %v3506_v32 = vld [vmem:[%s3796_s7 + $0x100] ss:$20 sps:$4 sm:$0xff]  }
  0xbe   : > { %1799 = vmatprep.mubr.bf16.mxu0 %v3434_v33  ;;  %2024 = vmatprep.mubr.bf16.mxu1 %v3436_v34 }
  0xc5   : > { %1800 = vmatmul.mubr.bf16.gmra.mxu0 %v3438_v35  ;;  %2025 = vmatmul.mubr.bf16.gmra.mxu1 %v3439_v36 }
  0xc6   : > { %1807 = vmatprep.mubr.bf16.mxu0 %v3440_v37  ;;  %2032 = vmatprep.mubr.bf16.mxu1 %v3442_v38 }
  0xcd   : > { %1808 = vmatmul.mubr.bf16.gmra.mxu0 %v3444_v39  ;;  %2033 = vmatmul.mubr.bf16.gmra.mxu1 %v3445_v40 }
  0xce   : > { %1815 = vmatprep.mubr.bf16.mxu0 %v3446_v41  ;;  %2040 = vmatprep.mubr.bf16.mxu1 %v3448_v42  ;;  %v3507_v41 = vld [vmem:[%s3796_s7 + $0x300] ss:$20 sps:$4 sm:$0xff]   ;;  %v3508_v42 = vld [vmem:[%s3796_s7 + $0x128] ss:$20 sps:$4 sm:$0xff]  }
  0xd5   : > { %1816 = vmatmul.mubr.bf16.gmra.mxu0 %v3450_v43  ;;  %2041 = vmatmul.mubr.bf16.gmra.mxu1 %v3451_v44  ;;  %v3511_v43 = vld [vmem:[%s3796_s7 + $0x32c] ss:$20 sps:$4 sm:$0xff]   ;;  %v3512_v44 = vld [vmem:[%s3796_s7 + $0x150] ss:$20 sps:$4 sm:$0xff]  }
  0xd6   : > { %1823 = vmatprep.mubr.bf16.mxu0 %v3452_v45  ;;  %2048 = vmatprep.mubr.bf16.mxu1 %v3454_v46 }
  0xdd   : > { %1824 = vmatmul.mubr.bf16.gmra.mxu0 %v3456_v47  ;;  %2049 = vmatmul.mubr.bf16.gmra.mxu1 %v3457_v48 }
  0xde   : > { %1831 = vmatprep.mubr.bf16.mxu0 %v3459_v49  ;;  %2056 = vmatprep.mubr.bf16.mxu1 %v3461_v50 }
  0xe5   : > { %1832 = vmatmul.mubr.bf16.gmra.mxu0 %v3463_v51  ;;  %2057 = vmatmul.mubr.bf16.gmra.mxu1 %v3464_v52 }
  0xe6   : > { %1839 = vmatprep.mubr.bf16.mxu0 %v3465_v53  ;;  %2064 = vmatprep.mubr.bf16.mxu1 %v3467_v54  ;;  %v3509_v53 = vld [vmem:[%s3796_s7 + $0x328] ss:$20 sps:$4 sm:$0xff]   ;;  %v3513_v54 = vld [vmem:[%s3796_s7 + $0x178] ss:$20 sps:$4 sm:$0xff]  }
  0xed   : > { %1840 = vmatmul.mubr.bf16.gmra.mxu0 %v3469_v55  ;;  %2065 = vmatmul.mubr.bf16.gmra.mxu1 %v3470_v56  ;;  %v3516_v55 = vld [vmem:[%s3796_s7 + $0x354] ss:$20 sps:$4 sm:$0xff]  }
  0xee   : > { %1847 = vmatprep.mubr.bf16.mxu0 %v3471_v57  ;;  %2072 = vmatprep.mubr.bf16.mxu1 %v3473_v58  ;;  %v3517_v56 = vld [vmem:[%s3796_s7 + $0x1a0] ss:$20 sps:$4 sm:$0xff]  }
  0xf5   : > { %1848 = vmatmul.mubr.bf16.gmra.mxu0 %v3475_v59  ;;  %2073 = vmatmul.mubr.bf16.gmra.mxu1 %v3476_v60 }
  0xf6   : > { %1855 = vmatprep.mubr.bf16.mxu0 %v3477_v61  ;;  %2080 = vmatprep.mubr.bf16.mxu1 %v3479_v62 }
  0xfd   : > { %1856 = vmatmul.mubr.bf16.gmra.mxu0 %v3481_v63  ;;  %2081 = vmatmul.mubr.bf16.gmra.mxu1 %v3482_v0 }
  0xfe   : > { %1863 = vmatprep.mubr.bf16.mxu0 %v3483_v2  ;;  %2088 = vmatprep.mubr.bf16.mxu1 %v3485_v3  ;;  %v3514_v2 = vld [vmem:[%s3796_s7 + $0x350] ss:$20 sps:$4 sm:$0xff]   ;;  %v3518_v3 = vld [vmem:[%s3796_s7 + $0x1c8] ss:$20 sps:$4 sm:$0xff]  }
 0x105   : > { %1864 = vmatmul.mubr.bf16.gmra.mxu0 %v3487_v4  ;;  %2089 = vmatmul.mubr.bf16.gmra.mxu1 %v3488_v5  ;;  %v3521_v4 = vld [vmem:[%s3796_s7 + $0x37c] ss:$20 sps:$4 sm:$0xff]  }
 0x106   : > { %2096 = vmatprep.mubr.bf16.mxu1 %v3489_v6  ;;  %3187 = vmatprep.mubr.msk.bf16.mxu0 %vm1550_vm0, %v3491_v7  ;;  %v3522_v5 = vld [vmem:[%s3796_s7 + $0x1f0] ss:$20 sps:$4 sm:$0xff]  }
 0x10d   : > { %v4034_v12 = vpop.f32.mrf.mxu0  ;;  %v4036_v13 = vpop.f32.mrf.mxu1  ;;  %2097 = vmatmul.mubr.bf16.gmra.mxu1 %v3492_v8  ;;  %3188 = vmatmul.mubr.msk.bf16.vlgmr.msra.gmra.mxu0 %vm1550_vm0, %v3493_v9 }
 0x10e   : > { %4775 = vst [vmem:[#allocation2_spill] sm:$0xff] %v4036_v13  ;;  %2104 = vmatprep.mubr.bf16.mxu1 %v3494_v10  ;;  %3191 = vmatprep.mubr.msk.bf16.mxu0 %vm1550_vm0, %v3496_v11 }
 0x10f   : > { %v1683_v14 = vpop.f32.mrf.mxu0  ;;  %v1875_v1 = vpop.f32.mrf.mxu1 }
 0x111   : > { %v4040_v15 = vpop.f32.mrf.mxu0  ;;  %v4042_v16 = vpop.f32.mrf.mxu1 }
 0x112   : > { %4776 = vst [vmem:[#allocation3_spill] sm:$0xff] %v4042_v16 }
 0x113   : > { %v1686_v21 = vpop.f32.mrf.mxu0  ;;  %v1878_v22 = vpop.f32.mrf.mxu1 }
 0x115   : > { %v4048_v23 = vpop.f32.mrf.mxu0  ;;  %v4050_v24 = vpop.f32.mrf.mxu1  ;;  %2105 = vmatmul.mubr.bf16.gmra.mxu1 %v3497_v17  ;;  %3192 = vmatmul.mubr.msk.bf16.gmra.mxu0 %vm1550_vm0, %v3498_v18  ;;  %v3519_v17 = vld [vmem:[%s3796_s7 + $0x378] ss:$20 sps:$4 sm:$0xff]  }
 0x116   : > { %4777 = vst [vmem:[#allocation4_spill] sm:$0xff] %v4050_v24  ;;  %2112 = vmatprep.mubr.bf16.mxu1 %v3499_v19  ;;  %3195 = vmatprep.mubr.msk.bf16.mxu0 %vm1550_vm0, %v3501_v20  ;;  %v3523_v18 = vld [vmem:[%s3796_s7 + $0x218] ss:$20 sps:$4 sm:$0xff]   ;;  %v3527_v20 = vld [vmem:[%s3796_s7 + $0x240] ss:$20 sps:$4 sm:$0xff]  }
 0x117   : > { %v1691_v25 = vpop.f32.mrf.mxu0  ;;  %v1883_v26 = vpop.f32.mrf.mxu1  ;;  %v3526_v19 = vld [vmem:[%s3796_s7 + $0x3a4] ss:$20 sps:$4 sm:$0xff]  }
 0x119   : > { %v4054_v27 = vpop.f32.mrf.mxu0  ;;  %v4056_v28 = vpop.f32.mrf.mxu1 }
 0x11a   : > { %4778 = vst [vmem:[#allocation5_spill] sm:$0xff] %v4056_v28 }
 0x11b   : > { %v1694_v33 = vpop.f32.mrf.mxu0  ;;  %v1886_v34 = vpop.f32.mrf.mxu1 }
 0x11c   : > { %v3524_v33 = vld [vmem:[%s3796_s7 + $0x3a0] ss:$20 sps:$4 sm:$0xff]   ;;  %v3528_v34 = vld [vmem:[%s3796_s7 + $0x268] ss:$20 sps:$4 sm:$0xff]  }
 0x11d   : > { %v4062_v35 = vpop.f32.mrf.mxu0  ;;  %v4064_v36 = vpop.f32.mrf.mxu1  ;;  %2113 = vmatmul.mubr.bf16.gmra.mxu1 %v3502_v29  ;;  %3196 = vmatmul.mubr.msk.bf16.gmra.mxu0 %vm1550_vm0, %v3503_v30 }
 0x11e   : > { %4779 = vst [vmem:[#allocation6_spill] sm:$0xff] %v4064_v36  ;;  %2120 = vmatprep.mubr.bf16.mxu1 %v3504_v31  ;;  %3199 = vmatprep.mubr.msk.bf16.mxu0 %vm1550_vm0, %v3506_v32 }
 0x11f   : > { %v1699_v37 = vpop.f32.mrf.mxu0  ;;  %v1891_v38 = vpop.f32.mrf.mxu1 }
 0x120   : > { %v3531_v37 = vld [vmem:[%s3796_s7 + $0x3cc] ss:$20 sps:$4 sm:$0xff]   ;;  %v3532_v38 = vld [vmem:[%s3796_s7 + $0x290] ss:$20 sps:$4 sm:$0xff]  }
 0x121   : > { %v4068_v39 = vpop.f32.mrf.mxu0  ;;  %v4070_v40 = vpop.f32.mrf.mxu1 }
 0x122   : > { %4780 = vst [vmem:[#allocation7_spill] sm:$0xff] %v4070_v40 }
 0x123   : > { %v1702_v45 = vpop.f32.mrf.mxu0  ;;  %v1894_v46 = vpop.f32.mrf.mxu1 }
 0x125   : > { %v4076_v47 = vpop.f32.mrf.mxu0  ;;  %v4078_v48 = vpop.f32.mrf.mxu1  ;;  %2121 = vmatmul.mubr.bf16.gmra.mxu1 %v3507_v41  ;;  %3200 = vmatmul.mubr.msk.bf16.gmra.mxu0 %vm1550_vm0, %v3508_v42 }
 0x126   : > { %4781 = vst [vmem:[#allocation8_spill] sm:$0xff] %v4078_v48  ;;  %2128 = vmatprep.mubr.bf16.mxu1 %v3511_v43  ;;  %3203 = vmatprep.mubr.msk.bf16.mxu0 %vm1550_vm0, %v3512_v44 }
 0x127   : > { %v1707_v49 = vpop.f32.mrf.mxu0  ;;  %v1899_v50 = vpop.f32.mrf.mxu1 }
 0x129   : > { %v4082_v51 = vpop.f32.mrf.mxu0  ;;  %v4084_v52 = vpop.f32.mrf.mxu1 }
 0x12a   : > { %4782 = vst [vmem:[#allocation9_spill] sm:$0xff] %v4084_v52 }
 0x12b   : > { %v1710_v57 = vpop.f32.mrf.mxu0  ;;  %v1902_v58 = vpop.f32.mrf.mxu1 }
 0x12d   : > { %v4090_v59 = vpop.f32.mrf.mxu0  ;;  %v4092_v60 = vpop.f32.mrf.mxu1  ;;  %2129 = vmatmul.mubr.bf16.gmra.mxu1 %v3509_v53  ;;  %3204 = vmatmul.mubr.msk.bf16.gmra.mxu0 %vm1550_vm0, %v3513_v54  ;;  %v3529_v53 = vld [vmem:[%s3796_s7 + $0x3c8] ss:$20 sps:$4 sm:$0xff]   ;;  %v3533_v54 = vld [vmem:[%s3796_s7 + $0x2b8] ss:$20 sps:$4 sm:$0xff]  }
 0x12e   : > { %4783 = vst [vmem:[#allocation10_spill] sm:$0xff] %v4092_v60  ;;  %2136 = vmatprep.mubr.bf16.mxu1 %v3516_v55  ;;  %3207 = vmatprep.mubr.msk.bf16.mxu0 %vm1550_vm0, %v3517_v56  ;;  %v3536_v55 = vld [vmem:[%s3796_s7 + $0x3f4] ss:$20 sps:$4 sm:$0xff]  }
 0x12f   : > { %v1715_v61 = vpop.f32.mrf.mxu0  ;;  %v1907_v62 = vpop.f32.mrf.mxu1  ;;  %v3537_v56 = vld [vmem:[%s3796_s7 + $0x2e0] ss:$20 sps:$4 sm:$0xff]  }
 0x131   : > { %v4096_v63 = vpop.f32.mrf.mxu0  ;;  %v4098_v0 = vpop.f32.mrf.mxu1 }
 0x132   : > { %4784 = vst [vmem:[#allocation11_spill] sm:$0xff] %v4098_v0 }
 0x133   : > { %v1718_v6 = vpop.f32.mrf.mxu0  ;;  %v1910_v7 = vpop.f32.mrf.mxu1 }
 0x134   : > { %v3534_v7 = vld [vmem:[%s3796_s7 + $0x3f0] ss:$20 sps:$4 sm:$0xff]  }
 0x135   : > { %v4104_v8 = vpop.f32.mrf.mxu0  ;;  %v4106_v9 = vpop.f32.mrf.mxu1  ;;  %2137 = vmatmul.mubr.bf16.gmra.mxu1 %v3514_v2  ;;  %3208 = vmatmul.mubr.msk.bf16.gmra.mxu0 %vm1550_vm0, %v3518_v3 }
 0x136   : > { %4785 = vst [vmem:[#allocation12_spill] sm:$0xff] %v4106_v9  ;;  %2144 = vmatprep.mubr.bf16.mxu1 %v3521_v4  ;;  %3211 = vmatprep.mubr.msk.bf16.mxu0 %vm1550_vm0, %v3522_v5 }
 0x137   : > { %v1723_v10 = vpop.f32.mrf.mxu0  ;;  %v1915_v11 = vpop.f32.mrf.mxu1 }
 0x138   : > { %v3538_v10 = vld [vmem:[%s3796_s7 + $0x308] ss:$20 sps:$4 sm:$0xff]  }
 0x139   : > { %v4110_v14 = vpop.f32.mrf.mxu0  ;;  %v4112_v1 = vpop.f32.mrf.mxu1 }
 0x13a   : > { %4786 = vst [vmem:[#allocation13_spill] sm:$0xff] %v4112_v1 }
 0x13b   : > { %v1726_v21 = vpop.f32.mrf.mxu0  ;;  %v1918_v22 = vpop.f32.mrf.mxu1 }
 0x13d   : > { %v4118_v25 = vpop.f32.mrf.mxu0  ;;  %v4120_v26 = vpop.f32.mrf.mxu1  ;;  %2145 = vmatmul.mubr.bf16.gmra.mxu1 %v3519_v17  ;;  %3212 = vmatmul.mubr.msk.bf16.gmra.mxu0 %vm1550_vm0, %v3523_v18  ;;  %v3541_v17 = vld [vmem:[%s3796_s7 + $0x41c] ss:$20 sps:$4 sm:$0xff]  }
 0x13e   : > { %4787 = vst [vmem:[#allocation14_spill] sm:$0xff] %v4120_v26  ;;  %2152 = vmatprep.mubr.bf16.mxu1 %v3526_v19  ;;  %3215 = vmatprep.mubr.msk.bf16.mxu0 %vm1550_vm0, %v3527_v20  ;;  %v3542_v18 = vld [vmem:[%s3796_s7 + $0x330] ss:$20 sps:$4 sm:$0xff]  }
 0x13f   : > { %v1731_v29 = vpop.f32.mrf.mxu0  ;;  %v1923_v30 = vpop.f32.mrf.mxu1 }
 0x141   : > { %v4124_v31 = vpop.f32.mrf.mxu0  ;;  %v4126_v32 = vpop.f32.mrf.mxu1 }
 0x142   : > { %4788 = vst [vmem:[#allocation15_spill] sm:$0xff] %v4126_v32 }
 0x143   : > { %v1734_v41 = vpop.f32.mrf.mxu0  ;;  %v1926_v42 = vpop.f32.mrf.mxu1 }
 0x144   : > { %v3546_v41 = vld [vmem:[%s3796_s7 + $0x444] ss:$20 sps:$4 sm:$0xff]   ;;  %v3547_v42 = vld [vmem:[%s3796_s7 + $0x380] ss:$20 sps:$4 sm:$0xff]  }
 0x145   : > { %v4132_v43 = vpop.f32.mrf.mxu0  ;;  %v4134_v44 = vpop.f32.mrf.mxu1  ;;  %2153 = vmatmul.mubr.bf16.gmra.mxu1 %v3524_v33  ;;  %3216 = vmatmul.mubr.msk.bf16.gmra.mxu0 %vm1550_vm0, %v3528_v34  ;;  %v3539_v34 = vld [vmem:[%s3796_s7 + $0x418] ss:$20 sps:$4 sm:$0xff]  }
 0x146   : > { %4789 = vst [vmem:[#allocation16_spill] sm:$0xff] %v4134_v44  ;;  %2160 = vmatprep.mubr.bf16.mxu1 %v3531_v37  ;;  %3219 = vmatprep.mubr.msk.bf16.mxu0 %vm1550_vm0, %v3532_v38  ;;  %v3543_v37 = vld [vmem:[%s3796_s7 + $0x358] ss:$20 sps:$4 sm:$0xff]  }
 0x147   : > { %v1739_v45 = vpop.f32.mrf.mxu0  ;;  %v1931_v46 = vpop.f32.mrf.mxu1 }
 0x149   : > { %v4138_v49 = vpop.f32.mrf.mxu0  ;;  %v4140_v50 = vpop.f32.mrf.mxu1 }
 0x14a   : > { %4790 = vst [vmem:[#allocation17_spill] sm:$0xff] %v4140_v50 }
 0x14b   : > { %v1742_v57 = vpop.f32.mrf.mxu0  ;;  %v1934_v58 = vpop.f32.mrf.mxu1 }
 0x14c   : > { %v3544_v58 = vld [vmem:[%s3796_s7 + $0x440] ss:$20 sps:$4 sm:$0xff]  }
 0x14d   : > { %v4146_v61 = vpop.f32.mrf.mxu0  ;;  %v1970_v62 = vpop.f32.mrf.mxu1  ;;  %2161 = vmatmul.mubr.bf16.gmra.mxu1 %v3529_v53  ;;  %3220 = vmatmul.mubr.msk.bf16.gmra.mxu0 %vm1550_vm0, %v3533_v54 }
 0x14e   : > { %v4150_v2 = vadd.f32 %v1970_v62, %v4034_v12  ;;  %2168 = vmatprep.mubr.bf16.mxu1 %v3536_v55  ;;  %3223 = vmatprep.mubr.msk.bf16.mxu0 %vm1550_vm0, %v3537_v56  ;;  %v3548_v62 = vld [vmem:[%s3796_s7 + $0x3a8] ss:$20 sps:$4 sm:$0xff]  }
 0x14f   : > { %v1747_v3 = vpop.f32.mrf.mxu0  ;;  %v1972_v4 = vpop.f32.mrf.mxu1 }
 0x150   : > { %v3551_v4 = vld [vmem:[%s3796_s7 + $0x46c] ss:$20 sps:$4 sm:$0xff]  }
 0x151   : > { %v4153_v5 = vpop.f32.mrf.mxu0  ;;  %v1973_v6 = vpop.f32.mrf.mxu1 }
 0x152   : > { %v4158_v11 = vadd.f32 %v1973_v6, %v4040_v15  ;;  %v3552_v6 = vld [vmem:[%s3796_s7 + $0x3d0] ss:$20 sps:$4 sm:$0xff]  }
 0x153   : > { %v1750_v19 = vpop.f32.mrf.mxu0  ;;  %v1975_v12 = vpop.f32.mrf.mxu1 }
 0x155   : > { %v4162_v20 = vpop.f32.mrf.mxu0  ;;  %v1978_v21 = vpop.f32.mrf.mxu1  ;;  %2169 = vmatmul.mubr.bf16.gmra.mxu1 %v3534_v7  ;;  %3224 = vmatmul.mubr.msk.bf16.gmra.mxu0 %vm1550_vm0, %v3538_v10 }
 0x156   : > { %v4166_v22 = vadd.f32 %v1978_v21, %v4048_v23  ;;  %2176 = vmatprep.mubr.bf16.mxu1 %v3541_v17  ;;  %3227 = vmatprep.mubr.msk.bf16.mxu0 %vm1550_vm0, %v3542_v18 }
 0x157   : > { %v1755_v15 = vpop.f32.mrf.mxu0  ;;  %v1980_v29 = vpop.f32.mrf.mxu1 }
 0x158   : > { %v3549_v15 = vld [vmem:[%s3796_s7 + $0x468] ss:$20 sps:$4 sm:$0xff]   ;;  %v3553_v29 = vld [vmem:[%s3796_s7 + $0x3f8] ss:$20 sps:$4 sm:$0xff]  }
 0x159   : > { %v4169_v30 = vpop.f32.mrf.mxu0  ;;  %v1981_v33 = vpop.f32.mrf.mxu1 }
 0x15a   : > { %v4174_v38 = vadd.f32 %v1981_v33, %v4054_v27 }
 0x15b   : > { %v1758_v45 = vpop.f32.mrf.mxu0  ;;  %v1983_v23 = vpop.f32.mrf.mxu1 }
 0x15d   : > { %v4178_v46 = vpop.f32.mrf.mxu0  ;;  %v1986_v53 = vpop.f32.mrf.mxu1  ;;  %2177 = vmatmul.mubr.bf16.gmra.mxu1 %v3539_v34  ;;  %3228 = vmatmul.mubr.msk.bf16.gmra.mxu0 %vm1550_vm0, %v3543_v37  ;;  %v3556_v34 = vld [vmem:[%s3796_s7 + $0x494] ss:$20 sps:$4 sm:$0xff]  }
 0x15e   : > { %v4182_v54 = vadd.f32 %v1986_v53, %v4062_v35  ;;  %2184 = vmatprep.mubr.bf16.mxu1 %v3546_v41  ;;  %3231 = vmatprep.mubr.msk.bf16.mxu0 %vm1550_vm0, %v3547_v42  ;;  %v3557_v37 = vld [vmem:[%s3796_s7 + $0x420] ss:$20 sps:$4 sm:$0xff]  }
 0x15f   : > { %v1763_v27 = vpop.f32.mrf.mxu0  ;;  %v1988_v55 = vpop.f32.mrf.mxu1 }
 0x161   : > { %v4185_v56 = vpop.f32.mrf.mxu0  ;;  %v1989_v57 = vpop.f32.mrf.mxu1 }
 0x162   : > { %v4190_v3 = vadd.f32 %v1989_v57, %v4068_v39  ;;  %v3554_v57 = vld [vmem:[%s3796_s7 + $0x490] ss:$20 sps:$4 sm:$0xff]  }
 0x163   : > { %v1766_v7 = vpop.f32.mrf.mxu0  ;;  %v1991_v35 = vpop.f32.mrf.mxu1 }
 0x165   : > { %v4194_v10 = vpop.f32.mrf.mxu0  ;;  %v1994_v17 = vpop.f32.mrf.mxu1  ;;  %2185 = vmatmul.mubr.bf16.gmra.mxu1 %v3544_v58  ;;  %3232 = vmatmul.mubr.msk.bf16.gmra.mxu0 %vm1550_vm0, %v3548_v62  ;;  %v3558_v58 = vld [vmem:[%s3796_s7 + $0x448] ss:$20 sps:$4 sm:$0xff]  }
 0x166   : > { %v4198_v18 = vadd.f32 %v1994_v17, %v4076_v47  ;;  %2192 = vmatprep.mubr.bf16.mxu1 %v3551_v4  ;;  %3235 = vmatprep.mubr.msk.bf16.mxu0 %vm1550_vm0, %v3552_v6  ;;  %v3561_v4 = vld [vmem:[%s3796_s7 + $0x4bc] ss:$20 sps:$4 sm:$0xff]  }
 0x167   : > { %v1771_v39 = vpop.f32.mrf.mxu0  ;;  %v1996_v19 = vpop.f32.mrf.mxu1  ;;  %v3562_v6 = vld [vmem:[%s3796_s7 + $0x470] ss:$20 sps:$4 sm:$0xff]  }
 0x169   : > { %v4201_v12 = vpop.f32.mrf.mxu0  ;;  %v1997_v21 = vpop.f32.mrf.mxu1 }
 0x16a   : > { %v4206_v33 = vadd.f32 %v1997_v21, %v4082_v51 }
 0x16b   : > { %v1774_v41 = vpop.f32.mrf.mxu0  ;;  %v1999_v47 = vpop.f32.mrf.mxu1 }
 0x16c   : > { %v3566_v41 = vld [vmem:[%s3796_s7 + $0x4e4] ss:$20 sps:$4 sm:$0xff]   ;;  %v3567_v47 = vld [vmem:[%s3796_s7 + $0x4c0] ss:$20 sps:$4 sm:$0xff]  }
 0x16d   : > { %v4210_v42 = vpop.f32.mrf.mxu0  ;;  %v2002_v45 = vpop.f32.mrf.mxu1  ;;  %2193 = vmatmul.mubr.bf16.gmra.mxu1 %v3549_v15  ;;  %3236 = vmatmul.mubr.msk.bf16.gmra.mxu0 %vm1550_vm0, %v3553_v29  ;;  %v3559_v29 = vld [vmem:[%s3796_s7 + $0x4b8] ss:$20 sps:$4 sm:$0xff]  }
 0x16e   : > { %v4214_v23 = vadd.f32 %v2002_v45, %v4090_v59  ;;  %2200 = vmatprep.mubr.bf16.mxu1 %v3556_v34  ;;  %3239 = vmatprep.mubr.msk.bf16.mxu0 %vm1550_vm0, %v3557_v37  ;;  %v3563_v34 = vld [vmem:[%s3796_s7 + $0x498] ss:$20 sps:$4 sm:$0xff]  }
 0x16f   : > { %v1779_v51 = vpop.f32.mrf.mxu0  ;;  %v2004_v53 = vpop.f32.mrf.mxu1 }
 0x171   : > { %v4217_v27 = vpop.f32.mrf.mxu0  ;;  %v2005_v55 = vpop.f32.mrf.mxu1 }
 0x172   : > { %v4222_v62 = vadd.f32 %v2005_v55, %v4096_v63 }
 0x173   : > { %v1782_v7 = vpop.f32.mrf.mxu0  ;;  %v2007_v59 = vpop.f32.mrf.mxu1 }
 0x174   : > { %v3568_v7 = vld [vmem:[%s3796_s7 + $0x4e8] ss:$20 sps:$4 sm:$0xff]  }
 0x175   : > { %v4226_v35 = vpop.f32.mrf.mxu0  ;;  %v2010_v17 = vpop.f32.mrf.mxu1  ;;  %2201 = vmatmul.mubr.bf16.gmra.mxu1 %v3554_v57  ;;  %3240 = vmatmul.mubr.msk.bf16.gmra.mxu0 %vm1550_vm0, %v3558_v58 }
 0x176   : > { %v4230_v39 = vadd.f32 %v2010_v17, %v4104_v8  ;;  %2208 = vmatprep.mubr.bf16.mxu1 %v3561_v4  ;;  %3243 = vmatprep.mubr.msk.bf16.mxu0 %vm1550_vm0, %v3562_v6  ;;  %v3564_v6 = vld [vmem:[%s3796_s7 + $0x4e0] ss:$20 sps:$4 sm:$0xff]  }
 0x177   : > { %v1787_v63 = vpop.f32.mrf.mxu0  ;;  %v2012_v19 = vpop.f32.mrf.mxu1 }
 0x179   : > { %v4233_v21 = vpop.f32.mrf.mxu0  ;;  %v2013_v15 = vpop.f32.mrf.mxu1 }
 0x17a   : > { %v4238_v37 = vadd.f32 %v2013_v15, %v4110_v14 }
 0x17b   : > { %v1790_v45 = vpop.f32.mrf.mxu0  ;;  %v2015_v8 = vpop.f32.mrf.mxu1 }
 0x17d   : > { %v4242_v51 = vpop.f32.mrf.mxu0  ;;  %v2018_v53 = vpop.f32.mrf.mxu1  ;;  %2209 = vmatmul.mubr.bf16.gmra.mxu1 %v3559_v29  ;;  %3244 = vmatmul.mubr.msk.bf16.gmra.mxu0 %vm1550_vm0, %v3563_v34 }
 0x17e   : > { %v4246_v55 = vadd.f32 %v2018_v53, %v4118_v25  ;;  %2216 = vmatprep.mubr.bf16.mxu1 %v3566_v41  ;;  %3247 = vmatprep.mubr.msk.bf16.mxu0 %vm1550_vm0, %v3567_v47 }
 0x17f   : > { %v1795_v14 = vpop.f32.mrf.mxu0  ;;  %v2020_v57 = vpop.f32.mrf.mxu1 }
 0x181   : > { %v4249_v58 = vpop.f32.mrf.mxu0  ;;  %v2021_v4 = vpop.f32.mrf.mxu1 }
 0x182   : > { %v4254_v59 = vadd.f32 %v2021_v4, %v4124_v31 }
 0x183   : > { %v1798_v17 = vpop.f32.mrf.mxu0  ;;  %v2023_v63 = vpop.f32.mrf.mxu1 }
 0x185   : > { %v4256_v19 = vpop.f32.mrf.mxu0  ;;  %v2026_v15 = vpop.f32.mrf.mxu1  ;;  %2217 = vmatmul.mubr.bf16.gmra.mxu1 %v3564_v6  ;;  %3248 = vmatmul.mubr.msk.bf16.gmra.mxu0 %vm1550_vm0, %v3568_v7 }
 0x186   : > { %v4260_v25 = vadd.f32 %v2026_v15, %v4132_v43 }
 0x187   : > { %v1803_v29 = vpop.f32.mrf.mxu0  ;;  %v2028_v34 = vpop.f32.mrf.mxu1 }
 0x189   : > { %v4262_v41 = vpop.f32.mrf.mxu0  ;;  %v2029_v47 = vpop.f32.mrf.mxu1 }
 0x18a   : > { %v4265_v45 = vadd.f32 %v2029_v47, %v4138_v49 }
 0x18b   : > { %v1806_v31 = vpop.f32.mrf.mxu0  ;;  %v2031_v8 = vpop.f32.mrf.mxu1 }
 0x18d   : > { %v4267_v53 = vpop.f32.mrf.mxu0  ;;  %v2034_v14 = vpop.f32.mrf.mxu1 }
 0x18e   : > { %v4270_v57 = vadd.f32 %v2034_v14, %v4146_v61 }
 0x18f   : > { %v1811_v4 = vpop.f32.mrf.mxu0  ;;  %v2036_v6 = vpop.f32.mrf.mxu1 }
 0x191   : > { %v4272_v43 = vpop.f32.mrf.mxu0  ;;  %v2037_v7 = vpop.f32.mrf.mxu1 }
 0x192   : > { %v4275_v17 = vadd.f32 %v2037_v7, %v4153_v5 }
 0x193   : > { %v1814_v63 = vpop.f32.mrf.mxu0  ;;  %v2039_v15 = vpop.f32.mrf.mxu1 }
 0x195   : > { %v4277_v49 = vpop.f32.mrf.mxu0  ;;  %v2042_v29 = vpop.f32.mrf.mxu1 }
 0x196   : > { %v4280_v34 = vadd.f32 %v2042_v29, %v4162_v20 }
 0x197   : > { %v1819_v47 = vpop.f32.mrf.mxu0  ;;  %v2044_v31 = vpop.f32.mrf.mxu1 }
 0x199   : > { %v4282_v61 = vpop.f32.mrf.mxu0  ;;  %v2045_v8 = vpop.f32.mrf.mxu1 }
 0x19a   : > { %v4285_v14 = vadd.f32 %v2045_v8, %v4169_v30 }
 0x19b   : > { %v1822_v4 = vpop.f32.mrf.mxu0  ;;  %v2047_v6 = vpop.f32.mrf.mxu1 }
 0x19d   : > { %v4287_v5 = vpop.f32.mrf.mxu0  ;;  %v2050_v7 = vpop.f32.mrf.mxu1 }
 0x19e   : > { %v4290_v63 = vadd.f32 %v2050_v7, %v4178_v46 }
 0x19f   : > { %v1827_v15 = vpop.f32.mrf.mxu0  ;;  %v2052_v50 = vpop.f32.mrf.mxu1 }
 0x1a1   : > { %v4292_v20 = vpop.f32.mrf.mxu0  ;;  %v2053_v29 = vpop.f32.mrf.mxu1 }
 0x1a2   : > { %v4295_v47 = vadd.f32 %v2053_v29, %v4185_v56 }
 0x1a3   : > { %v1830_v31 = vpop.f32.mrf.mxu0  ;;  %v2055_v32 = vpop.f32.mrf.mxu1 }
 0x1a5   : > { %v4297_v30 = vpop.f32.mrf.mxu0  ;;  %v2058_v8 = vpop.f32.mrf.mxu1 }
 0x1a6   : > { %v4300_v4 = vadd.f32 %v2058_v8, %v4194_v10 }
 0x1a7   : > { %v1835_v6 = vpop.f32.mrf.mxu0  ;;  %v2060_v44 = vpop.f32.mrf.mxu1 }
 0x1a9   : > { %v4302_v46 = vpop.f32.mrf.mxu0  ;;  %v2061_v7 = vpop.f32.mrf.mxu1 }
 0x1aa   : > { %v4305_v50 = vadd.f32 %v2061_v7, %v4201_v12 }
 0x1ab   : > { %v1838_v15 = vpop.f32.mrf.mxu0  ;;  %v2063_v26 = vpop.f32.mrf.mxu1 }
 0x1ad   : > { %v4307_v56 = vpop.f32.mrf.mxu0  ;;  %v2066_v29 = vpop.f32.mrf.mxu1 }
 0x1ae   : > { %v4310_v32 = vadd.f32 %v2066_v29, %v4210_v42 }
 0x1af   : > { %v1843_v31 = vpop.f32.mrf.mxu0  ;;  %v2068_v0 = vpop.f32.mrf.mxu1 }
 0x1b1   : > { %v4312_v10 = vpop.f32.mrf.mxu0  ;;  %v2069_v8 = vpop.f32.mrf.mxu1 }
 0x1b2   : > { %v4315_v44 = vadd.f32 %v2069_v8, %v4217_v27 }
 0x1b3   : > { %v1846_v6 = vpop.f32.mrf.mxu0  ;;  %v2071_v1 = vpop.f32.mrf.mxu1 }
 0x1b5   : > { %v4317_v12 = vpop.f32.mrf.mxu0  ;;  %v2074_v7 = vpop.f32.mrf.mxu1 }
 0x1b6   : > { %v4320_v26 = vadd.f32 %v2074_v7, %v4226_v35 }
 0x1b7   : > { %v1851_v15 = vpop.f32.mrf.mxu0  ;;  %v2076_v60 = vpop.f32.mrf.mxu1 }
 0x1b9   : > { %v4322_v42 = vpop.f32.mrf.mxu0  ;;  %v2077_v29 = vpop.f32.mrf.mxu1 }
 0x1ba   : > { %v4325_v0 = vadd.f32 %v2077_v29, %v4233_v21 }
 0x1bb   : > { %v1854_v31 = vpop.f32.mrf.mxu0  ;;  %v2079_v9 = vpop.f32.mrf.mxu1 }
 0x1bd   : > { %v4327_v27 = vpop.f32.mrf.mxu0  ;;  %v2082_v8 = vpop.f32.mrf.mxu1 }
 0x1be   : > { %v4330_v1 = vadd.f32 %v2082_v8, %v4242_v51 }
 0x1bf   : > { %v1859_v6 = vpop.f32.mrf.mxu0  ;;  %v2084_v40 = vpop.f32.mrf.mxu1 }
 0x1c1   : > { %v4332_v35 = vpop.f32.mrf.mxu0  ;;  %v2085_v7 = vpop.f32.mrf.mxu1 }
 0x1c2   : > { %4791 = vst [vmem:[#allocation18_spill] sm:$0xff] %v4332_v35  ;;  %v4335_v60 = vadd.f32 %v2085_v7, %v4249_v58  ;;  %v4348_v58 = vld [vmem:[%s4772_s2] ss:$0 sm:$0xff] }
 0x1c3   : > { %v1862_v15 = vpop.f32.mrf.mxu0  ;;  %v2087_v52 = vpop.f32.mrf.mxu1 }
 0x1c4   : > { %v4357_v15 = vld [vmem:[%s4773_s3] ss:$0 sm:$0xff] }
 0x1c5   : > { %v4337_v21 = vpop.f32.mrf.mxu0  ;;  %v4339_v29 = vpop.f32.mrf.mxu1 }
 0x1c7   : > { %v1867_v9 = vpop.f32.mrf.mxu0  ;;  %v2092_v31 = vpop.f32.mrf.mxu1 }
 0x1c9   : > { %v4341_v36 = vpop.f32.mrf.mxu0  ;;  %v4343_v51 = vpop.f32.mrf.mxu1 }
 0x1cb   : > { %v1870_v8 = vpop.f32.mrf.mxu0  ;;  %v2095_v40 = vpop.f32.mrf.mxu1 }
 0x1cd   : > { %v2098_v6 = vpop.f32.mrf.mxu1  ;;  %v3189_v48 = vpop.f32.mrf.mxu0 }
 0x1ce   : > { %v4351_v52 = vadd.f32 %v2098_v6, %v4267_v53  ;;  %v2268_v7 = vadd.f32 %v3189_v48, %v4166_v22 }
 0x1cf   : > { %v2100_v9 = vpop.f32.mrf.mxu1  ;;  %v2259_v31 = vpop.f32.mrf.mxu0 }
 0x1d0   : > { %v2523_v8 = vmul.f32 %v4348_v58, %v2268_v7  ;;  %v2260_v40 = vadd.f32 %v2259_v31, %v4150_v2 }
 0x1d1   : > { %v2101_v16 = vpop.f32.mrf.mxu1  ;;  %v3190_v28 = vpop.f32.mrf.mxu0 }
 0x1d2   : > { %v2594_v13 = vadd.f32 %v4357_v15, %v2523_v8  ;;  %v2521_v53 = vmul.f32 %v4348_v58, %v2260_v40  ;;  %v4364_v6 = vadd.f32 %v2101_v16, %v4272_v43  ;;  %v2271_v48 = vadd.f32 %v3190_v28, %v4174_v38 }
 0x1d3   : > { %v2103_v22 = vpop.f32.mrf.mxu1  ;;  %v2262_v24 = vpop.f32.mrf.mxu0 }
 0x1d4   : > { %3569 = vtanh.f32 %v2594_v13  ;;  %v2592_v9 = vadd.f32 %v4357_v15, %v2521_v53  ;;  %v2524_v7 = vmul.f32 %v4348_v58, %v2271_v48  ;;  %v2263_v2 = vadd.f32 %v2262_v24, %v4158_v11 }
 0x1d5   : > { %v4370_v31 = vpop.f32.mrf.mxu1  ;;  %v3193_v35 = vpop.f32.mrf.mxu0 }
 0x1d6   : > { %3571 = vtanh.f32 %v2592_v9  ;;  %v2595_v8 = vadd.f32 %v4357_v15, %v2524_v7  ;;  %v2522_v16 = vmul.f32 %v4348_v58, %v2263_v2  ;;  %v2284_v28 = vadd.f32 %v3193_v35, %v4198_v18 }
 0x1d7   : > { %v2108_v38 = vpop.f32.mrf.mxu1  ;;  %v2275_v43 = vpop.f32.mrf.mxu0 }
 0x1d8   : > { %3573 = vtanh.f32 %v2595_v8  ;;  %v2593_v13 = vadd.f32 %v4357_v15, %v2522_v16  ;;  %v2276_v40 = vadd.f32 %v2275_v43, %v4182_v54  ;;  %v2527_v24 = vmul.f32 %v4348_v58, %v2284_v28 }
 0x1d9   : > { %v4378_v11 = vpop.f32.mrf.mxu1  ;;  %v3194_v53 = vpop.f32.mrf.mxu0 }
 0x1da   : > { %3575 = vtanh.f32 %v2593_v13  ;;  %v2525_v48 = vmul.f32 %v4348_v58, %v2276_v40  ;;  %v2287_v22 = vadd.f32 %v3194_v53, %v4206_v33  ;;  %v2598_v9 = vadd.f32 %v4357_v15, %v2527_v24 }
 0x1db   : > { %v2111_v18 = vpop.f32.mrf.mxu1  ;;  %v2278_v35 = vpop.f32.mrf.mxu0 }
 0x1dc   : > { %v2596_v7 = vadd.f32 %v4357_v15, %v2525_v48  ;;  %v2528_v2 = vmul.f32 %v4348_v58, %v2287_v22  ;;  %v2279_v54 = vadd.f32 %v2278_v35, %v4190_v3  ;;  %3577 = vtanh.f32 %v2598_v9 }
 0x1dd   : > { %v4387_v8 = vpop.f32.mrf.mxu1  ;;  %v3197_v16 = vpop.f32.mrf.mxu0 }
 0x1de   : > { %3579 = vtanh.f32 %v2596_v7  ;;  %v2599_v28 = vadd.f32 %v4357_v15, %v2528_v2  ;;  %v2526_v33 = vmul.f32 %v4348_v58, %v2279_v54  ;;  %v2300_v38 = vadd.f32 %v3197_v16, %v4230_v39 }
 0x1df   : > { %v2116_v43 = vpop.f32.mrf.mxu1  ;;  %v2291_v3 = vpop.f32.mrf.mxu0 }
 0x1e0   : > { %3581 = vtanh.f32 %v2599_v28  ;;  %v2597_v13 = vadd.f32 %v4357_v15, %v2526_v33  ;;  %v2292_v40 = vadd.f32 %v2291_v3, %v4214_v23  ;;  %v2531_v53 = vmul.f32 %v4348_v58, %v2300_v38 }
 0x1e1   : > { %v3570_v24 = vpop.eup %3569  ;;  %v4400_v48 = vpop.f32.mrf.mxu1 }
 0x1e2   : > { %v3198_v22 = vpop.f32.mrf.mxu0  ;;  %2723 = vst.msk [vmem:[%s4394_s13 + $0x10] sm:$0xff] %vm2720_vm1, %v3570_v24  ;;  %3583 = vtanh.f32 %v2597_v13  ;;  %v2529_v39 = vmul.f32 %v4348_v58, %v2292_v40  ;;  %v2602_v35 = vadd.f32 %v4357_v15, %v2531_v53 }
 0x1e3   : > { %v2303_v9 = vadd.f32 %v3198_v22, %v4238_v37  ;;  %v3572_v18 = vpop.eup %3571  ;;  %v2119_v7 = vpop.f32.mrf.mxu1 }
 0x1e4   : > { %v2294_v2 = vpop.f32.mrf.mxu0  ;;  %2721 = vst.msk [vmem:[%s4394_s13] sm:$0xff] %vm2720_vm1, %v3572_v18  ;;  %v2600_v23 = vadd.f32 %v4357_v15, %v2529_v39  ;;  %3585 = vtanh.f32 %v2602_v35 }
 0x1e5   : > { %v2532_v54 = vmul.f32 %v4348_v58, %v2303_v9  ;;  %v2295_v16 = vadd.f32 %v2294_v2, %v4222_v62  ;;  %v3574_v28 = vpop.eup %3573  ;;  %v4412_v33 = vpop.f32.mrf.mxu1 }
 0x1e6   : > { %v3201_v38 = vpop.f32.mrf.mxu0  ;;  %2724 = vst.msk [vmem:[%s4394_s13 + $0x18] sm:$0xff] %vm2720_vm1, %v3574_v28  ;;  %3587 = vtanh.f32 %v2600_v23 }
 0x1e7   : > { %v2603_v37 = vadd.f32 %v4357_v15, %v2532_v54  ;;  %v2530_v43 = vmul.f32 %v4348_v58, %v2295_v16  ;;  %v3576_v3 = vpop.eup %3575  ;;  %v2316_v13 = vadd.f32 %v3201_v38, %v4260_v25  ;;  %v2124_v40 = vpop.f32.mrf.mxu1 }
 0x1e8   : > { %v2307_v24 = vpop.f32.mrf.mxu0  ;;  %2722 = vst.msk [vmem:[%s4394_s13 + $0x8] sm:$0xff] %vm2720_vm1, %v3576_v3 }
 0x1e9   : > { %3589 = vtanh.f32 %v2603_v37  ;;  %v2601_v62 = vadd.f32 %v4357_v15, %v2530_v43  ;;  %v2308_v53 = vadd.f32 %v2307_v24, %v4246_v55  ;;  %v2535_v22 = vmul.f32 %v4348_v58, %v2316_v13  ;;  %v4424_v39 = vpop.f32.mrf.mxu1  ;;  %v3578_v18 = vpop.eup %3577 }
 0x1ea   : > { %v3202_v9 = vpop.f32.mrf.mxu0  ;;  %2727 = vst.msk [vmem:[%s4394_s13 + $0x30] sm:$0xff] %vm2720_vm1, %v3578_v18 }
 0x1eb   : > { %3591 = vtanh.f32 %v2601_v62  ;;  %v2533_v25 = vmul.f32 %v4348_v58, %v2308_v53  ;;  %v2319_v35 = vadd.f32 %v3202_v9, %v4265_v45  ;;  %v3580_v7 = vpop.eup %3579  ;;  %v2606_v2 = vadd.f32 %v4357_v15, %v2535_v22  ;;  %v2127_v23 = vpop.f32.mrf.mxu1 }
 0x1ec   : > { %v2310_v54 = vpop.f32.mrf.mxu0  ;;  %2725 = vst.msk [vmem:[%s4394_s13 + $0x20] sm:$0xff] %vm2720_vm1, %v3580_v7 }
 0x1ed   : > { %v2604_v55 = vadd.f32 %v4357_v15, %v2533_v25  ;;  %v2536_v16 = vmul.f32 %v4348_v58, %v2319_v35  ;;  %v2311_v28 = vadd.f32 %v2310_v54, %v4254_v59  ;;  %v3582_v38 = vpop.eup %3581  ;;  %3593 = vtanh.f32 %v2606_v2  ;;  %v4436_v37 = vpop.f32.mrf.mxu1 }
 0x1ee   : > { %v3205_v45 = vpop.f32.mrf.mxu0  ;;  %2728 = vst.msk [vmem:[%s4394_s13 + $0x38] sm:$0xff] %vm2720_vm1, %v3582_v38 }
 0x1ef   : > { %3595 = vtanh.f32 %v2604_v55  ;;  %v2607_v43 = vadd.f32 %v4357_v15, %v2536_v16  ;;  %v2534_v3 = vmul.f32 %v4348_v58, %v2311_v28  ;;  %v3584_v13 = vpop.eup %3583  ;;  %v2332_v40 = vadd.f32 %v3205_v45, %v4280_v34  ;;  %v2132_v24 = vpop.f32.mrf.mxu1 }
 0x1f0   : > { %v2323_v62 = vpop.f32.mrf.mxu0  ;;  %2726 = vst.msk [vmem:[%s4394_s13 + $0x28] sm:$0xff] %vm2720_vm1, %v3584_v13 }
 0x1f1   : > { %3597 = vtanh.f32 %v2607_v43  ;;  %v2605_v59 = vadd.f32 %v4357_v15, %v2534_v3  ;;  %v2324_v53 = vadd.f32 %v2323_v62, %v4270_v57  ;;  %v2539_v22 = vmul.f32 %v4348_v58, %v2332_v40  ;;  %v4448_v9 = vpop.f32.mrf.mxu1  ;;  %v3586_v25 = vpop.eup %3585 }
 0x1f2   : > { %v3206_v18 = vpop.f32.mrf.mxu0  ;;  %2731 = vst.msk [vmem:[%s4394_s13 + $0x50] sm:$0xff] %vm2720_vm1, %v3586_v25 }
 0x1f3   : > { %3599 = vtanh.f32 %v2605_v59  ;;  %v2537_v34 = vmul.f32 %v4348_v58, %v2324_v53  ;;  %v2335_v35 = vadd.f32 %v3206_v18, %v4285_v14  ;;  %v3588_v7 = vpop.eup %3587  ;;  %v2610_v2 = vadd.f32 %v4357_v15, %v2539_v22  ;;  %v2135_v23 = vpop.f32.mrf.mxu1 }
 0x1f4   : > { %v2326_v54 = vpop.f32.mrf.mxu0  ;;  %2729 = vst.msk [vmem:[%s4394_s13 + $0x40] sm:$0xff] %vm2720_vm1, %v3588_v7 }
 0x1f5   : > { %v2608_v57 = vadd.f32 %v4357_v15, %v2537_v34  ;;  %v2540_v55 = vmul.f32 %v4348_v58, %v2335_v35  ;;  %v2327_v16 = vadd.f32 %v2326_v54, %v4275_v17  ;;  %3601 = vtanh.f32 %v2610_v2  ;;  %v4460_v38 = vpop.f32.mrf.mxu1 }
 0x1f6   : > { %v3590_v28 = vpop.eup %3589  ;;  %v3209_v14 = vpop.f32.mrf.mxu0 }
 0x1f7   : > { %2732 = vst.msk [vmem:[%s4394_s13 + $0x58] sm:$0xff] %vm2720_vm1, %v3590_v28  ;;  %3603 = vtanh.f32 %v2608_v57  ;;  %v2611_v45 = vadd.f32 %v4357_v15, %v2540_v55  ;;  %v2538_v43 = vmul.f32 %v4348_v58, %v2327_v16  ;;  %v2348_v13 = vadd.f32 %v3209_v14, %v4300_v4  ;;  %v2140_v40 = vpop.f32.mrf.mxu1 }
 0x1f8   : > { %v3592_v3 = vpop.eup %3591  ;;  %v2339_v24 = vpop.f32.mrf.mxu0 }
 0x1f9   : > { %2730 = vst.msk [vmem:[%s4394_s13 + $0x48] sm:$0xff] %vm2720_vm1, %v3592_v3  ;;  %3605 = vtanh.f32 %v2611_v45  ;;  %v2609_v17 = vadd.f32 %v4357_v15, %v2538_v43  ;;  %v2340_v62 = vadd.f32 %v2339_v24, %v4290_v63  ;;  %v2543_v59 = vmul.f32 %v4348_v58, %v2348_v13  ;;  %v4472_v53 = vpop.f32.mrf.mxu1 }
 0x1fa   : > { %v3210_v22 = vpop.f32.mrf.mxu0  ;;  %v3594_v18 = vpop.eup %3593 }
 0x1fb   : > { %3607 = vtanh.f32 %v2609_v17  ;;  %v2541_v4 = vmul.f32 %v4348_v58, %v2340_v62  ;;  %v2351_v25 = vadd.f32 %v3210_v22, %v4305_v50  ;;  %2735 = vst.msk [vmem:[%s4394_s13 + $0x70] sm:$0xff] %vm2720_vm1, %v3594_v18  ;;  %v2614_v35 = vadd.f32 %v4357_v15, %v2543_v59  ;;  %v2143_v7 = vpop.f32.mrf.mxu1 }
 0x1fc   : > { %v3596_v34 = vpop.eup %3595  ;;  %v2342_v2 = vpop.f32.mrf.mxu0 }
 0x1fd   : > { %2733 = vst.msk [vmem:[%s4394_s13 + $0x60] sm:$0xff] %vm2720_vm1, %v3596_v34  ;;  %v2612_v63 = vadd.f32 %v4357_v15, %v2541_v4  ;;  %v2544_v23 = vmul.f32 %v4348_v58, %v2351_v25  ;;  %v2343_v54 = vadd.f32 %v2342_v2, %v4295_v47  ;;  %3609 = vtanh.f32 %v2614_v35  ;;  %v4484_v55 = vpop.f32.mrf.mxu1 }
 0x1fe   : > { %v3598_v57 = vpop.eup %3597  ;;  %v3213_v50 = vpop.f32.mrf.mxu0 }
 0x1ff   : > { %2736 = vst.msk [vmem:[%s4394_s13 + $0x78] sm:$0xff] %vm2720_vm1, %v3598_v57  ;;  %3611 = vtanh.f32 %v2612_v63  ;;  %v2615_v16 = vadd.f32 %v4357_v15, %v2544_v23  ;;  %v2542_v28 = vmul.f32 %v4348_v58, %v2343_v54  ;;  %v2364_v45 = vadd.f32 %v3213_v50, %v4320_v26  ;;  %v2148_v43 = vpop.f32.mrf.mxu1 }
 0x200   : > { %v3600_v14 = vpop.eup %3599  ;;  %v2355_v3 = vpop.f32.mrf.mxu0 }
 0x201   : > { %2734 = vst.msk [vmem:[%s4394_s13 + $0x68] sm:$0xff] %vm2720_vm1, %v3600_v14  ;;  %3613 = vtanh.f32 %v2615_v16  ;;  %v2613_v47 = vadd.f32 %v4357_v15, %v2542_v28  ;;  %v2356_v13 = vadd.f32 %v2355_v3, %v4310_v32  ;;  %v2547_v40 = vmul.f32 %v4348_v58, %v2364_v45  ;;  %v4496_v24 = vpop.f32.mrf.mxu1 }
 0x202   : > { %v3214_v17 = vpop.f32.mrf.mxu0  ;;  %v3602_v62 = vpop.eup %3601  ;;  %v2094_v28 = vadd.f32 %v4343_v51, %v4262_v41 }
 0x203   : > { %3615 = vtanh.f32 %v2613_v47  ;;  %v2545_v59 = vmul.f32 %v4348_v58, %v2356_v13  ;;  %v2367_v26 = vadd.f32 %v3214_v17, %v4325_v0  ;;  %2739 = vst.msk [vmem:[%s4394_s13 + $0x90] sm:$0xff] %vm2720_vm1, %v3602_v62  ;;  %v2618_v18 = vadd.f32 %v4357_v15, %v2547_v40  ;;  %v2151_v4 = vpop.f32.mrf.mxu1 }
 0x204   : > { %v3604_v22 = vpop.eup %3603  ;;  %v2358_v25 = vpop.f32.mrf.mxu0  ;;  %v2091_v0 = vadd.f32 %v4339_v29, %v4256_v19 }
 0x205   : > { %2737 = vst.msk [vmem:[%s4394_s13 + $0x80] sm:$0xff] %vm2720_vm1, %v3604_v22  ;;  %v2616_v32 = vadd.f32 %v4357_v15, %v2545_v59  ;;  %v2548_v34 = vmul.f32 %v4348_v58, %v2367_v26  ;;  %v2359_v35 = vadd.f32 %v2358_v25, %v4315_v44  ;;  %3617 = vtanh.f32 %v2618_v18  ;;  %v4510_v2 = vpop.f32.mrf.mxu1 }
 0x206   : > { %v3606_v7 = vpop.eup %3605  ;;  %v3217_v63 = vpop.f32.mrf.mxu0  ;;  %v2107_v22 = vadd.f32 %v4370_v31, %v4277_v49 }
 0x207   : > { %2740 = vst.msk [vmem:[%s4394_s13 + $0x98] sm:$0xff] %vm2720_vm1, %v3606_v7  ;;  %3619 = vtanh.f32 %v2616_v32  ;;  %v2619_v23 = vadd.f32 %v4357_v15, %v2548_v34  ;;  %v2546_v54 = vmul.f32 %v4348_v58, %v2359_v35  ;;  %v2380_v50 = vadd.f32 %v3217_v63, %v2091_v0  ;;  %v2156_v16 = vpop.f32.mrf.mxu1 }
 0x208   : > { %v3608_v57 = vpop.eup %3607  ;;  %v2371_v44 = vpop.f32.mrf.mxu0  ;;  %v2110_v0 = vadd.f32 %v4378_v11, %v4282_v61 }
 0x209   : > { %2738 = vst.msk [vmem:[%s4394_s13 + $0x88] sm:$0xff] %vm2720_vm1, %v3608_v57  ;;  %3621 = vtanh.f32 %v2619_v23  ;;  %v2617_v19 = vadd.f32 %v4357_v15, %v2546_v54  ;;  %v2372_v29 = vadd.f32 %v2371_v44, %v4330_v1  ;;  %v2551_v14 = vmul.f32 %v4348_v58, %v2380_v50  ;;  %v4523_v45 = vpop.f32.mrf.mxu1 }
 0x20a   : > { %v3218_v43 = vpop.f32.mrf.mxu0  ;;  %v3610_v3 = vpop.eup %3609 }
 0x20b   : > { %3623 = vtanh.f32 %v2617_v19  ;;  %v2549_v47 = vmul.f32 %v4348_v58, %v2372_v29  ;;  %v2383_v13 = vadd.f32 %v3218_v43, %v2094_v28  ;;  %2743 = vst.msk [vmem:[%s4394_s13 + $0xb0] sm:$0xff] %vm2720_vm1, %v3610_v3  ;;  %v2622_v51 = vadd.f32 %v4357_v15, %v2551_v14  ;;  %v2159_v40 = vpop.f32.mrf.mxu1 }
 0x20c   : > { %v3612_v41 = vpop.eup %3611  ;;  %v2374_v17 = vpop.f32.mrf.mxu0  ;;  %v2123_v43 = vadd.f32 %v4412_v33, %v4297_v30  ;;  %v2126_v30 = vadd.f32 %v4424_v39, %v4302_v46 }
 0x20d   : > { %2741 = vst.msk [vmem:[%s4394_s13 + $0xa0] sm:$0xff] %vm2720_vm1, %v3612_v41  ;;  %v2620_v1 = vadd.f32 %v4357_v15, %v2549_v47  ;;  %v2552_v62 = vmul.f32 %v4348_v58, %v2383_v13  ;;  %v2375_v59 = vadd.f32 %v2374_v17, %v4335_v60  ;;  %3625 = vtanh.f32 %v2622_v51  ;;  %v4536_v18 = vpop.f32.mrf.mxu1 }
 0x20e   : > { %v3614_v26 = vpop.eup %3613  ;;  %v3221_v4 = vpop.f32.mrf.mxu0  ;;  %v2115_v13 = vadd.f32 %v4387_v8, %v4287_v5 }
 0x20f   : > { %2744 = vst.msk [vmem:[%s4394_s13 + $0xb8] sm:$0xff] %vm2720_vm1, %v3614_v26  ;;  %3627 = vtanh.f32 %v2620_v1  ;;  %v2623_v25 = vadd.f32 %v4357_v15, %v2552_v62  ;;  %v2550_v32 = vmul.f32 %v4348_v58, %v2375_v59  ;;  %v2396_v35 = vadd.f32 %v3221_v4, %v2107_v22  ;;  %v2164_v7 = vpop.f32.mrf.mxu1 }
 0x210   : > { %v3616_v34 = vpop.eup %3615  ;;  %v2387_v60 = vpop.f32.mrf.mxu0  ;;  %v2118_v22 = vadd.f32 %v4400_v48, %v4292_v20  ;;  %v2139_v48 = vadd.f32 %v4460_v38, %v4317_v12  ;;  %v2142_v12 = vadd.f32 %v4472_v53, %v4322_v42 }
 0x211   : > { %2742 = vst.msk [vmem:[%s4394_s13 + $0xa8] sm:$0xff] %vm2720_vm1, %v3616_v34  ;;  %3629 = vtanh.f32 %v2623_v25  ;;  %v2621_v49 = vadd.f32 %v4357_v15, %v2550_v32  ;;  %v2388_v31 = vadd.f32 %v2387_v60, %v4351_v52  ;;  %v2555_v63 = vmul.f32 %v4348_v58, %v2396_v35  ;;  %v4549_v23 = vpop.f32.mrf.mxu1 }
 0x212   : > { %v3222_v54 = vpop.f32.mrf.mxu0  ;;  %v3618_v57 = vpop.eup %3617 }
 0x213   : > { %3631 = vtanh.f32 %v2621_v49  ;;  %v2553_v50 = vmul.f32 %v4348_v58, %v2388_v31  ;;  %v2399_v16 = vadd.f32 %v3222_v54, %v2110_v0  ;;  %2747 = vst.msk [vmem:[%s4394_s13 + $0xd0] sm:$0xff] %vm2720_vm1, %v3618_v57  ;;  %v2626_v11 = vadd.f32 %v4357_v15, %v2555_v63  ;;  %v2167_v44 = vpop.f32.mrf.mxu1 }
 0x214   : > { %v3620_v61 = vpop.eup %3619  ;;  %v2390_v28 = vpop.f32.mrf.mxu0  ;;  %v2131_v31 = vadd.f32 %v4436_v37, %v4307_v56 }
 0x215   : > { %2745 = vst.msk [vmem:[%s4394_s13 + $0xc0] sm:$0xff] %vm2720_vm1, %v3620_v61  ;;  %v2624_v52 = vadd.f32 %v4357_v15, %v2553_v50  ;;  %v2556_v19 = vmul.f32 %v4348_v58, %v2399_v16  ;;  %v2391_v29 = vadd.f32 %v2390_v28, %v4364_v6  ;;  %3633 = vtanh.f32 %v2626_v11  ;;  %v4562_v3 = vpop.f32.mrf.mxu1 }
 0x216   : > { %v3622_v14 = vpop.eup %3621  ;;  %v3225_v47 = vpop.f32.mrf.mxu0 }
 0x217   : > { %2748 = vst.msk [vmem:[%s4394_s13 + $0xd8] sm:$0xff] %vm2720_vm1, %v3622_v14  ;;  %3635 = vtanh.f32 %v2624_v52  ;;  %v2627_v41 = vadd.f32 %v4357_v15, %v2556_v19  ;;  %v2554_v51 = vmul.f32 %v4348_v58, %v2391_v29  ;;  %v2412_v40 = vadd.f32 %v3225_v47, %v2123_v43  ;;  %v2172_v17 = vpop.f32.mrf.mxu1 }
 0x218   : > { %v3624_v6 = vpop.eup %3623  ;;  %v2403_v1 = vpop.f32.mrf.mxu0  ;;  %v2134_v52 = vadd.f32 %v4448_v9, %v4312_v10  ;;  %v2155_v9 = vadd.f32 %v4510_v2, %v4337_v21  ;;  %v2158_v21 = vadd.f32 %v4523_v45, %v4341_v36 }
 0x219   : > { %2746 = vst.msk [vmem:[%s4394_s13 + $0xc8] sm:$0xff] %vm2720_vm1, %v3624_v6  ;;  %3637 = vtanh.f32 %v2627_v41  ;;  %v2625_v5 = vadd.f32 %v4357_v15, %v2554_v51  ;;  %v2404_v8 = vadd.f32 %v2403_v1, %v2115_v13  ;;  %v2559_v33 = vmul.f32 %v4348_v58, %v2412_v40  ;;  %v4576_v62 = vpop.f32.mrf.mxu1 }
 0x21a   : > { %v3226_v59 = vpop.f32.mrf.mxu0  ;;  %v3626_v26 = vpop.eup %3625  ;;  %v2147_v40 = vadd.f32 %v4484_v55, %v4327_v27 }
 0x21b   : > { %3639 = vtanh.f32 %v2625_v5  ;;  %v2557_v4 = vmul.f32 %v4348_v58, %v2404_v8  ;;  %v2415_v46 = vadd.f32 %v3226_v59, %v2126_v30  ;;  %2751 = vst.msk [vmem:[%s4394_s13 + $0xf0] sm:$0xff] %vm2720_vm1, %v3626_v26  ;;  %v2630_v25 = vadd.f32 %v4357_v15, %v2559_v33  ;;  %v2175_v32 = vpop.f32.mrf.mxu1 }
 0x21c   : > { %v3628_v39 = vpop.eup %3627  ;;  %v2406_v34 = vpop.f32.mrf.mxu0 }
 0x21d   : > { %2749 = vst.msk [vmem:[%s4394_s13 + $0xe0] sm:$0xff] %vm2720_vm1, %v3628_v39  ;;  %v2628_v35 = vadd.f32 %v4357_v15, %v2557_v4  ;;  %v2560_v7 = vmul.f32 %v4348_v58, %v2415_v46  ;;  %v2407_v60 = vadd.f32 %v2406_v34, %v2118_v22  ;;  %3641 = vtanh.f32 %v2630_v25  ;;  %v4590_v0 = vpop.f32.mrf.mxu1  ;;  %v4792_v4 = vld [vmem:[#allocation18_spill] sm:$0xff] }
 0x21e   : > { %v3630_v20 = vpop.eup %3629  ;;  %v3229_v49 = vpop.f32.mrf.mxu0  ;;  %v2150_v46 = vadd.f32 %v4496_v24, %v4792_v4 }
 0x21f   : > { %2752 = vst.msk [vmem:[%s4394_s13 + $0xf8] sm:$0xff] %vm2720_vm1, %v3630_v20  ;;  %3643 = vtanh.f32 %v2628_v35  ;;  %v2631_v63 = vadd.f32 %v4357_v15, %v2560_v7  ;;  %v2558_v54 = vmul.f32 %v4348_v58, %v2407_v60  ;;  %v2428_v50 = vadd.f32 %v3229_v49, %v2139_v48  ;;  %v2180_v16 = vpop.f32.mrf.mxu1  ;;  %v4793_v20 = vld [vmem:[#allocation4_spill] sm:$0xff] }
 0x220   : > { %v3632_v57 = vpop.eup %3631  ;;  %v2419_v61 = vpop.f32.mrf.mxu0  ;;  %v2171_v48 = vadd.f32 %v4562_v3, %v4793_v20  ;;  %v4795_v3 = vld [vmem:[#allocation5_spill] sm:$0xff] }
 0x221   : > { %2750 = vst.msk [vmem:[%s4394_s13 + $0xe8] sm:$0xff] %vm2720_vm1, %v3632_v57  ;;  %3645 = vtanh.f32 %v2631_v63  ;;  %v2629_v56 = vadd.f32 %v4357_v15, %v2558_v54  ;;  %v2420_v37 = vadd.f32 %v2419_v61, %v2131_v31  ;;  %v2563_v38 = vmul.f32 %v4348_v58, %v2428_v50  ;;  %v4604_v11 = vpop.f32.mrf.mxu1  ;;  %v4794_v63 = vld [vmem:[#allocation2_spill] sm:$0xff] }
 0x222   : > { %v3230_v44 = vpop.f32.mrf.mxu0  ;;  %v3634_v28 = vpop.eup %3633  ;;  %v2163_v54 = vadd.f32 %v4536_v18, %v4794_v63 }
 0x223   : > { %3647 = vtanh.f32 %v2629_v56  ;;  %v2561_v19 = vmul.f32 %v4348_v58, %v2420_v37  ;;  %v2431_v42 = vadd.f32 %v3230_v44, %v2142_v12  ;;  %2755 = vst.msk [vmem:[%s4394_s13 + $0x110] sm:$0xff] %vm2720_vm1, %v3634_v28  ;;  %v2634_v29 = vadd.f32 %v4357_v15, %v2563_v38  ;;  %v2183_v14 = vpop.f32.mrf.mxu1 }
 0x224   : > { %v3636_v53 = vpop.eup %3635  ;;  %v2422_v43 = vpop.f32.mrf.mxu0  ;;  %v2174_v37 = vadd.f32 %v4576_v62, %v4795_v3 }
 0x225   : > { %2753 = vst.msk [vmem:[%s4394_s13 + $0x100] sm:$0xff] %vm2720_vm1, %v3636_v53  ;;  %v2632_v47 = vadd.f32 %v4357_v15, %v2561_v19  ;;  %v2564_v13 = vmul.f32 %v4348_v58, %v2431_v42  ;;  %v2423_v41 = vadd.f32 %v2422_v43, %v2134_v52  ;;  %3649 = vtanh.f32 %v2634_v29  ;;  %v4618_v51 = vpop.f32.mrf.mxu1  ;;  %v4796_v42 = vld [vmem:[#allocation3_spill] sm:$0xff] }
 0x226   : > { %v3638_v10 = vpop.eup %3637  ;;  %v3233_v6 = vpop.f32.mrf.mxu0  ;;  %v2166_v53 = vadd.f32 %v4549_v23, %v4796_v42 }
 0x227   : > { %2756 = vst.msk [vmem:[%s4394_s13 + $0x118] sm:$0xff] %vm2720_vm1, %v3638_v10  ;;  %3651 = vtanh.f32 %v2632_v47  ;;  %v2635_v17 = vadd.f32 %v4357_v15, %v2564_v13  ;;  %v2562_v1 = vmul.f32 %v4348_v58, %v2423_v41  ;;  %v2444_v5 = vadd.f32 %v3233_v6, %v2155_v9  ;;  %v2188_v8 = vpop.f32.mrf.mxu1  ;;  %v4797_v6 = vld [vmem:[#allocation8_spill] sm:$0xff] }
 0x228   : > { %v3640_v30 = vpop.eup %3639  ;;  %v2435_v33 = vpop.f32.mrf.mxu0 }
 0x229   : > { %2754 = vst.msk [vmem:[%s4394_s13 + $0x108] sm:$0xff] %vm2720_vm1, %v3640_v30  ;;  %3653 = vtanh.f32 %v2635_v17  ;;  %v2633_v27 = vadd.f32 %v4357_v15, %v2562_v1  ;;  %v2436_v55 = vadd.f32 %v2435_v33, %v2147_v40  ;;  %v2567_v2 = vmul.f32 %v4348_v58, %v2444_v5  ;;  %v4632_v59 = vpop.f32.mrf.mxu1  ;;  %v4798_v30 = vld [vmem:[#allocation6_spill] sm:$0xff] }
 0x22a   : > { %v3234_v26 = vpop.f32.mrf.mxu0  ;;  %v3642_v22 = vpop.eup %3641  ;;  %v2187_v40 = vadd.f32 %v4618_v51, %v4797_v6  ;;  %v2179_v5 = vadd.f32 %v4590_v0, %v4798_v30  ;;  %v4799_v51 = vld [vmem:[#allocation9_spill] sm:$0xff] }
 0x22b   : > { %3655 = vtanh.f32 %v2633_v27  ;;  %v2565_v39 = vmul.f32 %v4348_v58, %v2436_v55  ;;  %v2447_v36 = vadd.f32 %v3234_v26, %v2158_v21  ;;  %2759 = vst.msk [vmem:[%s4394_s13 + $0x130] sm:$0xff] %vm2720_vm1, %v3642_v22  ;;  %v2638_v25 = vadd.f32 %v4357_v15, %v2567_v2  ;;  %v2191_v32 = vpop.f32.mrf.mxu1 }
 0x22c   : > { %v3644_v45 = vpop.eup %3643  ;;  %v2438_v34 = vpop.f32.mrf.mxu0  ;;  %v2190_v26 = vadd.f32 %v4632_v59, %v4799_v51 }
 0x22d   : > { %2757 = vst.msk [vmem:[%s4394_s13 + $0x120] sm:$0xff] %vm2720_vm1, %v3644_v45  ;;  %v2636_v35 = vadd.f32 %v4357_v15, %v2565_v39  ;;  %v2568_v7 = vmul.f32 %v4348_v58, %v2447_v36  ;;  %v2439_v60 = vadd.f32 %v2438_v34, %v2150_v46  ;;  %3657 = vtanh.f32 %v2638_v25  ;;  %v4646_v49 = vpop.f32.mrf.mxu1  ;;  %v4800_v45 = vld [vmem:[#allocation7_spill] sm:$0xff] }
 0x22e   : > { %v3646_v24 = vpop.eup %3645  ;;  %v3237_v31 = vpop.f32.mrf.mxu0  ;;  %v2182_v25 = vadd.f32 %v4604_v11, %v4800_v45 }
 0x22f   : > { %2760 = vst.msk [vmem:[%s4394_s13 + $0x138] sm:$0xff] %vm2720_vm1, %v3646_v24  ;;  %3659 = vtanh.f32 %v2636_v35  ;;  %v2639_v57 = vadd.f32 %v4357_v15, %v2568_v7  ;;  %v2566_v50 = vmul.f32 %v4348_v58, %v2439_v60  ;;  %v2460_v61 = vadd.f32 %v3237_v31, %v2171_v48  ;;  %v2196_v12 = vpop.f32.mrf.mxu1  ;;  %v4801_v31 = vld [vmem:[#allocation12_spill] sm:$0xff] }
 0x230   : > { %v3648_v16 = vpop.eup %3647  ;;  %v2451_v56 = vpop.f32.mrf.mxu0 }
 0x231   : > { %2758 = vst.msk [vmem:[%s4394_s13 + $0x128] sm:$0xff] %vm2720_vm1, %v3648_v16  ;;  %3661 = vtanh.f32 %v2639_v57  ;;  %v2637_v18 = vadd.f32 %v4357_v15, %v2566_v50  ;;  %v2452_v38 = vadd.f32 %v2451_v56, %v2163_v54  ;;  %v2571_v44 = vmul.f32 %v4348_v58, %v2460_v61  ;;  %v4660_v28 = vpop.f32.mrf.mxu1  ;;  %v4802_v50 = vld [vmem:[#allocation10_spill] sm:$0xff] }
 0x232   : > { %v3238_v52 = vpop.f32.mrf.mxu0  ;;  %v3650_v19 = vpop.eup %3649  ;;  %v2195_v16 = vadd.f32 %v4646_v49, %v4802_v50 }
 0x233   : > { %3663 = vtanh.f32 %v2637_v18  ;;  %v2569_v29 = vmul.f32 %v4348_v58, %v2452_v38  ;;  %v2463_v62 = vadd.f32 %v3238_v52, %v2174_v37  ;;  %2763 = vst.msk [vmem:[%s4394_s13 + $0x150] sm:$0xff] %vm2720_vm1, %v3650_v19  ;;  %v2642_v43 = vadd.f32 %v4357_v15, %v2571_v44  ;;  %v2199_v47 = vpop.f32.mrf.mxu1  ;;  %v4803_v38 = vld [vmem:[#allocation13_spill] sm:$0xff] }
 0x234   : > { %v3652_v14 = vpop.eup %3651  ;;  %v2454_v13 = vpop.f32.mrf.mxu0 }
 0x235   : > { %2761 = vst.msk [vmem:[%s4394_s13 + $0x140] sm:$0xff] %vm2720_vm1, %v3652_v14  ;;  %v2640_v41 = vadd.f32 %v4357_v15, %v2569_v29  ;;  %v2572_v10 = vmul.f32 %v4348_v58, %v2463_v62  ;;  %v2455_v23 = vadd.f32 %v2454_v13, %v2166_v53  ;;  %3665 = vtanh.f32 %v2642_v43  ;;  %v2202_v17 = vpop.f32.mrf.mxu1  ;;  %v4804_v62 = vld [vmem:[#allocation11_spill] sm:$0xff] }
 0x236   : > { %v3654_v9 = vpop.eup %3653  ;;  %v3241_v1 = vpop.f32.mrf.mxu0  ;;  %v2203_v63 = vadd.f32 %v2202_v17, %v4801_v31  ;;  %v2198_v14 = vadd.f32 %v4660_v28, %v4804_v62  ;;  %v4805_v17 = vld [vmem:[#allocation14_spill] sm:$0xff] }
 0x237   : > { %2764 = vst.msk [vmem:[%s4394_s13 + $0x158] sm:$0xff] %vm2720_vm1, %v3654_v9  ;;  %3667 = vtanh.f32 %v2640_v41  ;;  %v2643_v8 = vadd.f32 %v4357_v15, %v2572_v10  ;;  %v2570_v33 = vmul.f32 %v4348_v58, %v2455_v23  ;;  %v2476_v27 = vadd.f32 %v3241_v1, %v2187_v40  ;;  %v2204_v55 = vpop.f32.mrf.mxu1  ;;  %v3698_v31 = vld [vmem:[%s4772_s2] ss:$0 sm:$0xff] }
 0x238   : > { %v3656_v21 = vpop.eup %3655  ;;  %v2467_v2 = vpop.f32.mrf.mxu0 }
 0x239   : > { %2762 = vst.msk [vmem:[%s4394_s13 + $0x148] sm:$0xff] %vm2720_vm1, %v3656_v21  ;;  %3669 = vtanh.f32 %v2643_v8  ;;  %v2641_v0 = vadd.f32 %v4357_v15, %v2570_v33  ;;  %v2468_v22 = vadd.f32 %v2467_v2, %v2179_v5  ;;  %v2575_v4 = vmul.f32 %v4348_v58, %v2476_v27  ;;  %v2205_v46 = vpop.f32.mrf.mxu1  ;;  %v4806_v21 = vld [vmem:[#allocation16_spill] sm:$0xff] }
 0x23a   : > { %v3242_v39 = vpop.f32.mrf.mxu0  ;;  %v3658_v36 = vpop.eup %3657  ;;  %v2206_v44 = vadd.f32 %v2205_v46, %v4803_v38 }
 0x23b   : > { %3671 = vtanh.f32 %v2641_v0  ;;  %v2573_v32 = vmul.f32 %v4348_v58, %v2468_v22  ;;  %v2479_v34 = vadd.f32 %v3242_v39, %v2190_v26  ;;  %2767 = vst.msk [vmem:[%s4394_s13 + $0x170] sm:$0xff] %vm2720_vm1, %v3658_v36  ;;  %v2646_v59 = vadd.f32 %v4357_v15, %v2575_v4  ;;  %v2207_v7 = vpop.f32.mrf.mxu1  ;;  %v4807_v4 = vld [vmem:[#allocation15_spill] sm:$0xff] }
 0x23c   : > { %v3660_v35 = vpop.eup %3659  ;;  %v2470_v60 = vpop.f32.mrf.mxu0 }
 0x23d   : > { %2765 = vst.msk [vmem:[%s4394_s13 + $0x160] sm:$0xff] %vm2720_vm1, %v3660_v35  ;;  %v2644_v24 = vadd.f32 %v4357_v15, %v2573_v32  ;;  %v2576_v20 = vmul.f32 %v4348_v58, %v2479_v34  ;;  %v2471_v11 = vadd.f32 %v2470_v60, %v2182_v25  ;;  %3673 = vtanh.f32 %v2646_v59  ;;  %v2210_v54 = vpop.f32.mrf.mxu1  ;;  %v4808_v34 = vld [vmem:[#allocation17_spill] sm:$0xff]  ;;  %v3697_v60 = vld [vmem:[%s4773_s3] ss:$0 sm:$0xff] }
 0x23e   : > { %v3662_v48 = vpop.eup %3661  ;;  %v3245_v57 = vpop.f32.mrf.mxu0  ;;  %v2211_v1 = vadd.f32 %v2210_v54, %v4805_v17 }
 0x23f   : > { %2768 = vst.msk [vmem:[%s4394_s13 + $0x178] sm:$0xff] %vm2720_vm1, %v3662_v48  ;;  %3675 = vtanh.f32 %v2644_v24  ;;  %v2647_v61 = vadd.f32 %v4357_v15, %v2576_v20  ;;  %v2574_v12 = vmul.f32 %v4348_v58, %v2471_v11  ;;  %v2492_v3 = vadd.f32 %v3245_v57, %v2203_v63  ;;  %v2212_v37 = vpop.f32.mrf.mxu1 }
 0x240   : > { %v3664_v56 = vpop.eup %3663  ;;  %v2483_v18 = vpop.f32.mrf.mxu0 }
 0x241   : > { %2766 = vst.msk [vmem:[%s4394_s13 + $0x168] sm:$0xff] %vm2720_vm1, %v3664_v56  ;;  %3677 = vtanh.f32 %v2647_v61  ;;  %v2645_v52 = vadd.f32 %v4357_v15, %v2574_v12  ;;  %v2484_v19 = vadd.f32 %v2483_v18, %v2195_v16  ;;  %v2579_v49 = vmul.f32 %v4348_v58, %v2492_v3  ;;  %v2213_v42 = vpop.f32.mrf.mxu1 }
 0x242   : > { %v3246_v53 = vpop.f32.mrf.mxu0  ;;  %v3666_v29 = vpop.eup %3665  ;;  %v2214_v46 = vadd.f32 %v2213_v42, %v4807_v4 }
 0x243   : > { %3679 = vtanh.f32 %v2645_v52  ;;  %v2577_v43 = vmul.f32 %v4348_v58, %v2484_v19  ;;  %v2495_v47 = vadd.f32 %v3246_v53, %v2206_v44  ;;  %2771 = vst.msk [vmem:[%s4394_s13 + $0x190] sm:$0xff] %vm2720_vm1, %v3666_v29  ;;  %v2650_v41 = vadd.f32 %v4357_v15, %v2579_v49  ;;  %v2215_v10 = vpop.f32.mrf.mxu1 }
 0x244   : > { %v3668_v13 = vpop.eup %3667  ;;  %v2486_v23 = vpop.f32.mrf.mxu0 }
 0x245   : > { %2769 = vst.msk [vmem:[%s4394_s13 + $0x180] sm:$0xff] %vm2720_vm1, %v3668_v13  ;;  %v2648_v9 = vadd.f32 %v4357_v15, %v2577_v43  ;;  %v2580_v6 = vmul.f32 %v4348_v58, %v2495_v47  ;;  %v2487_v28 = vadd.f32 %v2486_v23, %v2198_v14  ;;  %3681 = vtanh.f32 %v2650_v41  ;;  %v2218_v30 = vpop.f32.mrf.mxu1 }
 0x246   : > { %v3670_v40 = vpop.eup %3669  ;;  %v3249_v5 = vpop.f32.mrf.mxu0  ;;  %v2219_v27 = vadd.f32 %v2218_v30, %v4806_v21 }
 0x247   : > { %2772 = vst.msk [vmem:[%s4394_s13 + $0x198] sm:$0xff] %vm2720_vm1, %v3670_v40  ;;  %3683 = vtanh.f32 %v2648_v9  ;;  %v2651_v8 = vadd.f32 %v4357_v15, %v2580_v6  ;;  %v2578_v33 = vmul.f32 %v4348_v58, %v2487_v28  ;;  %v2220_v2 = vpop.f32.mrf.mxu1 }
 0x248   : > { %v3672_v55 = vpop.eup %3671  ;;  %v2499_v51 = vpop.f32.mrf.mxu0  ;;  %v2508_v0 = vadd.f32 %v3249_v5, %v2219_v27 }
 0x249   : > { %2770 = vst.msk [vmem:[%s4394_s13 + $0x188] sm:$0xff] %vm2720_vm1, %v3672_v55  ;;  %3685 = vtanh.f32 %v2651_v8  ;;  %v2649_v26 = vadd.f32 %v4357_v15, %v2578_v33  ;;  %v2500_v22 = vadd.f32 %v2499_v51, %v2211_v1  ;;  %v2221_v39 = vpop.f32.mrf.mxu1 }
 0x24a   : > { %v3250_v36 = vpop.f32.mrf.mxu0  ;;  %v3674_v45 = vpop.eup %3673  ;;  %v2583_v25 = vmul.f32 %v4348_v58, %v2508_v0  ;;  %v2222_v35 = vadd.f32 %v2221_v39, %v4808_v34 }
 0x24b   : > { %3687 = vtanh.f32 %v2649_v26  ;;  %v2581_v32 = vmul.f32 %v4348_v58, %v2500_v22  ;;  %2775 = vst.msk [vmem:[%s4394_s13 + $0x1b0] sm:$0xff] %vm2720_vm1, %v3674_v45  ;;  %v2223_v7 = vpop.f32.mrf.mxu1 }
 0x24c   : > { %v3676_v59 = vpop.eup %3675  ;;  %v2502_v15 = vpop.f32.mrf.mxu0  ;;  %v2654_v24 = vadd.f32 %v3697_v60, %v2583_v25  ;;  %v2511_v11 = vadd.f32 %v3250_v36, %v2222_v35 }
 0x24d   : > { %2773 = vst.msk [vmem:[%s4394_s13 + $0x1a0] sm:$0xff] %vm2720_vm1, %v3676_v59  ;;  %v2652_v20 = vadd.f32 %v3697_v60, %v2581_v32  ;;  %v2503_v48 = vadd.f32 %v2502_v15, %v2214_v46 }
 0x24e   : > { %v3678_v58 = vpop.eup %3677  ;;  %3689 = vtanh.f32 %v2654_v24  ;;  %v2584_v63 = vmul.f32 %v3698_v31, %v2511_v11 }
 0x24f   : > { %2776 = vst.msk [vmem:[%s4394_s13 + $0x1b8] sm:$0xff] %vm2720_vm1, %v3678_v58  ;;  %v2582_v54 = vmul.f32 %v3698_v31, %v2503_v48  ;;  %3691 = vtanh.f32 %v2652_v20 }
 0x250   : > { %v3680_v57 = vpop.eup %3679  ;;  %v2655_v50 = vadd.f32 %v3697_v60, %v2584_v63 }
 0x251   : > { %2774 = vst.msk [vmem:[%s4394_s13 + $0x1a8] sm:$0xff] %vm2720_vm1, %v3680_v57  ;;  %v2653_v16 = vadd.f32 %v3697_v60, %v2582_v54 }
 0x252   : > { %v3682_v61 = vpop.eup %3681  ;;  %3693 = vtanh.f32 %v2655_v50 }
 0x253   : > { %2779 = vst.msk [vmem:[%s4394_s13 + $0x1d0] sm:$0xff] %vm2720_vm1, %v3682_v61  ;;  %3695 = vtanh.f32 %v2653_v16 }
 0x254   : > { %v3684_v12 = vpop.eup %3683 }
 0x255   : > { %2777 = vst.msk [vmem:[%s4394_s13 + $0x1c0] sm:$0xff] %vm2720_vm1, %v3684_v12 }
 0x256   : > { %v3686_v56 = vpop.eup %3685 }
 0x257   : > { %2780 = vst.msk [vmem:[%s4394_s13 + $0x1d8] sm:$0xff] %vm2720_vm1, %v3686_v56 }
 0x258   : > { %v3688_v3 = vpop.eup %3687 }
 0x259   : > { %2778 = vst.msk [vmem:[%s4394_s13 + $0x1c8] sm:$0xff] %vm2720_vm1, %v3688_v3 }
 0x25b   : > { %v3690_v37 = vpop.eup %3689 }
 0x25c   : > { %v3692_v18 = vpop.eup %3691  ;;  %2783 = vst.msk [vmem:[%s4394_s13 + $0x1f0] sm:$0xff] %vm2720_vm1, %v3690_v37 }
 0x25d   : > { %2781 = vst.msk [vmem:[%s4394_s13 + $0x1e0] sm:$0xff] %vm2720_vm1, %v3692_v18 }
 0x25f   : > { %v3694_v38 = vpop.eup %3693 }
 0x260   : > { %v3696_v44 = vpop.eup %3695  ;;  %2784 = vst.msk [vmem:[%s4394_s13 + $0x1f8] sm:$0xff] %vm2720_vm1, %v3694_v38 }
 0x261   : > { %2782 = vst.msk [vmem:[%s4394_s13 + $0x1e8] sm:$0xff] %vm2720_vm1, %v3696_v44 }
 0x262 PF: > { %s14_s17 = sadd.s32 1, %s3721_s17   ;;  %s4809_s15 = smov %s3717_s16 }
 0x263   : > { %p11_p5 = scmp.ge.s32.totalorder %s14_s17, 6   ;;  %s4810_s16 = smov %s4812_s18 }
 0x265   :  { %13 = sbr.rel (!%p11_p5) target bundleno = 2 (0x2), region = 75 }

</bundles_post_ra>
